<compile_context>
chip_gen: v5e
topology: v5e:2x2
jax: 0.10.0
libtpu: 0.0.40
codegen_flags: <defaults>
</compile_context>

<pallas_src>
import functools
import math

import jax
import jax.numpy as jnp
from jax.experimental import pallas as pl
from jax.experimental.pallas import tpu as pltpu


# ----------------------------------------------------------------------------
# Single fused kernel
# ----------------------------------------------------------------------------
def fused_forward_kernel(
    x_ref, w1_ref, b1_ref, w2_ref, b2_ref, wfc_ref, bfc_ref, wo_ref, bo_ref,
    o_ref, pad1_ref, pad2_ref,
    *, N, H, W, C0, C1, C2, K1, K2, P1, P2):
  f32 = jnp.float32

  def conv_pool_relu(pad_ref, src, w_ref, b_ref, Hc, Wc, Cin, Cout, K, pool):
    # 'same' padding: write src into the interior of a zeroed VMEM scratch.
    halo = (K - 1) // 2
    pad_ref[...] = jnp.zeros_like(pad_ref)
    pad_ref[:, halo:halo + Hc, halo:halo + Wc, :] = src
    # conv == sum over K*K taps of shifted-window @ w[kh, kw] (MXU),
    # f32 accumulation with the bias folded into the init.
    acc = jnp.broadcast_to(b_ref[...], (N * Hc * Wc, Cout)).astype(f32)
    for kh in range(K):
      for kw in range(K):
        patch = pad_ref[:, kh:kh + Hc, kw:kw + Wc, :].reshape(N * Hc * Wc, Cin)
        acc = acc + jnp.dot(patch, w_ref[kh, kw], preferred_element_type=f32)
    # MaxPool2d(pool, stride=pool): pool w first, then h.  Both reshapes only
    # split leading (row) dims, so they are exact row-major reinterpretations.
    ph, pw = pool
    Ho, Wo = Hc // ph, Wc // pw
    y = jnp.max(acc.reshape(N * Hc * Wo, pw, Cout), axis=1)
    y = jnp.max(y.reshape(N * Ho, ph, Wo, Cout), axis=1)   # (N*Ho, Wo, Cout)
    return jnp.maximum(y, 0.0)                              # ReLU

  # ---- conv stack (all activations stay in VMEM) ---------------------------
  a1 = conv_pool_relu(pad1_ref, x_ref[...], w1_ref, b1_ref,
                      H, W, C0, C1, K1, P1)
  H1, W1 = H // P1[0], W // P1[1]
  a2 = conv_pool_relu(pad2_ref, a1.reshape(N, H1, W1, C1), w2_ref, b2_ref,
                      H1, W1, C1, C2, K2, P2)
  H2, W2 = H1 // P2[0], W1 // P2[1]
  a2 = a2.reshape(N, H2, W2, C2)                            # (N, 4, 4, 16)

  # ---- fc1 (+ Dropout(p=0.0) identity) + ReLU -------------------------------
  # PyTorch's (C, H, W) flatten order lives in the fc1 weight layout
  # (wfc_ref is (H2, W2, C2, hidden)); contract per (h, w) block so the
  # activations never need a lane relayout / transpose.  fc1 bias folded
  # into the accumulator init.
  hidden = wfc_ref.shape[-1]
  acc = jnp.broadcast_to(bfc_ref[...], (N, hidden)).astype(f32)
  for hh in range(H2):
    for ww in range(W2):
      acc = acc + jnp.dot(a2[:, hh, ww, :], wfc_ref[hh, ww],
                          preferred_element_type=f32)
  hfc = jnp.maximum(acc, 0.0)

  # ---- final linear ---------------------------------------------------------
  o_ref[...] = (jnp.dot(hfc, wo_ref[...], preferred_element_type=f32)
                + bo_ref[...])


# ----------------------------------------------------------------------------
# Wrapper: weight-side layout plumbing only, then a single pallas_call.
# ----------------------------------------------------------------------------
def model_forward(params, x_nchw, pools):
  (w1, b1), (w2, b2) = params["conv"]
  pool1, pool2 = pools
  N, C0, H, W = x_nchw.shape
  K1, K2 = w1.shape[0], w2.shape[0]
  C1, C2 = w1.shape[-1], w2.shape[-1]
  # PyTorch padding='same' is symmetric only for odd kernel sizes.
  assert K1 % 2 == 1 and K2 % 2 == 1, "only odd kernel sizes supported"
  # MaxPool2d floors; this kernel assumes exact divisibility.
  assert H % pool1[0] == 0 and W % pool1[1] == 0
  H1, W1 = H // pool1[0], W // pool1[1]
  assert H1 % pool2[0] == 0 and W1 % pool2[1] == 0
  H2, W2 = H1 // pool2[0], W1 // pool2[1]

  wfc, bfc = params["fc1"]
  wo, bo = params["final"]
  hidden, out_f = wfc.shape[1], wo.shape[1]
  assert wfc.shape[0] == C2 * H2 * W2

  # Fold PyTorch's (C, H, W) flatten order into the fc1 weights (tiny,
  # weight-side, conceptually a one-time checkpoint transform):
  #   row c*H2*W2 + h*W2 + w  ->  wfc_hw[h, w, c, :]
  wfc_hw = jnp.transpose(wfc.reshape(C2, H2, W2, hidden), (1, 2, 0, 3))

  # Channels on the lane axis for the conv tap matmuls.
  x_nhwc = jnp.transpose(x_nchw, (0, 2, 3, 1))

  kern = functools.partial(
      fused_forward_kernel, N=N, H=H, W=W, C0=C0, C1=C1, C2=C2,
      K1=K1, K2=K2, P1=tuple(pool1), P2=tuple(pool2))

  return pl.pallas_call(
      kern,
      out_shape=jax.ShapeDtypeStruct((N, out_f), jnp.float32),
      scratch_shapes=[
          # zero-padded ('same' halo) staging buffers for the two conv layers
          pltpu.VMEM((N, H + K1 - 1, W + K1 - 1, C0), jnp.float32),
          pltpu.VMEM((N, H1 + K2 - 1, W1 + K2 - 1, C1), jnp.float32),
      ],
  )(x_nhwc, w1, b1.reshape(1, C1), w2, b2.reshape(1, C2),
    wfc_hw, bfc.reshape(1, hidden), wo, bo.reshape(1, out_f))


# ----------------------------------------------------------------------------
# Pure-JAX reference (uses the original, unpermuted parameters)
# ----------------------------------------------------------------------------
def model_ref(params, x_nchw, pools):
  hi = jax.lax.Precision.HIGHEST
  x = jnp.transpose(x_nchw, (0, 2, 3, 1))
  for (w, b), pool in zip(params["conv"], pools):
    y = jax.lax.conv_general_dilated(
        x, w, (1, 1), "SAME",
        dimension_numbers=("NHWC", "HWIO", "NHWC"), precision=hi) + b
    ph, pw = pool
    y = jax.lax.reduce_window(y, -jnp.inf, jax.lax.max,
                              (1, ph, pw, 1), (1, ph, pw, 1), "VALID")
    x = jnp.maximum(y, 0.0)
  x = jnp.transpose(x, (0, 3, 1, 2)).reshape(x.shape[0], -1)  # PyTorch flatten
  w1, b1 = params["fc1"]
  wf, bf = params["final"]
  h = jnp.maximum(jnp.dot(x, w1, precision=hi) + b1, 0.0)
  return jnp.dot(h, wf, precision=hi) + bf


if __name__ == "__main__":
  # Model config (small but consistent with the module's __init__)
  in_channels = 4
  in_image_size = (16, 16)
  out_features = 10
  conv_cfg = [(8, 3, (2, 2)), (16, 3, (2, 2))]     # (out_ch, ksize, pool)
  fc_hidden = 32
  batch = 2

  # Deterministic synthetic parameters
  key = jax.random.PRNGKey(0)
  keys = jax.random.split(key, 16)
  params = {"conv": []}
  pools = []
  cin = in_channels
  c_img = in_image_size
  ki = 0
  for (cout, ks, pool) in conv_cfg:
    w = 0.1 * jax.random.normal(keys[ki], (ks, ks, cin, cout), jnp.float32)
    b = 0.1 * jax.random.normal(keys[ki + 1], (cout,), jnp.float32)
    params["conv"].append((w, b))
    pools.append(pool)
    cin = cout
    c_img = tuple(int((d - 1) / s + 1) for d, s in zip(c_img, pool))
    ki += 2
  pools = tuple(pools)
  fc_in_features = cin * math.prod(c_img)          # 16 * 4 * 4 = 256
  params["fc1"] = (
      0.1 * jax.random.normal(keys[ki], (fc_in_features, fc_hidden), jnp.float32),
      0.1 * jax.random.normal(keys[ki + 1], (fc_hidden,), jnp.float32),
  )
  params["final"] = (
      0.1 * jax.random.normal(keys[ki + 2], (fc_hidden, out_features), jnp.float32),
      0.1 * jax.random.normal(keys[ki + 3], (out_features,), jnp.float32),
  )

  # Input (NCHW, like PyTorch)
  x = jax.random.normal(keys[ki + 4], (batch, in_channels, *in_image_size),
                        jnp.float32)

  fwd = jax.jit(functools.partial(model_forward, pools=pools))
  out = jax.block_until_ready(fwd(params, x))
  ref = jax.block_until_ready(model_ref(params, x, pools))

  assert out.shape == (batch, out_features), out.shape
  assert jnp.allclose(out, ref, atol=1e-2, rtol=1e-2), (
      f"max abs err {jnp.max(jnp.abs(out - ref))}")

  # TODO(synk): nn.Dropout in train mode (stochastic masking) not modeled;
  # p=0.0 / eval mode makes it an exact identity here.
  print("KERNEL_OK")
</pallas_src>

<mosaic_0001>
module attributes {stable_mosaic.version = 11 : i64} {
  func.func @fused_forward_kernel(%arg0: memref<2x16x16x4xf32, #tpu.memory_space<vmem>>, %arg1: memref<3x3x4x8xf32, #tpu.memory_space<vmem>>, %arg2: memref<1x8xf32, #tpu.memory_space<vmem>>, %arg3: memref<3x3x8x16xf32, #tpu.memory_space<vmem>>, %arg4: memref<1x16xf32, #tpu.memory_space<vmem>>, %arg5: memref<4x4x16x32xf32, #tpu.memory_space<vmem>>, %arg6: memref<1x32xf32, #tpu.memory_space<vmem>>, %arg7: memref<32x10xf32, #tpu.memory_space<vmem>>, %arg8: memref<1x10xf32, #tpu.memory_space<vmem>>, %arg9: memref<2x10xf32, #tpu.memory_space<vmem>>, %arg10: memref<2x18x18x4xf32, #tpu.memory_space<vmem>>, %arg11: memref<2x10x10x8xf32, #tpu.memory_space<vmem>>) attributes {dimension_semantics = [], scalar_prefetch = 0 : i64, scratch_operands = 2 : i64, tpu.core_type = #tpu.core_type<tc>} {
    %c0 = arith.constant 0 : index
    %c0_0 = arith.constant 0 : index
    %c0_1 = arith.constant 0 : index
    %c0_2 = arith.constant 0 : index
    %0 = vector.load %arg0[%c0, %c0_0, %c0_1, %c0_2] : memref<2x16x16x4xf32, #tpu.memory_space<vmem>>, vector<2x16x16x4xf32>
    %cst = arith.constant 0.000000e+00 : f32
    %1 = vector.broadcast %cst : f32 to vector<2x18x18x4xf32>
    %c0_3 = arith.constant 0 : index
    %c0_4 = arith.constant 0 : index
    %c0_5 = arith.constant 0 : index
    %c0_6 = arith.constant 0 : index
    %2 = vector.load %arg10[%c0_3, %c0_4, %c0_5, %c0_6] : memref<2x18x18x4xf32, #tpu.memory_space<vmem>>, vector<2x18x18x4xf32>
    tpu.vector_store %arg10[%c0_3, %c0_4, %c0_5, %c0_6], %1 {strides = array<i32>} : memref<2x18x18x4xf32, #tpu.memory_space<vmem>>, vector<2x18x18x4xf32>,
    %c0_7 = arith.constant 0 : index
    %c1 = arith.constant 1 : index
    %c1_8 = arith.constant 1 : index
    %c0_9 = arith.constant 0 : index
    %3 = vector.load %arg10[%c0_7, %c1, %c1_8, %c0_9] : memref<2x18x18x4xf32, #tpu.memory_space<vmem>>, vector<2x16x16x4xf32>
    tpu.vector_store %arg10[%c0_7, %c1, %c1_8, %c0_9], %0 {strides = array<i32>} : memref<2x18x18x4xf32, #tpu.memory_space<vmem>>, vector<2x16x16x4xf32>,
    %c0_10 = arith.constant 0 : index
    %c0_11 = arith.constant 0 : index
    %4 = vector.load %arg2[%c0_10, %c0_11] : memref<1x8xf32, #tpu.memory_space<vmem>>, vector<1x8xf32>
    %5 = vector.shape_cast %4 : vector<1x8xf32> to vector<1x8xf32>
    %6 = vector.broadcast %5 : vector<1x8xf32> to vector<512x8xf32>
    %c0_12 = arith.constant 0 : index
    %c0_13 = arith.constant 0 : index
    %c0_14 = arith.constant 0 : index
    %c0_15 = arith.constant 0 : index
    %7 = vector.load %arg10[%c0_12, %c0_13, %c0_14, %c0_15] : memref<2x18x18x4xf32, #tpu.memory_space<vmem>>, vector<2x16x16x4xf32>
    %8 = vector.shape_cast %7 : vector<2x16x16x4xf32> to vector<512x4xf32>
    %c0_16 = arith.constant 0 : index
    %c0_17 = arith.constant 0 : index
    %c0_18 = arith.constant 0 : index
    %c0_19 = arith.constant 0 : index
    %9 = vector.load %arg1[%c0_16, %c0_17, %c0_18, %c0_19] : memref<3x3x4x8xf32, #tpu.memory_space<vmem>>, vector<1x1x4x8xf32>
    %10 = vector.shape_cast %9 : vector<1x1x4x8xf32> to vector<4x8xf32>
    %cst_20 = arith.constant dense<0.000000e+00> : vector<512x8xf32>
    %11 = tpu.matmul %8, %10, %cst_20 {dimension_numbers = #tpu.dot_dimension_numbers<[1], [0], [0], [1], [0, 0, 1, 1], [], []>} : vector<512x4xf32>, vector<4x8xf32>, vector<512x8xf32> -> vector<512x8xf32>
    %12 = arith.addf %6, %11 : vector<512x8xf32>
    %c0_21 = arith.constant 0 : index
    %c0_22 = arith.constant 0 : index
    %c1_23 = arith.constant 1 : index
    %c0_24 = arith.constant 0 : index
    %13 = vector.load %arg10[%c0_21, %c0_22, %c1_23, %c0_24] : memref<2x18x18x4xf32, #tpu.memory_space<vmem>>, vector<2x16x16x4xf32>
    %14 = vector.shape_cast %13 : vector<2x16x16x4xf32> to vector<512x4xf32>
    %c0_25 = arith.constant 0 : index
    %c1_26 = arith.constant 1 : index
    %c0_27 = arith.constant 0 : index
    %c0_28 = arith.constant 0 : index
    %15 = vector.load %arg1[%c0_25, %c1_26, %c0_27, %c0_28] : memref<3x3x4x8xf32, #tpu.memory_space<vmem>>, vector<1x1x4x8xf32>
    %16 = vector.shape_cast %15 : vector<1x1x4x8xf32> to vector<4x8xf32>
    %cst_29 = arith.constant dense<0.000000e+00> : vector<512x8xf32>
    %17 = tpu.matmul %14, %16, %cst_29 {dimension_numbers = #tpu.dot_dimension_numbers<[1], [0], [0], [1], [0, 0, 1, 1], [], []>} : vector<512x4xf32>, vector<4x8xf32>, vector<512x8xf32> -> vector<512x8xf32>
    %18 = arith.addf %12, %17 : vector<512x8xf32>
    %c0_30 = arith.constant 0 : index
    %c0_31 = arith.constant 0 : index
    %c2 = arith.constant 2 : index
    %c0_32 = arith.constant 0 : index
    %19 = vector.load %arg10[%c0_30, %c0_31, %c2, %c0_32] : memref<2x18x18x4xf32, #tpu.memory_space<vmem>>, vector<2x16x16x4xf32>
    %20 = vector.shape_cast %19 : vector<2x16x16x4xf32> to vector<512x4xf32>
    %c0_33 = arith.constant 0 : index
    %c2_34 = arith.constant 2 : index
    %c0_35 = arith.constant 0 : index
    %c0_36 = arith.constant 0 : index
    %21 = vector.load %arg1[%c0_33, %c2_34, %c0_35, %c0_36] : memref<3x3x4x8xf32, #tpu.memory_space<vmem>>, vector<1x1x4x8xf32>
    %22 = vector.shape_cast %21 : vector<1x1x4x8xf32> to vector<4x8xf32>
    %cst_37 = arith.constant dense<0.000000e+00> : vector<512x8xf32>
    %23 = tpu.matmul %20, %22, %cst_37 {dimension_numbers = #tpu.dot_dimension_numbers<[1], [0], [0], [1], [0, 0, 1, 1], [], []>} : vector<512x4xf32>, vector<4x8xf32>, vector<512x8xf32> -> vector<512x8xf32>
    %24 = arith.addf %18, %23 : vector<512x8xf32>
    %c0_38 = arith.constant 0 : index
    %c1_39 = arith.constant 1 : index
    %c0_40 = arith.constant 0 : index
    %c0_41 = arith.constant 0 : index
    %25 = vector.load %arg10[%c0_38, %c1_39, %c0_40, %c0_41] : memref<2x18x18x4xf32, #tpu.memory_space<vmem>>, vector<2x16x16x4xf32>
    %26 = vector.shape_cast %25 : vector<2x16x16x4xf32> to vector<512x4xf32>
    %c1_42 = arith.constant 1 : index
    %c0_43 = arith.constant 0 : index
    %c0_44 = arith.constant 0 : index
    %c0_45 = arith.constant 0 : index
    %27 = vector.load %arg1[%c1_42, %c0_43, %c0_44, %c0_45] : memref<3x3x4x8xf32, #tpu.memory_space<vmem>>, vector<1x1x4x8xf32>
    %28 = vector.shape_cast %27 : vector<1x1x4x8xf32> to vector<4x8xf32>
    %cst_46 = arith.constant dense<0.000000e+00> : vector<512x8xf32>
    %29 = tpu.matmul %26, %28, %cst_46 {dimension_numbers = #tpu.dot_dimension_numbers<[1], [0], [0], [1], [0, 0, 1, 1], [], []>} : vector<512x4xf32>, vector<4x8xf32>, vector<512x8xf32> -> vector<512x8xf32>
    %30 = arith.addf %24, %29 : vector<512x8xf32>
    %c0_47 = arith.constant 0 : index
    %c1_48 = arith.constant 1 : index
    %c1_49 = arith.constant 1 : index
    %c0_50 = arith.constant 0 : index
    %31 = vector.load %arg10[%c0_47, %c1_48, %c1_49, %c0_50] : memref<2x18x18x4xf32, #tpu.memory_space<vmem>>, vector<2x16x16x4xf32>
    %32 = vector.shape_cast %31 : vector<2x16x16x4xf32> to vector<512x4xf32>
    %c1_51 = arith.constant 1 : index
    %c1_52 = arith.constant 1 : index
    %c0_53 = arith.constant 0 : index
    %c0_54 = arith.constant 0 : index
    %33 = vector.load %arg1[%c1_51, %c1_52, %c0_53, %c0_54] : memref<3x3x4x8xf32, #tpu.memory_space<vmem>>, vector<1x1x4x8xf32>
    %34 = vector.shape_cast %33 : vector<1x1x4x8xf32> to vector<4x8xf32>
    %cst_55 = arith.constant dense<0.000000e+00> : vector<512x8xf32>
    %35 = tpu.matmul %32, %34, %cst_55 {dimension_numbers = #tpu.dot_dimension_numbers<[1], [0], [0], [1], [0, 0, 1, 1], [], []>} : vector<512x4xf32>, vector<4x8xf32>, vector<512x8xf32> -> vector<512x8xf32>
    %36 = arith.addf %30, %35 : vector<512x8xf32>
    %c0_56 = arith.constant 0 : index
    %c1_57 = arith.constant 1 : index
    %c2_58 = arith.constant 2 : index
    %c0_59 = arith.constant 0 : index
    %37 = vector.load %arg10[%c0_56, %c1_57, %c2_58, %c0_59] : memref<2x18x18x4xf32, #tpu.memory_space<vmem>>, vector<2x16x16x4xf32>
    %38 = vector.shape_cast %37 : vector<2x16x16x4xf32> to vector<512x4xf32>
    %c1_60 = arith.constant 1 : index
    %c2_61 = arith.constant 2 : index
    %c0_62 = arith.constant 0 : index
    %c0_63 = arith.constant 0 : index
    %39 = vector.load %arg1[%c1_60, %c2_61, %c0_62, %c0_63] : memref<3x3x4x8xf32, #tpu.memory_space<vmem>>, vector<1x1x4x8xf32>
    %40 = vector.shape_cast %39 : vector<1x1x4x8xf32> to vector<4x8xf32>
    %cst_64 = arith.constant dense<0.000000e+00> : vector<512x8xf32>
    %41 = tpu.matmul %38, %40, %cst_64 {dimension_numbers = #tpu.dot_dimension_numbers<[1], [0], [0], [1], [0, 0, 1, 1], [], []>} : vector<512x4xf32>, vector<4x8xf32>, vector<512x8xf32> -> vector<512x8xf32>
    %42 = arith.addf %36, %41 : vector<512x8xf32>
    %c0_65 = arith.constant 0 : index
    %c2_66 = arith.constant 2 : index
    %c0_67 = arith.constant 0 : index
    %c0_68 = arith.constant 0 : index
    %43 = vector.load %arg10[%c0_65, %c2_66, %c0_67, %c0_68] : memref<2x18x18x4xf32, #tpu.memory_space<vmem>>, vector<2x16x16x4xf32>
    %44 = vector.shape_cast %43 : vector<2x16x16x4xf32> to vector<512x4xf32>
    %c2_69 = arith.constant 2 : index
    %c0_70 = arith.constant 0 : index
    %c0_71 = arith.constant 0 : index
    %c0_72 = arith.constant 0 : index
    %45 = vector.load %arg1[%c2_69, %c0_70, %c0_71, %c0_72] : memref<3x3x4x8xf32, #tpu.memory_space<vmem>>, vector<1x1x4x8xf32>
    %46 = vector.shape_cast %45 : vector<1x1x4x8xf32> to vector<4x8xf32>
    %cst_73 = arith.constant dense<0.000000e+00> : vector<512x8xf32>
    %47 = tpu.matmul %44, %46, %cst_73 {dimension_numbers = #tpu.dot_dimension_numbers<[1], [0], [0], [1], [0, 0, 1, 1], [], []>} : vector<512x4xf32>, vector<4x8xf32>, vector<512x8xf32> -> vector<512x8xf32>
    %48 = arith.addf %42, %47 : vector<512x8xf32>
    %c0_74 = arith.constant 0 : index
    %c2_75 = arith.constant 2 : index
    %c1_76 = arith.constant 1 : index
    %c0_77 = arith.constant 0 : index
    %49 = vector.load %arg10[%c0_74, %c2_75, %c1_76, %c0_77] : memref<2x18x18x4xf32, #tpu.memory_space<vmem>>, vector<2x16x16x4xf32>
    %50 = vector.shape_cast %49 : vector<2x16x16x4xf32> to vector<512x4xf32>
    %c2_78 = arith.constant 2 : index
    %c1_79 = arith.constant 1 : index
    %c0_80 = arith.constant 0 : index
    %c0_81 = arith.constant 0 : index
    %51 = vector.load %arg1[%c2_78, %c1_79, %c0_80, %c0_81] : memref<3x3x4x8xf32, #tpu.memory_space<vmem>>, vector<1x1x4x8xf32>
    %52 = vector.shape_cast %51 : vector<1x1x4x8xf32> to vector<4x8xf32>
    %cst_82 = arith.constant dense<0.000000e+00> : vector<512x8xf32>
    %53 = tpu.matmul %50, %52, %cst_82 {dimension_numbers = #tpu.dot_dimension_numbers<[1], [0], [0], [1], [0, 0, 1, 1], [], []>} : vector<512x4xf32>, vector<4x8xf32>, vector<512x8xf32> -> vector<512x8xf32>
    %54 = arith.addf %48, %53 : vector<512x8xf32>
    %c0_83 = arith.constant 0 : index
    %c2_84 = arith.constant 2 : index
    %c2_85 = arith.constant 2 : index
    %c0_86 = arith.constant 0 : index
    %55 = vector.load %arg10[%c0_83, %c2_84, %c2_85, %c0_86] : memref<2x18x18x4xf32, #tpu.memory_space<vmem>>, vector<2x16x16x4xf32>
    %56 = vector.shape_cast %55 : vector<2x16x16x4xf32> to vector<512x4xf32>
    %c2_87 = arith.constant 2 : index
    %c2_88 = arith.constant 2 : index
    %c0_89 = arith.constant 0 : index
    %c0_90 = arith.constant 0 : index
    %57 = vector.load %arg1[%c2_87, %c2_88, %c0_89, %c0_90] : memref<3x3x4x8xf32, #tpu.memory_space<vmem>>, vector<1x1x4x8xf32>
    %58 = vector.shape_cast %57 : vector<1x1x4x8xf32> to vector<4x8xf32>
    %cst_91 = arith.constant dense<0.000000e+00> : vector<512x8xf32>
    %59 = tpu.matmul %56, %58, %cst_91 {dimension_numbers = #tpu.dot_dimension_numbers<[1], [0], [0], [1], [0, 0, 1, 1], [], []>} : vector<512x4xf32>, vector<4x8xf32>, vector<512x8xf32> -> vector<512x8xf32>
    %60 = arith.addf %54, %59 : vector<512x8xf32>
    %61 = vector.shape_cast %60 : vector<512x8xf32> to vector<256x2x8xf32>
    %cst_92 = arith.constant dense<0xFF800000> : vector<256x8xf32>
    %62 = vector.multi_reduction <maximumf>, %61, %cst_92 [1] : vector<256x2x8xf32> to vector<256x8xf32>
    %63 = vector.shape_cast %62 : vector<256x8xf32> to vector<16x2x8x8xf32>
    %cst_93 = arith.constant dense<0xFF800000> : vector<16x8x8xf32>
    %64 = vector.multi_reduction <maximumf>, %63, %cst_93 [1] : vector<16x2x8x8xf32> to vector<16x8x8xf32>
    %cst_94 = arith.constant 0.000000e+00 : f32
    %65 = vector.broadcast %cst_94 : f32 to vector<16x8x8xf32>
    %66 = arith.maximumf %64, %65 : vector<16x8x8xf32>
    %67 = vector.shape_cast %66 : vector<16x8x8xf32> to vector<2x8x8x8xf32>
    %cst_95 = arith.constant 0.000000e+00 : f32
    %68 = vector.broadcast %cst_95 : f32 to vector<2x10x10x8xf32>
    %c0_96 = arith.constant 0 : index
    %c0_97 = arith.constant 0 : index
    %c0_98 = arith.constant 0 : index
    %c0_99 = arith.constant 0 : index
    %69 = vector.load %arg11[%c0_96, %c0_97, %c0_98, %c0_99] : memref<2x10x10x8xf32, #tpu.memory_space<vmem>>, vector<2x10x10x8xf32>
    tpu.vector_store %arg11[%c0_96, %c0_97, %c0_98, %c0_99], %68 {strides = array<i32>} : memref<2x10x10x8xf32, #tpu.memory_space<vmem>>, vector<2x10x10x8xf32>,
    %c0_100 = arith.constant 0 : index
    %c1_101 = arith.constant 1 : index
    %c1_102 = arith.constant 1 : index
    %c0_103 = arith.constant 0 : index
    %70 = vector.load %arg11[%c0_100, %c1_101, %c1_102, %c0_103] : memref<2x10x10x8xf32, #tpu.memory_space<vmem>>, vector<2x8x8x8xf32>
    tpu.vector_store %arg11[%c0_100, %c1_101, %c1_102, %c0_103], %67 {strides = array<i32>} : memref<2x10x10x8xf32, #tpu.memory_space<vmem>>, vector<2x8x8x8xf32>,
    %c0_104 = arith.constant 0 : index
    %c0_105 = arith.constant 0 : index
    %71 = vector.load %arg4[%c0_104, %c0_105] : memref<1x16xf32, #tpu.memory_space<vmem>>, vector<1x16xf32>
    %72 = vector.shape_cast %71 : vector<1x16xf32> to vector<1x16xf32>
    %73 = vector.broadcast %72 : vector<1x16xf32> to vector<128x16xf32>
    %c0_106 = arith.constant 0 : index
    %c0_107 = arith.constant 0 : index
    %c0_108 = arith.constant 0 : index
    %c0_109 = arith.constant 0 : index
    %74 = vector.load %arg11[%c0_106, %c0_107, %c0_108, %c0_109] : memref<2x10x10x8xf32, #tpu.memory_space<vmem>>, vector<2x8x8x8xf32>
    %75 = vector.shape_cast %74 : vector<2x8x8x8xf32> to vector<128x8xf32>
    %c0_110 = arith.constant 0 : index
    %c0_111 = arith.constant 0 : index
    %c0_112 = arith.constant 0 : index
    %c0_113 = arith.constant 0 : index
    %76 = vector.load %arg3[%c0_110, %c0_111, %c0_112, %c0_113] : memref<3x3x8x16xf32, #tpu.memory_space<vmem>>, vector<1x1x8x16xf32>
    %77 = vector.shape_cast %76 : vector<1x1x8x16xf32> to vector<8x16xf32>
    %cst_114 = arith.constant dense<0.000000e+00> : vector<128x16xf32>
    %78 = tpu.matmul %75, %77, %cst_114 {dimension_numbers = #tpu.dot_dimension_numbers<[1], [0], [0], [1], [0, 0, 1, 1], [], []>} : vector<128x8xf32>, vector<8x16xf32>, vector<128x16xf32> -> vector<128x16xf32>
    %79 = arith.addf %73, %78 : vector<128x16xf32>
    %c0_115 = arith.constant 0 : index
    %c0_116 = arith.constant 0 : index
    %c1_117 = arith.constant 1 : index
    %c0_118 = arith.constant 0 : index
    %80 = vector.load %arg11[%c0_115, %c0_116, %c1_117, %c0_118] : memref<2x10x10x8xf32, #tpu.memory_space<vmem>>, vector<2x8x8x8xf32>
    %81 = vector.shape_cast %80 : vector<2x8x8x8xf32> to vector<128x8xf32>
    %c0_119 = arith.constant 0 : index
    %c1_120 = arith.constant 1 : index
    %c0_121 = arith.constant 0 : index
    %c0_122 = arith.constant 0 : index
    %82 = vector.load %arg3[%c0_119, %c1_120, %c0_121, %c0_122] : memref<3x3x8x16xf32, #tpu.memory_space<vmem>>, vector<1x1x8x16xf32>
    %83 = vector.shape_cast %82 : vector<1x1x8x16xf32> to vector<8x16xf32>
    %cst_123 = arith.constant dense<0.000000e+00> : vector<128x16xf32>
    %84 = tpu.matmul %81, %83, %cst_123 {dimension_numbers = #tpu.dot_dimension_numbers<[1], [0], [0], [1], [0, 0, 1, 1], [], []>} : vector<128x8xf32>, vector<8x16xf32>, vector<128x16xf32> -> vector<128x16xf32>
    %85 = arith.addf %79, %84 : vector<128x16xf32>
    %c0_124 = arith.constant 0 : index
    %c0_125 = arith.constant 0 : index
    %c2_126 = arith.constant 2 : index
    %c0_127 = arith.constant 0 : index
    %86 = vector.load %arg11[%c0_124, %c0_125, %c2_126, %c0_127] : memref<2x10x10x8xf32, #tpu.memory_space<vmem>>, vector<2x8x8x8xf32>
    %87 = vector.shape_cast %86 : vector<2x8x8x8xf32> to vector<128x8xf32>
    %c0_128 = arith.constant 0 : index
    %c2_129 = arith.constant 2 : index
    %c0_130 = arith.constant 0 : index
    %c0_131 = arith.constant 0 : index
    %88 = vector.load %arg3[%c0_128, %c2_129, %c0_130, %c0_131] : memref<3x3x8x16xf32, #tpu.memory_space<vmem>>, vector<1x1x8x16xf32>
    %89 = vector.shape_cast %88 : vector<1x1x8x16xf32> to vector<8x16xf32>
    %cst_132 = arith.constant dense<0.000000e+00> : vector<128x16xf32>
    %90 = tpu.matmul %87, %89, %cst_132 {dimension_numbers = #tpu.dot_dimension_numbers<[1], [0], [0], [1], [0, 0, 1, 1], [], []>} : vector<128x8xf32>, vector<8x16xf32>, vector<128x16xf32> -> vector<128x16xf32>
    %91 = arith.addf %85, %90 : vector<128x16xf32>
    %c0_133 = arith.constant 0 : index
    %c1_134 = arith.constant 1 : index
    %c0_135 = arith.constant 0 : index
    %c0_136 = arith.constant 0 : index
    %92 = vector.load %arg11[%c0_133, %c1_134, %c0_135, %c0_136] : memref<2x10x10x8xf32, #tpu.memory_space<vmem>>, vector<2x8x8x8xf32>
    %93 = vector.shape_cast %92 : vector<2x8x8x8xf32> to vector<128x8xf32>
    %c1_137 = arith.constant 1 : index
    %c0_138 = arith.constant 0 : index
    %c0_139 = arith.constant 0 : index
    %c0_140 = arith.constant 0 : index
    %94 = vector.load %arg3[%c1_137, %c0_138, %c0_139, %c0_140] : memref<3x3x8x16xf32, #tpu.memory_space<vmem>>, vector<1x1x8x16xf32>
    %95 = vector.shape_cast %94 : vector<1x1x8x16xf32> to vector<8x16xf32>
    %cst_141 = arith.constant dense<0.000000e+00> : vector<128x16xf32>
    %96 = tpu.matmul %93, %95, %cst_141 {dimension_numbers = #tpu.dot_dimension_numbers<[1], [0], [0], [1], [0, 0, 1, 1], [], []>} : vector<128x8xf32>, vector<8x16xf32>, vector<128x16xf32> -> vector<128x16xf32>
    %97 = arith.addf %91, %96 : vector<128x16xf32>
    %c0_142 = arith.constant 0 : index
    %c1_143 = arith.constant 1 : index
    %c1_144 = arith.constant 1 : index
    %c0_145 = arith.constant 0 : index
    %98 = vector.load %arg11[%c0_142, %c1_143, %c1_144, %c0_145] : memref<2x10x10x8xf32, #tpu.memory_space<vmem>>, vector<2x8x8x8xf32>
    %99 = vector.shape_cast %98 : vector<2x8x8x8xf32> to vector<128x8xf32>
    %c1_146 = arith.constant 1 : index
    %c1_147 = arith.constant 1 : index
    %c0_148 = arith.constant 0 : index
    %c0_149 = arith.constant 0 : index
    %100 = vector.load %arg3[%c1_146, %c1_147, %c0_148, %c0_149] : memref<3x3x8x16xf32, #tpu.memory_space<vmem>>, vector<1x1x8x16xf32>
    %101 = vector.shape_cast %100 : vector<1x1x8x16xf32> to vector<8x16xf32>
    %cst_150 = arith.constant dense<0.000000e+00> : vector<128x16xf32>
    %102 = tpu.matmul %99, %101, %cst_150 {dimension_numbers = #tpu.dot_dimension_numbers<[1], [0], [0], [1], [0, 0, 1, 1], [], []>} : vector<128x8xf32>, vector<8x16xf32>, vector<128x16xf32> -> vector<128x16xf32>
    %103 = arith.addf %97, %102 : vector<128x16xf32>
    %c0_151 = arith.constant 0 : index
    %c1_152 = arith.constant 1 : index
    %c2_153 = arith.constant 2 : index
    %c0_154 = arith.constant 0 : index
    %104 = vector.load %arg11[%c0_151, %c1_152, %c2_153, %c0_154] : memref<2x10x10x8xf32, #tpu.memory_space<vmem>>, vector<2x8x8x8xf32>
    %105 = vector.shape_cast %104 : vector<2x8x8x8xf32> to vector<128x8xf32>
    %c1_155 = arith.constant 1 : index
    %c2_156 = arith.constant 2 : index
    %c0_157 = arith.constant 0 : index
    %c0_158 = arith.constant 0 : index
    %106 = vector.load %arg3[%c1_155, %c2_156, %c0_157, %c0_158] : memref<3x3x8x16xf32, #tpu.memory_space<vmem>>, vector<1x1x8x16xf32>
    %107 = vector.shape_cast %106 : vector<1x1x8x16xf32> to vector<8x16xf32>
    %cst_159 = arith.constant dense<0.000000e+00> : vector<128x16xf32>
    %108 = tpu.matmul %105, %107, %cst_159 {dimension_numbers = #tpu.dot_dimension_numbers<[1], [0], [0], [1], [0, 0, 1, 1], [], []>} : vector<128x8xf32>, vector<8x16xf32>, vector<128x16xf32> -> vector<128x16xf32>
    %109 = arith.addf %103, %108 : vector<128x16xf32>
    %c0_160 = arith.constant 0 : index
    %c2_161 = arith.constant 2 : index
    %c0_162 = arith.constant 0 : index
    %c0_163 = arith.constant 0 : index
    %110 = vector.load %arg11[%c0_160, %c2_161, %c0_162, %c0_163] : memref<2x10x10x8xf32, #tpu.memory_space<vmem>>, vector<2x8x8x8xf32>
    %111 = vector.shape_cast %110 : vector<2x8x8x8xf32> to vector<128x8xf32>
    %c2_164 = arith.constant 2 : index
    %c0_165 = arith.constant 0 : index
    %c0_166 = arith.constant 0 : index
    %c0_167 = arith.constant 0 : index
    %112 = vector.load %arg3[%c2_164, %c0_165, %c0_166, %c0_167] : memref<3x3x8x16xf32, #tpu.memory_space<vmem>>, vector<1x1x8x16xf32>
    %113 = vector.shape_cast %112 : vector<1x1x8x16xf32> to vector<8x16xf32>
    %cst_168 = arith.constant dense<0.000000e+00> : vector<128x16xf32>
    %114 = tpu.matmul %111, %113, %cst_168 {dimension_numbers = #tpu.dot_dimension_numbers<[1], [0], [0], [1], [0, 0, 1, 1], [], []>} : vector<128x8xf32>, vector<8x16xf32>, vector<128x16xf32> -> vector<128x16xf32>
    %115 = arith.addf %109, %114 : vector<128x16xf32>
    %c0_169 = arith.constant 0 : index
    %c2_170 = arith.constant 2 : index
    %c1_171 = arith.constant 1 : index
    %c0_172 = arith.constant 0 : index
    %116 = vector.load %arg11[%c0_169, %c2_170, %c1_171, %c0_172] : memref<2x10x10x8xf32, #tpu.memory_space<vmem>>, vector<2x8x8x8xf32>
    %117 = vector.shape_cast %116 : vector<2x8x8x8xf32> to vector<128x8xf32>
    %c2_173 = arith.constant 2 : index
    %c1_174 = arith.constant 1 : index
    %c0_175 = arith.constant 0 : index
    %c0_176 = arith.constant 0 : index
    %118 = vector.load %arg3[%c2_173, %c1_174, %c0_175, %c0_176] : memref<3x3x8x16xf32, #tpu.memory_space<vmem>>, vector<1x1x8x16xf32>
    %119 = vector.shape_cast %118 : vector<1x1x8x16xf32> to vector<8x16xf32>
    %cst_177 = arith.constant dense<0.000000e+00> : vector<128x16xf32>
    %120 = tpu.matmul %117, %119, %cst_177 {dimension_numbers = #tpu.dot_dimension_numbers<[1], [0], [0], [1], [0, 0, 1, 1], [], []>} : vector<128x8xf32>, vector<8x16xf32>, vector<128x16xf32> -> vector<128x16xf32>
    %121 = arith.addf %115, %120 : vector<128x16xf32>
    %c0_178 = arith.constant 0 : index
    %c2_179 = arith.constant 2 : index
    %c2_180 = arith.constant 2 : index
    %c0_181 = arith.constant 0 : index
    %122 = vector.load %arg11[%c0_178, %c2_179, %c2_180, %c0_181] : memref<2x10x10x8xf32, #tpu.memory_space<vmem>>, vector<2x8x8x8xf32>
    %123 = vector.shape_cast %122 : vector<2x8x8x8xf32> to vector<128x8xf32>
    %c2_182 = arith.constant 2 : index
    %c2_183 = arith.constant 2 : index
    %c0_184 = arith.constant 0 : index
    %c0_185 = arith.constant 0 : index
    %124 = vector.load %arg3[%c2_182, %c2_183, %c0_184, %c0_185] : memref<3x3x8x16xf32, #tpu.memory_space<vmem>>, vector<1x1x8x16xf32>
    %125 = vector.shape_cast %124 : vector<1x1x8x16xf32> to vector<8x16xf32>
    %cst_186 = arith.constant dense<0.000000e+00> : vector<128x16xf32>
    %126 = tpu.matmul %123, %125, %cst_186 {dimension_numbers = #tpu.dot_dimension_numbers<[1], [0], [0], [1], [0, 0, 1, 1], [], []>} : vector<128x8xf32>, vector<8x16xf32>, vector<128x16xf32> -> vector<128x16xf32>
    %127 = arith.addf %121, %126 : vector<128x16xf32>
    %128 = vector.shape_cast %127 : vector<128x16xf32> to vector<64x2x16xf32>
    %cst_187 = arith.constant dense<0xFF800000> : vector<64x16xf32>
    %129 = vector.multi_reduction <maximumf>, %128, %cst_187 [1] : vector<64x2x16xf32> to vector<64x16xf32>
    %130 = vector.shape_cast %129 : vector<64x16xf32> to vector<8x2x4x16xf32>
    %cst_188 = arith.constant dense<0xFF800000> : vector<8x4x16xf32>
    %131 = vector.multi_reduction <maximumf>, %130, %cst_188 [1] : vector<8x2x4x16xf32> to vector<8x4x16xf32>
    %cst_189 = arith.constant 0.000000e+00 : f32
    %132 = vector.broadcast %cst_189 : f32 to vector<8x4x16xf32>
    %133 = arith.maximumf %131, %132 : vector<8x4x16xf32>
    %134 = vector.shape_cast %133 : vector<8x4x16xf32> to vector<2x4x4x16xf32>
    %c0_190 = arith.constant 0 : index
    %c0_191 = arith.constant 0 : index
    %135 = vector.load %arg6[%c0_190, %c0_191] : memref<1x32xf32, #tpu.memory_space<vmem>>, vector<1x32xf32>
    %136 = vector.shape_cast %135 : vector<1x32xf32> to vector<1x32xf32>
    %137 = vector.broadcast %136 : vector<1x32xf32> to vector<2x32xf32>
    %138 = vector.extract_strided_slice %134 {offsets = [0, 0, 0, 0], sizes = [2, 1, 1, 16], strides = [1, 1, 1, 1]} : vector<2x4x4x16xf32> to vector<2x1x1x16xf32>
    %139 = vector.shape_cast %138 : vector<2x1x1x16xf32> to vector<2x16xf32>
    %c0_192 = arith.constant 0 : index
    %c0_193 = arith.constant 0 : index
    %c0_194 = arith.constant 0 : index
    %c0_195 = arith.constant 0 : index
    %140 = vector.load %arg5[%c0_192, %c0_193, %c0_194, %c0_195] : memref<4x4x16x32xf32, #tpu.memory_space<vmem>>, vector<1x1x16x32xf32>
    %141 = vector.shape_cast %140 : vector<1x1x16x32xf32> to vector<16x32xf32>
    %cst_196 = arith.constant dense<0.000000e+00> : vector<2x32xf32>
    %142 = tpu.matmul %139, %141, %cst_196 {dimension_numbers = #tpu.dot_dimension_numbers<[1], [0], [0], [1], [0, 0, 1, 1], [], []>} : vector<2x16xf32>, vector<16x32xf32>, vector<2x32xf32> -> vector<2x32xf32>
    %143 = arith.addf %137, %142 : vector<2x32xf32>
    %144 = vector.extract_strided_slice %134 {offsets = [0, 0, 1, 0], sizes = [2, 1, 1, 16], strides = [1, 1, 1, 1]} : vector<2x4x4x16xf32> to vector<2x1x1x16xf32>
    %145 = vector.shape_cast %144 : vector<2x1x1x16xf32> to vector<2x16xf32>
    %c0_197 = arith.constant 0 : index
    %c1_198 = arith.constant 1 : index
    %c0_199 = arith.constant 0 : index
    %c0_200 = arith.constant 0 : index
    %146 = vector.load %arg5[%c0_197, %c1_198, %c0_199, %c0_200] : memref<4x4x16x32xf32, #tpu.memory_space<vmem>>, vector<1x1x16x32xf32>
    %147 = vector.shape_cast %146 : vector<1x1x16x32xf32> to vector<16x32xf32>
    %cst_201 = arith.constant dense<0.000000e+00> : vector<2x32xf32>
    %148 = tpu.matmul %145, %147, %cst_201 {dimension_numbers = #tpu.dot_dimension_numbers<[1], [0], [0], [1], [0, 0, 1, 1], [], []>} : vector<2x16xf32>, vector<16x32xf32>, vector<2x32xf32> -> vector<2x32xf32>
    %149 = arith.addf %143, %148 : vector<2x32xf32>
    %150 = vector.extract_strided_slice %134 {offsets = [0, 0, 2, 0], sizes = [2, 1, 1, 16], strides = [1, 1, 1, 1]} : vector<2x4x4x16xf32> to vector<2x1x1x16xf32>
    %151 = vector.shape_cast %150 : vector<2x1x1x16xf32> to vector<2x16xf32>
    %c0_202 = arith.constant 0 : index
    %c2_203 = arith.constant 2 : index
    %c0_204 = arith.constant 0 : index
    %c0_205 = arith.constant 0 : index
    %152 = vector.load %arg5[%c0_202, %c2_203, %c0_204, %c0_205] : memref<4x4x16x32xf32, #tpu.memory_space<vmem>>, vector<1x1x16x32xf32>
    %153 = vector.shape_cast %152 : vector<1x1x16x32xf32> to vector<16x32xf32>
    %cst_206 = arith.constant dense<0.000000e+00> : vector<2x32xf32>
    %154 = tpu.matmul %151, %153, %cst_206 {dimension_numbers = #tpu.dot_dimension_numbers<[1], [0], [0], [1], [0, 0, 1, 1], [], []>} : vector<2x16xf32>, vector<16x32xf32>, vector<2x32xf32> -> vector<2x32xf32>
    %155 = arith.addf %149, %154 : vector<2x32xf32>
    %156 = vector.extract_strided_slice %134 {offsets = [0, 0, 3, 0], sizes = [2, 1, 1, 16], strides = [1, 1, 1, 1]} : vector<2x4x4x16xf32> to vector<2x1x1x16xf32>
    %157 = vector.shape_cast %156 : vector<2x1x1x16xf32> to vector<2x16xf32>
    %c0_207 = arith.constant 0 : index
    %c3 = arith.constant 3 : index
    %c0_208 = arith.constant 0 : index
    %c0_209 = arith.constant 0 : index
    %158 = vector.load %arg5[%c0_207, %c3, %c0_208, %c0_209] : memref<4x4x16x32xf32, #tpu.memory_space<vmem>>, vector<1x1x16x32xf32>
    %159 = vector.shape_cast %158 : vector<1x1x16x32xf32> to vector<16x32xf32>
    %cst_210 = arith.constant dense<0.000000e+00> : vector<2x32xf32>
    %160 = tpu.matmul %157, %159, %cst_210 {dimension_numbers = #tpu.dot_dimension_numbers<[1], [0], [0], [1], [0, 0, 1, 1], [], []>} : vector<2x16xf32>, vector<16x32xf32>, vector<2x32xf32> -> vector<2x32xf32>
    %161 = arith.addf %155, %160 : vector<2x32xf32>
    %162 = vector.extract_strided_slice %134 {offsets = [0, 1, 0, 0], sizes = [2, 1, 1, 16], strides = [1, 1, 1, 1]} : vector<2x4x4x16xf32> to vector<2x1x1x16xf32>
    %163 = vector.shape_cast %162 : vector<2x1x1x16xf32> to vector<2x16xf32>
    %c1_211 = arith.constant 1 : index
    %c0_212 = arith.constant 0 : index
    %c0_213 = arith.constant 0 : index
    %c0_214 = arith.constant 0 : index
    %164 = vector.load %arg5[%c1_211, %c0_212, %c0_213, %c0_214] : memref<4x4x16x32xf32, #tpu.memory_space<vmem>>, vector<1x1x16x32xf32>
    %165 = vector.shape_cast %164 : vector<1x1x16x32xf32> to vector<16x32xf32>
    %cst_215 = arith.constant dense<0.000000e+00> : vector<2x32xf32>
    %166 = tpu.matmul %163, %165, %cst_215 {dimension_numbers = #tpu.dot_dimension_numbers<[1], [0], [0], [1], [0, 0, 1, 1], [], []>} : vector<2x16xf32>, vector<16x32xf32>, vector<2x32xf32> -> vector<2x32xf32>
    %167 = arith.addf %161, %166 : vector<2x32xf32>
    %168 = vector.extract_strided_slice %134 {offsets = [0, 1, 1, 0], sizes = [2, 1, 1, 16], strides = [1, 1, 1, 1]} : vector<2x4x4x16xf32> to vector<2x1x1x16xf32>
    %169 = vector.shape_cast %168 : vector<2x1x1x16xf32> to vector<2x16xf32>
    %c1_216 = arith.constant 1 : index
    %c1_217 = arith.constant 1 : index
    %c0_218 = arith.constant 0 : index
    %c0_219 = arith.constant 0 : index
    %170 = vector.load %arg5[%c1_216, %c1_217, %c0_218, %c0_219] : memref<4x4x16x32xf32, #tpu.memory_space<vmem>>, vector<1x1x16x32xf32>
    %171 = vector.shape_cast %170 : vector<1x1x16x32xf32> to vector<16x32xf32>
    %cst_220 = arith.constant dense<0.000000e+00> : vector<2x32xf32>
    %172 = tpu.matmul %169, %171, %cst_220 {dimension_numbers = #tpu.dot_dimension_numbers<[1], [0], [0], [1], [0, 0, 1, 1], [], []>} : vector<2x16xf32>, vector<16x32xf32>, vector<2x32xf32> -> vector<2x32xf32>
    %173 = arith.addf %167, %172 : vector<2x32xf32>
    %174 = vector.extract_strided_slice %134 {offsets = [0, 1, 2, 0], sizes = [2, 1, 1, 16], strides = [1, 1, 1, 1]} : vector<2x4x4x16xf32> to vector<2x1x1x16xf32>
    %175 = vector.shape_cast %174 : vector<2x1x1x16xf32> to vector<2x16xf32>
    %c1_221 = arith.constant 1 : index
    %c2_222 = arith.constant 2 : index
    %c0_223 = arith.constant 0 : index
    %c0_224 = arith.constant 0 : index
    %176 = vector.load %arg5[%c1_221, %c2_222, %c0_223, %c0_224] : memref<4x4x16x32xf32, #tpu.memory_space<vmem>>, vector<1x1x16x32xf32>
    %177 = vector.shape_cast %176 : vector<1x1x16x32xf32> to vector<16x32xf32>
    %cst_225 = arith.constant dense<0.000000e+00> : vector<2x32xf32>
    %178 = tpu.matmul %175, %177, %cst_225 {dimension_numbers = #tpu.dot_dimension_numbers<[1], [0], [0], [1], [0, 0, 1, 1], [], []>} : vector<2x16xf32>, vector<16x32xf32>, vector<2x32xf32> -> vector<2x32xf32>
    %179 = arith.addf %173, %178 : vector<2x32xf32>
    %180 = vector.extract_strided_slice %134 {offsets = [0, 1, 3, 0], sizes = [2, 1, 1, 16], strides = [1, 1, 1, 1]} : vector<2x4x4x16xf32> to vector<2x1x1x16xf32>
    %181 = vector.shape_cast %180 : vector<2x1x1x16xf32> to vector<2x16xf32>
    %c1_226 = arith.constant 1 : index
    %c3_227 = arith.constant 3 : index
    %c0_228 = arith.constant 0 : index
    %c0_229 = arith.constant 0 : index
    %182 = vector.load %arg5[%c1_226, %c3_227, %c0_228, %c0_229] : memref<4x4x16x32xf32, #tpu.memory_space<vmem>>, vector<1x1x16x32xf32>
    %183 = vector.shape_cast %182 : vector<1x1x16x32xf32> to vector<16x32xf32>
    %cst_230 = arith.constant dense<0.000000e+00> : vector<2x32xf32>
    %184 = tpu.matmul %181, %183, %cst_230 {dimension_numbers = #tpu.dot_dimension_numbers<[1], [0], [0], [1], [0, 0, 1, 1], [], []>} : vector<2x16xf32>, vector<16x32xf32>, vector<2x32xf32> -> vector<2x32xf32>
    %185 = arith.addf %179, %184 : vector<2x32xf32>
    %186 = vector.extract_strided_slice %134 {offsets = [0, 2, 0, 0], sizes = [2, 1, 1, 16], strides = [1, 1, 1, 1]} : vector<2x4x4x16xf32> to vector<2x1x1x16xf32>
    %187 = vector.shape_cast %186 : vector<2x1x1x16xf32> to vector<2x16xf32>
    %c2_231 = arith.constant 2 : index
    %c0_232 = arith.constant 0 : index
    %c0_233 = arith.constant 0 : index
    %c0_234 = arith.constant 0 : index
    %188 = vector.load %arg5[%c2_231, %c0_232, %c0_233, %c0_234] : memref<4x4x16x32xf32, #tpu.memory_space<vmem>>, vector<1x1x16x32xf32>
    %189 = vector.shape_cast %188 : vector<1x1x16x32xf32> to vector<16x32xf32>
    %cst_235 = arith.constant dense<0.000000e+00> : vector<2x32xf32>
    %190 = tpu.matmul %187, %189, %cst_235 {dimension_numbers = #tpu.dot_dimension_numbers<[1], [0], [0], [1], [0, 0, 1, 1], [], []>} : vector<2x16xf32>, vector<16x32xf32>, vector<2x32xf32> -> vector<2x32xf32>
    %191 = arith.addf %185, %190 : vector<2x32xf32>
    %192 = vector.extract_strided_slice %134 {offsets = [0, 2, 1, 0], sizes = [2, 1, 1, 16], strides = [1, 1, 1, 1]} : vector<2x4x4x16xf32> to vector<2x1x1x16xf32>
    %193 = vector.shape_cast %192 : vector<2x1x1x16xf32> to vector<2x16xf32>
    %c2_236 = arith.constant 2 : index
    %c1_237 = arith.constant 1 : index
    %c0_238 = arith.constant 0 : index
    %c0_239 = arith.constant 0 : index
    %194 = vector.load %arg5[%c2_236, %c1_237, %c0_238, %c0_239] : memref<4x4x16x32xf32, #tpu.memory_space<vmem>>, vector<1x1x16x32xf32>
    %195 = vector.shape_cast %194 : vector<1x1x16x32xf32> to vector<16x32xf32>
    %cst_240 = arith.constant dense<0.000000e+00> : vector<2x32xf32>
    %196 = tpu.matmul %193, %195, %cst_240 {dimension_numbers = #tpu.dot_dimension_numbers<[1], [0], [0], [1], [0, 0, 1, 1], [], []>} : vector<2x16xf32>, vector<16x32xf32>, vector<2x32xf32> -> vector<2x32xf32>
    %197 = arith.addf %191, %196 : vector<2x32xf32>
    %198 = vector.extract_strided_slice %134 {offsets = [0, 2, 2, 0], sizes = [2, 1, 1, 16], strides = [1, 1, 1, 1]} : vector<2x4x4x16xf32> to vector<2x1x1x16xf32>
    %199 = vector.shape_cast %198 : vector<2x1x1x16xf32> to vector<2x16xf32>
    %c2_241 = arith.constant 2 : index
    %c2_242 = arith.constant 2 : index
    %c0_243 = arith.constant 0 : index
    %c0_244 = arith.constant 0 : index
    %200 = vector.load %arg5[%c2_241, %c2_242, %c0_243, %c0_244] : memref<4x4x16x32xf32, #tpu.memory_space<vmem>>, vector<1x1x16x32xf32>
    %201 = vector.shape_cast %200 : vector<1x1x16x32xf32> to vector<16x32xf32>
    %cst_245 = arith.constant dense<0.000000e+00> : vector<2x32xf32>
    %202 = tpu.matmul %199, %201, %cst_245 {dimension_numbers = #tpu.dot_dimension_numbers<[1], [0], [0], [1], [0, 0, 1, 1], [], []>} : vector<2x16xf32>, vector<16x32xf32>, vector<2x32xf32> -> vector<2x32xf32>
    %203 = arith.addf %197, %202 : vector<2x32xf32>
    %204 = vector.extract_strided_slice %134 {offsets = [0, 2, 3, 0], sizes = [2, 1, 1, 16], strides = [1, 1, 1, 1]} : vector<2x4x4x16xf32> to vector<2x1x1x16xf32>
    %205 = vector.shape_cast %204 : vector<2x1x1x16xf32> to vector<2x16xf32>
    %c2_246 = arith.constant 2 : index
    %c3_247 = arith.constant 3 : index
    %c0_248 = arith.constant 0 : index
    %c0_249 = arith.constant 0 : index
    %206 = vector.load %arg5[%c2_246, %c3_247, %c0_248, %c0_249] : memref<4x4x16x32xf32, #tpu.memory_space<vmem>>, vector<1x1x16x32xf32>
    %207 = vector.shape_cast %206 : vector<1x1x16x32xf32> to vector<16x32xf32>
    %cst_250 = arith.constant dense<0.000000e+00> : vector<2x32xf32>
    %208 = tpu.matmul %205, %207, %cst_250 {dimension_numbers = #tpu.dot_dimension_numbers<[1], [0], [0], [1], [0, 0, 1, 1], [], []>} : vector<2x16xf32>, vector<16x32xf32>, vector<2x32xf32> -> vector<2x32xf32>
    %209 = arith.addf %203, %208 : vector<2x32xf32>
    %210 = vector.extract_strided_slice %134 {offsets = [0, 3, 0, 0], sizes = [2, 1, 1, 16], strides = [1, 1, 1, 1]} : vector<2x4x4x16xf32> to vector<2x1x1x16xf32>
    %211 = vector.shape_cast %210 : vector<2x1x1x16xf32> to vector<2x16xf32>
    %c3_251 = arith.constant 3 : index
    %c0_252 = arith.constant 0 : index
    %c0_253 = arith.constant 0 : index
    %c0_254 = arith.constant 0 : index
    %212 = vector.load %arg5[%c3_251, %c0_252, %c0_253, %c0_254] : memref<4x4x16x32xf32, #tpu.memory_space<vmem>>, vector<1x1x16x32xf32>
    %213 = vector.shape_cast %212 : vector<1x1x16x32xf32> to vector<16x32xf32>
    %cst_255 = arith.constant dense<0.000000e+00> : vector<2x32xf32>
    %214 = tpu.matmul %211, %213, %cst_255 {dimension_numbers = #tpu.dot_dimension_numbers<[1], [0], [0], [1], [0, 0, 1, 1], [], []>} : vector<2x16xf32>, vector<16x32xf32>, vector<2x32xf32> -> vector<2x32xf32>
    %215 = arith.addf %209, %214 : vector<2x32xf32>
    %216 = vector.extract_strided_slice %134 {offsets = [0, 3, 1, 0], sizes = [2, 1, 1, 16], strides = [1, 1, 1, 1]} : vector<2x4x4x16xf32> to vector<2x1x1x16xf32>
    %217 = vector.shape_cast %216 : vector<2x1x1x16xf32> to vector<2x16xf32>
    %c3_256 = arith.constant 3 : index
    %c1_257 = arith.constant 1 : index
    %c0_258 = arith.constant 0 : index
    %c0_259 = arith.constant 0 : index
    %218 = vector.load %arg5[%c3_256, %c1_257, %c0_258, %c0_259] : memref<4x4x16x32xf32, #tpu.memory_space<vmem>>, vector<1x1x16x32xf32>
    %219 = vector.shape_cast %218 : vector<1x1x16x32xf32> to vector<16x32xf32>
    %cst_260 = arith.constant dense<0.000000e+00> : vector<2x32xf32>
    %220 = tpu.matmul %217, %219, %cst_260 {dimension_numbers = #tpu.dot_dimension_numbers<[1], [0], [0], [1], [0, 0, 1, 1], [], []>} : vector<2x16xf32>, vector<16x32xf32>, vector<2x32xf32> -> vector<2x32xf32>
    %221 = arith.addf %215, %220 : vector<2x32xf32>
    %222 = vector.extract_strided_slice %134 {offsets = [0, 3, 2, 0], sizes = [2, 1, 1, 16], strides = [1, 1, 1, 1]} : vector<2x4x4x16xf32> to vector<2x1x1x16xf32>
    %223 = vector.shape_cast %222 : vector<2x1x1x16xf32> to vector<2x16xf32>
    %c3_261 = arith.constant 3 : index
    %c2_262 = arith.constant 2 : index
    %c0_263 = arith.constant 0 : index
    %c0_264 = arith.constant 0 : index
    %224 = vector.load %arg5[%c3_261, %c2_262, %c0_263, %c0_264] : memref<4x4x16x32xf32, #tpu.memory_space<vmem>>, vector<1x1x16x32xf32>
    %225 = vector.shape_cast %224 : vector<1x1x16x32xf32> to vector<16x32xf32>
    %cst_265 = arith.constant dense<0.000000e+00> : vector<2x32xf32>
    %226 = tpu.matmul %223, %225, %cst_265 {dimension_numbers = #tpu.dot_dimension_numbers<[1], [0], [0], [1], [0, 0, 1, 1], [], []>} : vector<2x16xf32>, vector<16x32xf32>, vector<2x32xf32> -> vector<2x32xf32>
    %227 = arith.addf %221, %226 : vector<2x32xf32>
    %228 = vector.extract_strided_slice %134 {offsets = [0, 3, 3, 0], sizes = [2, 1, 1, 16], strides = [1, 1, 1, 1]} : vector<2x4x4x16xf32> to vector<2x1x1x16xf32>
    %229 = vector.shape_cast %228 : vector<2x1x1x16xf32> to vector<2x16xf32>
    %c3_266 = arith.constant 3 : index
    %c3_267 = arith.constant 3 : index
    %c0_268 = arith.constant 0 : index
    %c0_269 = arith.constant 0 : index
    %230 = vector.load %arg5[%c3_266, %c3_267, %c0_268, %c0_269] : memref<4x4x16x32xf32, #tpu.memory_space<vmem>>, vector<1x1x16x32xf32>
    %231 = vector.shape_cast %230 : vector<1x1x16x32xf32> to vector<16x32xf32>
    %cst_270 = arith.constant dense<0.000000e+00> : vector<2x32xf32>
    %232 = tpu.matmul %229, %231, %cst_270 {dimension_numbers = #tpu.dot_dimension_numbers<[1], [0], [0], [1], [0, 0, 1, 1], [], []>} : vector<2x16xf32>, vector<16x32xf32>, vector<2x32xf32> -> vector<2x32xf32>
    %233 = arith.addf %227, %232 : vector<2x32xf32>
    %cst_271 = arith.constant 0.000000e+00 : f32
    %234 = vector.broadcast %cst_271 : f32 to vector<2x32xf32>
    %235 = arith.maximumf %233, %234 : vector<2x32xf32>
    %c0_272 = arith.constant 0 : index
    %c0_273 = arith.constant 0 : index
    %236 = vector.load %arg7[%c0_272, %c0_273] : memref<32x10xf32, #tpu.memory_space<vmem>>, vector<32x10xf32>
    %cst_274 = arith.constant dense<0.000000e+00> : vector<2x10xf32>
    %237 = tpu.matmul %235, %236, %cst_274 {dimension_numbers = #tpu.dot_dimension_numbers<[1], [0], [0], [1], [0, 0, 1, 1], [], []>} : vector<2x32xf32>, vector<32x10xf32>, vector<2x10xf32> -> vector<2x10xf32>
    %c0_275 = arith.constant 0 : index
    %c0_276 = arith.constant 0 : index
    %238 = vector.load %arg8[%c0_275, %c0_276] : memref<1x10xf32, #tpu.memory_space<vmem>>, vector<1x10xf32>
    %239 = vector.broadcast %238 : vector<1x10xf32> to vector<2x10xf32>
    %240 = arith.addf %237, %239 : vector<2x10xf32>
    %c0_277 = arith.constant 0 : index
    %c0_278 = arith.constant 0 : index
    %241 = vector.load %arg9[%c0_277, %c0_278] : memref<2x10xf32, #tpu.memory_space<vmem>>, vector<2x10xf32>
    tpu.vector_store %arg9[%c0_277, %c0_278], %240 {strides = array<i32>} : memref<2x10xf32, #tpu.memory_space<vmem>>, vector<2x10xf32>,
    return
  }
}

</mosaic_0001>

<bundles_post_ra>
// kernel: model_forward.1
= control target key start
LH: loop header
LB: loop body
LE: loop exit
PB: predicated region body
PF: predicated region fallthrough
CT: control target
= control target key end

     0   :  { %vm533_vm0 = vcmask 1043456   ;;  %vm97_vm1 = vcmask 31744   ;;  %v16475_v1 = vmov 0.0   ;;  %s16465_s0 = inlined_call_operand.vmem [shape: f32[2,16,16,4], index: 0, kind: input, shape index: {}]   ;;  %s16466_s1 = inlined_call_operand.vmem [shape: f32[3,3,4,8], index: 1, kind: input, shape index: {}]   ;;  %s16467_s2 = inlined_call_operand.vmem [shape: f32[1,8], index: 2, kind: input, shape index: {}]   ;;  %s16468_s3 = inlined_call_operand.vmem [shape: f32[3,3,8,16], index: 3, kind: input, shape index: {}]   ;;  %s16469_s4 = inlined_call_operand.vmem [shape: f32[1,16], index: 4, kind: input, shape index: {}]   ;;  %s16470_s5 = inlined_call_operand.vmem [shape: f32[4,4,16,32], index: 5, kind: input, shape index: {}]   ;;  %s16471_s6 = inlined_call_operand.vmem [shape: f32[1,32], index: 6, kind: input, shape index: {}]   ;;  %s16472_s7 = inlined_call_operand.vmem [shape: f32[32,10], index: 7, kind: input, shape index: {}]   ;;  %s16473_s8 = inlined_call_operand.vmem [shape: f32[1,10], index: 8, kind: input, shape index: {}]   ;;  %s16474_s9 = inlined_call_operand.hbm [shape: f32[2,10], index: 9, kind: output, shape index: {}]  }
   0x1   :  { %v340_v0 = vld [vmem:[%s16466_s1] sm:$0xf]  ;;  %98 = vst.msk [vmem:[#allocation2] sm:$0xff] %vm97_vm1, %v16475_v1 }
   0x2   :  { %10692 = vmatpush.msk.msra.mxu0 %vm533_vm0, %v340_v0  ;;  %11484 = vmatpush.msk.msra.mxu1 %vm533_vm0, %v340_v0  ;;  %99 = vst.msk [vmem:[#allocation2 + $0x8] sm:$0xff] %vm97_vm1, %v16475_v1 }
   0x3   :  { %11485 = vmatpush.msk.msra.mxu3 %vm533_vm0, %v340_v0  ;;  %102 = vst.msk [vmem:[#allocation2 + $0x18] sm:$0xff] %vm97_vm1, %v16475_v1 }
   0x4   :  { %14 = vsyncpa [#allocation5], 0  ;;  %103 = vst.msk [vmem:[#allocation2 + $0x20] sm:$0xff] %vm97_vm1, %v16475_v1  ;;  %v10955_v3 = vld [vmem:[%s16466_s1 + $0x10] sm:$0xf]  ;;  %vm100_vm2 = vcmask 25600  }
   0x5   :  { %105 = vst.msk [vmem:[#allocation2 + $0x30] sm:$0xff] %vm97_vm1, %v16475_v1  ;;  %10956 = vmatpush.msk.msrb.mxu0 %vm533_vm0, %v10955_v3  ;;  %v87_v4 = vld [vmem:[%s16465_s0 + $0x1b0] sm:$0xff]  ;;  %v88_v5 = vld [vmem:[%s16465_s0 + $0x1b8] sm:$0xff]  ;;  %v10823_v8 = vld [vmem:[%s16466_s1 + $0x8] sm:$0xf]  ;;  %vm5531_vm3 = vcmask 58368  }
   0x6   :  { %106 = vst.msk [vmem:[#allocation2 + $0x38] sm:$0xff] %vm97_vm1, %v16475_v1  ;;  %10824 = vmatpush.msk.msra.mxu2 %vm533_vm0, %v10823_v8  ;;  %v10757_v10 = vld [vmem:[%s16466_s1 + $0x4] sm:$0xf]  ;;  %v91_v11 = vld [vmem:[%s16465_s0 + $0x1d0] sm:$0xff]  ;;  %v92_v13 = vld [vmem:[%s16465_s0 + $0x1d8] sm:$0xff]  ;;  %vm7324_vm4 = vcmask 64512  }
   0x7   :  { %108 = vst.msk [vmem:[#allocation2 + $0x48] sm:$0xff] %vm97_vm1, %v16475_v1  ;;  %10758 = vmatpush.msk.msrb.mxu1 %vm533_vm0, %v10757_v10  ;;  %v89_v12 = vld [vmem:[%s16465_s0 + $0x1c0] sm:$0xff]  ;;  %v10889_v16 = vld [vmem:[%s16466_s1 + $0xc] sm:$0xf]  ;;  %v35_v21 = vld [vmem:[%s16465_s0 + $0x10] sm:$0xff]  ;;  %vm8005_vm5 = vcmask 1041409  }
   0x8   :  { %v276_v2 = vld [vmem:[#allocation2] sm:$0xff]  ;;  %109 = vst.msk [vmem:[#allocation2 + $0x50] sm:$0xff] %vm97_vm1, %v16475_v1  ;;  %v90_v17 = vld [vmem:[%s16465_s0 + $0x1c8] sm:$0xff]  ;;  %10890 = vmatpush.msk.msrb.mxu3 %vm533_vm0, %v10889_v16  ;;  %v36_v22 = vld [vmem:[%s16465_s0 + $0x18] sm:$0xff]  ;;  %vm8007_vm6 = vcmask 1042434   ;;  %vm8009_vm7 = vcmask 1043459  }
   0x9   :  { %10693 = vmatmul.msk.f32.vlgmr.msra.gmra.mxu0 %vm97_vm1, %v276_v2  ;;  %111 = vst.msk [vmem:[#allocation2 + $0x60] sm:$0xff] %vm97_vm1, %v16475_v1  ;;  %v277_v7 = vld [vmem:[#allocation2 + $0x8] sm:$0xff]  ;;  %v33_v14 = vld [vmem:[%s16465_s0] sm:$0xff]  ;;  %v39_v39 = vld [vmem:[%s16465_s0 + $0x30] sm:$0xff]  ;;  %vm8011_vm8 = vcmask 1044484   ;;  %vm8013_vm9 = vcmask 1045509  }
   0xa   :  { %112 = vst.msk [vmem:[#allocation2 + $0x68] sm:$0xff] %vm97_vm1, %v16475_v1  ;;  %v1344_v9 = vld [vmem:[#allocation2 + $0x2] sm:$0xff]  ;;  %v40_v43 = vld [vmem:[%s16465_s0 + $0x38] sm:$0xff]  ;;  %v43_v55 = vld [vmem:[%s16465_s0 + $0x50] sm:$0xff]  ;;  %vm8015_vm10 = vcmask 1046534   ;;  %vm8017_vm11 = vcmask 1047559  }
   0xb   :  { %114 = vst.msk [vmem:[#allocation2 + $0x78] sm:$0xff] %vm97_vm1, %v16475_v1  ;;  %10825 = vmatmul.msk.f32.vlgmr.msra.gmra.mxu2 %vm97_vm1, %v1344_v9  ;;  %v93_v18 = vld [vmem:[%s16465_s0 + $0x1e0] sm:$0xff]  ;;  %v34_v19 = vld [vmem:[%s16465_s0 + $0x8] sm:$0xff]  ;;  %v44_v59 = vld [vmem:[%s16465_s0 + $0x58] sm:$0xff]  ;;  %vm9596_vm12 = vcmask 123904   ;;  %vm10045_vm13 = vcmask 130048  }
   0xc   :  { %115 = vst.msk [vmem:[#allocation2 + $0x80] sm:$0xff] %vm97_vm1, %v16475_v1  ;;  %v94_v20 = vld [vmem:[%s16465_s0 + $0x1e8] sm:$0xff]  ;;  %v37_v29 = vld [vmem:[%s16465_s0 + $0x20] sm:$0xff]  ;;  %v47_v8 = vld [vmem:[%s16465_s0 + $0x70] sm:$0xff]  ;;  %vm10650_vm14 = vcmask 261120   ;;  %s11526_s23 = smov [#allocation4]  }
   0xd   :  { %117 = vst.msk [vmem:[#allocation2 + $0x90] sm:$0xff] %vm97_vm1, %v16475_v1  ;;  %v810_v33 = vld [vmem:[#allocation2 + $0x1] sm:$0xff]  ;;  %s10681_s24 = sshll.u32 %s11526_s23, 4  ;;  %s10683_s26 = sshll.u32 %s16474_s9, 4  ;;  %vm10674_vm15 = vcmask 74752   ;;  %s10682_s24 = int_to_ptr.vmem [resolvable:$true] %s10681_s24  ;;  %s10684_s26 = int_to_ptr.hbm [resolvable:$true] %s10683_s26 }
   0xe   :  { %118 = vst.msk [vmem:[#allocation2 + $0x98] sm:$0xff] %vm97_vm1, %v16475_v1  ;;  %v38_v34 = vld [vmem:[%s16465_s0 + $0x28] sm:$0xff]  ;;  %v41_v47 = vld [vmem:[%s16465_s0 + $0x40] sm:$0xff] }
   0xf   :  { %120 = vst.msk [vmem:[#allocation2 + $0xa8] sm:$0xff] %vm97_vm1, %v16475_v1  ;;  %v42_v51 = vld [vmem:[%s16465_s0 + $0x48] sm:$0xff]  ;;  %v45_v63 = vld [vmem:[%s16465_s0 + $0x60] sm:$0xff] }
  0x10   :  { %121 = vst.msk [vmem:[#allocation2 + $0xb0] sm:$0xff] %vm97_vm1, %v16475_v1  ;;  %v49_v16 = vld [vmem:[%s16465_s0 + $0x80] sm:$0xff] }
  0x11   :  { %123 = vst.msk [vmem:[#allocation2 + $0xc0] sm:$0xff] %vm97_vm1, %v16475_v1  ;;  %10694 = vmatmul.msk.f32.gmra.mxu0 %vm97_vm1, %v277_v7 }
  0x12   :  { %124 = vst.msk [vmem:[#allocation2 + $0xc8] sm:$0xff] %vm97_vm1, %v16475_v1 }
  0x13   :  { %126 = vst.msk [vmem:[#allocation2 + $0xd8] sm:$0xff] %vm97_vm1, %v16475_v1 }
  0x14   :  { %127 = vst.msk [vmem:[#allocation2 + $0xe0] sm:$0xff] %vm97_vm1, %v16475_v1 }
  0x15   :  { %129 = vst.msk [vmem:[#allocation2 + $0xf0] sm:$0xff] %vm97_vm1, %v16475_v1 }
  0x16   :  { %130 = vst.msk [vmem:[#allocation2 + $0xf8] sm:$0xff] %vm97_vm1, %v16475_v1 }
  0x17   :  { %132 = vst.msk [vmem:[#allocation2 + $0x108] sm:$0xff] %vm97_vm1, %v16475_v1 }
  0x18   :  { %133 = vst.msk [vmem:[#allocation2 + $0x110] sm:$0xff] %vm97_vm1, %v16475_v1 }
  0x19   :  { %135 = vst.msk [vmem:[#allocation2 + $0x120] sm:$0xff] %vm97_vm1, %v16475_v1 }
  0x1a   :  { %136 = vst.msk [vmem:[#allocation2 + $0x128] sm:$0xff] %vm97_vm1, %v16475_v1 }
  0x1b   :  { %138 = vst.msk [vmem:[#allocation2 + $0x138] sm:$0xff] %vm97_vm1, %v16475_v1 }
  0x1c   :  { %139 = vst.msk [vmem:[#allocation2 + $0x140] sm:$0xff] %vm97_vm1, %v16475_v1 }
  0x1d   :  { %141 = vst.msk [vmem:[#allocation2 + $0x150] sm:$0xff] %vm97_vm1, %v16475_v1 }
  0x1e   :  { %142 = vst.msk [vmem:[#allocation2 + $0x158] sm:$0xff] %vm97_vm1, %v16475_v1 }
  0x1f   :  { %144 = vst.msk [vmem:[#allocation2 + $0x168] sm:$0xff] %vm97_vm1, %v16475_v1 }
  0x20   :  { %145 = vst.msk [vmem:[#allocation2 + $0x170] sm:$0xff] %vm97_vm1, %v16475_v1 }
  0x21   :  { %147 = vst.msk [vmem:[#allocation2 + $0x180] sm:$0xff] %vm97_vm1, %v16475_v1 }
  0x22   :  { %148 = vst.msk [vmem:[#allocation2 + $0x188] sm:$0xff] %vm97_vm1, %v16475_v1 }
  0x23   :  { %150 = vst.msk [vmem:[#allocation2 + $0x198] sm:$0xff] %vm97_vm1, %v16475_v1 }
  0x24   :  { %151 = vst.msk [vmem:[#allocation2 + $0x1a0] sm:$0xff] %vm97_vm1, %v16475_v1 }
  0x25   :  { %153 = vst.msk [vmem:[#allocation2 + $0x1b0] sm:$0xff] %vm97_vm1, %v16475_v1 }
  0x26   :  { %154 = vst.msk [vmem:[#allocation2 + $0x1b8] sm:$0xff] %vm97_vm1, %v16475_v1 }
  0x27   :  { %156 = vst.msk [vmem:[#allocation2 + $0x1c8] sm:$0xff] %vm97_vm1, %v16475_v1 }
  0x28   :  { %157 = vst.msk [vmem:[#allocation2 + $0x1d0] sm:$0xff] %vm97_vm1, %v16475_v1 }
  0x29   :  { %159 = vst.msk [vmem:[#allocation2 + $0x1e0] sm:$0xff] %vm97_vm1, %v16475_v1 }
  0x2a   :  { %160 = vst.msk [vmem:[#allocation2 + $0x1e8] sm:$0xff] %vm97_vm1, %v16475_v1 }
  0x2b   :  { %162 = vst.msk [vmem:[#allocation2 + $0x1f8] sm:$0xff] %vm97_vm1, %v16475_v1 }
  0x2c   :  { %163 = vst.msk [vmem:[#allocation2 + $0x200] sm:$0xff] %vm97_vm1, %v16475_v1 }
  0x2d   :  { %165 = vst.msk [vmem:[#allocation2 + $0x210] sm:$0xff] %vm97_vm1, %v16475_v1 }
  0x2e   :  { %166 = vst.msk [vmem:[#allocation2 + $0x218] sm:$0xff] %vm97_vm1, %v16475_v1 }
  0x2f   :  { %168 = vst.msk [vmem:[#allocation2 + $0x228] sm:$0xff] %vm97_vm1, %v16475_v1 }
  0x30   :  { %169 = vst.msk [vmem:[#allocation2 + $0x230] sm:$0xff] %vm97_vm1, %v16475_v1 }
  0x31   :  { %171 = vst.msk [vmem:[#allocation2 + $0x240] sm:$0xff] %vm97_vm1, %v16475_v1 }
  0x32   :  { %172 = vst.msk [vmem:[#allocation2 + $0x248] sm:$0xff] %vm97_vm1, %v16475_v1 }
  0x33   :  { %174 = vst.msk [vmem:[#allocation2 + $0x258] sm:$0xff] %vm97_vm1, %v16475_v1 }
  0x34   :  { %175 = vst.msk [vmem:[#allocation2 + $0x260] sm:$0xff] %vm97_vm1, %v16475_v1 }
  0x35   :  { %177 = vst.msk [vmem:[#allocation2 + $0x270] sm:$0xff] %vm97_vm1, %v16475_v1 }
  0x36   :  { %178 = vst.msk [vmem:[#allocation2 + $0x278] sm:$0xff] %vm97_vm1, %v16475_v1 }
  0x37   :  { %180 = vst.msk [vmem:[#allocation2 + $0x288] sm:$0xff] %vm97_vm1, %v16475_v1 }
  0x38   :  { %181 = vst.msk [vmem:[#allocation2 + $0x290] sm:$0xff] %vm97_vm1, %v16475_v1 }
  0x39   :  { %183 = vst.msk [vmem:[#allocation2 + $0x2a0] sm:$0xff] %vm97_vm1, %v16475_v1 }
  0x3a   :  { %184 = vst.msk [vmem:[#allocation2 + $0x2a8] sm:$0xff] %vm97_vm1, %v16475_v1 }
  0x3b   :  { %186 = vst.msk [vmem:[#allocation2 + $0x2b8] sm:$0xff] %vm97_vm1, %v16475_v1 }
  0x3c   :  { %187 = vst.msk [vmem:[#allocation2 + $0x2c0] sm:$0xff] %vm97_vm1, %v16475_v1 }
  0x3d   :  { %189 = vst.msk [vmem:[#allocation2 + $0x2d0] sm:$0xff] %vm97_vm1, %v16475_v1 }
  0x3e   :  { %190 = vst.msk [vmem:[#allocation2 + $0x2d8] sm:$0xff] %vm97_vm1, %v16475_v1 }
  0x3f   :  { %192 = vst.msk [vmem:[#allocation2 + $0x2e8] sm:$0xff] %vm97_vm1, %v16475_v1 }
  0x40   :  { %193 = vst.msk [vmem:[#allocation2 + $0x2f0] sm:$0xff] %vm97_vm1, %v16475_v1 }
  0x41   :  { %195 = vst.msk [vmem:[#allocation2 + $0x300] sm:$0xff] %vm97_vm1, %v16475_v1 }
  0x42   :  { %196 = vst.msk [vmem:[#allocation2 + $0x308] sm:$0xff] %vm97_vm1, %v16475_v1 }
  0x43   :  { %198 = vst.msk [vmem:[#allocation2 + $0x318] sm:$0xff] %vm97_vm1, %v16475_v1 }
  0x44   :  { %199 = vst.msk [vmem:[#allocation2 + $0x320] sm:$0xff] %vm97_vm1, %v16475_v1 }
  0x45   :  { %201 = vst.msk [vmem:[#allocation2 + $0x330] sm:$0xff] %vm97_vm1, %v16475_v1 }
  0x46   :  { %202 = vst.msk [vmem:[#allocation2 + $0x338] sm:$0xff] %vm97_vm1, %v16475_v1 }
  0x47   :  { %204 = vst.msk [vmem:[#allocation2 + $0x348] sm:$0xff] %vm97_vm1, %v16475_v1 }
  0x48   :  { %205 = vst.msk [vmem:[#allocation2 + $0x350] sm:$0xff] %vm97_vm1, %v16475_v1 }
  0x49   :  { %191 = vst.msk [vmem:[#allocation2 + $0x2e0] sm:$0x3] %vm100_vm2, %v16475_v1 }
  0x4a   :  { %262 = vst.msk [vmem:[#allocation2 + $0x2d1] sm:$0xff] %vm97_vm1, %v87_v4  ;;  %v46_v4 = vld [vmem:[%s16465_s0 + $0x68] sm:$0xff] }
  0x4b   :  { %263 = vst.msk [vmem:[#allocation2 + $0x2d9] sm:$0xff] %vm97_vm1, %v88_v5 }
  0x4c   :  { %101 = vst.msk [vmem:[#allocation2 + $0x10] sm:$0x3] %vm100_vm2, %v16475_v1 }
  0x4d   :  { %104 = vst.msk [vmem:[#allocation2 + $0x28] sm:$0x3] %vm100_vm2, %v16475_v1 }
  0x4e   :  { %107 = vst.msk [vmem:[#allocation2 + $0x40] sm:$0x3] %vm100_vm2, %v16475_v1 }
  0x4f   :  { %110 = vst.msk [vmem:[#allocation2 + $0x58] sm:$0x3] %vm100_vm2, %v16475_v1 }
  0x50   :  { %113 = vst.msk [vmem:[#allocation2 + $0x70] sm:$0x3] %vm100_vm2, %v16475_v1 }
  0x51   :  { %116 = vst.msk [vmem:[#allocation2 + $0x88] sm:$0x3] %vm100_vm2, %v16475_v1 }
  0x52   :  { %v333_v6 = vld [vmem:[#allocation2 + $0x2d8] sm:$0xff]  ;;  %119 = vst.msk [vmem:[#allocation2 + $0xa0] sm:$0x3] %vm100_vm2, %v16475_v1 }
  0x53   :  { %10750 = vmatmul.msk.f32.vlgmr.msra.gmra.mxu1 %vm97_vm1, %v333_v6  ;;  %122 = vst.msk [vmem:[#allocation2 + $0xb8] sm:$0x3] %vm100_vm2, %v16475_v1  ;;  %v1345_v15 = vld [vmem:[#allocation2 + $0xa] sm:$0xff] }
  0x54   :  { %125 = vst.msk [vmem:[#allocation2 + $0xd0] sm:$0x3] %vm100_vm2, %v16475_v1  ;;  %10826 = vmatmul.msk.f32.gmra.mxu2 %vm97_vm1, %v1345_v15  ;;  %v811_v38 = vld [vmem:[#allocation2 + $0x9] sm:$0xff] }
  0x55   :  { %128 = vst.msk [vmem:[#allocation2 + $0xe8] sm:$0x3] %vm100_vm2, %v16475_v1 }
  0x56   :  { %131 = vst.msk [vmem:[#allocation2 + $0x100] sm:$0x3] %vm100_vm2, %v16475_v1 }
  0x57   :  { %134 = vst.msk [vmem:[#allocation2 + $0x118] sm:$0x3] %vm100_vm2, %v16475_v1 }
  0x58   :  { %137 = vst.msk [vmem:[#allocation2 + $0x130] sm:$0x3] %vm100_vm2, %v16475_v1 }
  0x59   :  { %140 = vst.msk [vmem:[#allocation2 + $0x148] sm:$0x3] %vm100_vm2, %v16475_v1 }
  0x5a   :  { %143 = vst.msk [vmem:[#allocation2 + $0x160] sm:$0x3] %vm100_vm2, %v16475_v1 }
  0x5b   :  { %146 = vst.msk [vmem:[#allocation2 + $0x178] sm:$0x3] %vm100_vm2, %v16475_v1 }
  0x5c   :  { %149 = vst.msk [vmem:[#allocation2 + $0x190] sm:$0x3] %vm100_vm2, %v16475_v1 }
  0x5d   :  { %152 = vst.msk [vmem:[#allocation2 + $0x1a8] sm:$0x3] %vm100_vm2, %v16475_v1 }
  0x5e   :  { %155 = vst.msk [vmem:[#allocation2 + $0x1c0] sm:$0x3] %vm100_vm2, %v16475_v1 }
  0x5f   :  { %158 = vst.msk [vmem:[#allocation2 + $0x1d8] sm:$0x3] %vm100_vm2, %v16475_v1 }
  0x60   :  { %161 = vst.msk [vmem:[#allocation2 + $0x1f0] sm:$0x3] %vm100_vm2, %v16475_v1 }
  0x61   :  { %164 = vst.msk [vmem:[#allocation2 + $0x208] sm:$0x3] %vm100_vm2, %v16475_v1 }
  0x62   :  { %167 = vst.msk [vmem:[#allocation2 + $0x220] sm:$0x3] %vm100_vm2, %v16475_v1 }
  0x63   :  { %170 = vst.msk [vmem:[#allocation2 + $0x238] sm:$0x3] %vm100_vm2, %v16475_v1 }
  0x64   :  { %173 = vst.msk [vmem:[#allocation2 + $0x250] sm:$0x3] %vm100_vm2, %v16475_v1 }
  0x65   :  { %176 = vst.msk [vmem:[#allocation2 + $0x268] sm:$0x3] %vm100_vm2, %v16475_v1 }
  0x66   :  { %179 = vst.msk [vmem:[#allocation2 + $0x280] sm:$0x3] %vm100_vm2, %v16475_v1 }
  0x67   :  { %182 = vst.msk [vmem:[#allocation2 + $0x298] sm:$0x3] %vm100_vm2, %v16475_v1 }
  0x68   :  { %185 = vst.msk [vmem:[#allocation2 + $0x2b0] sm:$0x3] %vm100_vm2, %v16475_v1 }
  0x69   :  { %188 = vst.msk [vmem:[#allocation2 + $0x2c8] sm:$0x3] %vm100_vm2, %v16475_v1 }
  0x6a   :  { %194 = vst.msk [vmem:[#allocation2 + $0x2f8] sm:$0x3] %vm100_vm2, %v16475_v1 }
  0x6b   :  { %197 = vst.msk [vmem:[#allocation2 + $0x310] sm:$0x3] %vm100_vm2, %v16475_v1 }
  0x6c   :  { %200 = vst.msk [vmem:[#allocation2 + $0x328] sm:$0x3] %vm100_vm2, %v16475_v1 }
  0x6d   :  { %203 = vst.msk [vmem:[#allocation2 + $0x340] sm:$0x3] %vm100_vm2, %v16475_v1 }
  0x6e   :  { %206 = vst.msk [vmem:[#allocation2 + $0x358] sm:$0x3] %vm100_vm2, %v16475_v1 }
  0x6f   :  { %266 = vst.msk [vmem:[#allocation2 + $0x301] sm:$0xff] %vm97_vm1, %v91_v11 }
  0x70   :  { %264 = vst.msk [vmem:[#allocation2 + $0x2e9] sm:$0xff] %vm97_vm1, %v89_v12  ;;  %v48_v12 = vld [vmem:[%s16465_s0 + $0x78] sm:$0xff] }
  0x71   :  { %267 = vst.msk [vmem:[#allocation2 + $0x309] sm:$0xff] %vm97_vm1, %v92_v13 }
  0x72   :  { %208 = vst.msk [vmem:[#allocation2 + $0x19] sm:$0xff] %vm97_vm1, %v33_v14 }
  0x73   :  { %265 = vst.msk [vmem:[#allocation2 + $0x2f1] sm:$0xff] %vm97_vm1, %v90_v17 }
  0x74   :  { %268 = vst.msk [vmem:[#allocation2 + $0x319] sm:$0xff] %vm97_vm1, %v93_v18 }
  0x75   :  { %209 = vst.msk [vmem:[#allocation2 + $0x21] sm:$0xff] %vm97_vm1, %v34_v19 }
  0x76   :  { %v336_v23 = vld [vmem:[#allocation2 + $0x300] sm:$0xff]  ;;  %269 = vst.msk [vmem:[#allocation2 + $0x321] sm:$0xff] %vm97_vm1, %v94_v20 }
  0x77   :  { %10753 = vmatmul.msk.f32.vlgmr.msra.gmra.mxu3 %vm97_vm1, %v336_v23  ;;  %v334_v24 = vld [vmem:[#allocation2 + $0x2e8] sm:$0xff]  ;;  %210 = vst.msk [vmem:[#allocation2 + $0x31] sm:$0xff] %vm97_vm1, %v35_v21 }
  0x78   :  { %10751 = vmatmul.msk.f32.gmra.mxu1 %vm97_vm1, %v334_v24  ;;  %211 = vst.msk [vmem:[#allocation2 + $0x39] sm:$0xff] %vm97_vm1, %v36_v22  ;;  %v337_v26 = vld [vmem:[#allocation2 + $0x308] sm:$0xff] }
  0x79   :  { %v278_v25 = vld [vmem:[#allocation2 + $0x18] sm:$0xff]  ;;  %212 = vst.msk [vmem:[#allocation2 + $0x49] sm:$0xff] %vm97_vm1, %v37_v29  ;;  %v50_v21 = vld [vmem:[%s16465_s0 + $0x88] sm:$0xff] }
  0x7a   :  { %10695 = vmatmul.msk.f32.gmra.mxu0 %vm97_vm1, %v278_v25  ;;  %v335_v28 = vld [vmem:[#allocation2 + $0x2f0] sm:$0xff]  ;;  %213 = vst.msk [vmem:[#allocation2 + $0x51] sm:$0xff] %vm97_vm1, %v38_v34  ;;  %v812_v42 = vld [vmem:[#allocation2 + $0x19] sm:$0xff] }
  0x7b   :  { %v338_v32 = vld [vmem:[#allocation2 + $0x318] sm:$0xff]  ;;  %214 = vst.msk [vmem:[#allocation2 + $0x61] sm:$0xff] %vm97_vm1, %v39_v39 }
  0x7c   :  { %v1346_v27 = vld [vmem:[#allocation2 + $0x1a] sm:$0xff]  ;;  %v1347_v31 = vld [vmem:[#allocation2 + $0x22] sm:$0xff]  ;;  %215 = vst.msk [vmem:[#allocation2 + $0x69] sm:$0xff] %vm97_vm1, %v40_v43 }
  0x7d   :  { %10827 = vmatmul.msk.f32.gmra.mxu2 %vm97_vm1, %v1346_v27  ;;  %v279_v30 = vld [vmem:[#allocation2 + $0x20] sm:$0xff]  ;;  %216 = vst.msk [vmem:[#allocation2 + $0x79] sm:$0xff] %vm97_vm1, %v41_v47 }
  0x7e   :  { %v280_v35 = vld [vmem:[#allocation2 + $0x30] sm:$0xff]  ;;  %v339_v37 = vld [vmem:[#allocation2 + $0x320] sm:$0xff]  ;;  %217 = vst.msk [vmem:[#allocation2 + $0x81] sm:$0xff] %vm97_vm1, %v42_v51 }
  0x7f   :  { %10754 = vmatmul.msk.f32.gmra.mxu3 %vm97_vm1, %v337_v26  ;;  %v1348_v36 = vld [vmem:[#allocation2 + $0x32] sm:$0xff]  ;;  %v1349_v41 = vld [vmem:[#allocation2 + $0x3a] sm:$0xff]  ;;  %218 = vst.msk [vmem:[#allocation2 + $0x91] sm:$0xff] %vm97_vm1, %v43_v55 }
  0x80   :  { %10752 = vmatmul.msk.f32.gmra.mxu1 %vm97_vm1, %v335_v28  ;;  %v281_v40 = vld [vmem:[#allocation2 + $0x38] sm:$0xff]  ;;  %v282_v44 = vld [vmem:[#allocation2 + $0x48] sm:$0xff]  ;;  %219 = vst.msk [vmem:[#allocation2 + $0x99] sm:$0xff] %vm97_vm1, %v44_v59  ;;  %v51_v28 = vld [vmem:[%s16465_s0 + $0x90] sm:$0xff] }
  0x81   :  { %v1350_v45 = vld [vmem:[#allocation2 + $0x4a] sm:$0xff]  ;;  %v813_v46 = vld [vmem:[#allocation2 + $0x21] sm:$0xff]  ;;  %v1351_v49 = vld [vmem:[#allocation2 + $0x52] sm:$0xff]  ;;  %220 = vst.msk [vmem:[#allocation2 + $0xa9] sm:$0xff] %vm97_vm1, %v45_v63 }
  0x82   :  { %10696 = vmatmul.msk.f32.gmra.mxu0 %vm97_vm1, %v279_v30  ;;  %v283_v48 = vld [vmem:[#allocation2 + $0x50] sm:$0xff]  ;;  %v284_v52 = vld [vmem:[#allocation2 + $0x60] sm:$0xff]  ;;  %221 = vst.msk [vmem:[#allocation2 + $0xb1] sm:$0xff] %vm97_vm1, %v46_v4 }
  0x83   :  { %v814_v50 = vld [vmem:[#allocation2 + $0x31] sm:$0xff]  ;;  %v1352_v53 = vld [vmem:[#allocation2 + $0x62] sm:$0xff]  ;;  %v815_v54 = vld [vmem:[#allocation2 + $0x39] sm:$0xff]  ;;  %222 = vst.msk [vmem:[#allocation2 + $0xc1] sm:$0xff] %vm97_vm1, %v47_v8 }
  0x84   :  { %v285_v56 = vld [vmem:[#allocation2 + $0x68] sm:$0xff]  ;;  %v286_v60 = vld [vmem:[#allocation2 + $0x78] sm:$0xff]  ;;  %223 = vst.msk [vmem:[#allocation2 + $0xc9] sm:$0xff] %vm97_vm1, %v48_v12 }
  0x85   :  { %10828 = vmatmul.msk.f32.gmra.mxu2 %vm97_vm1, %v1347_v31  ;;  %v1353_v57 = vld [vmem:[#allocation2 + $0x6a] sm:$0xff]  ;;  %v1354_v61 = vld [vmem:[#allocation2 + $0x7a] sm:$0xff]  ;;  %v1355_v2 = vld [vmem:[#allocation2 + $0x82] sm:$0xff]  ;;  %224 = vst.msk [vmem:[#allocation2 + $0xd9] sm:$0xff] %vm97_vm1, %v49_v16 }
  0x86   :  { %v816_v58 = vld [vmem:[#allocation2 + $0x49] sm:$0xff]  ;;  %v817_v62 = vld [vmem:[#allocation2 + $0x51] sm:$0xff]  ;;  %v287_v0 = vld [vmem:[#allocation2 + $0x80] sm:$0xff]  ;;  %v11975_v19 = vpop.f32.mrf.mxu0  ;;  %225 = vst.msk [vmem:[#allocation2 + $0xe1] sm:$0xff] %vm97_vm1, %v50_v21 }
  0x87   :  { %10755 = vmatmul.msk.f32.gmra.mxu3 %vm97_vm1, %v338_v32  ;;  %v818_v3 = vld [vmem:[#allocation2 + $0x61] sm:$0xff]  ;;  %v288_v5 = vld [vmem:[#allocation2 + $0x90] sm:$0xff]  ;;  %v289_v9 = vld [vmem:[#allocation2 + $0x98] sm:$0xff]  ;;  %226 = vst.msk [vmem:[#allocation2 + $0xf1] sm:$0xff] %vm97_vm1, %v51_v28 }
  0x88   :  { %10759 = vmatmul.msk.f32.vlgmr.msrb.gmra.mxu1 %vm97_vm1, %v810_v33  ;;  %v1356_v6 = vld [vmem:[#allocation2 + $0x92] sm:$0xff]  ;;  %v819_v7 = vld [vmem:[#allocation2 + $0x69] sm:$0xff]  ;;  %v1357_v10 = vld [vmem:[#allocation2 + $0x9a] sm:$0xff] }
  0x89   :  { %v820_v11 = vld [vmem:[#allocation2 + $0x79] sm:$0xff]  ;;  %v290_v13 = vld [vmem:[#allocation2 + $0xa8] sm:$0xff]  ;;  %v291_v17 = vld [vmem:[#allocation2 + $0xb0] sm:$0xff] }
  0x8a   :  { %10697 = vmatmul.msk.f32.gmra.mxu0 %vm97_vm1, %v280_v35  ;;  %v1358_v14 = vld [vmem:[#allocation2 + $0xaa] sm:$0xff]  ;;  %v821_v15 = vld [vmem:[#allocation2 + $0x81] sm:$0xff]  ;;  %v1359_v18 = vld [vmem:[#allocation2 + $0xb2] sm:$0xff] }
  0x8b   :  { %v822_v20 = vld [vmem:[#allocation2 + $0x91] sm:$0xff]  ;;  %v292_v22 = vld [vmem:[#allocation2 + $0xc0] sm:$0xff]  ;;  %v293_v29 = vld [vmem:[#allocation2 + $0xc8] sm:$0xff] }
  0x8c   :  { %v1360_v23 = vld [vmem:[#allocation2 + $0xc2] sm:$0xff]  ;;  %v823_v26 = vld [vmem:[#allocation2 + $0x99] sm:$0xff] }
  0x8d   :  { %10829 = vmatmul.msk.f32.gmra.mxu2 %vm97_vm1, %v1348_v36  ;;  %v824_v32 = vld [vmem:[#allocation2 + $0xa9] sm:$0xff]  ;;  %v52_v33 = vld [vmem:[%s16465_s0 + $0x98] sm:$0xff]  ;;  %v295_v43 = vld [vmem:[#allocation2 + $0xe0] sm:$0xff] }
  0x8e   :  { %v11989_v27 = vpop.f32.mrf.mxu0  ;;  %227 = vst.msk [vmem:[#allocation2 + $0xf9] sm:$0xff] %vm97_vm1, %v52_v33  ;;  %v294_v36 = vld [vmem:[#allocation2 + $0xd8] sm:$0xff]  ;;  %v296_v51 = vld [vmem:[#allocation2 + $0xf0] sm:$0xff]  ;;  %v829_v16 = vld [vmem:[#allocation2 + $0xe1] sm:$0xff] }
  0x8f   :  { %10756 = vmatmul.msk.f32.gmra.mxu3 %vm97_vm1, %v339_v37  ;;  %v828_v4 = vld [vmem:[#allocation2 + $0xd9] sm:$0xff] }
  0x90   :  { %10760 = vmatmul.msk.f32.gmra.mxu1 %vm97_vm1, %v811_v38  ;;  %v1362_v38 = vld [vmem:[#allocation2 + $0xda] sm:$0xff] }
  0x92   :  { %10698 = vmatmul.msk.f32.gmra.mxu0 %vm97_vm1, %v281_v40 }
  0x95   :  { %10830 = vmatmul.msk.f32.gmra.mxu2 %vm97_vm1, %v1349_v41  ;;  %v53_v41 = vld [vmem:[%s16465_s0 + $0xa0] sm:$0xff] }
  0x96   :  { %228 = vst.msk [vmem:[#allocation2 + $0x109] sm:$0xff] %vm97_vm1, %v53_v41  ;;  %v1365_v63 = vld [vmem:[#allocation2 + $0xfa] sm:$0xff] }
  0x97   :  { %10891 = vmatmul.msk.f32.vlgmr.msrb.gmra.mxu3 %vm97_vm1, %v278_v25  ;;  %v11987_v25 = vpop.f32.mrf.mxu2 }
  0x98   :  { %10761 = vmatmul.msk.f32.gmra.mxu1 %vm97_vm1, %v812_v42 }
  0x9a   :  { %10699 = vmatmul.msk.f32.gmra.mxu0 %vm97_vm1, %v282_v44 }
  0x9d   :  { %10831 = vmatmul.msk.f32.gmra.mxu2 %vm97_vm1, %v1350_v45 }
  0x9f   :  { %10892 = vmatmul.msk.f32.gmra.mxu3 %vm97_vm1, %v279_v30  ;;  %v1361_v30 = vld [vmem:[#allocation2 + $0xca] sm:$0xff] }
  0xa0   :  { %10762 = vmatmul.msk.f32.gmra.mxu1 %vm97_vm1, %v813_v46  ;;  %v1363_v46 = vld [vmem:[#allocation2 + $0xe2] sm:$0xff] }
  0xa2   :  { %10700 = vmatmul.msk.f32.gmra.mxu0 %vm97_vm1, %v283_v48 }
  0xa5   :  { %10832 = vmatmul.msk.f32.gmra.mxu2 %vm97_vm1, %v1351_v49  ;;  %v54_v49 = vld [vmem:[%s16465_s0 + $0xa8] sm:$0xff] }
  0xa6   :  { %229 = vst.msk [vmem:[#allocation2 + $0x111] sm:$0xff] %vm97_vm1, %v54_v49 }
  0xa7   :  { %10893 = vmatmul.msk.f32.gmra.mxu3 %vm97_vm1, %v280_v35 }
  0xa8   :  { %10763 = vmatmul.msk.f32.gmra.mxu1 %vm97_vm1, %v814_v50 }
  0xaa   :  { %10701 = vmatmul.msk.f32.gmra.mxu0 %vm97_vm1, %v284_v52 }
  0xad   :  { %10833 = vmatmul.msk.f32.gmra.mxu2 %vm97_vm1, %v1352_v53 }
  0xaf   :  { %10894 = vmatmul.msk.f32.gmra.mxu3 %vm97_vm1, %v281_v40  ;;  %v825_v40 = vld [vmem:[#allocation2 + $0xb1] sm:$0xff] }
  0xb0   :  { %10764 = vmatmul.msk.f32.gmra.mxu1 %vm97_vm1, %v815_v54  ;;  %v1364_v54 = vld [vmem:[#allocation2 + $0xf2] sm:$0xff] }
  0xb2   :  { %10702 = vmatmul.msk.f32.gmra.mxu0 %vm97_vm1, %v285_v56 }
  0xb5   :  { %10834 = vmatmul.msk.f32.gmra.mxu2 %vm97_vm1, %v1353_v57  ;;  %v55_v57 = vld [vmem:[%s16465_s0 + $0xb0] sm:$0xff] }
  0xb6   :  { %230 = vst.msk [vmem:[#allocation2 + $0x121] sm:$0xff] %vm97_vm1, %v55_v57 }
  0xb7   :  { %10895 = vmatmul.msk.f32.gmra.mxu3 %vm97_vm1, %v282_v44 }
  0xb8   :  { %10765 = vmatmul.msk.f32.gmra.mxu1 %vm97_vm1, %v816_v58  ;;  %v12053_v58 = vld [vmem:[%s16467_s2] ss:$0 sm:$0xff] }
  0xb9   :  { %v747_v12 = vadd.f32 %v12053_v58, %v11989_v27 }
  0xba   :  { %10703 = vmatmul.msk.f32.gmra.mxu0 %vm97_vm1, %v286_v60 }
  0xbd   :  { %10835 = vmatmul.msk.f32.gmra.mxu2 %vm97_vm1, %v1354_v61  ;;  %v12117_v33 = vld [vmem:[#allocation2 + $0x120] sm:$0xff] }
  0xbf   :  { %10896 = vmatmul.msk.f32.gmra.mxu3 %vm97_vm1, %v283_v48  ;;  %v826_v48 = vld [vmem:[#allocation2 + $0xc1] sm:$0xff] }
  0xc0   :  { %10766 = vmatmul.msk.f32.gmra.mxu1 %vm97_vm1, %v817_v62 }
  0xc2   :  { %10704 = vmatmul.msk.f32.gmra.mxu0 %vm97_vm1, %v287_v0 }
  0xc5   :  { %10836 = vmatmul.msk.f32.gmra.mxu2 %vm97_vm1, %v1355_v2 }
  0xc7   :  { %10897 = vmatmul.msk.f32.gmra.mxu3 %vm97_vm1, %v284_v52 }
  0xc8   :  { %10767 = vmatmul.msk.f32.gmra.mxu1 %vm97_vm1, %v818_v3 }
  0xca   :  { %10705 = vmatmul.msk.f32.gmra.mxu0 %vm97_vm1, %v288_v5 }
  0xcd   :  { %10837 = vmatmul.msk.f32.gmra.mxu2 %vm97_vm1, %v1356_v6 }
  0xcf   :  { %10898 = vmatmul.msk.f32.gmra.mxu3 %vm97_vm1, %v285_v56  ;;  %v827_v56 = vld [vmem:[#allocation2 + $0xc9] sm:$0xff] }
  0xd0   :  { %10768 = vmatmul.msk.f32.gmra.mxu1 %vm97_vm1, %v819_v7  ;;  %v11985_v24 = vpop.f32.mrf.mxu1  ;;  %v12077_v7 = vld [vmem:[#allocation2 + $0x108] sm:$0xff] }
  0xd2   :  { %10706 = vmatmul.msk.f32.gmra.mxu0 %vm97_vm1, %v289_v9 }
  0xd5   :  { %10838 = vmatmul.msk.f32.gmra.mxu2 %vm97_vm1, %v1357_v10 }
  0xd7   :  { %10899 = vmatmul.msk.f32.gmra.mxu3 %vm97_vm1, %v286_v60  ;;  %v12005_v34 = vpop.f32.mrf.mxu2  ;;  %v12058_v60 = vld [vmem:[#allocation2 + $0xf8] sm:$0xff] }
  0xd8   :  { %10769 = vmatmul.msk.f32.gmra.mxu1 %vm97_vm1, %v820_v11  ;;  %v1366_v11 = vld [vmem:[#allocation2 + $0x10a] sm:$0xff] }
  0xda   :  { %10707 = vmatmul.msk.f32.gmra.mxu0 %vm97_vm1, %v290_v13 }
  0xdd   :  { %10839 = vmatmul.msk.f32.gmra.mxu2 %vm97_vm1, %v1358_v14 }
  0xdf   :  { %10900 = vmatmul.msk.f32.gmra.mxu3 %vm97_vm1, %v287_v0  ;;  %v746_v0 = vadd.f32 %v12053_v58, %v11975_v19  ;;  %v12097_v19 = vld [vmem:[#allocation2 + $0x110] sm:$0xff] }
  0xe0   :  { %10770 = vmatmul.msk.f32.gmra.mxu1 %vm97_vm1, %v821_v15 }
  0xe2   :  { %10708 = vmatmul.msk.f32.gmra.mxu0 %vm97_vm1, %v291_v17 }
  0xe5   :  { %10840 = vmatmul.msk.f32.gmra.mxu2 %vm97_vm1, %v1359_v18 }
  0xe7   :  { %10901 = vmatmul.msk.f32.gmra.mxu3 %vm97_vm1, %v288_v5  ;;  %v56_v5 = vld [vmem:[%s16465_s0 + $0xb8] sm:$0xff] }
  0xe8   :  { %10771 = vmatmul.msk.f32.gmra.mxu1 %vm97_vm1, %v822_v20  ;;  %231 = vst.msk [vmem:[#allocation2 + $0x129] sm:$0xff] %vm97_vm1, %v56_v5 }
  0xea   :  { %10709 = vmatmul.msk.f32.gmra.mxu0 %vm97_vm1, %v292_v22 }
  0xed   :  { %10841 = vmatmul.msk.f32.gmra.mxu2 %vm97_vm1, %v1360_v23  ;;  %v1367_v23 = vld [vmem:[#allocation2 + $0x112] sm:$0xff] }
  0xef   :  { %10902 = vmatmul.msk.f32.gmra.mxu3 %vm97_vm1, %v289_v9  ;;  %v12138_v49 = vld [vmem:[#allocation2 + $0x128] sm:$0xff] }
  0xf0   :  { %10772 = vmatmul.msk.f32.gmra.mxu1 %vm97_vm1, %v823_v26 }
  0xf2   :  { %10710 = vmatmul.msk.f32.gmra.mxu0 %vm97_vm1, %v293_v29 }
  0xf5   :  { %v11999_v31 = vpop.f32.mrf.mxu1  ;;  %10842 = vmatmul.msk.f32.gmra.mxu2 %vm97_vm1, %v1361_v30  ;;  %v58_v30 = vld [vmem:[%s16465_s0 + $0xc8] sm:$0xff] }
  0xf6   :  { %233 = vst.msk [vmem:[#allocation2 + $0x141] sm:$0xff] %vm97_vm1, %v58_v30 }
  0xf7   :  { %10903 = vmatmul.msk.f32.gmra.mxu3 %vm97_vm1, %v290_v13  ;;  %v12009_v35 = vpop.f32.mrf.mxu0 }
  0xf8   :  { %10773 = vmatmul.msk.f32.gmra.mxu1 %vm97_vm1, %v824_v32 }
  0xfa   :  { %v12012_v37 = vpop.f32.mrf.mxu3  ;;  %10711 = vmatmul.msk.f32.gmra.mxu0 %vm97_vm1, %v294_v36 }
  0xfd   :  { %v12015_v39 = vpop.f32.mrf.mxu1  ;;  %10843 = vmatmul.msk.f32.gmra.mxu2 %vm97_vm1, %v1362_v38  ;;  %v1368_v38 = vld [vmem:[#allocation2 + $0x122] sm:$0xff] }
  0xff   :  { %10904 = vmatmul.msk.f32.gmra.mxu3 %vm97_vm1, %v291_v17  ;;  %v12023_v42 = vpop.f32.mrf.mxu0  ;;  %v57_v17 = vld [vmem:[%s16465_s0 + $0xc0] sm:$0xff] }
 0x100   :  { %10774 = vmatmul.msk.f32.gmra.mxu1 %vm97_vm1, %v825_v40  ;;  %v12026_v44 = vpop.f32.mrf.mxu2  ;;  %232 = vst.msk [vmem:[#allocation2 + $0x139] sm:$0xff] %vm97_vm1, %v57_v17  ;;  %v749_v40 = vadd.f32 %v12053_v58, %v12023_v42 }
 0x102   :  { %v12028_v45 = vpop.f32.mrf.mxu3  ;;  %10712 = vmatmul.msk.f32.gmra.mxu0 %vm97_vm1, %v295_v43 }
 0x105   :  { %v1088_v47 = vpop.f32.mrf.mxu1  ;;  %10844 = vmatmul.msk.f32.gmra.mxu2 %vm97_vm1, %v1363_v46 }
 0x106   :  { %v1280_v2 = vadd.f32 %v1088_v47, %v746_v0  ;;  %v831_v47 = vld [vmem:[#allocation2 + $0xf9] sm:$0xff]  ;;  %v832_v0 = vld [vmem:[#allocation2 + $0x109] sm:$0xff] }
 0x107   :  { %10905 = vmatmul.msk.f32.gmra.mxu3 %vm97_vm1, %v292_v22  ;;  %v12037_v50 = vpop.f32.mrf.mxu0 }
 0x108   :  { %10775 = vmatmul.msk.f32.gmra.mxu1 %vm97_vm1, %v826_v48  ;;  %v12040_v52 = vpop.f32.mrf.mxu2  ;;  %v1814_v9 = vadd.f32 %v11987_v25, %v1280_v2  ;;  %v748_v25 = vadd.f32 %v12053_v58, %v12009_v35  ;;  %v59_v48 = vld [vmem:[%s16465_s0 + $0xd0] sm:$0xff]  ;;  %v60_v2 = vld [vmem:[%s16465_s0 + $0xd8] sm:$0xff] }
 0x109   :  { %234 = vst.msk [vmem:[#allocation2 + $0x151] sm:$0xff] %vm97_vm1, %v59_v48 }
 0x10a   :  { %v12042_v53 = vpop.f32.mrf.mxu3  ;;  %10713 = vmatmul.msk.f32.gmra.mxu0 %vm97_vm1, %v296_v51  ;;  %235 = vst.msk [vmem:[#allocation2 + $0x159] sm:$0xff] %vm97_vm1, %v60_v2 }
 0x10d   :  { %v1091_v55 = vpop.f32.mrf.mxu1  ;;  %10845 = vmatmul.msk.f32.gmra.mxu2 %vm97_vm1, %v1364_v54 }
 0x10e   :  { %v1281_v14 = vadd.f32 %v1091_v55, %v747_v12  ;;  %v1369_v55 = vld [vmem:[#allocation2 + $0x12a] sm:$0xff] }
 0x10f   :  { %10906 = vmatmul.msk.f32.gmra.mxu3 %vm97_vm1, %v293_v29  ;;  %v12056_v59 = vpop.f32.mrf.mxu0  ;;  %v830_v29 = vld [vmem:[#allocation2 + $0xf1] sm:$0xff] }
 0x110   :  { %10776 = vmatmul.msk.f32.gmra.mxu1 %vm97_vm1, %v827_v56  ;;  %v12061_v61 = vpop.f32.mrf.mxu2  ;;  %v1815_v21 = vadd.f32 %v12005_v34, %v1281_v14  ;;  %v750_v56 = vadd.f32 %v12053_v58, %v12037_v50  ;;  %v833_v14 = vld [vmem:[#allocation2 + $0x111] sm:$0xff] }
 0x111   :  { %v12198_v30 = vld [vmem:[#allocation2 + $0x150] sm:$0xff] }
 0x112   :  { %v12063_v62 = vpop.f32.mrf.mxu3  ;;  %10714 = vmatmul.msk.f32.gmra.mxu0 %vm97_vm1, %v12058_v60 }
 0x115   :  { %v1094_v3 = vpop.f32.mrf.mxu1  ;;  %10846 = vmatmul.msk.f32.gmra.mxu2 %vm97_vm1, %v1365_v63 }
 0x116   :  { %v1282_v27 = vadd.f32 %v1094_v3, %v748_v25  ;;  %v302_v3 = vld [vmem:[#allocation2 + $0x138] sm:$0xff] }
 0x117   :  { %10907 = vmatmul.msk.f32.gmra.mxu3 %vm97_vm1, %v294_v36  ;;  %v12075_v6 = vpop.f32.mrf.mxu0 }
 0x118   :  { %10777 = vmatmul.msk.f32.gmra.mxu1 %vm97_vm1, %v828_v4  ;;  %v12080_v8 = vpop.f32.mrf.mxu2  ;;  %v1816_v35 = vadd.f32 %v12026_v44, %v1282_v27 }
 0x11a   :  { %v2156_v10 = vpop.f32.mrf.mxu3  ;;  %10715 = vmatmul.msk.f32.gmra.mxu0 %vm97_vm1, %v12077_v7 }
 0x11b   :  { %v12087_v13 = vadd.f32 %v2156_v10, %v1814_v9  ;;  %v1370_v9 = vld [vmem:[#allocation2 + $0x13a] sm:$0xff]  ;;  %v751_v10 = vadd.f32 %v12053_v58, %v12056_v59 }
 0x11d   :  { %v1097_v15 = vpop.f32.mrf.mxu1  ;;  %10847 = vmatmul.msk.f32.gmra.mxu2 %vm97_vm1, %v1366_v11 }
 0x11f   :  { %10908 = vmatmul.msk.f32.gmra.mxu3 %vm97_vm1, %v295_v43  ;;  %v12095_v18 = vpop.f32.mrf.mxu0  ;;  %v1283_v43 = vadd.f32 %v1097_v15, %v749_v40  ;;  %v61_v15 = vld [vmem:[%s16465_s0 + $0xe0] sm:$0xff] }
 0x120   :  { %10778 = vmatmul.msk.f32.gmra.mxu1 %vm97_vm1, %v829_v16  ;;  %v12100_v20 = vpop.f32.mrf.mxu2  ;;  %236 = vst.msk [vmem:[#allocation2 + $0x169] sm:$0xff] %vm97_vm1, %v61_v15  ;;  %v12177_v16 = vld [vmem:[#allocation2 + $0x140] sm:$0xff]  ;;  %v753_v40 = vadd.f32 %v12053_v58, %v12095_v18 }
 0x121   :  { %v65_v15 = vld [vmem:[%s16465_s0 + $0x100] sm:$0xff] }
 0x122   :  { %v2159_v22 = vpop.f32.mrf.mxu3  ;;  %10716 = vmatmul.msk.f32.gmra.mxu0 %vm97_vm1, %v12097_v19  ;;  %240 = vst.msk [vmem:[#allocation2 + $0x1c9] sm:$0xff] %vm97_vm1, %v65_v15 }
 0x123   :  { %v12107_v26 = vadd.f32 %v2159_v22, %v1815_v21  ;;  %v1371_v22 = vld [vmem:[#allocation2 + $0x142] sm:$0xff] }
 0x125   :  { %v1100_v28 = vpop.f32.mrf.mxu1  ;;  %10848 = vmatmul.msk.f32.gmra.mxu2 %vm97_vm1, %v1367_v23  ;;  %v752_v23 = vadd.f32 %v12053_v58, %v12075_v6 }
 0x127   :  { %10909 = vmatmul.msk.f32.gmra.mxu3 %vm97_vm1, %v296_v51  ;;  %v12115_v32 = vpop.f32.mrf.mxu0  ;;  %v1817_v51 = vadd.f32 %v12040_v52, %v1283_v43 }
 0x128   :  { %10779 = vmatmul.msk.f32.gmra.mxu1 %vm97_vm1, %v830_v29  ;;  %v12120_v34 = vpop.f32.mrf.mxu2  ;;  %v62_v29 = vld [vmem:[%s16465_s0 + $0xe8] sm:$0xff] }
 0x129   :  { %237 = vst.msk [vmem:[#allocation2 + $0x171] sm:$0xff] %vm97_vm1, %v62_v29  ;;  %v12317_v15 = vld [vmem:[#allocation2 + $0x1c8] sm:$0xff] }
 0x12a   :  { %v2162_v36 = vpop.f32.mrf.mxu3  ;;  %10717 = vmatmul.msk.f32.gmra.mxu0 %vm97_vm1, %v12117_v33 }
 0x12b   :  { %v12127_v41 = vadd.f32 %v2162_v36, %v1816_v35 }
 0x12d   :  { %v1103_v46 = vpop.f32.mrf.mxu1  ;;  %10849 = vmatmul.msk.f32.gmra.mxu2 %vm97_vm1, %v1368_v38  ;;  %v1372_v38 = vld [vmem:[#allocation2 + $0x152] sm:$0xff] }
 0x12e   :  { %v1285_v12 = vadd.f32 %v1103_v46, %v751_v10 }
 0x12f   :  { %10910 = vmatmul.msk.f32.gmra.mxu3 %vm97_vm1, %v12058_v60  ;;  %v12136_v44 = vpop.f32.mrf.mxu0  ;;  %v1284_v60 = vadd.f32 %v1100_v28, %v750_v56  ;;  %v834_v28 = vld [vmem:[#allocation2 + $0x121] sm:$0xff]  ;;  %v754_v56 = vadd.f32 %v12053_v58, %v12115_v32 }
 0x130   :  { %10780 = vmatmul.msk.f32.gmra.mxu1 %vm97_vm1, %v831_v47  ;;  %v12141_v42 = vpop.f32.mrf.mxu2  ;;  %v1819_v17 = vadd.f32 %v12080_v8, %v1285_v12  ;;  %v835_v47 = vld [vmem:[#allocation2 + $0x129] sm:$0xff]  ;;  %v755_v10 = vadd.f32 %v12053_v58, %v12136_v44 }
 0x131   :  { %v1818_v4 = vadd.f32 %v12061_v61, %v1284_v60 }
 0x132   :  { %v2165_v54 = vpop.f32.mrf.mxu3  ;;  %10718 = vmatmul.msk.f32.gmra.mxu0 %vm97_vm1, %v12138_v49 }
 0x133   :  { %v12148_v57 = vadd.f32 %v2165_v54, %v1817_v51 }
 0x135   :  { %v1106_v63 = vpop.f32.mrf.mxu1  ;;  %10850 = vmatmul.msk.f32.gmra.mxu2 %vm97_vm1, %v1369_v55  ;;  %v1373_v55 = vld [vmem:[#allocation2 + $0x15a] sm:$0xff] }
 0x137   :  { %10911 = vmatmul.msk.f32.gmra.mxu3 %vm97_vm1, %v12077_v7  ;;  %v12157_v52 = vpop.f32.mrf.mxu0 }
 0x138   :  { %10781 = vmatmul.msk.f32.gmra.mxu1 %vm97_vm1, %v832_v0  ;;  %v12160_v50 = vpop.f32.mrf.mxu2  ;;  %v836_v0 = vld [vmem:[#allocation2 + $0x139] sm:$0xff] }
 0x13a   :  { %v2168_v5 = vpop.f32.mrf.mxu3  ;;  %10719 = vmatmul.msk.f32.gmra.mxu0 %vm97_vm1, %v302_v3 }
 0x13b   :  { %v12166_v11 = vadd.f32 %v2168_v5, %v1818_v4 }
 0x13d   :  { %v1109_v7 = vpop.f32.mrf.mxu1  ;;  %10851 = vmatmul.msk.f32.gmra.mxu2 %vm97_vm1, %v1370_v9  ;;  %v1374_v9 = vld [vmem:[#allocation2 + $0x16a] sm:$0xff] }
 0x13f   :  { %10912 = vmatmul.msk.f32.gmra.mxu3 %vm97_vm1, %v12097_v19  ;;  %v12175_v61 = vpop.f32.mrf.mxu0  ;;  %v1286_v19 = vadd.f32 %v1106_v63, %v752_v23 }
 0x140   :  { %10782 = vmatmul.msk.f32.gmra.mxu1 %vm97_vm1, %v833_v14  ;;  %v12180_v59 = vpop.f32.mrf.mxu2  ;;  %v837_v14 = vld [vmem:[#allocation2 + $0x141] sm:$0xff] }
 0x141   :  { %v1820_v35 = vadd.f32 %v12100_v20, %v1286_v19  ;;  %v12215_v20 = vld [vmem:[#allocation2 + $0x158] sm:$0xff] }
 0x142   :  { %v2171_v21 = vpop.f32.mrf.mxu3  ;;  %10720 = vmatmul.msk.f32.gmra.mxu0 %vm97_vm1, %v12177_v16  ;;  %v1375_v19 = vld [vmem:[#allocation2 + $0x172] sm:$0xff] }
 0x143   :  { %v12187_v25 = vadd.f32 %v2171_v21, %v1819_v17  ;;  %v12255_v17 = vld [vmem:[#allocation2 + $0x170] sm:$0xff] }
 0x145   :  { %v1112_v27 = vpop.f32.mrf.mxu1  ;;  %10852 = vmatmul.msk.f32.gmra.mxu2 %vm97_vm1, %v1371_v22 }
 0x147   :  { %10913 = vmatmul.msk.f32.gmra.mxu3 %vm97_vm1, %v12117_v33  ;;  %v12196_v8 = vpop.f32.mrf.mxu0  ;;  %v1287_v33 = vadd.f32 %v1109_v7, %v753_v40 }
 0x148   :  { %10783 = vmatmul.msk.f32.gmra.mxu1 %vm97_vm1, %v834_v28  ;;  %v12201_v6 = vpop.f32.mrf.mxu2 }
 0x149   :  { %v1821_v18 = vadd.f32 %v12120_v34, %v1287_v33  ;;  %v12231_v34 = vld [vmem:[#allocation2 + $0x168] sm:$0xff] }
 0x14a   :  { %v2174_v36 = vpop.f32.mrf.mxu3  ;;  %10721 = vmatmul.msk.f32.gmra.mxu0 %vm97_vm1, %v12198_v30 }
 0x14b   :  { %v12208_v43 = vadd.f32 %v2174_v36, %v1820_v35  ;;  %v838_v35 = vld [vmem:[#allocation2 + $0x151] sm:$0xff]  ;;  %v66_v36 = vld [vmem:[%s16465_s0 + $0x108] sm:$0xff] }
 0x14c   :  { %241 = vst.msk [vmem:[#allocation2 + $0x1d1] sm:$0xff] %vm97_vm1, %v66_v36 }
 0x14d   :  { %v1115_v46 = vpop.f32.mrf.mxu1  ;;  %10853 = vmatmul.msk.f32.gmra.mxu2 %vm97_vm1, %v1372_v38  ;;  %v308_v38 = vld [vmem:[#allocation2 + $0x1b0] sm:$0xff] }
 0x14f   :  { %10914 = vmatmul.msk.f32.gmra.mxu3 %vm97_vm1, %v12138_v49  ;;  %v12213_v48 = vpop.f32.mrf.mxu0  ;;  %v1288_v49 = vadd.f32 %v1112_v27, %v754_v56  ;;  %v839_v56 = vld [vmem:[#allocation2 + $0x159] sm:$0xff] }
 0x150   :  { %10784 = vmatmul.msk.f32.gmra.mxu1 %vm97_vm1, %v835_v47  ;;  %v12218_v51 = vpop.f32.mrf.mxu2  ;;  %v1376_v47 = vld [vmem:[#allocation2 + $0x1b2] sm:$0xff] }
 0x151   :  { %v1822_v5 = vadd.f32 %v12141_v42, %v1288_v49  ;;  %v63_v42 = vld [vmem:[%s16465_s0 + $0xf0] sm:$0xff] }
 0x152   :  { %v2177_v54 = vpop.f32.mrf.mxu3  ;;  %10722 = vmatmul.msk.f32.gmra.mxu0 %vm97_vm1, %v12215_v20  ;;  %238 = vst.msk [vmem:[#allocation2 + $0x181] sm:$0xff] %vm97_vm1, %v63_v42  ;;  %v67_v49 = vld [vmem:[%s16465_s0 + $0x110] sm:$0xff] }
 0x153   :  { %v12225_v60 = vadd.f32 %v2177_v54, %v1821_v18  ;;  %v757_v18 = vadd.f32 %v12053_v58, %v12175_v61  ;;  %242 = vst.msk [vmem:[#allocation2 + $0x1e1] sm:$0xff] %vm97_vm1, %v67_v49  ;;  %v12338_v36 = vld [vmem:[#allocation2 + $0x1d0] sm:$0xff] }
 0x155   :  { %v1118_v63 = vpop.f32.mrf.mxu1  ;;  %10854 = vmatmul.msk.f32.gmra.mxu2 %vm97_vm1, %v1373_v55 }
 0x157   :  { %10915 = vmatmul.msk.f32.gmra.mxu3 %vm97_vm1, %v302_v3  ;;  %v12229_v2 = vpop.f32.mrf.mxu0  ;;  %v1289_v3 = vadd.f32 %v1115_v46, %v755_v10 }
 0x158   :  { %10785 = vmatmul.msk.f32.gmra.mxu1 %vm97_vm1, %v836_v0  ;;  %v12234_v4 = vpop.f32.mrf.mxu2 }
 0x159   :  { %v1823_v22 = vadd.f32 %v12160_v50, %v1289_v3  ;;  %v64_v50 = vld [vmem:[%s16465_s0 + $0xf8] sm:$0xff] }
 0x15a   :  { %v2180_v32 = vpop.f32.mrf.mxu3  ;;  %10723 = vmatmul.msk.f32.gmra.mxu0 %vm97_vm1, %v12231_v34  ;;  %239 = vst.msk [vmem:[#allocation2 + $0x189] sm:$0xff] %vm97_vm1, %v64_v50  ;;  %v12358_v49 = vld [vmem:[#allocation2 + $0x1e0] sm:$0xff] }
 0x15b   :  { %v12241_v12 = vadd.f32 %v2180_v32, %v1822_v5  ;;  %v1377_v32 = vld [vmem:[#allocation2 + $0x1ba] sm:$0xff] }
 0x15d   :  { %v1121_v7 = vpop.f32.mrf.mxu1  ;;  %10855 = vmatmul.msk.f32.gmra.mxu2 %vm97_vm1, %v1374_v9  ;;  %v758_v9 = vadd.f32 %v12053_v58, %v12196_v8 }
 0x15f   :  { %10916 = vmatmul.msk.f32.gmra.mxu3 %vm97_vm1, %v12177_v16  ;;  %v12253_v44 = vpop.f32.mrf.mxu0  ;;  %v756_v16 = vadd.f32 %v12053_v58, %v12157_v52 }
 0x160   :  { %10786 = vmatmul.msk.f32.gmra.mxu1 %vm97_vm1, %v837_v14  ;;  %v12259_v21 = vpop.f32.mrf.mxu2  ;;  %v68_v14 = vld [vmem:[%s16465_s0 + $0x118] sm:$0xff] }
 0x161   :  { %v1290_v28 = vadd.f32 %v1118_v63, %v756_v16  ;;  %v309_v63 = vld [vmem:[#allocation2 + $0x1b8] sm:$0xff]  ;;  %243 = vst.msk [vmem:[#allocation2 + $0x1e9] sm:$0xff] %vm97_vm1, %v68_v14 }
 0x162   :  { %v2183_v23 = vpop.f32.mrf.mxu3  ;;  %10724 = vmatmul.msk.f32.gmra.mxu0 %vm97_vm1, %v12255_v17  ;;  %v843_v14 = vld [vmem:[#allocation2 + $0x1b9] sm:$0xff] }
 0x163   :  { %v12266_v27 = vadd.f32 %v2183_v23, %v1823_v22  ;;  %v1824_v33 = vadd.f32 %v12180_v59, %v1290_v28  ;;  %v1378_v23 = vld [vmem:[#allocation2 + $0x1ca] sm:$0xff] }
 0x165   :  { %v1124_v29 = vpop.f32.mrf.mxu1  ;;  %10856 = vmatmul.msk.f32.gmra.mxu2 %vm97_vm1, %v1375_v19  ;;  %v759_v19 = vadd.f32 %v12053_v58, %v12213_v48 }
 0x166   :  { %v1292_v3 = vadd.f32 %v1124_v29, %v758_v9  ;;  %v841_v29 = vld [vmem:[#allocation2 + $0x171] sm:$0xff] }
 0x167   :  { %10917 = vmatmul.msk.f32.gmra.mxu3 %vm97_vm1, %v12198_v30  ;;  %v12278_v52 = vpop.f32.mrf.mxu0  ;;  %v1291_v30 = vadd.f32 %v1121_v7, %v757_v18  ;;  %v840_v7 = vld [vmem:[#allocation2 + $0x169] sm:$0xff] }
 0x168   :  { %10787 = vmatmul.msk.f32.gmra.mxu1 %vm97_vm1, %v838_v35  ;;  %v12282_v40 = vpop.f32.mrf.mxu2  ;;  %v1826_v42 = vadd.f32 %v12218_v51, %v1292_v3  ;;  %v69_v35 = vld [vmem:[%s16465_s0 + $0x120] sm:$0xff]  ;;  %v1909_v3 = vld [vmem:[#allocation2 + $0x188] sm:$0xff] }
 0x169   :  { %v1825_v0 = vadd.f32 %v12201_v6, %v1291_v30  ;;  %244 = vst.msk [vmem:[#allocation2 + $0x1f9] sm:$0xff] %vm97_vm1, %v69_v35 }
 0x16a   :  { %v2186_v46 = vpop.f32.mrf.mxu3  ;;  %10725 = vmatmul.msk.f32.gmra.mxu0 %vm97_vm1, %v308_v38 }
 0x16b   :  { %v12288_v54 = vadd.f32 %v2186_v46, %v1824_v33  ;;  %v1379_v33 = vld [vmem:[#allocation2 + $0x1d2] sm:$0xff]  ;;  %v760_v46 = vadd.f32 %v12053_v58, %v12229_v2 }
 0x16d   :  { %v1127_v55 = vpop.f32.mrf.mxu1  ;;  %10857 = vmatmul.msk.f32.gmra.mxu2 %vm97_vm1, %v1376_v47 }
 0x16f   :  { %10918 = vmatmul.msk.f32.gmra.mxu3 %vm97_vm1, %v12215_v20  ;;  %v12297_v59 = vpop.f32.mrf.mxu0 }
 0x170   :  { %10788 = vmatmul.msk.f32.gmra.mxu1 %vm97_vm1, %v839_v56  ;;  %v12300_v61 = vpop.f32.mrf.mxu2 }
 0x172   :  { %v2189_v5 = vpop.f32.mrf.mxu3  ;;  %10726 = vmatmul.msk.f32.gmra.mxu0 %vm97_vm1, %v309_v63 }
 0x173   :  { %v12306_v10 = vadd.f32 %v2189_v5, %v1825_v0  ;;  %v1380_v5 = vld [vmem:[#allocation2 + $0x1e2] sm:$0xff] }
 0x175   :  { %v1130_v20 = vpop.f32.mrf.mxu1  ;;  %10858 = vmatmul.msk.f32.gmra.mxu2 %vm97_vm1, %v1377_v32  ;;  %v761_v32 = vadd.f32 %v12053_v58, %v12253_v44 }
 0x176   :  { %v1294_v18 = vadd.f32 %v1130_v20, %v760_v46  ;;  %v12399_v46 = vld [vmem:[#allocation2 + $0x1f8] sm:$0xff] }
 0x177   :  { %10919 = vmatmul.msk.f32.gmra.mxu3 %vm97_vm1, %v12231_v34  ;;  %v12315_v6 = vpop.f32.mrf.mxu0  ;;  %v1293_v34 = vadd.f32 %v1127_v55, %v759_v19  ;;  %v842_v55 = vld [vmem:[#allocation2 + $0x1b1] sm:$0xff] }
 0x178   :  { %10789 = vmatmul.msk.f32.gmra.mxu1 %vm97_vm1, %v840_v7  ;;  %v12320_v8 = vpop.f32.mrf.mxu2  ;;  %v1828_v63 = vadd.f32 %v12259_v21, %v1294_v18  ;;  %v71_v21 = vld [vmem:[%s16465_s0 + $0x130] sm:$0xff] }
 0x179   :  { %v1827_v50 = vadd.f32 %v12234_v4, %v1293_v34  ;;  %v70_v4 = vld [vmem:[%s16465_s0 + $0x128] sm:$0xff]  ;;  %246 = vst.msk [vmem:[#allocation2 + $0x211] sm:$0xff] %vm97_vm1, %v71_v21 }
 0x17a   :  { %v2192_v22 = vpop.f32.mrf.mxu3  ;;  %10727 = vmatmul.msk.f32.gmra.mxu0 %vm97_vm1, %v12317_v15  ;;  %245 = vst.msk [vmem:[#allocation2 + $0x201] sm:$0xff] %vm97_vm1, %v70_v4  ;;  %v1381_v34 = vld [vmem:[#allocation2 + $0x1ea] sm:$0xff] }
 0x17b   :  { %v12327_v16 = vadd.f32 %v2192_v22, %v1826_v42  ;;  %v12378_v22 = vld [vmem:[#allocation2 + $0x1e8] sm:$0xff] }
 0x17d   :  { %v1133_v28 = vpop.f32.mrf.mxu1  ;;  %10859 = vmatmul.msk.f32.gmra.mxu2 %vm97_vm1, %v1378_v23 }
 0x17e   :  { %v1295_v20 = vadd.f32 %v1133_v28, %v761_v32  ;;  %v762_v28 = vadd.f32 %v12053_v58, %v12278_v52 }
 0x17f   :  { %10920 = vmatmul.msk.f32.gmra.mxu3 %vm97_vm1, %v12255_v17  ;;  %v12336_v51 = vpop.f32.mrf.mxu0  ;;  %v1908_v17 = vld [vmem:[#allocation2 + $0x180] sm:$0xff] }
 0x180   :  { %10790 = vmatmul.msk.f32.gmra.mxu1 %vm97_vm1, %v841_v29  ;;  %v12341_v48 = vpop.f32.mrf.mxu2  ;;  %v1829_v23 = vadd.f32 %v12282_v40, %v1295_v20 }
 0x181   :  { %v12420_v32 = vld [vmem:[#allocation2 + $0x200] sm:$0xff] }
 0x182   :  { %v2195_v38 = vpop.f32.mrf.mxu3  ;;  %10728 = vmatmul.msk.f32.gmra.mxu0 %vm97_vm1, %v12338_v36 }
 0x183   :  { %v12348_v47 = vadd.f32 %v2195_v38, %v1827_v50  ;;  %v844_v38 = vld [vmem:[#allocation2 + $0x1c9] sm:$0xff] }
 0x185   :  { %v1136_v30 = vpop.f32.mrf.mxu1  ;;  %10860 = vmatmul.msk.f32.gmra.mxu2 %vm97_vm1, %v1379_v33  ;;  %v72_v33 = vld [vmem:[%s16465_s0 + $0x138] sm:$0xff] }
 0x186   :  { %v1296_v35 = vadd.f32 %v1136_v30, %v762_v28  ;;  %247 = vst.msk [vmem:[#allocation2 + $0x219] sm:$0xff] %vm97_vm1, %v72_v33  ;;  %v1382_v30 = vld [vmem:[#allocation2 + $0x1fa] sm:$0xff]  ;;  %v12441_v28 = vld [vmem:[#allocation2 + $0x210] sm:$0xff]  ;;  %v765_v33 = vadd.f32 %v12053_v58, %v12336_v51 }
 0x187   :  { %10921 = vmatmul.msk.f32.gmra.mxu3 %vm97_vm1, %v1908_v17  ;;  %v12356_v56 = vpop.f32.mrf.mxu0 }
 0x188   :  { %10791 = vmatmul.msk.f32.gmra.mxu1 %vm97_vm1, %v842_v55  ;;  %v12361_v2 = vpop.f32.mrf.mxu2  ;;  %v1830_v17 = vadd.f32 %v12300_v61, %v1296_v35  ;;  %v763_v55 = vadd.f32 %v12053_v58, %v12297_v59 }
 0x18a   :  { %v2198_v0 = vpop.f32.mrf.mxu3  ;;  %10729 = vmatmul.msk.f32.gmra.mxu0 %vm97_vm1, %v12358_v49 }
 0x18b   :  { %v12368_v9 = vadd.f32 %v2198_v0, %v1828_v63  ;;  %v845_v0 = vld [vmem:[#allocation2 + $0x1d1] sm:$0xff] }
 0x18d   :  { %v1139_v7 = vpop.f32.mrf.mxu1  ;;  %10861 = vmatmul.msk.f32.gmra.mxu2 %vm97_vm1, %v1380_v5  ;;  %v73_v5 = vld [vmem:[%s16465_s0 + $0x140] sm:$0xff] }
 0x18e   :  { %248 = vst.msk [vmem:[#allocation2 + $0x229] sm:$0xff] %vm97_vm1, %v73_v5  ;;  %v1385_v5 = vld [vmem:[#allocation2 + $0x21a] sm:$0xff] }
 0x18f   :  { %10922 = vmatmul.msk.f32.gmra.mxu3 %vm97_vm1, %v1909_v3  ;;  %v12376_v42 = vpop.f32.mrf.mxu0 }
 0x190   :  { %10792 = vmatmul.msk.f32.gmra.mxu1 %vm97_vm1, %v843_v14  ;;  %v12381_v44 = vpop.f32.mrf.mxu2  ;;  %v764_v14 = vadd.f32 %v12053_v58, %v12315_v6 }
 0x192   :  { %v2201_v19 = vpop.f32.mrf.mxu3  ;;  %10730 = vmatmul.msk.f32.gmra.mxu0 %vm97_vm1, %v12378_v22 }
 0x193   :  { %v12388_v29 = vadd.f32 %v2201_v19, %v1829_v23  ;;  %v846_v19 = vld [vmem:[#allocation2 + $0x1e1] sm:$0xff] }
 0x195   :  { %v1142_v50 = vpop.f32.mrf.mxu1  ;;  %10862 = vmatmul.msk.f32.gmra.mxu2 %vm97_vm1, %v1381_v34  ;;  %v74_v34 = vld [vmem:[%s16465_s0 + $0x148] sm:$0xff] }
 0x196   :  { %249 = vst.msk [vmem:[#allocation2 + $0x231] sm:$0xff] %vm97_vm1, %v74_v34 }
 0x197   :  { %10923 = vmatmul.msk.f32.gmra.mxu3 %vm97_vm1, %v12317_v15  ;;  %v12397_v40 = vpop.f32.mrf.mxu0  ;;  %v1297_v15 = vadd.f32 %v1139_v7, %v763_v55  ;;  %v1383_v7 = vld [vmem:[#allocation2 + $0x202] sm:$0xff]  ;;  %v75_v55 = vld [vmem:[%s16465_s0 + $0x150] sm:$0xff] }
 0x198   :  { %10793 = vmatmul.msk.f32.gmra.mxu1 %vm97_vm1, %v844_v38  ;;  %v12402_v52 = vpop.f32.mrf.mxu2  ;;  %v1384_v38 = vld [vmem:[#allocation2 + $0x212] sm:$0xff]  ;;  %250 = vst.msk [vmem:[#allocation2 + $0x241] sm:$0xff] %vm97_vm1, %v75_v55 }
 0x199   :  { %v1831_v3 = vadd.f32 %v12320_v8, %v1297_v15  ;;  %v12462_v15 = vld [vmem:[#allocation2 + $0x218] sm:$0xff] }
 0x19a   :  { %v2204_v18 = vpop.f32.mrf.mxu3  ;;  %10731 = vmatmul.msk.f32.gmra.mxu0 %vm97_vm1, %v12399_v46 }
 0x19b   :  { %v12409_v4 = vadd.f32 %v2204_v18, %v1830_v17 }
 0x19d   :  { %v1145_v63 = vpop.f32.mrf.mxu1  ;;  %10863 = vmatmul.msk.f32.gmra.mxu2 %vm97_vm1, %v1382_v30  ;;  %v847_v30 = vld [vmem:[#allocation2 + $0x1e9] sm:$0xff] }
 0x19e   :  { %v12504_v55 = vld [vmem:[#allocation2 + $0x230] sm:$0xff] }
 0x19f   :  { %10924 = vmatmul.msk.f32.gmra.mxu3 %vm97_vm1, %v12338_v36  ;;  %v12418_v61 = vpop.f32.mrf.mxu0  ;;  %v1298_v36 = vadd.f32 %v1142_v50, %v764_v14  ;;  %v848_v14 = vld [vmem:[#allocation2 + $0x1f9] sm:$0xff] }
 0x1a0   :  { %10794 = vmatmul.msk.f32.gmra.mxu1 %vm97_vm1, %v845_v0  ;;  %v12423_v59 = vpop.f32.mrf.mxu2 }
 0x1a1   :  { %v1832_v35 = vadd.f32 %v12341_v48, %v1298_v36  ;;  %v76_v36 = vld [vmem:[%s16465_s0 + $0x158] sm:$0xff] }
 0x1a2   :  { %v2207_v20 = vpop.f32.mrf.mxu3  ;;  %10732 = vmatmul.msk.f32.gmra.mxu0 %vm97_vm1, %v12420_v32  ;;  %251 = vst.msk [vmem:[#allocation2 + $0x249] sm:$0xff] %vm97_vm1, %v76_v36  ;;  %v78_v36 = vld [vmem:[%s16465_s0 + $0x168] sm:$0xff] }
 0x1a3   :  { %v12430_v21 = vadd.f32 %v2207_v20, %v1831_v3  ;;  %v766_v3 = vadd.f32 %v12053_v58, %v12356_v56  ;;  %253 = vst.msk [vmem:[#allocation2 + $0x261] sm:$0xff] %vm97_vm1, %v78_v36 }
 0x1a5   :  { %v1148_v23 = vpop.f32.mrf.mxu1  ;;  %10864 = vmatmul.msk.f32.gmra.mxu2 %vm97_vm1, %v1383_v7 }
 0x1a7   :  { %10925 = vmatmul.msk.f32.gmra.mxu3 %vm97_vm1, %v12358_v49  ;;  %v12439_v8 = vpop.f32.mrf.mxu0  ;;  %v1299_v49 = vadd.f32 %v1145_v63, %v765_v33 }
 0x1a8   :  { %10795 = vmatmul.msk.f32.gmra.mxu1 %vm97_vm1, %v846_v19  ;;  %v12444_v6 = vpop.f32.mrf.mxu2  ;;  %v12483_v19 = vld [vmem:[#allocation2 + $0x228] sm:$0xff] }
 0x1a9   :  { %v1833_v63 = vadd.f32 %v12361_v2, %v1299_v49  ;;  %v849_v49 = vld [vmem:[#allocation2 + $0x201] sm:$0xff] }
 0x1aa   :  { %v2210_v50 = vpop.f32.mrf.mxu3  ;;  %10733 = vmatmul.msk.f32.gmra.mxu0 %vm97_vm1, %v12441_v28  ;;  %v857_v1 = vld [vmem:[#allocation2 + $0x261] sm:$0xff] }
 0x1ab   :  { %v12451_v17 = vadd.f32 %v2210_v50, %v1832_v35  ;;  %v1386_v35 = vld [vmem:[#allocation2 + $0x22a] sm:$0xff]  ;;  %v767_v50 = vadd.f32 %v12053_v58, %v12376_v42 }
 0x1ad   :  { %v1151_v18 = vpop.f32.mrf.mxu1  ;;  %10865 = vmatmul.msk.f32.gmra.mxu2 %vm97_vm1, %v1384_v38 }
 0x1af   :  { %10926 = vmatmul.msk.f32.gmra.mxu3 %vm97_vm1, %v12378_v22  ;;  %v12460_v48 = vpop.f32.mrf.mxu0  ;;  %v1300_v22 = vadd.f32 %v1148_v23, %v766_v3 }
 0x1b0   :  { %10796 = vmatmul.msk.f32.gmra.mxu1 %vm97_vm1, %v847_v30  ;;  %v12465_v51 = vpop.f32.mrf.mxu2  ;;  %v77_v30 = vld [vmem:[%s16465_s0 + $0x160] sm:$0xff] }
 0x1b1   :  { %v1834_v23 = vadd.f32 %v12381_v44, %v1300_v22  ;;  %252 = vst.msk [vmem:[#allocation2 + $0x259] sm:$0xff] %vm97_vm1, %v77_v30  ;;  %v851_v30 = vld [vmem:[#allocation2 + $0x219] sm:$0xff] }
 0x1b2   :  { %v2213_v0 = vpop.f32.mrf.mxu3  ;;  %10734 = vmatmul.msk.f32.gmra.mxu0 %vm97_vm1, %v12462_v15 }
 0x1b3   :  { %v12472_v20 = vadd.f32 %v2213_v0, %v1833_v63  ;;  %v1387_v0 = vld [vmem:[#allocation2 + $0x232] sm:$0xff] }
 0x1b5   :  { %16483 = vst [vmem:[#allocation7_spill] sm:$0xff] %v12472_v20  ;;  %v1154_v7 = vpop.f32.mrf.mxu1  ;;  %10866 = vmatmul.msk.f32.gmra.mxu2 %vm97_vm1, %v1385_v5  ;;  %v768_v5 = vadd.f32 %v12053_v58, %v12397_v40 }
 0x1b7   :  { %10927 = vmatmul.msk.f32.gmra.mxu3 %vm97_vm1, %v12399_v46  ;;  %v12481_v2 = vpop.f32.mrf.mxu0  ;;  %v1301_v46 = vadd.f32 %v1151_v18, %v767_v50  ;;  %v769_v50 = vadd.f32 %v12053_v58, %v12418_v61 }
 0x1b8   :  { %10797 = vmatmul.msk.f32.gmra.mxu1 %vm97_vm1, %v848_v14  ;;  %v12486_v56 = vpop.f32.mrf.mxu2  ;;  %v850_v14 = vld [vmem:[#allocation2 + $0x211] sm:$0xff] }
 0x1b9   :  { %v1835_v18 = vadd.f32 %v12402_v52, %v1301_v46 }
 0x1ba   :  { %v2216_v34 = vpop.f32.mrf.mxu3  ;;  %10735 = vmatmul.msk.f32.gmra.mxu0 %vm97_vm1, %v12483_v19 }
 0x1bb   :  { %v12493_v38 = vadd.f32 %v2216_v34, %v1834_v23  ;;  %v12525_v23 = vld [vmem:[#allocation2 + $0x240] sm:$0xff] }
 0x1bd   :  { %16484 = vst [vmem:[#allocation8_spill] sm:$0xff] %v12493_v38  ;;  %v1157_v33 = vpop.f32.mrf.mxu1  ;;  %10867 = vmatmul.msk.f32.gmra.mxu2 %vm97_vm1, %v1386_v35  ;;  %v1388_v35 = vld [vmem:[#allocation2 + $0x242] sm:$0xff] }
 0x1bf   :  { %10928 = vmatmul.msk.f32.gmra.mxu3 %vm97_vm1, %v12420_v32  ;;  %v12502_v44 = vpop.f32.mrf.mxu0  ;;  %v1302_v32 = vadd.f32 %v1154_v7, %v768_v5  ;;  %v1389_v5 = vld [vmem:[#allocation2 + $0x24a] sm:$0xff] }
 0x1c0   :  { %10798 = vmatmul.msk.f32.gmra.mxu1 %vm97_vm1, %v849_v49  ;;  %v12507_v42 = vpop.f32.mrf.mxu2 }
 0x1c1   :  { %v1836_v7 = vadd.f32 %v12423_v59, %v1302_v32  ;;  %v770_v32 = vadd.f32 %v12053_v58, %v12439_v8 }
 0x1c2   :  { %v2219_v63 = vpop.f32.mrf.mxu3  ;;  %10736 = vmatmul.msk.f32.gmra.mxu0 %vm97_vm1, %v12504_v55 }
 0x1c3   :  { %v12514_v3 = vadd.f32 %v2219_v63, %v1835_v18  ;;  %v79_v18 = vld [vmem:[%s16465_s0 + $0x170] sm:$0xff]  ;;  %v12546_v63 = vld [vmem:[#allocation2 + $0x248] sm:$0xff] }
 0x1c4   :  { %254 = vst.msk [vmem:[#allocation2 + $0x271] sm:$0xff] %vm97_vm1, %v79_v18 }
 0x1c5   :  { %16485 = vst [vmem:[#allocation9_spill] sm:$0xff] %v12514_v3  ;;  %v1160_v22 = vpop.f32.mrf.mxu1  ;;  %10868 = vmatmul.msk.f32.gmra.mxu2 %vm97_vm1, %v1387_v0  ;;  %v2947_v3 = vld [vmem:[#allocation2 + $0x22] sm:$0xff] }
 0x1c7   :  { %10929 = vmatmul.msk.f32.gmra.mxu3 %vm97_vm1, %v12441_v28  ;;  %v12523_v52 = vpop.f32.mrf.mxu0  ;;  %v1303_v28 = vadd.f32 %v1157_v33, %v769_v50 }
 0x1c8   :  { %10799 = vmatmul.msk.f32.gmra.mxu1 %vm97_vm1, %v850_v14  ;;  %v12528_v40 = vpop.f32.mrf.mxu2 }
 0x1c9   :  { %v1837_v33 = vadd.f32 %v12444_v6, %v1303_v28  ;;  %v1390_v28 = vld [vmem:[#allocation2 + $0x25a] sm:$0xff] }
 0x1ca   :  { %v2222_v34 = vpop.f32.mrf.mxu3  ;;  %10737 = vmatmul.msk.f32.gmra.mxu0 %vm97_vm1, %v12525_v23 }
 0x1cb   :  { %v12535_v46 = vadd.f32 %v2222_v34, %v1836_v7  ;;  %v852_v7 = vld [vmem:[#allocation2 + $0x229] sm:$0xff]  ;;  %v80_v34 = vld [vmem:[%s16465_s0 + $0x178] sm:$0xff] }
 0x1cc   :  { %255 = vst.msk [vmem:[#allocation2 + $0x279] sm:$0xff] %vm97_vm1, %v80_v34  ;;  %v772_v34 = vadd.f32 %v12053_v58, %v12481_v2 }
 0x1cd   :  { %16486 = vst [vmem:[#allocation10_spill] sm:$0xff] %v12535_v46  ;;  %v1163_v49 = vpop.f32.mrf.mxu1  ;;  %10869 = vmatmul.msk.f32.gmra.mxu2 %vm97_vm1, %v1388_v35  ;;  %v12567_v35 = vld [vmem:[#allocation2 + $0x258] sm:$0xff] }
 0x1ce   :  { %v2946_v46 = vld [vmem:[#allocation2 + $0x1a] sm:$0xff] }
 0x1cf   :  { %10930 = vmatmul.msk.f32.gmra.mxu3 %vm97_vm1, %v12462_v15  ;;  %v12544_v59 = vpop.f32.mrf.mxu0  ;;  %v1304_v15 = vadd.f32 %v1160_v22, %v770_v32  ;;  %v12588_v32 = vld [vmem:[#allocation2 + $0x260] sm:$0xff] }
 0x1d0   :  { %10800 = vmatmul.msk.f32.gmra.mxu1 %vm97_vm1, %v851_v30  ;;  %v12549_v61 = vpop.f32.mrf.mxu2  ;;  %v771_v30 = vadd.f32 %v12053_v58, %v12460_v48 }
 0x1d1   :  { %v1838_v22 = vadd.f32 %v12465_v51, %v1304_v15 }
 0x1d2   :  { %v2225_v0 = vpop.f32.mrf.mxu3  ;;  %10738 = vmatmul.msk.f32.gmra.mxu0 %vm97_vm1, %v12546_v63 }
 0x1d3   :  { %v12556_v14 = vadd.f32 %v2225_v0, %v1837_v33  ;;  %v853_v0 = vld [vmem:[#allocation2 + $0x231] sm:$0xff] }
 0x1d5   :  { %16487 = vst [vmem:[#allocation11_spill] sm:$0xff] %v12556_v14  ;;  %v1166_v36 = vpop.f32.mrf.mxu1  ;;  %10870 = vmatmul.msk.f32.gmra.mxu2 %vm97_vm1, %v1389_v5  ;;  %v81_v5 = vld [vmem:[%s16465_s0 + $0x180] sm:$0xff] }
 0x1d6   :  { %256 = vst.msk [vmem:[#allocation2 + $0x289] sm:$0xff] %vm97_vm1, %v81_v5  ;;  %v1392_v5 = vld [vmem:[#allocation2 + $0x272] sm:$0xff]  ;;  %v873_v14 = vld [vmem:[#allocation2 + $0x321] sm:$0xff] }
 0x1d7   :  { %10931 = vmatmul.msk.f32.gmra.mxu3 %vm97_vm1, %v12483_v19  ;;  %v12565_v6 = vpop.f32.mrf.mxu0  ;;  %v1305_v19 = vadd.f32 %v1163_v49, %v771_v30  ;;  %v82_v30 = vld [vmem:[%s16465_s0 + $0x188] sm:$0xff] }
 0x1d8   :  { %10801 = vmatmul.msk.f32.gmra.mxu1 %vm97_vm1, %v852_v7  ;;  %v12570_v8 = vpop.f32.mrf.mxu2  ;;  %v1391_v7 = vld [vmem:[#allocation2 + $0x262] sm:$0xff]  ;;  %257 = vst.msk [vmem:[#allocation2 + $0x291] sm:$0xff] %vm97_vm1, %v82_v30 }
 0x1d9   :  { %v1839_v49 = vadd.f32 %v12486_v56, %v1305_v19  ;;  %v12609_v19 = vld [vmem:[#allocation2 + $0x270] sm:$0xff] }
 0x1da   :  { %v2228_v50 = vpop.f32.mrf.mxu3  ;;  %10739 = vmatmul.msk.f32.gmra.mxu0 %vm97_vm1, %v12567_v35 }
 0x1db   :  { %v12577_v18 = vadd.f32 %v2228_v50, %v1838_v22 }
 0x1dd   :  { %16488 = vst [vmem:[#allocation12_spill] sm:$0xff] %v12577_v18  ;;  %v1169_v33 = vpop.f32.mrf.mxu1  ;;  %10871 = vmatmul.msk.f32.gmra.mxu2 %vm97_vm1, %v1390_v28  ;;  %v854_v28 = vld [vmem:[#allocation2 + $0x241] sm:$0xff]  ;;  %v872_v18 = vld [vmem:[#allocation2 + $0x319] sm:$0xff] }
 0x1df   :  { %10932 = vmatmul.msk.f32.gmra.mxu3 %vm97_vm1, %v12504_v55  ;;  %v12586_v51 = vpop.f32.mrf.mxu0  ;;  %v1306_v55 = vadd.f32 %v1166_v36, %v772_v34  ;;  %v855_v34 = vld [vmem:[#allocation2 + $0x249] sm:$0xff] }
 0x1e0   :  { %10802 = vmatmul.msk.f32.gmra.mxu1 %vm97_vm1, %v853_v0  ;;  %v12591_v48 = vpop.f32.mrf.mxu2 }
 0x1e1   :  { %v1840_v36 = vadd.f32 %v12507_v42, %v1306_v55  ;;  %v12630_v55 = vld [vmem:[#allocation2 + $0x278] sm:$0xff] }
 0x1e2   :  { %v2231_v15 = vpop.f32.mrf.mxu3  ;;  %10740 = vmatmul.msk.f32.gmra.mxu0 %vm97_vm1, %v12588_v32 }
 0x1e3   :  { %v12598_v22 = vadd.f32 %v2231_v15, %v1839_v49  ;;  %v773_v49 = vadd.f32 %v12053_v58, %v12502_v44 }
 0x1e5   :  { %16489 = vst [vmem:[#allocation13_spill] sm:$0xff] %v12598_v22  ;;  %v1172_v50 = vpop.f32.mrf.mxu1  ;;  %10872 = vmatmul.msk.f32.gmra.mxu2 %vm97_vm1, %v1391_v7 }
 0x1e7   :  { %10933 = vmatmul.msk.f32.gmra.mxu3 %vm97_vm1, %v12525_v23  ;;  %v12607_v56 = vpop.f32.mrf.mxu0  ;;  %v1307_v23 = vadd.f32 %v1169_v33, %v773_v49 }
 0x1e8   :  { %10803 = vmatmul.msk.f32.gmra.mxu1 %vm97_vm1, %v854_v28  ;;  %v12612_v2 = vpop.f32.mrf.mxu2  ;;  %v83_v28 = vld [vmem:[%s16465_s0 + $0x190] sm:$0xff] }
 0x1e9   :  { %258 = vst.msk [vmem:[#allocation2 + $0x2a1] sm:$0xff] %vm97_vm1, %v83_v28  ;;  %v1841_v33 = vadd.f32 %v12528_v40, %v1307_v23  ;;  %v856_v28 = vld [vmem:[#allocation2 + $0x259] sm:$0xff]  ;;  %v12651_v23 = vld [vmem:[#allocation2 + $0x288] sm:$0xff] }
 0x1ea   :  { %v2234_v0 = vpop.f32.mrf.mxu3  ;;  %10741 = vmatmul.msk.f32.gmra.mxu0 %vm97_vm1, %v12609_v19 }
 0x1eb   :  { %v12619_v15 = vadd.f32 %v2234_v0, %v1840_v36  ;;  %v1393_v36 = vld [vmem:[#allocation2 + $0x27a] sm:$0xff]  ;;  %v774_v0 = vadd.f32 %v12053_v58, %v12523_v52 }
 0x1ed   :  { %16490 = vst [vmem:[#allocation14_spill] sm:$0xff] %v12619_v15  ;;  %v1175_v7 = vpop.f32.mrf.mxu1  ;;  %10873 = vmatmul.msk.f32.gmra.mxu2 %vm97_vm1, %v1392_v5 }
 0x1ef   :  { %10934 = vmatmul.msk.f32.gmra.mxu3 %vm97_vm1, %v12546_v63  ;;  %v12628_v42 = vpop.f32.mrf.mxu0  ;;  %v1308_v63 = vadd.f32 %v1172_v50, %v774_v0 }
 0x1f0   :  { %10804 = vmatmul.msk.f32.gmra.mxu1 %vm97_vm1, %v855_v34  ;;  %v12633_v44 = vpop.f32.mrf.mxu2  ;;  %v84_v34 = vld [vmem:[%s16465_s0 + $0x198] sm:$0xff] }
 0x1f1   :  { %259 = vst.msk [vmem:[#allocation2 + $0x2a9] sm:$0xff] %vm97_vm1, %v84_v34  ;;  %v1842_v50 = vadd.f32 %v12549_v61, %v1308_v63  ;;  %v12672_v63 = vld [vmem:[#allocation2 + $0x290] sm:$0xff] }
 0x1f2   :  { %v2237_v30 = vpop.f32.mrf.mxu3  ;;  %10742 = vmatmul.msk.f32.gmra.mxu0 %vm97_vm1, %v12630_v55 }
 0x1f3   :  { %v12640_v5 = vadd.f32 %v2237_v30, %v1841_v33  ;;  %v1394_v30 = vld [vmem:[#allocation2 + $0x28a] sm:$0xff] }
 0x1f5   :  { %16491 = vst [vmem:[#allocation15_spill] sm:$0xff] %v12640_v5  ;;  %v1178_v49 = vpop.f32.mrf.mxu1  ;;  %10874 = vmatmul.msk.f32.gmra.mxu2 %vm97_vm1, %v1393_v36  ;;  %v775_v36 = vadd.f32 %v12053_v58, %v12544_v59 }
 0x1f7   :  { %10935 = vmatmul.msk.f32.gmra.mxu3 %vm97_vm1, %v12567_v35  ;;  %v12649_v40 = vpop.f32.mrf.mxu0  ;;  %v1309_v35 = vadd.f32 %v1175_v7, %v775_v36 }
 0x1f8   :  { %10805 = vmatmul.msk.f32.gmra.mxu1 %vm97_vm1, %v856_v28  ;;  %v12654_v52 = vpop.f32.mrf.mxu2  ;;  %v85_v28 = vld [vmem:[%s16465_s0 + $0x1a0] sm:$0xff] }
 0x1f9   :  { %260 = vst.msk [vmem:[#allocation2 + $0x2b9] sm:$0xff] %vm97_vm1, %v85_v28  ;;  %v1843_v59 = vadd.f32 %v12570_v8, %v1309_v35  ;;  %v858_v28 = vld [vmem:[#allocation2 + $0x271] sm:$0xff]  ;;  %v86_v8 = vld [vmem:[%s16465_s0 + $0x1a8] sm:$0xff] }
 0x1fa   :  { %v2240_v33 = vpop.f32.mrf.mxu3  ;;  %10743 = vmatmul.msk.f32.gmra.mxu0 %vm97_vm1, %v12651_v23  ;;  %261 = vst.msk [vmem:[#allocation2 + $0x2c1] sm:$0xff] %vm97_vm1, %v86_v8 }
 0x1fb   :  { %v12661_v0 = vadd.f32 %v2240_v33, %v1842_v50  ;;  %v1395_v50 = vld [vmem:[#allocation2 + $0x292] sm:$0xff]  ;;  %v12683_v33 = vld [vmem:[%s16467_s2] ss:$0 sm:$0xff] }
 0x1fd   :  { %16492 = vst [vmem:[#allocation16_spill] sm:$0xff] %v12661_v0  ;;  %v1181_v34 = vpop.f32.mrf.mxu1  ;;  %10875 = vmatmul.msk.f32.gmra.mxu2 %vm97_vm1, %v1394_v30  ;;  %v12698_v0 = vld [vmem:[#allocation2 + $0x2a0] sm:$0xff] }
 0x1ff   :  { %10936 = vmatmul.msk.f32.gmra.mxu3 %vm97_vm1, %v12588_v32  ;;  %v12670_v61 = vpop.f32.mrf.mxu0  ;;  %v776_v32 = vadd.f32 %v12683_v33, %v12565_v6 }
 0x200   :  { %10806 = vmatmul.msk.f32.gmra.mxu1 %vm97_vm1, %v857_v1  ;;  %v12675_v58 = vpop.f32.mrf.mxu2 }
 0x201   :  { %v1310_v1 = vadd.f32 %v1178_v49, %v776_v32 }
 0x202   :  { %v2243_v7 = vpop.f32.mrf.mxu3  ;;  %10744 = vmatmul.msk.f32.gmra.mxu0 %vm97_vm1, %v12672_v63 }
 0x203   :  { %v12687_v30 = vadd.f32 %v2243_v7, %v1843_v59  ;;  %v1844_v49 = vadd.f32 %v12591_v48, %v1310_v1  ;;  %v1396_v7 = vld [vmem:[#allocation2 + $0x2a2] sm:$0xff] }
 0x204   :  { %v12715_v48 = vld [vmem:[#allocation2 + $0x2a8] sm:$0xff] }
 0x205   :  { %16493 = vst [vmem:[#allocation17_spill] sm:$0xff] %v12687_v30  ;;  %v1184_v36 = vpop.f32.mrf.mxu1  ;;  %10876 = vmatmul.msk.f32.gmra.mxu2 %vm97_vm1, %v1395_v50  ;;  %v777_v50 = vadd.f32 %v12683_v33, %v12586_v51  ;;  %v859_v30 = vld [vmem:[#allocation2 + $0x279] sm:$0xff] }
 0x207   :  { %10937 = vmatmul.msk.f32.gmra.mxu3 %vm97_vm1, %v12609_v19  ;;  %v12696_v35 = vpop.f32.mrf.mxu0  ;;  %v1311_v19 = vadd.f32 %v1181_v34, %v777_v50  ;;  %v1397_v34 = vld [vmem:[#allocation2 + $0x2aa] sm:$0xff] }
 0x208   :  { %10807 = vmatmul.msk.f32.gmra.mxu1 %vm97_vm1, %v858_v28  ;;  %v12701_v6 = vpop.f32.mrf.mxu2 }
 0x209   :  { %v1845_v51 = vadd.f32 %v12612_v2, %v1311_v19  ;;  %v860_v19 = vld [vmem:[#allocation2 + $0x289] sm:$0xff] }
 0x20a   :  { %v2246_v59 = vpop.f32.mrf.mxu3  ;;  %10745 = vmatmul.msk.f32.gmra.mxu0 %vm97_vm1, %v12698_v0 }
 0x20b   :  { %v12708_v32 = vadd.f32 %v2246_v59, %v1844_v49  ;;  %v778_v59 = vadd.f32 %v12683_v33, %v12607_v56 }
 0x20d   :  { %16494 = vst [vmem:[#allocation18_spill] sm:$0xff] %v12708_v32  ;;  %v1187_v8 = vpop.f32.mrf.mxu1  ;;  %10877 = vmatmul.msk.f32.gmra.mxu2 %vm97_vm1, %v1396_v7  ;;  %v1312_v2 = vadd.f32 %v1184_v36, %v778_v59 }
 0x20f   :  { %10938 = vmatmul.msk.f32.gmra.mxu3 %vm97_vm1, %v12630_v55  ;;  %v12713_v28 = vpop.f32.mrf.mxu0  ;;  %v11087_v55 = vld [vmem:[%s16466_s1 + $0x18] sm:$0xf]  ;;  %v1846_v36 = vadd.f32 %v12633_v44, %v1312_v2 }
 0x210   :  { %10808 = vmatmul.msk.f32.gmra.mxu1 %vm97_vm1, %v859_v30  ;;  %v12718_v1 = vpop.f32.mrf.mxu2  ;;  %v11153_v30 = vld [vmem:[%s16466_s1 + $0x1c] sm:$0xf]  ;;  %11088 = vmatpush.msk.msrb.mxu2 %vm533_vm0, %v11087_v55  ;;  %v861_v44 = vld [vmem:[#allocation2 + $0x291] sm:$0xff] }
 0x211   :  { %11154 = vmatpush.msk.msra.mxu3 %vm533_vm0, %v11153_v30 }
 0x212   :  { %v2249_v49 = vpop.f32.mrf.mxu3  ;;  %10746 = vmatmul.msk.f32.gmra.mxu0 %vm97_vm1, %v12715_v48 }
 0x213   :  { %v12725_v7 = vadd.f32 %v2249_v49, %v1845_v51  ;;  %v330_v51 = vld [vmem:[#allocation2 + $0x2b8] sm:$0xff]  ;;  %v11021_v49 = vld [vmem:[%s16466_s1 + $0x14] sm:$0xf] }
 0x214   :  { %11022 = vmatpush.msk.msra.mxu1 %vm533_vm0, %v11021_v49  ;;  %v331_v49 = vld [vmem:[#allocation2 + $0x2c0] sm:$0xff] }
 0x215   :  { %16495 = vst [vmem:[#allocation19_spill] sm:$0xff] %v12725_v7  ;;  %v1190_v50 = vpop.f32.mrf.mxu1  ;;  %10878 = vmatmul.msk.f32.gmra.mxu2 %vm97_vm1, %v1397_v34  ;;  %v1398_v34 = vld [vmem:[#allocation2 + $0x2ba] sm:$0xff] }
 0x216   :  { %v11219_v7 = vld [vmem:[%s16466_s1 + $0x20] sm:$0xf] }
 0x217   :  { %10939 = vmatmul.msk.f32.gmra.mxu3 %vm97_vm1, %v12651_v23  ;;  %v12738_v56 = vpop.f32.mrf.mxu0  ;;  %v779_v23 = vadd.f32 %v12683_v33, %v12628_v42  ;;  %11220 = vmatpush.msk.msra.mxu0 %vm533_vm0, %v11219_v7  ;;  %v780_v7 = vadd.f32 %v12683_v33, %v12649_v40 }
 0x218   :  { %10809 = vmatmul.msk.f32.gmra.mxu1 %vm97_vm1, %v860_v19  ;;  %v12744_v55 = vpop.f32.mrf.mxu2 }
 0x219   :  { %v1313_v19 = vadd.f32 %v1187_v8, %v779_v23  ;;  %v1399_v8 = vld [vmem:[#allocation2 + $0x2c2] sm:$0xff]  ;;  %v1314_v23 = vadd.f32 %v1190_v50, %v780_v7  ;;  %v1400_v50 = vld [vmem:[#allocation2 + $0x2d2] sm:$0xff] }
 0x21a   :  { %v2252_v59 = vpop.f32.mrf.mxu3  ;;  %10747 = vmatmul.msk.f32.gmra.mxu0 %vm97_vm1, %v330_v51  ;;  %v863_v7 = vld [vmem:[#allocation2 + $0x2a9] sm:$0xff] }
 0x21b   :  { %v12751_v30 = vadd.f32 %v2252_v59, %v1846_v36  ;;  %v1847_v36 = vadd.f32 %v12654_v52, %v1313_v19  ;;  %v332_v52 = vld [vmem:[#allocation2 + $0x2d0] sm:$0xff]  ;;  %v1848_v5 = vadd.f32 %v12675_v58, %v1314_v23  ;;  %v2412_v58 = vld [vmem:[#allocation2 + $0x19] sm:$0xff] }
 0x21d   :  { %16496 = vst [vmem:[#allocation20_spill] sm:$0xff] %v12751_v30  ;;  %v1193_v32 = vpop.f32.mrf.mxu1  ;;  %10879 = vmatmul.msk.f32.gmra.mxu2 %vm97_vm1, %v1398_v34  ;;  %v862_v30 = vld [vmem:[#allocation2 + $0x2a1] sm:$0xff] }
 0x21f   :  { %10940 = vmatmul.msk.f32.gmra.mxu3 %vm97_vm1, %v12672_v63  ;;  %v12760_v2 = vpop.f32.mrf.mxu0 }
 0x220   :  { %10810 = vmatmul.msk.f32.gmra.mxu1 %vm97_vm1, %v861_v44  ;;  %v12763_v42 = vpop.f32.mrf.mxu2 }
 0x222   :  { %v2255_v59 = vpop.f32.mrf.mxu3  ;;  %10748 = vmatmul.msk.f32.gmra.mxu0 %vm97_vm1, %v331_v49 }
 0x223   :  { %v12769_v34 = vadd.f32 %v2255_v59, %v1847_v36  ;;  %v781_v36 = vadd.f32 %v12683_v33, %v12670_v61 }
 0x225   :  { %16497 = vst [vmem:[#allocation21_spill] sm:$0xff] %v12769_v34  ;;  %v1196_v63 = vpop.f32.mrf.mxu1  ;;  %10880 = vmatmul.msk.f32.gmra.mxu2 %vm97_vm1, %v1399_v8  ;;  %v1315_v8 = vadd.f32 %v1193_v32, %v781_v36  ;;  %v782_v32 = vadd.f32 %v12683_v33, %v12696_v35  ;;  %v864_v36 = vld [vmem:[#allocation2 + $0x2b9] sm:$0xff]  ;;  %v1402_v35 = vld [vmem:[#allocation2 + $0x2ea] sm:$0xff] }
 0x227   :  { %10941 = vmatmul.msk.f32.gmra.mxu3 %vm97_vm1, %v12698_v0  ;;  %v12774_v44 = vpop.f32.mrf.mxu0  ;;  %v1849_v34 = vadd.f32 %v12701_v6, %v1315_v8 }
 0x228   :  { %10811 = vmatmul.msk.f32.gmra.mxu1 %vm97_vm1, %v862_v30  ;;  %v12777_v19 = vpop.f32.mrf.mxu2 }
 0x22a   :  { %v2258_v40 = vpop.f32.mrf.mxu3  ;;  %10749 = vmatmul.msk.f32.gmra.mxu0 %vm97_vm1, %v332_v52 }
 0x22b   :  { %v12783_v59 = vadd.f32 %v2258_v40, %v1848_v5  ;;  %v1401_v5 = vld [vmem:[#allocation2 + $0x2da] sm:$0xff] }
 0x22d   :  { %16498 = vst [vmem:[#allocation22_spill] sm:$0xff] %v12783_v59  ;;  %v1199_v0 = vpop.f32.mrf.mxu1  ;;  %10881 = vmatmul.msk.f32.gmra.mxu2 %vm97_vm1, %v1400_v50  ;;  %v1316_v50 = vadd.f32 %v1196_v63, %v782_v32  ;;  %v2413_v59 = vld [vmem:[#allocation2 + $0x21] sm:$0xff] }
 0x22f   :  { %10942 = vmatmul.msk.f32.gmra.mxu3 %vm97_vm1, %v12715_v48  ;;  %v12788_v30 = vpop.f32.mrf.mxu0  ;;  %v1850_v8 = vadd.f32 %v12718_v1, %v1316_v50  ;;  %v784_v50 = vadd.f32 %v12683_v33, %v12738_v56 }
 0x230   :  { %10812 = vmatmul.msk.f32.gmra.mxu1 %vm97_vm1, %v863_v7  ;;  %v12791_v23 = vpop.f32.mrf.mxu2 }
 0x232   :  { %v2261_v61 = vpop.f32.mrf.mxu3  ;;  %10957 = vmatmul.msk.f32.vlgmr.msrb.gmra.mxu0 %vm97_vm1, %v2412_v58 }
 0x233   :  { %v12797_v40 = vadd.f32 %v2261_v61, %v1849_v34  ;;  %v783_v34 = vadd.f32 %v12683_v33, %v12713_v28 }
 0x235   :  { %16499 = vst [vmem:[#allocation23_spill] sm:$0xff] %v12797_v40  ;;  %v1202_v48 = vpop.f32.mrf.mxu1  ;;  %10882 = vmatmul.msk.f32.gmra.mxu2 %vm97_vm1, %v1401_v5  ;;  %v1317_v61 = vadd.f32 %v1199_v0, %v783_v34  ;;  %v865_v5 = vld [vmem:[#allocation2 + $0x2c1] sm:$0xff]  ;;  %v1403_v0 = vld [vmem:[#allocation2 + $0x2f2] sm:$0xff] }
 0x236   :  { %v869_v40 = vld [vmem:[#allocation2 + $0x2f1] sm:$0xff] }
 0x237   :  { %10943 = vmatmul.msk.f32.gmra.mxu3 %vm97_vm1, %v330_v51  ;;  %v12801_v7 = vpop.f32.mrf.mxu0 }
 0x238   :  { %10813 = vmatmul.msk.f32.gmra.mxu1 %vm97_vm1, %v864_v36  ;;  %v12804_v6 = vpop.f32.mrf.mxu2  ;;  %v12816_v36 = vld [vmem:[#allocation2 + $0x31] sm:$0xff] }
 0x23a   :  { %v2264_v58 = vpop.f32.mrf.mxu3  ;;  %10958 = vmatmul.msk.f32.gmra.mxu0 %vm97_vm1, %v2413_v59  ;;  %v1851_v59 = vadd.f32 %v12744_v55, %v1317_v61  ;;  %v12832_v55 = vld [vmem:[#allocation2 + $0x39] sm:$0xff] }
 0x23b   :  { %v12810_v63 = vadd.f32 %v2264_v58, %v1850_v8 }
 0x23d   :  { %16500 = vst [vmem:[#allocation24_spill] sm:$0xff] %v12810_v63  ;;  %v1205_v51 = vpop.f32.mrf.mxu1  ;;  %10883 = vmatmul.msk.f32.gmra.mxu2 %vm97_vm1, %v1402_v35  ;;  %v866_v35 = vld [vmem:[#allocation2 + $0x2d1] sm:$0xff]  ;;  %v868_v63 = vld [vmem:[#allocation2 + $0x2e9] sm:$0xff] }
 0x23f   :  { %10944 = vmatmul.msk.f32.gmra.mxu3 %vm97_vm1, %v331_v49  ;;  %v12814_v32 = vpop.f32.mrf.mxu0  ;;  %v1318_v49 = vadd.f32 %v1202_v48, %v784_v50  ;;  %v1404_v48 = vld [vmem:[#allocation2 + $0x302] sm:$0xff] }
 0x240   :  { %10814 = vmatmul.msk.f32.gmra.mxu1 %vm97_vm1, %v865_v5  ;;  %v12819_v1 = vpop.f32.mrf.mxu2 }
 0x241   :  { %v1852_v5 = vadd.f32 %v12763_v42, %v1318_v49  ;;  %v12848_v42 = vld [vmem:[#allocation2 + $0x49] sm:$0xff] }
 0x242   :  { %v2267_v28 = vpop.f32.mrf.mxu3  ;;  %10959 = vmatmul.msk.f32.gmra.mxu0 %vm97_vm1, %v12816_v36 }
 0x243   :  { %v12826_v8 = vadd.f32 %v2267_v28, %v1851_v59  ;;  %v785_v59 = vadd.f32 %v12683_v33, %v12760_v2 }
 0x245   :  { %16501 = vst [vmem:[#allocation25_spill] sm:$0xff] %v12826_v8  ;;  %v1208_v58 = vpop.f32.mrf.mxu1  ;;  %10884 = vmatmul.msk.f32.gmra.mxu2 %vm97_vm1, %v1403_v0  ;;  %v1319_v0 = vadd.f32 %v1205_v51, %v785_v59  ;;  %v867_v8 = vld [vmem:[#allocation2 + $0x2d9] sm:$0xff]  ;;  %v1405_v51 = vld [vmem:[#allocation2 + $0x30a] sm:$0xff] }
 0x246   :  { %v1934_v59 = vld [vmem:[#allocation2 + $0x2e8] sm:$0xff] }
 0x247   :  { %10945 = vmatmul.msk.f32.gmra.mxu3 %vm97_vm1, %v332_v52  ;;  %v12830_v34 = vpop.f32.mrf.mxu0  ;;  %v1933_v52 = vld [vmem:[#allocation2 + $0x2d8] sm:$0xff]  ;;  %v1853_v2 = vadd.f32 %v12777_v19, %v1319_v0 }
 0x248   :  { %10815 = vmatmul.msk.f32.gmra.mxu1 %vm97_vm1, %v866_v35  ;;  %v12835_v61 = vpop.f32.mrf.mxu2  ;;  %v12864_v19 = vld [vmem:[#allocation2 + $0x51] sm:$0xff] }
 0x24a   :  { %v2270_v56 = vpop.f32.mrf.mxu3  ;;  %10960 = vmatmul.msk.f32.gmra.mxu0 %vm97_vm1, %v12832_v55 }
 0x24b   :  { %v12842_v28 = vadd.f32 %v2270_v56, %v1852_v5  ;;  %v786_v56 = vadd.f32 %v12683_v33, %v12774_v44 }
 0x24d   :  { %16502 = vst [vmem:[#allocation26_spill] sm:$0xff] %v12842_v28  ;;  %v1211_v50 = vpop.f32.mrf.mxu1  ;;  %10885 = vmatmul.msk.f32.gmra.mxu2 %vm97_vm1, %v1404_v48 }
 0x24f   :  { %10946 = vmatmul.msk.f32.gmra.mxu3 %vm97_vm1, %v1933_v52  ;;  %v12846_v35 = vpop.f32.mrf.mxu0  ;;  %v1320_v52 = vadd.f32 %v1208_v58, %v786_v56  ;;  %v1406_v58 = vld [vmem:[#allocation2 + $0x31a] sm:$0xff]  ;;  %v1935_v56 = vld [vmem:[#allocation2 + $0x2f0] sm:$0xff] }
 0x250   :  { %10816 = vmatmul.msk.f32.gmra.mxu1 %vm97_vm1, %v867_v8  ;;  %v12851_v49 = vpop.f32.mrf.mxu2 }
 0x251   :  { %v1854_v44 = vadd.f32 %v12791_v23, %v1320_v52  ;;  %v95_v23 = vld [vmem:[%s16465_s0 + $0x1f0] sm:$0xff]  ;;  %v12883_v52 = vld [vmem:[#allocation2 + $0x61] sm:$0xff] }
 0x252   :  { %v2273_v5 = vpop.f32.mrf.mxu3  ;;  %10961 = vmatmul.msk.f32.gmra.mxu0 %vm97_vm1, %v12848_v42  ;;  %270 = vst.msk [vmem:[#allocation2 + $0x331] sm:$0xff] %vm97_vm1, %v95_v23  ;;  %v870_v23 = vld [vmem:[#allocation2 + $0x301] sm:$0xff] }
 0x253   :  { %v12858_v48 = vadd.f32 %v2273_v5, %v1853_v2  ;;  %v787_v5 = vadd.f32 %v12683_v33, %v12788_v30 }
 0x255   :  { %16503 = vst [vmem:[#allocation27_spill] sm:$0xff] %v12858_v48  ;;  %v1214_v28 = vpop.f32.mrf.mxu1  ;;  %10886 = vmatmul.msk.f32.gmra.mxu2 %vm97_vm1, %v1405_v51 }
 0x257   :  { %10947 = vmatmul.msk.f32.gmra.mxu3 %vm97_vm1, %v1934_v59  ;;  %v12862_v8 = vpop.f32.mrf.mxu0  ;;  %v1321_v59 = vadd.f32 %v1211_v50, %v787_v5 }
 0x258   :  { %10817 = vmatmul.msk.f32.gmra.mxu1 %vm97_vm1, %v868_v63  ;;  %v12867_v0 = vpop.f32.mrf.mxu2 }
 0x259   :  { %v1855_v50 = vadd.f32 %v12804_v6, %v1321_v59  ;;  %v12903_v59 = vld [vmem:[#allocation2 + $0x69] sm:$0xff] }
 0x25a   :  { %v2276_v2 = vpop.f32.mrf.mxu3  ;;  %10962 = vmatmul.msk.f32.gmra.mxu0 %vm97_vm1, %v12864_v19 }
 0x25b   :  { %v12874_v51 = vadd.f32 %v2276_v2, %v1854_v44  ;;  %v1407_v2 = vld [vmem:[#allocation2 + $0x322] sm:$0xff] }
 0x25d   :  { %16504 = vst [vmem:[#allocation28_spill] sm:$0xff] %v12874_v51  ;;  %v1217_v48 = vpop.f32.mrf.mxu1  ;;  %10887 = vmatmul.msk.f32.gmra.mxu2 %vm97_vm1, %v1406_v58  ;;  %v788_v58 = vadd.f32 %v12683_v33, %v12801_v7 }
 0x25f   :  { %10948 = vmatmul.msk.f32.gmra.mxu3 %vm97_vm1, %v1935_v56  ;;  %v12881_v63 = vpop.f32.mrf.mxu0  ;;  %v1936_v56 = vld [vmem:[#allocation2 + $0x300] sm:$0xff]  ;;  %v1322_v51 = vadd.f32 %v1214_v28, %v788_v58 }
 0x260   :  { %10818 = vmatmul.msk.f32.gmra.mxu1 %vm97_vm1, %v869_v40  ;;  %v12887_v30 = vpop.f32.mrf.mxu2  ;;  %v96_v40 = vld [vmem:[%s16465_s0 + $0x1f8] sm:$0xff] }
 0x261   :  { %271 = vst.msk [vmem:[#allocation2 + $0x339] sm:$0xff] %vm97_vm1, %v96_v40  ;;  %v1856_v28 = vadd.f32 %v12819_v1, %v1322_v51  ;;  %v871_v40 = vld [vmem:[#allocation2 + $0x309] sm:$0xff]  ;;  %v12920_v1 = vld [vmem:[#allocation2 + $0x79] sm:$0xff] }
 0x262   :  { %v2279_v44 = vpop.f32.mrf.mxu3  ;;  %10963 = vmatmul.msk.f32.gmra.mxu0 %vm97_vm1, %v12883_v52 }
 0x263   :  { %v12894_v5 = vadd.f32 %v2279_v44, %v1855_v50  ;;  %v3481_v44 = vld [vmem:[#allocation2 + $0x30] sm:$0xff] }
 0x265   :  { %16505 = vst [vmem:[#allocation29_spill] sm:$0xff] %v12894_v5  ;;  %v1220_v15 = vpop.f32.mrf.mxu1  ;;  %10888 = vmatmul.msk.f32.gmra.mxu2 %vm97_vm1, %v1407_v2  ;;  %v789_v2 = vadd.f32 %v12683_v33, %v12814_v32 }
 0x267   :  { %10949 = vmatmul.msk.f32.gmra.mxu3 %vm97_vm1, %v1936_v56  ;;  %v12901_v6 = vpop.f32.mrf.mxu0  ;;  %v1937_v56 = vld [vmem:[#allocation2 + $0x308] sm:$0xff]  ;;  %v1323_v5 = vadd.f32 %v1217_v48, %v789_v2  ;;  %v3482_v48 = vld [vmem:[#allocation2 + $0x38] sm:$0xff] }
 0x268   :  { %10819 = vmatmul.msk.f32.gmra.mxu1 %vm97_vm1, %v870_v23  ;;  %v12907_v7 = vpop.f32.mrf.mxu2  ;;  %v1938_v2 = vld [vmem:[#allocation2 + $0x318] sm:$0xff] }
 0x269   :  { %v1857_v32 = vadd.f32 %v12835_v61, %v1323_v5  ;;  %v12936_v61 = vld [vmem:[#allocation2 + $0x81] sm:$0xff] }
 0x26a   :  { %v2282_v50 = vpop.f32.mrf.mxu3  ;;  %10964 = vmatmul.msk.f32.gmra.mxu0 %vm97_vm1, %v12903_v59 }
 0x26b   :  { %v12914_v58 = vadd.f32 %v2282_v50, %v1856_v28  ;;  %v790_v50 = vadd.f32 %v12683_v33, %v12830_v34 }
 0x26d   :  { %16506 = vst [vmem:[#allocation30_spill] sm:$0xff] %v12914_v58  ;;  %v1223_v22 = vpop.f32.mrf.mxu1  ;;  %11089 = vmatmul.msk.f32.vlgmr.msrb.gmra.mxu2 %vm97_vm1, %v3481_v44 }
 0x26f   :  { %10950 = vmatmul.msk.f32.gmra.mxu3 %vm97_vm1, %v1937_v56  ;;  %v12918_v23 = vpop.f32.mrf.mxu0  ;;  %v1324_v56 = vadd.f32 %v1220_v15, %v790_v50  ;;  %v3483_v15 = vld [vmem:[#allocation2 + $0x48] sm:$0xff]  ;;  %v1939_v50 = vld [vmem:[#allocation2 + $0x320] sm:$0xff] }
 0x270   :  { %10820 = vmatmul.msk.f32.gmra.mxu1 %vm97_vm1, %v871_v40  ;;  %v12923_v51 = vpop.f32.mrf.mxu2 }
 0x271   :  { %v1858_v34 = vadd.f32 %v12851_v49, %v1324_v56  ;;  %v12952_v49 = vld [vmem:[#allocation2 + $0x91] sm:$0xff] }
 0x272   :  { %v2285_v28 = vpop.f32.mrf.mxu3  ;;  %10965 = vmatmul.msk.f32.gmra.mxu0 %vm97_vm1, %v12920_v1 }
 0x273   :  { %v12930_v44 = vadd.f32 %v2285_v28, %v1857_v32  ;;  %v791_v28 = vadd.f32 %v12683_v33, %v12846_v35 }
 0x275   :  { %16507 = vst [vmem:[#allocation31_spill] sm:$0xff] %v12930_v44  ;;  %v1226_v58 = vpop.f32.mrf.mxu1  ;;  %11090 = vmatmul.msk.f32.gmra.mxu2 %vm97_vm1, %v3482_v48 }
 0x277   :  { %10951 = vmatmul.msk.f32.gmra.mxu3 %vm97_vm1, %v1938_v2  ;;  %v12934_v40 = vpop.f32.mrf.mxu0  ;;  %v1325_v2 = vadd.f32 %v1223_v22, %v791_v28  ;;  %v3484_v22 = vld [vmem:[#allocation2 + $0x50] sm:$0xff] }
 0x278   :  { %10821 = vmatmul.msk.f32.gmra.mxu1 %vm97_vm1, %v872_v18  ;;  %v12939_v5 = vpop.f32.mrf.mxu2  ;;  %v1940_v28 = vld [vmem:[#allocation2 + $0x330] sm:$0xff] }
 0x279   :  { %v1859_v35 = vadd.f32 %v12867_v0, %v1325_v2  ;;  %v12968_v0 = vld [vmem:[#allocation2 + $0x99] sm:$0xff] }
 0x27a   :  { %v2288_v32 = vpop.f32.mrf.mxu3  ;;  %10966 = vmatmul.msk.f32.gmra.mxu0 %vm97_vm1, %v12936_v61 }
 0x27b   :  { %v12946_v48 = vadd.f32 %v2288_v32, %v1858_v34  ;;  %v792_v32 = vadd.f32 %v12683_v33, %v12862_v8 }
 0x27d   :  { %16508 = vst [vmem:[#allocation32_spill] sm:$0xff] %v12946_v48  ;;  %v1229_v44 = vpop.f32.mrf.mxu1  ;;  %11091 = vmatmul.msk.f32.gmra.mxu2 %vm97_vm1, %v3483_v15 }
 0x27f   :  { %10952 = vmatmul.msk.f32.gmra.mxu3 %vm97_vm1, %v1939_v50  ;;  %v12950_v18 = vpop.f32.mrf.mxu0  ;;  %v1326_v50 = vadd.f32 %v1226_v58, %v792_v32  ;;  %v3485_v58 = vld [vmem:[#allocation2 + $0x60] sm:$0xff]  ;;  %v1941_v32 = vld [vmem:[#allocation2 + $0x338] sm:$0xff] }
 0x280   :  { %10822 = vmatmul.msk.f32.gmra.mxu1 %vm97_vm1, %v873_v14  ;;  %v12955_v56 = vpop.f32.mrf.mxu2 }
 0x281   :  { %v1860_v8 = vadd.f32 %v12887_v30, %v1326_v50  ;;  %v12984_v30 = vld [vmem:[#allocation2 + $0xa9] sm:$0xff] }
 0x282   :  { %v2291_v34 = vpop.f32.mrf.mxu3  ;;  %10967 = vmatmul.msk.f32.gmra.mxu0 %vm97_vm1, %v12952_v49 }
 0x283   :  { %v12962_v15 = vadd.f32 %v2291_v34, %v1859_v35  ;;  %v793_v34 = vadd.f32 %v12683_v33, %v12881_v63 }
 0x285   :  { %16509 = vst [vmem:[#allocation33_spill] sm:$0xff] %v12962_v15  ;;  %v1232_v48 = vpop.f32.mrf.mxu1  ;;  %11092 = vmatmul.msk.f32.gmra.mxu2 %vm97_vm1, %v3484_v22 }
 0x287   :  { %10953 = vmatmul.msk.f32.gmra.mxu3 %vm97_vm1, %v1940_v28  ;;  %v12966_v14 = vpop.f32.mrf.mxu0  ;;  %v1327_v28 = vadd.f32 %v1229_v44, %v793_v34  ;;  %v3486_v44 = vld [vmem:[#allocation2 + $0x68] sm:$0xff] }
 0x288   :  { %11023 = vmatmul.msk.f32.vlgmr.msra.gmra.mxu1 %vm97_vm1, %v2946_v46  ;;  %v12971_v2 = vpop.f32.mrf.mxu2 }
 0x289   :  { %v1861_v63 = vadd.f32 %v12907_v7, %v1327_v28  ;;  %v13001_v7 = vld [vmem:[#allocation2 + $0xb1] sm:$0xff] }
 0x28a   :  { %v2294_v35 = vpop.f32.mrf.mxu3  ;;  %10968 = vmatmul.msk.f32.gmra.mxu0 %vm97_vm1, %v12968_v0 }
 0x28b   :  { %v12978_v22 = vadd.f32 %v2294_v35, %v1860_v8  ;;  %v794_v35 = vadd.f32 %v12683_v33, %v12901_v6 }
 0x28d   :  { %16510 = vst [vmem:[#allocation34_spill] sm:$0xff] %v12978_v22  ;;  %v1235_v15 = vpop.f32.mrf.mxu1  ;;  %11093 = vmatmul.msk.f32.gmra.mxu2 %vm97_vm1, %v3485_v58  ;;  %v1328_v34 = vadd.f32 %v1232_v48, %v794_v35  ;;  %v2948_v22 = vld [vmem:[#allocation2 + $0x32] sm:$0xff] }
 0x28e   :  { %v3487_v48 = vld [vmem:[#allocation2 + $0x78] sm:$0xff] }
 0x28f   :  { %10954 = vmatmul.msk.f32.gmra.mxu3 %vm97_vm1, %v1941_v32  ;;  %v12982_v46 = vpop.f32.mrf.mxu0  ;;  %v1862_v6 = vadd.f32 %v12923_v51, %v1328_v34  ;;  %v13018_v51 = vld [vmem:[#allocation2 + $0xc1] sm:$0xff] }
 0x290   :  { %11024 = vmatmul.msk.f32.gmra.mxu1 %vm97_vm1, %v2947_v3  ;;  %v12987_v50 = vpop.f32.mrf.mxu2 }
 0x292   :  { %v2297_v8 = vpop.f32.mrf.mxu3  ;;  %10969 = vmatmul.msk.f32.gmra.mxu0 %vm97_vm1, %v12984_v30 }
 0x293   :  { %v12994_v58 = vadd.f32 %v2297_v8, %v1861_v63  ;;  %v795_v8 = vadd.f32 %v12683_v33, %v12918_v23 }
 0x295   :  { %16511 = vst [vmem:[#allocation35_spill] sm:$0xff] %v12994_v58  ;;  %v1238_v32 = vpop.f32.mrf.mxu1  ;;  %11094 = vmatmul.msk.f32.gmra.mxu2 %vm97_vm1, %v3486_v44  ;;  %v2949_v58 = vld [vmem:[#allocation2 + $0x3a] sm:$0xff] }
 0x297   :  { %11155 = vmatmul.msk.f32.vlgmr.msra.gmra.mxu3 %vm97_vm1, %v12816_v36  ;;  %v12999_v3 = vpop.f32.mrf.mxu0  ;;  %v1329_v36 = vadd.f32 %v1235_v15, %v795_v8  ;;  %v3488_v15 = vld [vmem:[#allocation2 + $0x80] sm:$0xff] }
 0x298   :  { %11025 = vmatmul.msk.f32.gmra.mxu1 %vm97_vm1, %v2948_v22  ;;  %v13004_v28 = vpop.f32.mrf.mxu2 }
 0x299   :  { %v1863_v23 = vadd.f32 %v12939_v5, %v1329_v36  ;;  %v13035_v5 = vld [vmem:[#allocation2 + $0xc9] sm:$0xff] }
 0x29a   :  { %v2300_v63 = vpop.f32.mrf.mxu3  ;;  %10970 = vmatmul.msk.f32.gmra.mxu0 %vm97_vm1, %v13001_v7 }
 0x29b   :  { %v13011_v44 = vadd.f32 %v2300_v63, %v1862_v6  ;;  %v796_v63 = vadd.f32 %v12683_v33, %v12934_v40 }
 0x29d   :  { %16512 = vst [vmem:[#allocation36_spill] sm:$0xff] %v13011_v44  ;;  %v1241_v35 = vpop.f32.mrf.mxu1  ;;  %11095 = vmatmul.msk.f32.gmra.mxu2 %vm97_vm1, %v3487_v48  ;;  %v2950_v44 = vld [vmem:[#allocation2 + $0x4a] sm:$0xff] }
 0x29f   :  { %11156 = vmatmul.msk.f32.gmra.mxu3 %vm97_vm1, %v12832_v55  ;;  %v13016_v22 = vpop.f32.mrf.mxu0  ;;  %v1330_v55 = vadd.f32 %v1238_v32, %v796_v63  ;;  %v3489_v32 = vld [vmem:[#allocation2 + $0x90] sm:$0xff] }
 0x2a0   :  { %11026 = vmatmul.msk.f32.gmra.mxu1 %vm97_vm1, %v2949_v58  ;;  %v13021_v34 = vpop.f32.mrf.mxu2 }
 0x2a1   :  { %v1864_v40 = vadd.f32 %v12955_v56, %v1330_v55  ;;  %v13052_v56 = vld [vmem:[#allocation2 + $0xd9] sm:$0xff] }
 0x2a2   :  { %v2303_v6 = vpop.f32.mrf.mxu3  ;;  %10971 = vmatmul.msk.f32.gmra.mxu0 %vm97_vm1, %v13018_v51 }
 0x2a3   :  { %v13028_v48 = vadd.f32 %v2303_v6, %v1863_v23  ;;  %v797_v6 = vadd.f32 %v12683_v33, %v12950_v18 }
 0x2a5   :  { %16513 = vst [vmem:[#allocation37_spill] sm:$0xff] %v13028_v48  ;;  %v1244_v8 = vpop.f32.mrf.mxu1  ;;  %11096 = vmatmul.msk.f32.gmra.mxu2 %vm97_vm1, %v3488_v15  ;;  %v2951_v48 = vld [vmem:[#allocation2 + $0x52] sm:$0xff] }
 0x2a7   :  { %11157 = vmatmul.msk.f32.gmra.mxu3 %vm97_vm1, %v12848_v42  ;;  %v13033_v58 = vpop.f32.mrf.mxu0  ;;  %v1331_v42 = vadd.f32 %v1241_v35, %v797_v6  ;;  %v3490_v35 = vld [vmem:[#allocation2 + $0x98] sm:$0xff] }
 0x2a8   :  { %11027 = vmatmul.msk.f32.gmra.mxu1 %vm97_vm1, %v2950_v44  ;;  %v13038_v36 = vpop.f32.mrf.mxu2 }
 0x2a9   :  { %v1865_v18 = vadd.f32 %v12971_v2, %v1331_v42  ;;  %v13069_v2 = vld [vmem:[#allocation2 + $0xe1] sm:$0xff] }
 0x2aa   :  { %v2306_v23 = vpop.f32.mrf.mxu3  ;;  %10972 = vmatmul.msk.f32.gmra.mxu0 %vm97_vm1, %v13035_v5 }
 0x2ab   :  { %v13045_v15 = vadd.f32 %v2306_v23, %v1864_v40  ;;  %v798_v23 = vadd.f32 %v12683_v33, %v12966_v14 }
 0x2ad   :  { %16514 = vst [vmem:[#allocation38_spill] sm:$0xff] %v13045_v15  ;;  %v1247_v63 = vpop.f32.mrf.mxu1  ;;  %11097 = vmatmul.msk.f32.gmra.mxu2 %vm97_vm1, %v3489_v32  ;;  %v2952_v15 = vld [vmem:[#allocation2 + $0x62] sm:$0xff] }
 0x2af   :  { %11158 = vmatmul.msk.f32.gmra.mxu3 %vm97_vm1, %v12864_v19  ;;  %v13050_v44 = vpop.f32.mrf.mxu0  ;;  %v1332_v19 = vadd.f32 %v1244_v8, %v798_v23  ;;  %v3491_v8 = vld [vmem:[#allocation2 + $0xa8] sm:$0xff] }
 0x2b0   :  { %11028 = vmatmul.msk.f32.gmra.mxu1 %vm97_vm1, %v2951_v48  ;;  %v13055_v55 = vpop.f32.mrf.mxu2 }
 0x2b1   :  { %v1866_v14 = vadd.f32 %v12987_v50, %v1332_v19  ;;  %v13086_v50 = vld [vmem:[#allocation2 + $0xf1] sm:$0xff] }
 0x2b2   :  { %v2309_v40 = vpop.f32.mrf.mxu3  ;;  %10973 = vmatmul.msk.f32.gmra.mxu0 %vm97_vm1, %v13052_v56 }
 0x2b3   :  { %v13062_v32 = vadd.f32 %v2309_v40, %v1865_v18  ;;  %v799_v40 = vadd.f32 %v12683_v33, %v12982_v46 }
 0x2b5   :  { %16515 = vst [vmem:[#allocation39_spill] sm:$0xff] %v13062_v32  ;;  %v1250_v6 = vpop.f32.mrf.mxu1  ;;  %11098 = vmatmul.msk.f32.gmra.mxu2 %vm97_vm1, %v3490_v35  ;;  %v2953_v32 = vld [vmem:[#allocation2 + $0x6a] sm:$0xff] }
 0x2b7   :  { %11159 = vmatmul.msk.f32.gmra.mxu3 %vm97_vm1, %v12883_v52  ;;  %v13067_v48 = vpop.f32.mrf.mxu0  ;;  %v1333_v52 = vadd.f32 %v1247_v63, %v799_v40  ;;  %v3492_v63 = vld [vmem:[#allocation2 + $0xb0] sm:$0xff] }
 0x2b8   :  { %11029 = vmatmul.msk.f32.gmra.mxu1 %vm97_vm1, %v2952_v15  ;;  %v13072_v42 = vpop.f32.mrf.mxu2 }
 0x2b9   :  { %v1867_v46 = vadd.f32 %v13004_v28, %v1333_v52  ;;  %v13103_v28 = vld [vmem:[#allocation2 + $0xf9] sm:$0xff] }
 0x2ba   :  { %v2312_v18 = vpop.f32.mrf.mxu3  ;;  %10974 = vmatmul.msk.f32.gmra.mxu0 %vm97_vm1, %v13069_v2 }
 0x2bb   :  { %v13079_v35 = vadd.f32 %v2312_v18, %v1866_v14  ;;  %v800_v18 = vadd.f32 %v12683_v33, %v12999_v3 }
 0x2bd   :  { %16516 = vst [vmem:[#allocation40_spill] sm:$0xff] %v13079_v35  ;;  %v1253_v23 = vpop.f32.mrf.mxu1  ;;  %11099 = vmatmul.msk.f32.gmra.mxu2 %vm97_vm1, %v3491_v8  ;;  %v2954_v35 = vld [vmem:[#allocation2 + $0x7a] sm:$0xff] }
 0x2bf   :  { %11160 = vmatmul.msk.f32.gmra.mxu3 %vm97_vm1, %v12903_v59  ;;  %v13084_v15 = vpop.f32.mrf.mxu0  ;;  %v1334_v59 = vadd.f32 %v1250_v6, %v800_v18  ;;  %v3493_v6 = vld [vmem:[#allocation2 + $0xc0] sm:$0xff] }
 0x2c0   :  { %11030 = vmatmul.msk.f32.gmra.mxu1 %vm97_vm1, %v2953_v32  ;;  %v13089_v19 = vpop.f32.mrf.mxu2 }
 0x2c1   :  { %v1868_v3 = vadd.f32 %v13021_v34, %v1334_v59  ;;  %v13120_v34 = vld [vmem:[#allocation2 + $0x109] sm:$0xff] }
 0x2c2   :  { %v2315_v14 = vpop.f32.mrf.mxu3  ;;  %10975 = vmatmul.msk.f32.gmra.mxu0 %vm97_vm1, %v13086_v50 }
 0x2c3   :  { %v13096_v8 = vadd.f32 %v2315_v14, %v1867_v46  ;;  %v801_v14 = vadd.f32 %v12683_v33, %v13016_v22 }
 0x2c5   :  { %16517 = vst [vmem:[#allocation41_spill] sm:$0xff] %v13096_v8  ;;  %v1256_v40 = vpop.f32.mrf.mxu1  ;;  %11100 = vmatmul.msk.f32.gmra.mxu2 %vm97_vm1, %v3492_v63  ;;  %v2955_v8 = vld [vmem:[#allocation2 + $0x82] sm:$0xff] }
 0x2c7   :  { %11161 = vmatmul.msk.f32.gmra.mxu3 %vm97_vm1, %v12920_v1  ;;  %v13101_v32 = vpop.f32.mrf.mxu0  ;;  %v1335_v1 = vadd.f32 %v1253_v23, %v801_v14  ;;  %v3494_v23 = vld [vmem:[#allocation2 + $0xc8] sm:$0xff]  ;;  %v2956_v14 = vld [vmem:[#allocation2 + $0x92] sm:$0xff] }
 0x2c8   :  { %11031 = vmatmul.msk.f32.gmra.mxu1 %vm97_vm1, %v2954_v35  ;;  %v13106_v52 = vpop.f32.mrf.mxu2 }
 0x2c9   :  { %v1869_v38 = vadd.f32 %v13038_v36, %v1335_v1  ;;  %v13135_v36 = vld [vmem:[#allocation2 + $0x111] sm:$0xff] }
 0x2ca   :  { %v2318_v46 = vpop.f32.mrf.mxu3  ;;  %10976 = vmatmul.msk.f32.gmra.mxu0 %vm97_vm1, %v13103_v28 }
 0x2cb   :  { %v13113_v63 = vadd.f32 %v2318_v46, %v1868_v3  ;;  %v802_v3 = vadd.f32 %v12683_v33, %v13033_v58 }
 0x2cd   :  { %16518 = vst [vmem:[#allocation42_spill] sm:$0xff] %v13113_v63  ;;  %v1259_v18 = vpop.f32.mrf.mxu1  ;;  %11101 = vmatmul.msk.f32.gmra.mxu2 %vm97_vm1, %v3493_v6 }
 0x2cf   :  { %11162 = vmatmul.msk.f32.gmra.mxu3 %vm97_vm1, %v12936_v61  ;;  %v13118_v35 = vpop.f32.mrf.mxu0  ;;  %v1336_v61 = vadd.f32 %v1256_v40, %v802_v3  ;;  %v803_v40 = vadd.f32 %v12683_v33, %v11985_v24  ;;  %v2957_v3 = vld [vmem:[#allocation2 + $0x9a] sm:$0xff] }
 0x2d0   :  { %11032 = vmatmul.msk.f32.gmra.mxu1 %vm97_vm1, %v2955_v8  ;;  %v1802_v59 = vpop.f32.mrf.mxu2 }
 0x2d1   :  { %v1870_v63 = vadd.f32 %v13055_v55, %v1336_v61  ;;  %v13150_v55 = vld [vmem:[#allocation2 + $0x121] sm:$0xff] }
 0x2d2   :  { %v2321_v22 = vpop.f32.mrf.mxu3  ;;  %10977 = vmatmul.msk.f32.gmra.mxu0 %vm97_vm1, %v13120_v34 }
 0x2d3   :  { %v13128_v46 = vadd.f32 %v2321_v22, %v1869_v38  ;;  %v3495_v38 = vld [vmem:[#allocation2 + $0xd8] sm:$0xff] }
 0x2d5   :  { %16519 = vst [vmem:[#allocation43_spill] sm:$0xff] %v13128_v46  ;;  %v1262_v6 = vpop.f32.mrf.mxu1  ;;  %11102 = vmatmul.msk.f32.gmra.mxu2 %vm97_vm1, %v3494_v23 }
 0x2d7   :  { %11163 = vmatmul.msk.f32.gmra.mxu3 %vm97_vm1, %v12952_v49  ;;  %v13133_v8 = vpop.f32.mrf.mxu0  ;;  %v1337_v49 = vadd.f32 %v1259_v18, %v803_v40  ;;  %v804_v18 = vadd.f32 %v12683_v33, %v11999_v31 }
 0x2d8   :  { %11033 = vmatmul.msk.f32.gmra.mxu1 %vm97_vm1, %v2956_v14  ;;  %v1805_v1 = vpop.f32.mrf.mxu2 }
 0x2d9   :  { %v1871_v46 = vadd.f32 %v13072_v42, %v1337_v49  ;;  %v13167_v49 = vld [vmem:[#allocation2 + $0x129] sm:$0xff] }
 0x2da   :  { %v2324_v58 = vpop.f32.mrf.mxu3  ;;  %10978 = vmatmul.msk.f32.gmra.mxu0 %vm97_vm1, %v13135_v36 }
 0x2db   :  { %v13143_v22 = vadd.f32 %v2324_v58, %v1870_v63  ;;  %v3496_v63 = vld [vmem:[#allocation2 + $0xe0] sm:$0xff] }
 0x2dd   :  { %16520 = vst [vmem:[#allocation44_spill] sm:$0xff] %v13143_v22  ;;  %v1265_v23 = vpop.f32.mrf.mxu1  ;;  %11103 = vmatmul.msk.f32.gmra.mxu2 %vm97_vm1, %v3495_v38  ;;  %v1338_v38 = vadd.f32 %v1262_v6, %v804_v18  ;;  %v2958_v22 = vld [vmem:[#allocation2 + $0xaa] sm:$0xff] }
 0x2de   :  { %v3497_v6 = vld [vmem:[#allocation2 + $0xf0] sm:$0xff] }
 0x2df   :  { %11164 = vmatmul.msk.f32.gmra.mxu3 %vm97_vm1, %v12968_v0  ;;  %v13148_v14 = vpop.f32.mrf.mxu0  ;;  %v806_v0 = vadd.f32 %v12683_v33, %v12012_v37 }
 0x2e0   :  { %11034 = vmatmul.msk.f32.gmra.mxu1 %vm97_vm1, %v2957_v3  ;;  %v1808_v61 = vpop.f32.mrf.mxu2 }
 0x2e2   :  { %v2327_v24 = vpop.f32.mrf.mxu3  ;;  %10979 = vmatmul.msk.f32.gmra.mxu0 %vm97_vm1, %v13150_v55 }
 0x2e3   :  { %v13158_v58 = vadd.f32 %v2327_v24, %v1871_v46  ;;  %v1872_v46 = vadd.f32 %v13089_v19, %v1338_v38  ;;  %v805_v24 = vadd.f32 %v12683_v33, %v12015_v39  ;;  %v13184_v38 = vld [vmem:[#allocation2 + $0x139] sm:$0xff] }
 0x2e5   :  { %v1268_v40 = vpop.f32.mrf.mxu1  ;;  %11104 = vmatmul.msk.f32.gmra.mxu2 %vm97_vm1, %v3496_v63  ;;  %v1339_v18 = vadd.f32 %v1265_v23, %v805_v24  ;;  %v3498_v23 = vld [vmem:[#allocation2 + $0xf8] sm:$0xff] }
 0x2e6   :  { %v1340_v3 = vadd.f32 %v1268_v40, %v806_v0  ;;  %v2959_v0 = vld [vmem:[#allocation2 + $0xb2] sm:$0xff] }
 0x2e7   :  { %11165 = vmatmul.msk.f32.gmra.mxu3 %vm97_vm1, %v12984_v30  ;;  %v13165_v42 = vpop.f32.mrf.mxu0  ;;  %v807_v30 = vadd.f32 %v12683_v33, %v12028_v45 }
 0x2e8   :  { %v1874_v20 = vadd.f32 %v1802_v59, %v1340_v3  ;;  %11035 = vmatmul.msk.f32.gmra.mxu1 %vm97_vm1, %v2958_v22  ;;  %v1811_v31 = vpop.f32.mrf.mxu2  ;;  %v1873_v3 = vadd.f32 %v13106_v52, %v1339_v18  ;;  %v13199_v52 = vld [vmem:[#allocation2 + $0x141] sm:$0xff] }
 0x2ea   :  { %v2330_v37 = vpop.f32.mrf.mxu3  ;;  %10980 = vmatmul.msk.f32.gmra.mxu0 %vm97_vm1, %v13167_v49 }
 0x2eb   :  { %v13175_v63 = vadd.f32 %v2330_v37, %v1872_v46 }
 0x2ed   :  { %v1271_v59 = vpop.f32.mrf.mxu1  ;;  %11105 = vmatmul.msk.f32.gmra.mxu2 %vm97_vm1, %v3497_v6  ;;  %v2960_v6 = vld [vmem:[#allocation2 + $0xc2] sm:$0xff] }
 0x2ee   :  { %v1341_v22 = vadd.f32 %v1271_v59, %v807_v30 }
 0x2ef   :  { %11166 = vmatmul.msk.f32.gmra.mxu3 %vm97_vm1, %v13001_v7  ;;  %v13182_v19 = vpop.f32.mrf.mxu0  ;;  %v808_v7 = vadd.f32 %v12683_v33, %v12042_v53  ;;  %v3499_v53 = vld [vmem:[#allocation2 + $0x108] sm:$0xff] }
 0x2f0   :  { %v1875_v40 = vadd.f32 %v1805_v1, %v1341_v22  ;;  %11036 = vmatmul.msk.f32.gmra.mxu1 %vm97_vm1, %v2959_v0  ;;  %v3759_v39 = vpop.f32.mrf.mxu2  ;;  %v809_v22 = vadd.f32 %v12683_v33, %v12063_v62  ;;  %v3500_v62 = vld [vmem:[#allocation2 + $0x110] sm:$0xff] }
 0x2f2   :  { %v2333_v45 = vpop.f32.mrf.mxu3  ;;  %10981 = vmatmul.msk.f32.gmra.mxu0 %vm97_vm1, %v13184_v38 }
 0x2f3   :  { %v13190_v46 = vadd.f32 %v2333_v45, %v1873_v3 }
 0x2f5   :  { %v1274_v37 = vpop.f32.mrf.mxu1  ;;  %11106 = vmatmul.msk.f32.gmra.mxu2 %vm97_vm1, %v3498_v23  ;;  %v13213_v23 = vld [vmem:[#allocation2 + $0x151] sm:$0xff] }
 0x2f6   :  { %v1342_v1 = vadd.f32 %v1274_v37, %v808_v7 }
 0x2f7   :  { %11167 = vmatmul.msk.f32.gmra.mxu3 %vm97_vm1, %v13018_v51  ;;  %v13197_v24 = vpop.f32.mrf.mxu0  ;;  %v2961_v51 = vld [vmem:[#allocation2 + $0xca] sm:$0xff] }
 0x2f8   :  { %v1876_v30 = vadd.f32 %v1808_v61, %v1342_v1  ;;  %11037 = vmatmul.msk.f32.gmra.mxu1 %vm97_vm1, %v2960_v6  ;;  %v3762_v18 = vpop.f32.mrf.mxu2  ;;  %v2882_v6 = vadd.f32 %v13050_v44, %v12087_v13  ;;  %v3501_v13 = vld [vmem:[#allocation2 + $0x120] sm:$0xff] }
 0x2fa   :  { %v2336_v59 = vpop.f32.mrf.mxu3  ;;  %10982 = vmatmul.msk.f32.gmra.mxu0 %vm97_vm1, %v13199_v52 }
 0x2fb   :  { %v13204_v0 = vadd.f32 %v2336_v59, %v1874_v20 }
 0x2fd   :  { %v1277_v3 = vpop.f32.mrf.mxu1  ;;  %11107 = vmatmul.msk.f32.gmra.mxu2 %vm97_vm1, %v3499_v53  ;;  %v13227_v53 = vld [vmem:[#allocation2 + $0x159] sm:$0xff] }
 0x2fe   :  { %v1343_v45 = vadd.f32 %v1277_v3, %v809_v22 }
 0x2ff   :  { %11168 = vmatmul.msk.f32.gmra.mxu3 %vm97_vm1, %v13035_v5  ;;  %v13211_v61 = vpop.f32.mrf.mxu0  ;;  %v2962_v5 = vld [vmem:[#allocation2 + $0xda] sm:$0xff] }
 0x300   :  { %v1877_v7 = vadd.f32 %v1811_v31, %v1343_v45  ;;  %11038 = vmatmul.msk.f32.gmra.mxu1 %vm97_vm1, %v2961_v51  ;;  %v3765_v20 = vpop.f32.mrf.mxu2  ;;  %v2883_v51 = vadd.f32 %v13067_v48, %v12107_v26  ;;  %v3502_v26 = vld [vmem:[#allocation2 + $0x128] sm:$0xff] }
 0x302   :  { %v2339_v37 = vpop.f32.mrf.mxu3  ;;  %10983 = vmatmul.msk.f32.gmra.mxu0 %vm97_vm1, %v13213_v23 }
 0x303   :  { %v13218_v33 = vadd.f32 %v2339_v37, %v1875_v40 }
 0x305   :  { %v3224_v1 = vpop.f32.mrf.mxu1  ;;  %11108 = vmatmul.msk.f32.gmra.mxu2 %vm97_vm1, %v3500_v62  ;;  %v13241_v62 = vld [vmem:[#allocation2 + $0x169] sm:$0xff] }
 0x306   :  { %v3416_v59 = vadd.f32 %v3224_v1, %v2882_v6 }
 0x307   :  { %11169 = vmatmul.msk.f32.gmra.mxu3 %vm97_vm1, %v13052_v56  ;;  %v13225_v31 = vpop.f32.mrf.mxu0  ;;  %v2963_v56 = vld [vmem:[#allocation2 + $0xe2] sm:$0xff] }
 0x308   :  { %v3951_v22 = vadd.f32 %v3759_v39, %v3416_v59  ;;  %11039 = vmatmul.msk.f32.gmra.mxu1 %vm97_vm1, %v2962_v5  ;;  %v3768_v40 = vpop.f32.mrf.mxu2  ;;  %v2884_v5 = vadd.f32 %v13084_v15, %v12127_v41  ;;  %v3503_v41 = vld [vmem:[#allocation2 + $0x138] sm:$0xff] }
 0x30a   :  { %v2342_v3 = vpop.f32.mrf.mxu3  ;;  %10984 = vmatmul.msk.f32.gmra.mxu0 %vm97_vm1, %v13227_v53 }
 0x30b   :  { %v13232_v44 = vadd.f32 %v2342_v3, %v1876_v30 }
 0x30d   :  { %16521 = vst [vmem:[#allocation45_spill] sm:$0xff] %v13232_v44  ;;  %v3227_v45 = vpop.f32.mrf.mxu1  ;;  %11109 = vmatmul.msk.f32.gmra.mxu2 %vm97_vm1, %v3501_v13  ;;  %v13255_v13 = vld [vmem:[#allocation2 + $0x171] sm:$0xff] }
 0x30e   :  { %v3417_v37 = vadd.f32 %v3227_v45, %v2883_v51 }
 0x30f   :  { %11170 = vmatmul.msk.f32.gmra.mxu3 %vm97_vm1, %v13069_v2  ;;  %v13239_v39 = vpop.f32.mrf.mxu0  ;;  %v2964_v2 = vld [vmem:[#allocation2 + $0xf2] sm:$0xff] }
 0x310   :  { %v3952_v6 = vadd.f32 %v3762_v18, %v3417_v37  ;;  %11040 = vmatmul.msk.f32.gmra.mxu1 %vm97_vm1, %v2963_v56  ;;  %v3771_v30 = vpop.f32.mrf.mxu2  ;;  %v2885_v56 = vadd.f32 %v13101_v32, %v12148_v57  ;;  %v3504_v57 = vld [vmem:[#allocation2 + $0x140] sm:$0xff] }
 0x312   :  { %v2345_v1 = vpop.f32.mrf.mxu3  ;;  %10985 = vmatmul.msk.f32.gmra.mxu0 %vm97_vm1, %v13241_v62 }
 0x313   :  { %v13246_v48 = vadd.f32 %v2345_v1, %v1877_v7 }
 0x315   :  { %16522 = vst [vmem:[#allocation46_spill] sm:$0xff] %v13246_v48  ;;  %v3230_v59 = vpop.f32.mrf.mxu1  ;;  %11110 = vmatmul.msk.f32.gmra.mxu2 %vm97_vm1, %v3502_v26  ;;  %v13269_v26 = vld [vmem:[#allocation2 + $0x181] sm:$0xff] }
 0x316   :  { %v3418_v3 = vadd.f32 %v3230_v59, %v2884_v5 }
 0x317   :  { %11171 = vmatmul.msk.f32.gmra.mxu3 %vm97_vm1, %v13086_v50  ;;  %v13253_v18 = vpop.f32.mrf.mxu0  ;;  %v2965_v50 = vld [vmem:[#allocation2 + $0xfa] sm:$0xff] }
 0x318   :  { %v3953_v51 = vadd.f32 %v3765_v20, %v3418_v3  ;;  %11041 = vmatmul.msk.f32.gmra.mxu1 %vm97_vm1, %v2964_v2  ;;  %v3774_v7 = vpop.f32.mrf.mxu2  ;;  %v2886_v2 = vadd.f32 %v13118_v35, %v12166_v11  ;;  %v3505_v11 = vld [vmem:[#allocation2 + $0x150] sm:$0xff] }
 0x31a   :  { %v4293_v45 = vpop.f32.mrf.mxu3  ;;  %10986 = vmatmul.msk.f32.gmra.mxu0 %vm97_vm1, %v13255_v13 }
 0x31b   :  { %v13260_v15 = vadd.f32 %v4293_v45, %v3951_v22 }
 0x31d   :  { %v3233_v37 = vpop.f32.mrf.mxu1  ;;  %11111 = vmatmul.msk.f32.gmra.mxu2 %vm97_vm1, %v3503_v41  ;;  %v13283_v41 = vld [vmem:[#allocation2 + $0x189] sm:$0xff] }
 0x31e   :  { %v3419_v1 = vadd.f32 %v3233_v37, %v2885_v56 }
 0x31f   :  { %11172 = vmatmul.msk.f32.gmra.mxu3 %vm97_vm1, %v13103_v28  ;;  %v13267_v20 = vpop.f32.mrf.mxu0  ;;  %v2966_v28 = vld [vmem:[#allocation2 + $0x10a] sm:$0xff] }
 0x320   :  { %v3954_v5 = vadd.f32 %v3768_v40, %v3419_v1  ;;  %11042 = vmatmul.msk.f32.gmra.mxu1 %vm97_vm1, %v2965_v50  ;;  %v3777_v22 = vpop.f32.mrf.mxu2  ;;  %v2887_v50 = vadd.f32 %v13133_v8, %v12187_v25  ;;  %v2888_v8 = vadd.f32 %v13148_v14, %v12208_v43  ;;  %v2889_v14 = vadd.f32 %v13165_v42, %v12225_v60  ;;  %v3508_v60 = vld [vmem:[#allocation2 + $0x170] sm:$0xff] }
 0x322   :  { %v4296_v59 = vpop.f32.mrf.mxu3  ;;  %10987 = vmatmul.msk.f32.gmra.mxu0 %vm97_vm1, %v13269_v26 }
 0x323   :  { %v13274_v32 = vadd.f32 %v4296_v59, %v3952_v6 }
 0x325   :  { %v3236_v3 = vpop.f32.mrf.mxu1  ;;  %11112 = vmatmul.msk.f32.gmra.mxu2 %vm97_vm1, %v3504_v57  ;;  %v2444_v57 = vld [vmem:[#allocation2 + $0x1c9] sm:$0xff] }
 0x326   :  { %v3420_v45 = vadd.f32 %v3236_v3, %v2886_v2 }
 0x327   :  { %11173 = vmatmul.msk.f32.gmra.mxu3 %vm97_vm1, %v13120_v34  ;;  %v13281_v40 = vpop.f32.mrf.mxu0  ;;  %v2967_v34 = vld [vmem:[#allocation2 + $0x112] sm:$0xff] }
 0x328   :  { %v3955_v56 = vadd.f32 %v3771_v30, %v3420_v45  ;;  %11043 = vmatmul.msk.f32.gmra.mxu1 %vm97_vm1, %v2966_v28  ;;  %v3780_v6 = vpop.f32.mrf.mxu2  ;;  %v3506_v28 = vld [vmem:[#allocation2 + $0x158] sm:$0xff] }
 0x32a   :  { %v4299_v37 = vpop.f32.mrf.mxu3  ;;  %10988 = vmatmul.msk.f32.gmra.mxu0 %vm97_vm1, %v13283_v41 }
 0x32b   :  { %v13288_v35 = vadd.f32 %v4299_v37, %v3953_v51  ;;  %v2968_v37 = vld [vmem:[#allocation2 + $0x122] sm:$0xff] }
 0x32d   :  { %v3239_v1 = vpop.f32.mrf.mxu1  ;;  %11113 = vmatmul.msk.f32.gmra.mxu2 %vm97_vm1, %v3505_v11  ;;  %v2445_v11 = vld [vmem:[#allocation2 + $0x1d1] sm:$0xff] }
 0x32e   :  { %v3421_v59 = vadd.f32 %v3239_v1, %v2887_v50 }
 0x32f   :  { %11174 = vmatmul.msk.f32.gmra.mxu3 %vm97_vm1, %v13135_v36  ;;  %v13295_v30 = vpop.f32.mrf.mxu0 }
 0x330   :  { %v3956_v2 = vadd.f32 %v3774_v7, %v3421_v59  ;;  %11044 = vmatmul.msk.f32.gmra.mxu1 %vm97_vm1, %v2967_v34  ;;  %v3783_v3 = vpop.f32.mrf.mxu2  ;;  %v3507_v34 = vld [vmem:[#allocation2 + $0x168] sm:$0xff] }
 0x332   :  { %v4302_v51 = vpop.f32.mrf.mxu3  ;;  %10989 = vmatmul.msk.f32.gmra.mxu0 %vm97_vm1, %v2444_v57  ;;  %v2969_v57 = vld [vmem:[#allocation2 + $0x12a] sm:$0xff] }
 0x333   :  { %v13299_v25 = vadd.f32 %v4302_v51, %v3954_v5  ;;  %v13319_v51 = vld [vmem:[#allocation2 + $0x1e1] sm:$0xff] }
 0x335   :  { %v3242_v45 = vpop.f32.mrf.mxu1  ;;  %11114 = vmatmul.msk.f32.gmra.mxu2 %vm97_vm1, %v3506_v28 }
 0x336   :  { %v3422_v36 = vadd.f32 %v3242_v45, %v2888_v8  ;;  %v2890_v45 = vadd.f32 %v13182_v19, %v12241_v12  ;;  %v3509_v12 = vld [vmem:[#allocation2 + $0x180] sm:$0xff] }
 0x337   :  { %11175 = vmatmul.msk.f32.gmra.mxu3 %vm97_vm1, %v13150_v55  ;;  %v13306_v7 = vpop.f32.mrf.mxu0 }
 0x338   :  { %v3957_v50 = vadd.f32 %v3777_v22, %v3422_v36  ;;  %11045 = vmatmul.msk.f32.gmra.mxu1 %vm97_vm1, %v2968_v37  ;;  %v3786_v1 = vpop.f32.mrf.mxu2 }
 0x33a   :  { %v4305_v5 = vpop.f32.mrf.mxu3  ;;  %10990 = vmatmul.msk.f32.gmra.mxu0 %vm97_vm1, %v2445_v11  ;;  %v13333_v11 = vld [vmem:[#allocation2 + $0x1e9] sm:$0xff] }
 0x33b   :  { %v13310_v43 = vadd.f32 %v4305_v5, %v3955_v56 }
 0x33d   :  { %v3245_v59 = vpop.f32.mrf.mxu1  ;;  %11115 = vmatmul.msk.f32.gmra.mxu2 %vm97_vm1, %v3507_v34 }
 0x33e   :  { %v3423_v55 = vadd.f32 %v3245_v59, %v2889_v14  ;;  %v2891_v14 = vadd.f32 %v13197_v24, %v12266_v27  ;;  %v3510_v27 = vld [vmem:[#allocation2 + $0x188] sm:$0xff] }
 0x33f   :  { %11176 = vmatmul.msk.f32.gmra.mxu3 %vm97_vm1, %v13167_v49  ;;  %v13317_v22 = vpop.f32.mrf.mxu0  ;;  %v2970_v49 = vld [vmem:[#allocation2 + $0x13a] sm:$0xff] }
 0x340   :  { %v3958_v28 = vadd.f32 %v3780_v6, %v3423_v55  ;;  %11046 = vmatmul.msk.f32.gmra.mxu1 %vm97_vm1, %v2969_v57  ;;  %v3789_v56 = vpop.f32.mrf.mxu2  ;;  %v13347_v55 = vld [vmem:[#allocation2 + $0x1f9] sm:$0xff] }
 0x342   :  { %v4308_v8 = vpop.f32.mrf.mxu3  ;;  %10991 = vmatmul.msk.f32.gmra.mxu0 %vm97_vm1, %v13319_v51 }
 0x343   :  { %v13324_v42 = vadd.f32 %v4308_v8, %v3956_v2 }
 0x345   :  { %v3248_v37 = vpop.f32.mrf.mxu1  ;;  %11116 = vmatmul.msk.f32.gmra.mxu2 %vm97_vm1, %v3508_v60 }
 0x346   :  { %v3424_v36 = vadd.f32 %v3248_v37, %v2890_v45  ;;  %v2892_v45 = vadd.f32 %v13211_v61, %v12288_v54  ;;  %v3511_v54 = vld [vmem:[#allocation2 + $0x198] sm:$0xff] }
 0x347   :  { %11177 = vmatmul.msk.f32.gmra.mxu3 %vm97_vm1, %v13184_v38  ;;  %v13331_v6 = vpop.f32.mrf.mxu0  ;;  %v2971_v38 = vld [vmem:[#allocation2 + $0x142] sm:$0xff] }
 0x348   :  { %v3959_v5 = vadd.f32 %v3783_v3, %v3424_v36  ;;  %11047 = vmatmul.msk.f32.gmra.mxu1 %vm97_vm1, %v2970_v49  ;;  %v3792_v2 = vpop.f32.mrf.mxu2  ;;  %v13361_v36 = vld [vmem:[#allocation2 + $0x201] sm:$0xff] }
 0x34a   :  { %v4311_v34 = vpop.f32.mrf.mxu3  ;;  %10992 = vmatmul.msk.f32.gmra.mxu0 %vm97_vm1, %v13333_v11 }
 0x34b   :  { %v13338_v19 = vadd.f32 %v4311_v34, %v3957_v50 }
 0x34d   :  { %v3251_v59 = vpop.f32.mrf.mxu1  ;;  %11117 = vmatmul.msk.f32.gmra.mxu2 %vm97_vm1, %v3509_v12 }
 0x34e   :  { %v3425_v57 = vadd.f32 %v3251_v59, %v2891_v14  ;;  %v2893_v14 = vadd.f32 %v13225_v31, %v12306_v10  ;;  %v3512_v10 = vld [vmem:[#allocation2 + $0x1a0] sm:$0xff] }
 0x34f   :  { %11178 = vmatmul.msk.f32.gmra.mxu3 %vm97_vm1, %v13199_v52  ;;  %v13345_v3 = vpop.f32.mrf.mxu0  ;;  %v2972_v52 = vld [vmem:[#allocation2 + $0x152] sm:$0xff] }
 0x350   :  { %v3960_v8 = vadd.f32 %v3786_v1, %v3425_v57  ;;  %11048 = vmatmul.msk.f32.gmra.mxu1 %vm97_vm1, %v2971_v38  ;;  %v3795_v50 = vpop.f32.mrf.mxu2  ;;  %v13375_v57 = vld [vmem:[#allocation2 + $0x211] sm:$0xff] }
 0x352   :  { %v4314_v60 = vpop.f32.mrf.mxu3  ;;  %10993 = vmatmul.msk.f32.gmra.mxu0 %vm97_vm1, %v13347_v55 }
 0x353   :  { %v13352_v24 = vadd.f32 %v4314_v60, %v3958_v28 }
 0x355   :  { %v3254_v37 = vpop.f32.mrf.mxu1  ;;  %11118 = vmatmul.msk.f32.gmra.mxu2 %vm97_vm1, %v3510_v27 }
 0x356   :  { %v3426_v49 = vadd.f32 %v3254_v37, %v2892_v45  ;;  %v2894_v45 = vadd.f32 %v13239_v39, %v12327_v16  ;;  %v3513_v16 = vld [vmem:[#allocation2 + $0x1e0] sm:$0xff] }
 0x357   :  { %11179 = vmatmul.msk.f32.gmra.mxu3 %vm97_vm1, %v13213_v23  ;;  %v13359_v1 = vpop.f32.mrf.mxu0  ;;  %v2973_v23 = vld [vmem:[#allocation2 + $0x15a] sm:$0xff] }
 0x358   :  { %v3961_v34 = vadd.f32 %v3789_v56, %v3426_v49  ;;  %11049 = vmatmul.msk.f32.gmra.mxu1 %vm97_vm1, %v2972_v52  ;;  %v3798_v28 = vpop.f32.mrf.mxu2  ;;  %v13389_v49 = vld [vmem:[#allocation2 + $0x219] sm:$0xff] }
 0x35a   :  { %v4317_v12 = vpop.f32.mrf.mxu3  ;;  %10994 = vmatmul.msk.f32.gmra.mxu0 %vm97_vm1, %v13361_v36 }
 0x35b   :  { %v13366_v61 = vadd.f32 %v4317_v12, %v3959_v5 }
 0x35d   :  { %v3257_v59 = vpop.f32.mrf.mxu1  ;;  %11119 = vmatmul.msk.f32.gmra.mxu2 %vm97_vm1, %v3511_v54 }
 0x35e   :  { %v3427_v38 = vadd.f32 %v3257_v59, %v2893_v14  ;;  %v2895_v14 = vadd.f32 %v13253_v18, %v12348_v47  ;;  %v3514_v47 = vld [vmem:[#allocation2 + $0x1e8] sm:$0xff] }
 0x35f   :  { %11180 = vmatmul.msk.f32.gmra.mxu3 %vm97_vm1, %v13227_v53  ;;  %v13373_v56 = vpop.f32.mrf.mxu0  ;;  %v2974_v53 = vld [vmem:[#allocation2 + $0x16a] sm:$0xff] }
 0x360   :  { %v3962_v60 = vadd.f32 %v3792_v2, %v3427_v38  ;;  %11050 = vmatmul.msk.f32.gmra.mxu1 %vm97_vm1, %v2973_v23  ;;  %v3801_v5 = vpop.f32.mrf.mxu2  ;;  %v13403_v38 = vld [vmem:[#allocation2 + $0x229] sm:$0xff] }
 0x362   :  { %v4320_v27 = vpop.f32.mrf.mxu3  ;;  %10995 = vmatmul.msk.f32.gmra.mxu0 %vm97_vm1, %v13375_v57 }
 0x363   :  { %v13380_v31 = vadd.f32 %v4320_v27, %v3960_v8 }
 0x365   :  { %16523 = vst [vmem:[#allocation47_spill] sm:$0xff] %v13380_v31  ;;  %v3260_v37 = vpop.f32.mrf.mxu1  ;;  %11120 = vmatmul.msk.f32.gmra.mxu2 %vm97_vm1, %v3512_v10 }
 0x366   :  { %v3428_v52 = vadd.f32 %v3260_v37, %v2894_v45  ;;  %v2896_v45 = vadd.f32 %v13267_v20, %v12368_v9  ;;  %v3515_v9 = vld [vmem:[#allocation2 + $0x1f8] sm:$0xff] }
 0x367   :  { %11181 = vmatmul.msk.f32.gmra.mxu3 %vm97_vm1, %v13241_v62  ;;  %v13387_v2 = vpop.f32.mrf.mxu0  ;;  %v2975_v62 = vld [vmem:[#allocation2 + $0x172] sm:$0xff] }
 0x368   :  { %v3963_v12 = vadd.f32 %v3795_v50, %v3428_v52  ;;  %11051 = vmatmul.msk.f32.gmra.mxu1 %vm97_vm1, %v2974_v53  ;;  %v3804_v8 = vpop.f32.mrf.mxu2  ;;  %v13417_v52 = vld [vmem:[#allocation2 + $0x231] sm:$0xff] }
 0x36a   :  { %v4323_v54 = vpop.f32.mrf.mxu3  ;;  %10996 = vmatmul.msk.f32.gmra.mxu0 %vm97_vm1, %v13389_v49 }
 0x36b   :  { %v13394_v39 = vadd.f32 %v4323_v54, %v3961_v34 }
 0x36d   :  { %16524 = vst [vmem:[#allocation48_spill] sm:$0xff] %v13394_v39  ;;  %v3263_v59 = vpop.f32.mrf.mxu1  ;;  %11121 = vmatmul.msk.f32.gmra.mxu2 %vm97_vm1, %v3513_v16 }
 0x36e   :  { %v3429_v23 = vadd.f32 %v3263_v59, %v2895_v14  ;;  %v2897_v14 = vadd.f32 %v13281_v40, %v12388_v29  ;;  %v3516_v29 = vld [vmem:[#allocation2 + $0x200] sm:$0xff] }
 0x36f   :  { %11182 = vmatmul.msk.f32.gmra.mxu3 %vm97_vm1, %v13255_v13  ;;  %v13401_v50 = vpop.f32.mrf.mxu0  ;;  %v2976_v13 = vld [vmem:[#allocation2 + $0x182] sm:$0xff] }
 0x370   :  { %v3964_v27 = vadd.f32 %v3798_v28, %v3429_v23  ;;  %11052 = vmatmul.msk.f32.gmra.mxu1 %vm97_vm1, %v2975_v62  ;;  %v3807_v34 = vpop.f32.mrf.mxu2  ;;  %v13431_v23 = vld [vmem:[#allocation2 + $0x241] sm:$0xff] }
 0x372   :  { %v4326_v10 = vpop.f32.mrf.mxu3  ;;  %10997 = vmatmul.msk.f32.gmra.mxu0 %vm97_vm1, %v13403_v38 }
 0x373   :  { %v13408_v18 = vadd.f32 %v4326_v10, %v3962_v60 }
 0x375   :  { %16525 = vst [vmem:[#allocation49_spill] sm:$0xff] %v13408_v18  ;;  %v3266_v37 = vpop.f32.mrf.mxu1  ;;  %11122 = vmatmul.msk.f32.gmra.mxu2 %vm97_vm1, %v3514_v47  ;;  %v16581_v18 = vld [vmem:[#allocation30_spill] sm:$0xff] }
 0x376   :  { %v3430_v53 = vadd.f32 %v3266_v37, %v2896_v45  ;;  %v2898_v45 = vadd.f32 %v13295_v30, %v12409_v4  ;;  %v4045_v37 = vld [vmem:[#allocation2 + $0x199] sm:$0xff]  ;;  %v3517_v4 = vld [vmem:[#allocation2 + $0x210] sm:$0xff] }
 0x377   :  { %11183 = vmatmul.msk.f32.gmra.mxu3 %vm97_vm1, %v13269_v26  ;;  %v13415_v28 = vpop.f32.mrf.mxu0  ;;  %v2977_v26 = vld [vmem:[#allocation2 + $0x18a] sm:$0xff] }
 0x378   :  { %v3965_v54 = vadd.f32 %v3801_v5, %v3430_v53  ;;  %11053 = vmatmul.msk.f32.gmra.mxu1 %vm97_vm1, %v2976_v13  ;;  %v3810_v60 = vpop.f32.mrf.mxu2  ;;  %v2978_v13 = vld [vmem:[#allocation2 + $0x1ca] sm:$0xff] }
 0x37a   :  { %v4329_v16 = vpop.f32.mrf.mxu3  ;;  %10998 = vmatmul.msk.f32.gmra.mxu0 %vm97_vm1, %v13417_v52 }
 0x37b   :  { %v13422_v20 = vadd.f32 %v4329_v16, %v3963_v12  ;;  %v13444_v16 = vld [vmem:[#allocation2 + $0x249] sm:$0xff] }
 0x37d   :  { %16526 = vst [vmem:[#allocation50_spill] sm:$0xff] %v13422_v20  ;;  %v3269_v59 = vpop.f32.mrf.mxu1  ;;  %11123 = vmatmul.msk.f32.gmra.mxu2 %vm97_vm1, %v3515_v9 }
 0x37e   :  { %v3431_v62 = vadd.f32 %v3269_v59, %v2897_v14  ;;  %v2899_v59 = vadd.f32 %v13306_v7, %v12430_v21  ;;  %v3518_v21 = vld [vmem:[#allocation2 + $0x218] sm:$0xff] }
 0x37f   :  { %11184 = vmatmul.msk.f32.gmra.mxu3 %vm97_vm1, %v13283_v41  ;;  %v13429_v5 = vpop.f32.mrf.mxu0 }
 0x380   :  { %v3966_v10 = vadd.f32 %v3804_v8, %v3431_v62  ;;  %11054 = vmatmul.msk.f32.gmra.mxu1 %vm97_vm1, %v2977_v26  ;;  %v3813_v12 = vpop.f32.mrf.mxu2  ;;  %v4046_v26 = vld [vmem:[#allocation2 + $0x1a1] sm:$0xff] }
 0x382   :  { %v4332_v47 = vpop.f32.mrf.mxu3  ;;  %10999 = vmatmul.msk.f32.gmra.mxu0 %vm97_vm1, %v13431_v23 }
 0x383   :  { %v13436_v40 = vadd.f32 %v4332_v47, %v3964_v27  ;;  %v2979_v47 = vld [vmem:[#allocation2 + $0x1d2] sm:$0xff] }
 0x385   :  { %16527 = vst [vmem:[#allocation51_spill] sm:$0xff] %v13436_v40  ;;  %v3272_v41 = vpop.f32.mrf.mxu1  ;;  %11124 = vmatmul.msk.f32.gmra.mxu2 %vm97_vm1, %v3516_v29 }
 0x386   :  { %v3432_v53 = vadd.f32 %v3272_v41, %v2898_v45  ;;  %v13457_v45 = vld [vmem:[#allocation2 + $0x259] sm:$0xff] }
 0x387   :  { %11185 = vmatmul.msk.f32.gmra.mxu3 %vm97_vm1, %v4045_v37  ;;  %v13442_v8 = vpop.f32.mrf.mxu0 }
 0x388   :  { %v3967_v9 = vadd.f32 %v3807_v34, %v3432_v53  ;;  %11055 = vmatmul.msk.f32.gmra.mxu1 %vm97_vm1, %v2978_v13  ;;  %v3816_v27 = vpop.f32.mrf.mxu2  ;;  %v2900_v13 = vadd.f32 %v13317_v22, %v12451_v17  ;;  %v3519_v17 = vld [vmem:[#allocation2 + $0x228] sm:$0xff] }
 0x38a   :  { %v4335_v14 = vpop.f32.mrf.mxu3  ;;  %11000 = vmatmul.msk.f32.gmra.mxu0 %vm97_vm1, %v13444_v16 }
 0x38b   :  { %v13449_v30 = vadd.f32 %v4335_v14, %v3965_v54  ;;  %v2980_v14 = vld [vmem:[#allocation2 + $0x1e2] sm:$0xff] }
 0x38d   :  { %16528 = vst [vmem:[#allocation52_spill] sm:$0xff] %v13449_v30  ;;  %v3275_v62 = vpop.f32.mrf.mxu1  ;;  %11125 = vmatmul.msk.f32.gmra.mxu2 %vm97_vm1, %v3517_v4  ;;  %v16580_v30 = vld [vmem:[#allocation29_spill] sm:$0xff] }
 0x38e   :  { %v3433_v29 = vadd.f32 %v3275_v62, %v2899_v59  ;;  %v13471_v59 = vld [vmem:[#allocation2 + $0x261] sm:$0xff] }
 0x38f   :  { %11186 = vmatmul.msk.f32.gmra.mxu3 %vm97_vm1, %v4046_v26  ;;  %v13455_v34 = vpop.f32.mrf.mxu0 }
 0x390   :  { %v3968_v37 = vadd.f32 %v3810_v60, %v3433_v29  ;;  %11056 = vmatmul.msk.f32.gmra.mxu1 %vm97_vm1, %v2979_v47  ;;  %v3819_v54 = vpop.f32.mrf.mxu2  ;;  %v16531_v47 = vld [vmem:[#allocation7_spill] sm:$0xff] }
 0x391   :  { %v2901_v29 = vadd.f32 %v13331_v6, %v16531_v47  ;;  %v3520_v6 = vld [vmem:[#allocation2 + $0x230] sm:$0xff] }
 0x392   :  { %v4338_v41 = vpop.f32.mrf.mxu3  ;;  %11001 = vmatmul.msk.f32.gmra.mxu0 %vm97_vm1, %v13457_v45 }
 0x393   :  { %v13462_v7 = vadd.f32 %v4338_v41, %v3966_v10 }
 0x395   :  { %16529 = vst [vmem:[#allocation53_spill] sm:$0xff] %v13462_v7  ;;  %v3278_v53 = vpop.f32.mrf.mxu1  ;;  %11126 = vmatmul.msk.f32.gmra.mxu2 %vm97_vm1, %v3518_v21 }
 0x396   :  { %v3434_v4 = vadd.f32 %v3278_v53, %v2900_v13  ;;  %v13485_v13 = vld [vmem:[#allocation2 + $0x271] sm:$0xff] }
 0x397   :  { %11187 = vmatmul.msk.f32.gmra.mxu3 %vm97_vm1, %v13319_v51  ;;  %v13469_v60 = vpop.f32.mrf.mxu0  ;;  %v2981_v51 = vld [vmem:[#allocation2 + $0x1ea] sm:$0xff] }
 0x398   :  { %v3969_v26 = vadd.f32 %v3813_v12, %v3434_v4  ;;  %11057 = vmatmul.msk.f32.gmra.mxu1 %vm97_vm1, %v2980_v14  ;;  %v3822_v10 = vpop.f32.mrf.mxu2 }
 0x39a   :  { %v4341_v62 = vpop.f32.mrf.mxu3  ;;  %11002 = vmatmul.msk.f32.gmra.mxu0 %vm97_vm1, %v13471_v59 }
 0x39b   :  { %v13476_v22 = vadd.f32 %v4341_v62, %v3967_v9  ;;  %v16533_v62 = vld [vmem:[#allocation8_spill] sm:$0xff] }
 0x39d   :  { %16530 = vst [vmem:[#allocation54_spill] sm:$0xff] %v13476_v22  ;;  %v3281_v41 = vpop.f32.mrf.mxu1  ;;  %11127 = vmatmul.msk.f32.gmra.mxu2 %vm97_vm1, %v3519_v17  ;;  %v2902_v17 = vadd.f32 %v13345_v3, %v16533_v62  ;;  %v3521_v3 = vld [vmem:[#allocation2 + $0x240] sm:$0xff]  ;;  %v16579_v22 = vld [vmem:[#allocation28_spill] sm:$0xff] }
 0x39e   :  { %v3435_v21 = vadd.f32 %v3281_v41, %v2901_v29  ;;  %v13499_v41 = vld [vmem:[#allocation2 + $0x279] sm:$0xff] }
 0x39f   :  { %11188 = vmatmul.msk.f32.gmra.mxu3 %vm97_vm1, %v13333_v11  ;;  %v13483_v12 = vpop.f32.mrf.mxu0  ;;  %v2982_v11 = vld [vmem:[#allocation2 + $0x1fa] sm:$0xff] }
 0x3a0   :  { %v3970_v53 = vadd.f32 %v3816_v27, %v3435_v21  ;;  %11058 = vmatmul.msk.f32.gmra.mxu1 %vm97_vm1, %v2981_v51  ;;  %v3825_v9 = vpop.f32.mrf.mxu2 }
 0x3a2   :  { %v4344_v14 = vpop.f32.mrf.mxu3  ;;  %11003 = vmatmul.msk.f32.gmra.mxu0 %vm97_vm1, %v13485_v13 }
 0x3a3   :  { %v13490_v4 = vadd.f32 %v4344_v14, %v3968_v37 }
 0x3a5   :  { %16532 = vst [vmem:[#allocation7_spill] sm:$0xff] %v13490_v4  ;;  %v3284_v47 = vpop.f32.mrf.mxu1  ;;  %11128 = vmatmul.msk.f32.gmra.mxu2 %vm97_vm1, %v3520_v6  ;;  %v16535_v6 = vld [vmem:[#allocation9_spill] sm:$0xff] }
 0x3a6   :  { %v3436_v29 = vadd.f32 %v3284_v47, %v2902_v17  ;;  %v2903_v62 = vadd.f32 %v13359_v1, %v16535_v6  ;;  %v3522_v1 = vld [vmem:[#allocation2 + $0x248] sm:$0xff] }
 0x3a7   :  { %11189 = vmatmul.msk.f32.gmra.mxu3 %vm97_vm1, %v13347_v55  ;;  %v13497_v27 = vpop.f32.mrf.mxu0  ;;  %v2983_v55 = vld [vmem:[#allocation2 + $0x202] sm:$0xff] }
 0x3a8   :  { %v3971_v51 = vadd.f32 %v3819_v54, %v3436_v29  ;;  %11059 = vmatmul.msk.f32.gmra.mxu1 %vm97_vm1, %v2982_v11  ;;  %v3828_v37 = vpop.f32.mrf.mxu2  ;;  %v13513_v11 = vld [vmem:[#allocation2 + $0x289] sm:$0xff] }
 0x3aa   :  { %v4347_v21 = vpop.f32.mrf.mxu3  ;;  %11004 = vmatmul.msk.f32.gmra.mxu0 %vm97_vm1, %v13499_v41 }
 0x3ab   :  { %v13504_v14 = vadd.f32 %v4347_v21, %v3969_v26 }
 0x3ad   :  { %16534 = vst [vmem:[#allocation8_spill] sm:$0xff] %v13504_v14  ;;  %v3287_v17 = vpop.f32.mrf.mxu1  ;;  %11129 = vmatmul.msk.f32.gmra.mxu2 %vm97_vm1, %v3521_v3  ;;  %v16537_v3 = vld [vmem:[#allocation10_spill] sm:$0xff] }
 0x3ae   :  { %v3437_v47 = vadd.f32 %v3287_v17, %v2903_v62  ;;  %v2904_v62 = vadd.f32 %v13373_v56, %v16537_v3  ;;  %v3523_v56 = vld [vmem:[#allocation2 + $0x258] sm:$0xff] }
 0x3af   :  { %11190 = vmatmul.msk.f32.gmra.mxu3 %vm97_vm1, %v13361_v36  ;;  %v13511_v54 = vpop.f32.mrf.mxu0  ;;  %v2984_v36 = vld [vmem:[#allocation2 + $0x212] sm:$0xff] }
 0x3b0   :  { %v3972_v29 = vadd.f32 %v3822_v10, %v3437_v47  ;;  %11060 = vmatmul.msk.f32.gmra.mxu1 %vm97_vm1, %v2983_v55  ;;  %v3831_v26 = vpop.f32.mrf.mxu2  ;;  %v13527_v55 = vld [vmem:[#allocation2 + $0x291] sm:$0xff] }
 0x3b2   :  { %v4350_v21 = vpop.f32.mrf.mxu3  ;;  %11005 = vmatmul.msk.f32.gmra.mxu0 %vm97_vm1, %v13513_v11 }
 0x3b3   :  { %v13518_v6 = vadd.f32 %v4350_v21, %v3970_v53 }
 0x3b5   :  { %16536 = vst [vmem:[#allocation9_spill] sm:$0xff] %v13518_v6  ;;  %v3290_v17 = vpop.f32.mrf.mxu1  ;;  %11130 = vmatmul.msk.f32.gmra.mxu2 %vm97_vm1, %v3522_v1  ;;  %v16539_v1 = vld [vmem:[#allocation11_spill] sm:$0xff] }
 0x3b6   :  { %v3438_v48 = vadd.f32 %v3290_v17, %v2904_v62  ;;  %v2905_v62 = vadd.f32 %v13387_v2, %v16539_v1  ;;  %v3524_v2 = vld [vmem:[#allocation2 + $0x260] sm:$0xff] }
 0x3b7   :  { %11191 = vmatmul.msk.f32.gmra.mxu3 %vm97_vm1, %v13375_v57  ;;  %v13525_v10 = vpop.f32.mrf.mxu0  ;;  %v2985_v57 = vld [vmem:[#allocation2 + $0x21a] sm:$0xff] }
 0x3b8   :  { %v3973_v47 = vadd.f32 %v3825_v9, %v3438_v48  ;;  %11061 = vmatmul.msk.f32.gmra.mxu1 %vm97_vm1, %v2984_v36  ;;  %v3834_v53 = vpop.f32.mrf.mxu2  ;;  %v13541_v9 = vld [vmem:[#allocation2 + $0x2a1] sm:$0xff] }
 0x3ba   :  { %v4353_v21 = vpop.f32.mrf.mxu3  ;;  %11006 = vmatmul.msk.f32.gmra.mxu0 %vm97_vm1, %v13527_v55 }
 0x3bb   :  { %v13532_v3 = vadd.f32 %v4353_v21, %v3971_v51 }
 0x3bd   :  { %16538 = vst [vmem:[#allocation10_spill] sm:$0xff] %v13532_v3  ;;  %v3293_v17 = vpop.f32.mrf.mxu1  ;;  %11131 = vmatmul.msk.f32.gmra.mxu2 %vm97_vm1, %v3523_v56  ;;  %v16541_v56 = vld [vmem:[#allocation12_spill] sm:$0xff] }
 0x3be   :  { %v3439_v6 = vadd.f32 %v3293_v17, %v2905_v62  ;;  %v2906_v62 = vadd.f32 %v13401_v50, %v16541_v56  ;;  %v3525_v50 = vld [vmem:[#allocation2 + $0x270] sm:$0xff] }
 0x3bf   :  { %11192 = vmatmul.msk.f32.gmra.mxu3 %vm97_vm1, %v13389_v49  ;;  %v13539_v48 = vpop.f32.mrf.mxu0  ;;  %v2986_v49 = vld [vmem:[#allocation2 + $0x22a] sm:$0xff] }
 0x3c0   :  { %v3974_v36 = vadd.f32 %v3828_v37, %v3439_v6  ;;  %11062 = vmatmul.msk.f32.gmra.mxu1 %vm97_vm1, %v2985_v57  ;;  %v3837_v51 = vpop.f32.mrf.mxu2  ;;  %v13555_v6 = vld [vmem:[#allocation2 + $0x2a9] sm:$0xff] }
 0x3c2   :  { %v4356_v21 = vpop.f32.mrf.mxu3  ;;  %11007 = vmatmul.msk.f32.gmra.mxu0 %vm97_vm1, %v13541_v9 }
 0x3c3   :  { %v13546_v1 = vadd.f32 %v4356_v21, %v3972_v29 }
 0x3c5   :  { %16540 = vst [vmem:[#allocation11_spill] sm:$0xff] %v13546_v1  ;;  %v3296_v17 = vpop.f32.mrf.mxu1  ;;  %11132 = vmatmul.msk.f32.gmra.mxu2 %vm97_vm1, %v3524_v2  ;;  %v16543_v2 = vld [vmem:[#allocation13_spill] sm:$0xff] }
 0x3c6   :  { %v3440_v3 = vadd.f32 %v3296_v17, %v2906_v62  ;;  %v2907_v62 = vadd.f32 %v13415_v28, %v16543_v2  ;;  %v3526_v28 = vld [vmem:[#allocation2 + $0x278] sm:$0xff] }
 0x3c7   :  { %11193 = vmatmul.msk.f32.gmra.mxu3 %vm97_vm1, %v13403_v38  ;;  %v13553_v37 = vpop.f32.mrf.mxu0  ;;  %v2987_v38 = vld [vmem:[#allocation2 + $0x232] sm:$0xff] }
 0x3c8   :  { %v3975_v57 = vadd.f32 %v3831_v26, %v3440_v3  ;;  %11063 = vmatmul.msk.f32.gmra.mxu1 %vm97_vm1, %v2986_v49  ;;  %v3840_v29 = vpop.f32.mrf.mxu2  ;;  %v13569_v3 = vld [vmem:[#allocation2 + $0x2b9] sm:$0xff] }
 0x3ca   :  { %v4359_v21 = vpop.f32.mrf.mxu3  ;;  %11008 = vmatmul.msk.f32.gmra.mxu0 %vm97_vm1, %v13555_v6 }
 0x3cb   :  { %v13560_v56 = vadd.f32 %v4359_v21, %v3973_v47 }
 0x3cd   :  { %16542 = vst [vmem:[#allocation12_spill] sm:$0xff] %v13560_v56  ;;  %v3299_v17 = vpop.f32.mrf.mxu1  ;;  %11133 = vmatmul.msk.f32.gmra.mxu2 %vm97_vm1, %v3525_v50  ;;  %v16545_v50 = vld [vmem:[#allocation14_spill] sm:$0xff] }
 0x3ce   :  { %v3441_v1 = vadd.f32 %v3299_v17, %v2907_v62  ;;  %v2908_v62 = vadd.f32 %v13429_v5, %v16545_v50  ;;  %v3527_v5 = vld [vmem:[#allocation2 + $0x288] sm:$0xff] }
 0x3cf   :  { %11194 = vmatmul.msk.f32.gmra.mxu3 %vm97_vm1, %v13417_v52  ;;  %v13567_v26 = vpop.f32.mrf.mxu0  ;;  %v2988_v52 = vld [vmem:[#allocation2 + $0x242] sm:$0xff] }
 0x3d0   :  { %v3976_v49 = vadd.f32 %v3834_v53, %v3441_v1  ;;  %11064 = vmatmul.msk.f32.gmra.mxu1 %vm97_vm1, %v2987_v38  ;;  %v3843_v47 = vpop.f32.mrf.mxu2  ;;  %v13583_v1 = vld [vmem:[#allocation2 + $0x2c1] sm:$0xff] }
 0x3d2   :  { %v4362_v21 = vpop.f32.mrf.mxu3  ;;  %11009 = vmatmul.msk.f32.gmra.mxu0 %vm97_vm1, %v13569_v3 }
 0x3d3   :  { %v13574_v2 = vadd.f32 %v4362_v21, %v3974_v36 }
 0x3d5   :  { %16544 = vst [vmem:[#allocation13_spill] sm:$0xff] %v13574_v2  ;;  %v3302_v17 = vpop.f32.mrf.mxu1  ;;  %11134 = vmatmul.msk.f32.gmra.mxu2 %vm97_vm1, %v3526_v28  ;;  %v16547_v28 = vld [vmem:[#allocation15_spill] sm:$0xff] }
 0x3d6   :  { %v3442_v56 = vadd.f32 %v3302_v17, %v2908_v62  ;;  %v2909_v62 = vadd.f32 %v13442_v8, %v16547_v28  ;;  %v3528_v8 = vld [vmem:[#allocation2 + $0x290] sm:$0xff] }
 0x3d7   :  { %11195 = vmatmul.msk.f32.gmra.mxu3 %vm97_vm1, %v13431_v23  ;;  %v13581_v53 = vpop.f32.mrf.mxu0  ;;  %v2989_v23 = vld [vmem:[#allocation2 + $0x24a] sm:$0xff] }
 0x3d8   :  { %v3977_v38 = vadd.f32 %v3837_v51, %v3442_v56  ;;  %11065 = vmatmul.msk.f32.gmra.mxu1 %vm97_vm1, %v2988_v52  ;;  %v3846_v36 = vpop.f32.mrf.mxu2  ;;  %v13597_v56 = vld [vmem:[#allocation2 + $0x2d1] sm:$0xff] }
 0x3da   :  { %v4365_v21 = vpop.f32.mrf.mxu3  ;;  %11010 = vmatmul.msk.f32.gmra.mxu0 %vm97_vm1, %v13583_v1 }
 0x3db   :  { %v13588_v50 = vadd.f32 %v4365_v21, %v3975_v57 }
 0x3dd   :  { %16546 = vst [vmem:[#allocation14_spill] sm:$0xff] %v13588_v50  ;;  %v3305_v17 = vpop.f32.mrf.mxu1  ;;  %11135 = vmatmul.msk.f32.gmra.mxu2 %vm97_vm1, %v3527_v5  ;;  %v16549_v5 = vld [vmem:[#allocation16_spill] sm:$0xff] }
 0x3de   :  { %v3443_v2 = vadd.f32 %v3305_v17, %v2909_v62  ;;  %v2910_v62 = vadd.f32 %v13455_v34, %v16549_v5  ;;  %v3529_v34 = vld [vmem:[#allocation2 + $0x2a0] sm:$0xff]  ;;  %v16551_v5 = vld [vmem:[#allocation17_spill] sm:$0xff] }
 0x3df   :  { %11196 = vmatmul.msk.f32.gmra.mxu3 %vm97_vm1, %v13444_v16  ;;  %v13595_v51 = vpop.f32.mrf.mxu0  ;;  %v2990_v16 = vld [vmem:[#allocation2 + $0x25a] sm:$0xff] }
 0x3e0   :  { %v3978_v52 = vadd.f32 %v3840_v29, %v3443_v2  ;;  %11066 = vmatmul.msk.f32.gmra.mxu1 %vm97_vm1, %v2989_v23  ;;  %v3849_v28 = vpop.f32.mrf.mxu2  ;;  %v13611_v2 = vld [vmem:[#allocation2 + $0x2d9] sm:$0xff] }
 0x3e2   :  { %v4368_v57 = vpop.f32.mrf.mxu3  ;;  %11011 = vmatmul.msk.f32.gmra.mxu0 %vm97_vm1, %v13597_v56 }
 0x3e3   :  { %v13602_v21 = vadd.f32 %v4368_v57, %v3976_v49 }
 0x3e5   :  { %16548 = vst [vmem:[#allocation15_spill] sm:$0xff] %v13602_v21  ;;  %v3308_v17 = vpop.f32.mrf.mxu1  ;;  %11136 = vmatmul.msk.f32.gmra.mxu2 %vm97_vm1, %v3528_v8  ;;  %v2911_v8 = vadd.f32 %v13469_v60, %v16551_v5  ;;  %v3530_v60 = vld [vmem:[#allocation2 + $0x2a8] sm:$0xff]  ;;  %v16553_v5 = vld [vmem:[#allocation18_spill] sm:$0xff] }
 0x3e6   :  { %v3444_v50 = vadd.f32 %v3308_v17, %v2910_v62  ;;  %v2991_v17 = vld [vmem:[#allocation2 + $0x262] sm:$0xff] }
 0x3e7   :  { %11197 = vmatmul.msk.f32.gmra.mxu3 %vm97_vm1, %v13457_v45  ;;  %v13609_v29 = vpop.f32.mrf.mxu0 }
 0x3e8   :  { %v3979_v23 = vadd.f32 %v3843_v47, %v3444_v50  ;;  %11067 = vmatmul.msk.f32.gmra.mxu1 %vm97_vm1, %v2990_v16  ;;  %v3852_v45 = vpop.f32.mrf.mxu2  ;;  %v13625_v50 = vld [vmem:[#allocation2 + $0x2e9] sm:$0xff] }
 0x3ea   :  { %v4371_v49 = vpop.f32.mrf.mxu3  ;;  %11012 = vmatmul.msk.f32.gmra.mxu0 %vm97_vm1, %v13611_v2 }
 0x3eb   :  { %v13616_v57 = vadd.f32 %v4371_v49, %v3977_v38 }
 0x3ed   :  { %16550 = vst [vmem:[#allocation16_spill] sm:$0xff] %v13616_v57  ;;  %v3311_v62 = vpop.f32.mrf.mxu1  ;;  %11137 = vmatmul.msk.f32.gmra.mxu2 %vm97_vm1, %v3529_v34  ;;  %v2912_v34 = vadd.f32 %v13483_v12, %v16553_v5  ;;  %v3531_v12 = vld [vmem:[#allocation2 + $0x2b8] sm:$0xff] }
 0x3ee   :  { %v3445_v21 = vadd.f32 %v3311_v62, %v2911_v8  ;;  %v2992_v62 = vld [vmem:[#allocation2 + $0x272] sm:$0xff] }
 0x3ef   :  { %11198 = vmatmul.msk.f32.gmra.mxu3 %vm97_vm1, %v13471_v59  ;;  %v13623_v47 = vpop.f32.mrf.mxu0 }
 0x3f0   :  { %v3980_v16 = vadd.f32 %v3846_v36, %v3445_v21  ;;  %11068 = vmatmul.msk.f32.gmra.mxu1 %vm97_vm1, %v2991_v17  ;;  %v13639_v21 = vld [vmem:[#allocation2 + $0x2f1] sm:$0xff]  ;;  %v3855_v17 = vpop.f32.mrf.mxu2 }
 0x3f2   :  { %v4374_v38 = vpop.f32.mrf.mxu3  ;;  %11013 = vmatmul.msk.f32.gmra.mxu0 %vm97_vm1, %v13625_v50 }
 0x3f3   :  { %v13630_v49 = vadd.f32 %v4374_v38, %v3978_v52 }
 0x3f5   :  { %16552 = vst [vmem:[#allocation17_spill] sm:$0xff] %v13630_v49  ;;  %v3314_v8 = vpop.f32.mrf.mxu1  ;;  %11138 = vmatmul.msk.f32.gmra.mxu2 %vm97_vm1, %v3530_v60  ;;  %v16555_v60 = vld [vmem:[#allocation19_spill] sm:$0xff] }
 0x3f6   :  { %v3446_v59 = vadd.f32 %v3314_v8, %v2912_v34  ;;  %v2913_v5 = vadd.f32 %v13497_v27, %v16555_v60  ;;  %v3532_v27 = vld [vmem:[#allocation2 + $0x2c0] sm:$0xff] }
 0x3f7   :  { %11199 = vmatmul.msk.f32.gmra.mxu3 %vm97_vm1, %v13485_v13  ;;  %v13637_v36 = vpop.f32.mrf.mxu0  ;;  %v2993_v13 = vld [vmem:[#allocation2 + $0x27a] sm:$0xff] }
 0x3f8   :  { %v3981_v57 = vadd.f32 %v3849_v28, %v3446_v59  ;;  %11069 = vmatmul.msk.f32.gmra.mxu1 %vm97_vm1, %v2992_v62  ;;  %v13653_v62 = vld [vmem:[#allocation2 + $0x301] sm:$0xff]  ;;  %v2923_v40 = vadd.f32 %v13637_v36, %v16580_v30  ;;  %v16584_v30 = vld [vmem:[#allocation33_spill] sm:$0xff] }
 0x3f9   :  { %v16585_v36 = vld [vmem:[#allocation34_spill] sm:$0xff] }
 0x3fa   :  { %v4377_v52 = vpop.f32.mrf.mxu3  ;;  %11014 = vmatmul.msk.f32.gmra.mxu0 %vm97_vm1, %v13639_v21 }
 0x3fb   :  { %v13644_v38 = vadd.f32 %v4377_v52, %v3979_v23  ;;  %v3858_v23 = vpop.f32.mrf.mxu2 }
 0x3fd   :  { %16554 = vst [vmem:[#allocation18_spill] sm:$0xff] %v13644_v38  ;;  %v3317_v34 = vpop.f32.mrf.mxu1  ;;  %11139 = vmatmul.msk.f32.gmra.mxu2 %vm97_vm1, %v3531_v12  ;;  %v16557_v12 = vld [vmem:[#allocation20_spill] sm:$0xff] }
 0x3fe   :  { %v3447_v8 = vadd.f32 %v3317_v34, %v2913_v5  ;;  %v2914_v5 = vadd.f32 %v13511_v54, %v16557_v12  ;;  %v3533_v54 = vld [vmem:[#allocation2 + $0x2d0] sm:$0xff] }
 0x3ff   :  { %11200 = vmatmul.msk.f32.gmra.mxu3 %vm97_vm1, %v13499_v41  ;;  %v13651_v28 = vpop.f32.mrf.mxu0  ;;  %v2994_v41 = vld [vmem:[#allocation2 + $0x28a] sm:$0xff] }
 0x400   :  { %v3982_v59 = vadd.f32 %v3852_v45, %v3447_v8  ;;  %11070 = vmatmul.msk.f32.gmra.mxu1 %vm97_vm1, %v2993_v13  ;;  %v13667_v13 = vld [vmem:[#allocation2 + $0x309] sm:$0xff] }
 0x402   :  { %v4380_v52 = vpop.f32.mrf.mxu3  ;;  %11015 = vmatmul.msk.f32.gmra.mxu0 %vm97_vm1, %v13653_v62 }
 0x403   :  { %v13658_v60 = vadd.f32 %v4380_v52, %v3980_v16  ;;  %v3861_v12 = vpop.f32.mrf.mxu2 }
 0x405   :  { %16556 = vst [vmem:[#allocation19_spill] sm:$0xff] %v13658_v60  ;;  %v3320_v34 = vpop.f32.mrf.mxu1  ;;  %11140 = vmatmul.msk.f32.gmra.mxu2 %vm97_vm1, %v3532_v27  ;;  %v16559_v27 = vld [vmem:[#allocation21_spill] sm:$0xff] }
 0x406   :  { %v3448_v38 = vadd.f32 %v3320_v34, %v2914_v5  ;;  %v2915_v5 = vadd.f32 %v13525_v10, %v16559_v27  ;;  %v3534_v10 = vld [vmem:[#allocation2 + $0x2d8] sm:$0xff] }
 0x407   :  { %11201 = vmatmul.msk.f32.gmra.mxu3 %vm97_vm1, %v13513_v11  ;;  %v13665_v45 = vpop.f32.mrf.mxu0  ;;  %v2995_v11 = vld [vmem:[#allocation2 + $0x292] sm:$0xff]  ;;  %v16561_v27 = vld [vmem:[#allocation22_spill] sm:$0xff] }
 0x408   :  { %v3983_v8 = vadd.f32 %v3855_v17, %v3448_v38  ;;  %11071 = vmatmul.msk.f32.gmra.mxu1 %vm97_vm1, %v2994_v41  ;;  %v13681_v38 = vld [vmem:[#allocation2 + $0x319] sm:$0xff] }
 0x40a   :  { %v4383_v16 = vpop.f32.mrf.mxu3  ;;  %11016 = vmatmul.msk.f32.gmra.mxu0 %vm97_vm1, %v13667_v13 }
 0x40b   :  { %v13672_v52 = vadd.f32 %v4383_v16, %v3981_v57 }
 0x40d   :  { %16558 = vst [vmem:[#allocation20_spill] sm:$0xff] %v13672_v52  ;;  %v3323_v34 = vpop.f32.mrf.mxu1  ;;  %11141 = vmatmul.msk.f32.gmra.mxu2 %vm97_vm1, %v3533_v54  ;;  %v2916_v54 = vadd.f32 %v13539_v48, %v16561_v27  ;;  %v3535_v48 = vld [vmem:[#allocation2 + $0x2e8] sm:$0xff] }
 0x40e   :  { %v3449_v60 = vadd.f32 %v3323_v34, %v2915_v5  ;;  %v2996_v34 = vld [vmem:[#allocation2 + $0x2a2] sm:$0xff] }
 0x40f   :  { %11202 = vmatmul.msk.f32.gmra.mxu3 %vm97_vm1, %v13527_v55  ;;  %v13679_v17 = vpop.f32.mrf.mxu0  ;;  %v3864_v55 = vpop.f32.mrf.mxu2  ;;  %v16563_v27 = vld [vmem:[#allocation23_spill] sm:$0xff] }
 0x410   :  { %v3984_v41 = vadd.f32 %v3858_v23, %v3449_v60  ;;  %11072 = vmatmul.msk.f32.gmra.mxu1 %vm97_vm1, %v2995_v11  ;;  %v13695_v60 = vld [vmem:[#allocation2 + $0x321] sm:$0xff] }
 0x412   :  { %v4386_v57 = vpop.f32.mrf.mxu3  ;;  %11017 = vmatmul.msk.f32.gmra.mxu0 %vm97_vm1, %v13681_v38 }
 0x413   :  { %v13686_v16 = vadd.f32 %v4386_v57, %v3982_v59 }
 0x415   :  { %16560 = vst [vmem:[#allocation21_spill] sm:$0xff] %v13686_v16  ;;  %v3326_v5 = vpop.f32.mrf.mxu1  ;;  %11142 = vmatmul.msk.f32.gmra.mxu2 %vm97_vm1, %v3534_v10  ;;  %v11301_v10 = vld [vmem:[%s16468_s3 + $0x8] sm:$0xff]  ;;  %v2998_v16 = vld [vmem:[#allocation2 + $0x2ba] sm:$0xff] }
 0x416   :  { %v3450_v52 = vadd.f32 %v3326_v5, %v2916_v54  ;;  %8388 = vmatpush.msra.mxu2 %v11301_v10  ;;  %v2997_v5 = vld [vmem:[#allocation2 + $0x2aa] sm:$0xff] }
 0x417   :  { %11203 = vmatmul.msk.f32.gmra.mxu3 %vm97_vm1, %v13541_v9  ;;  %v13693_v23 = vpop.f32.mrf.mxu0  ;;  %v2917_v9 = vadd.f32 %v13553_v37, %v16563_v27  ;;  %v8177_v37 = vld [vmem:[%s16468_s3] sm:$0xff] }
 0x418   :  { %v3985_v11 = vadd.f32 %v3861_v12, %v3450_v52  ;;  %11073 = vmatmul.msk.f32.gmra.mxu1 %vm97_vm1, %v2996_v34  ;;  %v3867_v34 = vpop.f32.mrf.mxu2 }
 0x419   :  { %8241 = vmatpush.msrb.mxu1 %v8177_v37 }
 0x41a   :  { %v4389_v59 = vpop.f32.mrf.mxu3  ;;  %11018 = vmatmul.msk.f32.gmra.mxu0 %vm97_vm1, %v13695_v60 }
 0x41b   :  { %v13700_v57 = vadd.f32 %v4389_v59, %v3983_v8  ;;  %v13712_v8 = vld [vmem:[#allocation2 + $0x331] sm:$0xff] }
 0x41c   :  { %v11318_v59 = vld [vmem:[%s16468_s3 + $0x10] sm:$0xff] }
 0x41d   :  { %16562 = vst [vmem:[#allocation22_spill] sm:$0xff] %v13700_v57  ;;  %v3329_v54 = vpop.f32.mrf.mxu1  ;;  %11143 = vmatmul.msk.f32.gmra.mxu2 %vm97_vm1, %v3535_v48  ;;  %8535 = vmatpush.msrb.mxu3 %v11318_v59 }
 0x41e   :  { %v3451_v52 = vadd.f32 %v3329_v54, %v2917_v9  ;;  %v16565_v9 = vld [vmem:[#allocation24_spill] sm:$0xff] }
 0x41f   :  { %11204 = vmatmul.msk.f32.gmra.mxu3 %vm97_vm1, %v13555_v6  ;;  %v13710_v12 = vpop.f32.mrf.mxu0  ;;  %v3536_v6 = vld [vmem:[#allocation2 + $0x2f0] sm:$0xff]  ;;  %v2918_v54 = vadd.f32 %v13567_v26, %v16565_v9  ;;  %v3537_v26 = vld [vmem:[#allocation2 + $0x300] sm:$0xff] }
 0x420   :  { %v3986_v10 = vadd.f32 %v3864_v55, %v3451_v52  ;;  %11074 = vmatmul.msk.f32.gmra.mxu1 %vm97_vm1, %v2997_v5  ;;  %v13732_v5 = vld [vmem:[#allocation2 + $0x339] sm:$0xff] }
 0x422   :  { %v4392_v48 = vpop.f32.mrf.mxu3  ;;  %11019 = vmatmul.msk.f32.gmra.mxu0 %vm97_vm1, %v13712_v8 }
 0x423   :  { %v13723_v27 = vadd.f32 %v4392_v48, %v3984_v41  ;;  %v3870_v41 = vpop.f32.mrf.mxu2  ;;  %v16567_v48 = vld [vmem:[#allocation25_spill] sm:$0xff] }
 0x425   :  { %16564 = vst [vmem:[#allocation23_spill] sm:$0xff] %v13723_v27  ;;  %v3332_v57 = vpop.f32.mrf.mxu1  ;;  %11144 = vmatmul.msk.f32.gmra.mxu2 %vm97_vm1, %v3536_v6 }
 0x426   :  { %v3452_v49 = vadd.f32 %v3332_v57, %v2918_v54  ;;  %v2919_v57 = vadd.f32 %v13581_v53, %v16567_v48  ;;  %v16569_v48 = vld [vmem:[#allocation26_spill] sm:$0xff] }
 0x427   :  { %11205 = vmatmul.msk.f32.gmra.mxu3 %vm97_vm1, %v13569_v3  ;;  %v13730_v55 = vpop.f32.mrf.mxu0  ;;  %v2999_v3 = vld [vmem:[#allocation2 + $0x2c2] sm:$0xff] }
 0x428   :  { %v3987_v52 = vadd.f32 %v3867_v34, %v3452_v49  ;;  %11075 = vmatmul.msk.f32.gmra.mxu1 %vm97_vm1, %v2998_v16  ;;  %v4549_v16 = vld [vmem:[#allocation2 + $0x32] sm:$0xff] }
 0x42a   :  { %v4395_v59 = vpop.f32.mrf.mxu3  ;;  %11020 = vmatmul.msk.f32.gmra.mxu0 %vm97_vm1, %v13732_v5 }
 0x42b   :  { %v13737_v37 = vadd.f32 %v4395_v59, %v3985_v11  ;;  %v3538_v11 = vld [vmem:[#allocation2 + $0x308] sm:$0xff]  ;;  %v3873_v53 = vpop.f32.mrf.mxu2 }
 0x42d   :  { %16566 = vst [vmem:[#allocation24_spill] sm:$0xff] %v13737_v37  ;;  %v3335_v6 = vpop.f32.mrf.mxu1  ;;  %11145 = vmatmul.msk.f32.gmra.mxu2 %vm97_vm1, %v3537_v26  ;;  %v2920_v26 = vadd.f32 %v13595_v51, %v16569_v48  ;;  %v16571_v51 = vld [vmem:[#allocation27_spill] sm:$0xff] }
 0x42e   :  { %v3453_v9 = vadd.f32 %v3335_v6, %v2919_v57  ;;  %v3000_v6 = vld [vmem:[#allocation2 + $0x2d2] sm:$0xff]  ;;  %v2921_v48 = vadd.f32 %v13609_v29, %v16571_v51 }
 0x42f   :  { %11206 = vmatmul.msk.f32.gmra.mxu3 %vm97_vm1, %v13583_v1  ;;  %v13744_v49 = vpop.f32.mrf.mxu0 }
 0x430   :  { %v3988_v34 = vadd.f32 %v3870_v41, %v3453_v9  ;;  %11076 = vmatmul.msk.f32.gmra.mxu1 %vm97_vm1, %v2999_v3  ;;  %v4550_v3 = vld [vmem:[#allocation2 + $0x3a] sm:$0xff] }
 0x432   :  { %v4398_v54 = vpop.f32.mrf.mxu3  ;;  %11221 = vmatmul.msk.f32.vlgmr.msra.gmra.mxu0 %vm97_vm1, %v4549_v16  ;;  %v3539_v16 = vld [vmem:[#allocation2 + $0x318] sm:$0xff] }
 0x433   :  { %v13748_v59 = vadd.f32 %v4398_v54, %v3986_v10 }
 0x435   :  { %16568 = vst [vmem:[#allocation25_spill] sm:$0xff] %v13748_v59  ;;  %v3338_v57 = vpop.f32.mrf.mxu1  ;;  %11146 = vmatmul.msk.f32.gmra.mxu2 %vm97_vm1, %v3538_v11  ;;  %v16576_v59 = vmov 0.0  }
 0x436   :  { %v3454_v1 = vadd.f32 %v3338_v57, %v2920_v26  ;;  %v3876_v26 = vpop.f32.mrf.mxu2  ;;  %v3001_v57 = vld [vmem:[#allocation2 + $0x2da] sm:$0xff]  ;;  %7838 = vst.msk [vmem:[#allocation3 + $0x8] sm:$0x3] %vm5531_vm3, %v16576_v59 }
 0x437   :  { %11207 = vmatmul.msk.f32.gmra.mxu3 %vm97_vm1, %v13597_v56  ;;  %v13755_v41 = vpop.f32.mrf.mxu0  ;;  %7840 = vst.msk [vmem:[#allocation3 + $0x18] sm:$0x3] %vm5531_vm3, %v16576_v59 }
 0x438   :  { %v3989_v9 = vadd.f32 %v3873_v53, %v3454_v1  ;;  %11077 = vmatmul.msk.f32.gmra.mxu1 %vm97_vm1, %v3000_v6  ;;  %v4551_v6 = vld [vmem:[#allocation2 + $0x4a] sm:$0xff]  ;;  %7842 = vst.msk [vmem:[#allocation3 + $0x28] sm:$0x3] %vm5531_vm3, %v16576_v59 }
 0x439   :  { %7844 = vst.msk [vmem:[#allocation3 + $0x38] sm:$0x3] %vm5531_vm3, %v16576_v59 }
 0x43a   :  { %v4401_v10 = vpop.f32.mrf.mxu3  ;;  %11222 = vmatmul.msk.f32.gmra.mxu0 %vm97_vm1, %v4550_v3  ;;  %v3540_v3 = vld [vmem:[#allocation2 + $0x320] sm:$0xff]  ;;  %7846 = vst.msk [vmem:[#allocation3 + $0x48] sm:$0x3] %vm5531_vm3, %v16576_v59 }
 0x43b   :  { %v13759_v54 = vadd.f32 %v4401_v10, %v3987_v52  ;;  %v3002_v10 = vld [vmem:[#allocation2 + $0x2ea] sm:$0xff]  ;;  %7837 = vst.msk [vmem:[#allocation3] sm:$0xff] %vm7324_vm4, %v16576_v59 }
 0x43c   :  { %7839 = vst.msk [vmem:[#allocation3 + $0x10] sm:$0xff] %vm7324_vm4, %v16576_v59 }
 0x43d   :  { %16570 = vst [vmem:[#allocation26_spill] sm:$0xff] %v13759_v54  ;;  %v3341_v11 = vpop.f32.mrf.mxu1  ;;  %11147 = vmatmul.msk.f32.gmra.mxu2 %vm97_vm1, %v3539_v16 }
 0x43e   :  { %v3455_v56 = vadd.f32 %v3341_v11, %v2921_v48  ;;  %v3541_v48 = vld [vmem:[#allocation2 + $0x330] sm:$0xff]  ;;  %7841 = vst.msk [vmem:[#allocation3 + $0x20] sm:$0xff] %vm7324_vm4, %v16576_v59 }
 0x43f   :  { %11208 = vmatmul.msk.f32.gmra.mxu3 %vm97_vm1, %v13611_v2  ;;  %v13766_v53 = vpop.f32.mrf.mxu0  ;;  %v4552_v2 = vld [vmem:[#allocation2 + $0x52] sm:$0xff]  ;;  %7843 = vst.msk [vmem:[#allocation3 + $0x30] sm:$0xff] %vm7324_vm4, %v16576_v59 }
 0x440   :  { %v3990_v1 = vadd.f32 %v3876_v26, %v3455_v56  ;;  %11078 = vmatmul.msk.f32.gmra.mxu1 %vm97_vm1, %v3001_v57  ;;  %v3003_v26 = vld [vmem:[#allocation2 + $0x2f2] sm:$0xff]  ;;  %7845 = vst.msk [vmem:[#allocation3 + $0x40] sm:$0xff] %vm7324_vm4, %v16576_v59 }
 0x441   :  { %v3542_v56 = vld [vmem:[#allocation2 + $0x338] sm:$0xff]  ;;  %7847 = vst.msk [vmem:[#allocation3 + $0x50] sm:$0xff] %vm7324_vm4, %v16576_v59 }
 0x442   :  { %v4404_v52 = vpop.f32.mrf.mxu3  ;;  %11223 = vmatmul.msk.f32.gmra.mxu0 %vm97_vm1, %v4551_v6  ;;  %7848 = vst.msk [vmem:[#allocation3 + $0x58] sm:$0x3] %vm5531_vm3, %v16576_v59 }
 0x443   :  { %v13770_v29 = vadd.f32 %v4404_v52, %v3988_v34  ;;  %v3004_v52 = vld [vmem:[#allocation2 + $0x302] sm:$0xff]  ;;  %7849 = vst.msk [vmem:[#allocation3 + $0x60] sm:$0xff] %vm7324_vm4, %v16576_v59 }
 0x444   :  { %7850 = vst.msk [vmem:[#allocation3 + $0x68] sm:$0x3] %vm5531_vm3, %v16576_v59 }
 0x445   :  { %16572 = vst [vmem:[#allocation27_spill] sm:$0xff] %v13770_v29  ;;  %11148 = vmatmul.msk.f32.gmra.mxu2 %vm97_vm1, %v3540_v3  ;;  %v3543_v3 = vld [vmem:[#allocation2 + $0x348] sm:$0xff] }
 0x446   :  { %v4562_v29 = vld [vmem:[#allocation2 + $0xca] sm:$0xff]  ;;  %7851 = vst.msk [vmem:[#allocation3 + $0x70] sm:$0xff] %vm7324_vm4, %v16576_v59 }
 0x447   :  { %11209 = vmatmul.msk.f32.gmra.mxu3 %vm97_vm1, %v13625_v50  ;;  %v13775_v16 = vpop.f32.mrf.mxu0  ;;  %v4553_v50 = vld [vmem:[#allocation2 + $0x62] sm:$0xff]  ;;  %7852 = vst.msk [vmem:[#allocation3 + $0x78] sm:$0x3] %vm5531_vm3, %v16576_v59 }
 0x448   :  { %11079 = vmatmul.msk.f32.gmra.mxu1 %vm97_vm1, %v3002_v10  ;;  %v3005_v10 = vld [vmem:[#allocation2 + $0x30a] sm:$0xff]  ;;  %7853 = vst.msk [vmem:[#allocation3 + $0x80] sm:$0xff] %vm7324_vm4, %v16576_v59 }
 0x449   :  { %7854 = vst.msk [vmem:[#allocation3 + $0x88] sm:$0x3] %vm5531_vm3, %v16576_v59 }
 0x44a   :  { %v4407_v51 = vpop.f32.mrf.mxu3  ;;  %11224 = vmatmul.msk.f32.gmra.mxu0 %vm97_vm1, %v4552_v2  ;;  %v4555_v2 = vld [vmem:[#allocation2 + $0x7a] sm:$0xff]  ;;  %7855 = vst.msk [vmem:[#allocation3 + $0x90] sm:$0xff] %vm7324_vm4, %v16576_v59 }
 0x44b   :  { %v13779_v11 = vadd.f32 %v4407_v51, %v3989_v9  ;;  %v3006_v51 = vld [vmem:[#allocation2 + $0x31a] sm:$0xff]  ;;  %7856 = vst.msk [vmem:[#allocation3 + $0x98] sm:$0x3] %vm5531_vm3, %v16576_v59 }
 0x44c   :  { %7857 = vst.msk [vmem:[#allocation3 + $0xa0] sm:$0xff] %vm7324_vm4, %v16576_v59 }
 0x44d   :  { %16573 = vst [vmem:[#allocation55_spill] sm:$0xff] %v13779_v11  ;;  %11149 = vmatmul.msk.f32.gmra.mxu2 %vm97_vm1, %v3541_v48 }
 0x44e   :  { %7858 = vst.msk [vmem:[#allocation3 + $0xa8] sm:$0x3] %vm5531_vm3, %v16576_v59 }
 0x44f   :  { %11210 = vmatmul.msk.f32.gmra.mxu3 %vm97_vm1, %v13639_v21  ;;  %v13784_v34 = vpop.f32.mrf.mxu0  ;;  %v4554_v21 = vld [vmem:[#allocation2 + $0x6a] sm:$0xff]  ;;  %7859 = vst.msk [vmem:[#allocation3 + $0xb0] sm:$0xff] %vm7324_vm4, %v16576_v59 }
 0x450   :  { %11080 = vmatmul.msk.f32.gmra.mxu1 %vm97_vm1, %v3003_v26  ;;  %v4556_v26 = vld [vmem:[#allocation2 + $0x82] sm:$0xff]  ;;  %7860 = vst.msk [vmem:[#allocation3 + $0xb8] sm:$0x3] %vm5531_vm3, %v16576_v59 }
 0x451   :  { %7861 = vst.msk [vmem:[#allocation3 + $0xc0] sm:$0xff] %vm7324_vm4, %v16576_v59 }
 0x452   :  { %v4410_v57 = vpop.f32.mrf.mxu3  ;;  %11225 = vmatmul.msk.f32.gmra.mxu0 %vm97_vm1, %v4553_v50  ;;  %7862 = vst.msk [vmem:[#allocation3 + $0xc8] sm:$0x3] %vm5531_vm3, %v16576_v59 }
 0x453   :  { %v13788_v6 = vadd.f32 %v4410_v57, %v3990_v1  ;;  %v4557_v57 = vld [vmem:[#allocation2 + $0x92] sm:$0xff]  ;;  %7863 = vst.msk [vmem:[#allocation3 + $0xd0] sm:$0xff] %vm7324_vm4, %v16576_v59 }
 0x454   :  { %7864 = vst.msk [vmem:[#allocation3 + $0xd8] sm:$0x3] %vm5531_vm3, %v16576_v59 }
 0x455   :  { %16574 = vst [vmem:[#allocation56_spill] sm:$0xff] %v13788_v6  ;;  %11150 = vmatmul.msk.f32.gmra.mxu2 %vm97_vm1, %v3542_v56  ;;  %v13816_v56 = vpop.f32.mrf.mxu1  ;;  %v4561_v6 = vld [vmem:[#allocation2 + $0xc2] sm:$0xff] }
 0x456   :  { %7865 = vst.msk [vmem:[#allocation3 + $0xe0] sm:$0xff] %vm7324_vm4, %v16576_v59 }
 0x457   :  { %11211 = vmatmul.msk.f32.gmra.mxu3 %vm97_vm1, %v13653_v62  ;;  %v13793_v9 = vpop.f32.mrf.mxu0  ;;  %v3544_v62 = vld [vmem:[#allocation2 + $0x350] sm:$0xff]  ;;  %7866 = vst.msk [vmem:[#allocation3 + $0xe8] sm:$0x3] %vm5531_vm3, %v16576_v59 }
 0x458   :  { %11081 = vmatmul.msk.f32.gmra.mxu1 %vm97_vm1, %v3004_v52  ;;  %7867 = vst.msk [vmem:[#allocation3 + $0xf0] sm:$0xff] %vm7324_vm4, %v16576_v59 }
 0x459   :  { %7868 = vst.msk [vmem:[#allocation3 + $0xf8] sm:$0x3] %vm5531_vm3, %v16576_v59 }
 0x45a   :  { %11226 = vmatmul.msk.f32.gmra.mxu0 %vm97_vm1, %v4554_v21  ;;  %v4558_v21 = vld [vmem:[#allocation2 + $0x9a] sm:$0xff]  ;;  %7869 = vst.msk [vmem:[#allocation3 + $0x100] sm:$0xff] %vm7324_vm4, %v16576_v59 }
 0x45b   :  { %7870 = vst.msk [vmem:[#allocation3 + $0x108] sm:$0x3] %vm5531_vm3, %v16576_v59 }
 0x45c   :  { %7871 = vst.msk [vmem:[#allocation3 + $0x110] sm:$0xff] %vm7324_vm4, %v16576_v59 }
 0x45d   :  { %11151 = vmatmul.msk.f32.gmra.mxu2 %vm97_vm1, %v3543_v3  ;;  %v13823_v3 = vpop.f32.mrf.mxu2  ;;  %7872 = vst.msk [vmem:[#allocation3 + $0x118] sm:$0x3] %vm5531_vm3, %v16576_v59 }
 0x45e   :  { %7873 = vst.msk [vmem:[#allocation3 + $0x120] sm:$0xff] %vm7324_vm4, %v16576_v59 }
 0x45f   :  { %11212 = vmatmul.msk.f32.gmra.mxu3 %vm97_vm1, %v13667_v13  ;;  %v13800_v1 = vpop.f32.mrf.mxu0  ;;  %v3007_v13 = vld [vmem:[#allocation2 + $0x322] sm:$0xff]  ;;  %7874 = vst.msk [vmem:[#allocation3 + $0x128] sm:$0x3] %vm5531_vm3, %v16576_v59 }
 0x460   :  { %11082 = vmatmul.msk.f32.gmra.mxu1 %vm97_vm1, %v3005_v10  ;;  %v3009_v10 = vld [vmem:[#allocation2 + $0x33a] sm:$0xff]  ;;  %7875 = vst.msk [vmem:[#allocation3 + $0x130] sm:$0xff] %vm7324_vm4, %v16576_v59 }
 0x461   :  { %7876 = vst.msk [vmem:[#allocation3 + $0x138] sm:$0x3] %vm5531_vm3, %v16576_v59 }
 0x462   :  { %11227 = vmatmul.msk.f32.gmra.mxu0 %vm97_vm1, %v4555_v2 }
 0x465   :  { %11152 = vmatmul.msk.f32.gmra.mxu2 %vm97_vm1, %v3544_v62  ;;  %v4559_v62 = vld [vmem:[#allocation2 + $0xaa] sm:$0xff] }
 0x467   :  { %11213 = vmatmul.msk.f32.gmra.mxu3 %vm97_vm1, %v13681_v38  ;;  %v13807_v48 = vpop.f32.mrf.mxu0  ;;  %v3008_v38 = vld [vmem:[#allocation2 + $0x332] sm:$0xff] }
 0x468   :  { %11083 = vmatmul.msk.f32.gmra.mxu1 %vm97_vm1, %v3006_v51  ;;  %v4077_v51 = vld [vmem:[#allocation2 + $0x349] sm:$0xff] }
 0x46a   :  { %11228 = vmatmul.msk.f32.gmra.mxu0 %vm97_vm1, %v4556_v26 }
 0x46f   :  { %11214 = vmatmul.msk.f32.gmra.mxu3 %vm97_vm1, %v13695_v60  ;;  %v13813_v50 = vpop.f32.mrf.mxu0  ;;  %v13827_v60 = vpop.f32.mrf.mxu1 }
 0x470   :  { %11084 = vmatmul.msk.f32.gmra.mxu1 %vm97_vm1, %v3007_v13  ;;  %v3457_v31 = vadd.f32 %v13827_v60, %v2923_v40  ;;  %v16589_v40 = vld [vmem:[#allocation38_spill] sm:$0xff] }
 0x471   :  { %v13955_v60 = vadd.f32 %v13766_v53, %v16589_v40  ;;  %v16590_v53 = vld [vmem:[#allocation39_spill] sm:$0xff] }
 0x472   :  { %11229 = vmatmul.msk.f32.gmra.mxu0 %vm97_vm1, %v4557_v57  ;;  %v4560_v57 = vld [vmem:[#allocation2 + $0xb2] sm:$0xff] }
 0x477   :  { %11215 = vmatmul.msk.f32.gmra.mxu3 %vm97_vm1, %v13712_v8  ;;  %v13821_v52 = vpop.f32.mrf.mxu0  ;;  %v13834_v8 = vpop.f32.mrf.mxu2 }
 0x478   :  { %11085 = vmatmul.msk.f32.gmra.mxu1 %vm97_vm1, %v3008_v38  ;;  %v13837_v26 = vpop.f32.mrf.mxu1  ;;  %v4078_v38 = vld [vmem:[#allocation2 + $0x351] sm:$0xff] }
 0x47a   :  { %11230 = vmatmul.msk.f32.gmra.mxu0 %vm97_vm1, %v4558_v21  ;;  %v13845_v21 = vpop.f32.mrf.mxu3 }
 0x47f   :  { %11216 = vmatmul.msk.f32.gmra.mxu3 %vm97_vm1, %v13732_v5  ;;  %v13831_v2 = vpop.f32.mrf.mxu0  ;;  %v13843_v5 = vpop.f32.mrf.mxu2 }
 0x480   :  { %11086 = vmatmul.msk.f32.gmra.mxu1 %vm97_vm1, %v3009_v10  ;;  %v13847_v10 = vpop.f32.mrf.mxu1 }
 0x482   :  { %11231 = vmatmul.msk.f32.gmra.mxu0 %vm97_vm1, %v4559_v62 }
 0x487   :  { %11217 = vmatmul.msk.f32.gmra.mxu3 %vm97_vm1, %v4077_v51  ;;  %v13840_v13 = vpop.f32.mrf.mxu0  ;;  %v13853_v51 = vpop.f32.mrf.mxu2 }
 0x488   :  { %v13859_v54 = vpop.f32.mrf.mxu1 }
 0x48a   :  { %11232 = vmatmul.msk.f32.gmra.mxu0 %vm97_vm1, %v4560_v57  ;;  %v13857_v57 = vpop.f32.mrf.mxu3 }
 0x48f   :  { %11218 = vmatmul.msk.f32.gmra.mxu3 %vm97_vm1, %v4078_v38  ;;  %v13850_v62 = vpop.f32.mrf.mxu0  ;;  %v4563_v38 = vld [vmem:[#allocation2 + $0xda] sm:$0xff]  ;;  %v13872_v37 = vpop.f32.mrf.mxu2 }
 0x490   :  { %v13883_v27 = vpop.f32.mrf.mxu1 }
 0x492   :  { %11233 = vmatmul.msk.f32.gmra.mxu0 %vm97_vm1, %v4561_v6 }
 0x497   :  { %v13855_v11 = vpop.f32.mrf.mxu0  ;;  %v13901_v4 = vpop.f32.mrf.mxu2 }
 0x498   :  { %16575 = vst [vmem:[#allocation57_spill] sm:$0xff] %v13855_v11 }
 0x49a   :  { %11234 = vmatmul.msk.f32.gmra.mxu0 %vm97_vm1, %v4562_v29  ;;  %v13878_v29 = vpop.f32.mrf.mxu3 }
 0x49f   :  { %v13868_v6 = vpop.f32.mrf.mxu0 }
 0x4a0   :  { %16577 = vst [vmem:[#allocation58_spill] sm:$0xff] %v13868_v6  ;;  %v16583_v6 = vld [vmem:[#allocation32_spill] sm:$0xff] }
 0x4a1   :  { %v2926_v44 = vadd.f32 %v13679_v17, %v16583_v6 }
 0x4a2   :  { %11235 = vmatmul.msk.f32.gmra.mxu0 %vm97_vm1, %v4563_v38  ;;  %v4564_v38 = vld [vmem:[#allocation2 + $0xe2] sm:$0xff]  ;;  %v13910_v7 = vpop.f32.mrf.mxu3 }
 0x4a7   :  { %v13893_v14 = vpop.f32.mrf.mxu0 }
 0x4a8   :  { %16578 = vst [vmem:[#allocation59_spill] sm:$0xff] %v13893_v14  ;;  %v2922_v14 = vadd.f32 %v13623_v47, %v16579_v22  ;;  %v2924_v22 = vadd.f32 %v13651_v28, %v16581_v18  ;;  %v16582_v47 = vld [vmem:[#allocation31_spill] sm:$0xff]  ;;  %v4565_v18 = vld [vmem:[#allocation2 + $0xf2] sm:$0xff] }
 0x4a9   :  { %v2925_v39 = vadd.f32 %v13665_v45, %v16582_v47  ;;  %v16586_v28 = vld [vmem:[#allocation35_spill] sm:$0xff]  ;;  %v16587_v47 = vld [vmem:[#allocation36_spill] sm:$0xff] }
 0x4aa   :  { %11236 = vmatmul.msk.f32.gmra.mxu0 %vm97_vm1, %v4564_v38  ;;  %v3456_v20 = vadd.f32 %v13816_v56, %v2922_v14  ;;  %v13917_v38 = vpop.f32.mrf.mxu1  ;;  %v2927_v14 = vadd.f32 %v13693_v23, %v16584_v30  ;;  %v13933_v56 = vadd.f32 %v13710_v12, %v16585_v36  ;;  %v13940_v45 = vadd.f32 %v13730_v55, %v16586_v28  ;;  %v16588_v23 = vld [vmem:[#allocation37_spill] sm:$0xff] }
 0x4ab   :  { %v13944_v17 = vadd.f32 %v13744_v49, %v16587_v47  ;;  %v13948_v6 = vadd.f32 %v13755_v41, %v16588_v23  ;;  %v3458_v30 = vadd.f32 %v13837_v26, %v2924_v22  ;;  %v3459_v49 = vadd.f32 %v13847_v10, %v2925_v39  ;;  %v16591_v39 = vld [vmem:[#allocation40_spill] sm:$0xff]  ;;  %v3897_v22 = vpop.f32.mrf.mxu2 }
 0x4ac   :  { %v3991_v55 = vadd.f32 %v13823_v3, %v3456_v20  ;;  %v13968_v20 = vadd.f32 %v13775_v16, %v16590_v53  ;;  %v13973_v3 = vadd.f32 %v13784_v34, %v16591_v39  ;;  %v3460_v10 = vadd.f32 %v13859_v54, %v2926_v44  ;;  %v16592_v54 = vld [vmem:[#allocation41_spill] sm:$0xff] }
 0x4ad   :  { %v3993_v44 = vadd.f32 %v13843_v5, %v3458_v30  ;;  %v13991_v40 = vadd.f32 %v13793_v9, %v16592_v54 }
 0x4af   :  { %v4827_v11 = vpop.f32.mrf.mxu0 }
 0x4b0   :  { %v5019_v12 = vadd.f32 %v4827_v11, %v13260_v15  ;;  %v3992_v11 = vadd.f32 %v13834_v8, %v3457_v31 }
 0x4b2   :  { %v5147_v41 = vrot.slane %v5019_v12, 2  ;;  %v5148_v36 = vrot.slane %v5019_v12, 4  ;;  %v5149_v28 = vrot.slane %v5019_v12, 6  ;;  %v5532_v15 = vsel %vm5531_vm3, %v5019_v12, -inf  ;;  %11237 = vmatmul.msk.f32.gmra.mxu0 %vm97_vm1, %v4565_v18 }
 0x4b3   :  { %v5533_v26 = vrot.slane %v5532_v15, 4  ;;  %v13986_v12 = vadd.f32 %v13845_v21, %v3991_v55  ;;  %v4566_v21 = vld [vmem:[#allocation2 + $0xfa] sm:$0xff]  ;;  %v14000_v9 = vadd.f32 %v13857_v57, %v3992_v11 }
 0x4b4   :  { %v5539_v47 = vsel %vm5531_vm3, %v5147_v41, -inf  ;;  %v5546_v18 = vsel %vm5531_vm3, %v5148_v36, -inf  ;;  %v5553_v16 = vsel %vm5531_vm3, %v5149_v28, -inf  ;;  %v3994_v41 = vadd.f32 %v13853_v51, %v3459_v49  ;;  %v4425_v36 = vpop.f32.mrf.mxu3  ;;  %v16593_v55 = vld [vmem:[#allocation42_spill] sm:$0xff] }
 0x4b5   :  { %v5534_v31 = vmax.f32 %v5532_v15, %v5533_v26  ;;  %v5540_v8 = vrot.slane %v5539_v47, 4  ;;  %v5547_v34 = vrot.slane %v5546_v18, 4  ;;  %v5554_v23 = vrot.slane %v5553_v16, 4  ;;  %v3365_v15 = vpop.f32.mrf.mxu1 }
 0x4b6   :  { %v3461_v28 = vadd.f32 %v13883_v27, %v2927_v14  ;;  %v14004_v51 = vadd.f32 %v13800_v1, %v16593_v55  ;;  %v14010_v14 = vadd.f32 %v13878_v29, %v3993_v44  ;;  %v3995_v49 = vadd.f32 %v13872_v37, %v3460_v10 }
 0x4b7   :  { %v5535_v53 = vrot.slane %v5534_v31, 2  ;;  %v5541_v39 = vmax.f32 %v5539_v47, %v5540_v8  ;;  %v5548_v26 = vmax.f32 %v5546_v18, %v5547_v34  ;;  %v4830_v5 = vpop.f32.mrf.mxu0  ;;  %v5555_v30 = vmax.f32 %v5553_v16, %v5554_v23  ;;  %v16594_v47 = vld [vmem:[#allocation43_spill] sm:$0xff] }
 0x4b8   :  { %v5020_v27 = vadd.f32 %v4830_v5, %v13274_v32  ;;  %v14015_v18 = vadd.f32 %v13807_v48, %v16594_v47  ;;  %v3996_v37 = vadd.f32 %v13901_v4, %v3461_v28  ;;  %v3462_v48 = vadd.f32 %v13917_v38, %v13933_v56  ;;  %v16595_v4 = vld [vmem:[#allocation44_spill] sm:$0xff]  ;;  %v3900_v28 = vpop.f32.mrf.mxu2 }
 0x4b9   :  { %v5542_v57 = vrot.slane %v5541_v39, 2  ;;  %v5536_v29 = vmax.f32 %v5534_v31, %v5535_v53  ;;  %v5549_v10 = vrot.slane %v5548_v26, 2  ;;  %v5556_v8 = vrot.slane %v5555_v30, 2 }
 0x4ba   :  { %v5150_v1 = vrot.slane %v5020_v27, 2  ;;  %v5151_v11 = vrot.slane %v5020_v27, 4  ;;  %v5152_v16 = vrot.slane %v5020_v27, 6  ;;  %v5560_v32 = vsel %vm5531_vm3, %v5020_v27, -inf  ;;  %11238 = vmatmul.msk.f32.gmra.mxu0 %vm97_vm1, %v4566_v21  ;;  %v4567_v27 = vld [vmem:[#allocation2 + $0x10a] sm:$0xff] }
 0x4bb   :  { %v5561_v34 = vrot.slane %v5560_v32, 4  ;;  %v14033_v54 = vadd.f32 %v13910_v7, %v3994_v41  ;;  %v14037_v38 = vadd.f32 %v13813_v50, %v16595_v4  ;;  %v3463_v56 = vadd.f32 %v3365_v15, %v13940_v45 }
 0x4bc   :  { %v5567_v23 = vsel %vm5531_vm3, %v5150_v1, -inf  ;;  %v5574_v44 = vsel %vm5531_vm3, %v5151_v11, -inf  ;;  %v5543_v53 = vmax.f32 %v5541_v39, %v5542_v57  ;;  %v5581_v7 = vsel %vm5531_vm3, %v5152_v16, -inf  ;;  %v4428_v47 = vpop.f32.mrf.mxu3 }
 0x4bd   :  { %v5568_v31 = vrot.slane %v5567_v23, 4  ;;  %v5562_v5 = vmax.f32 %v5560_v32, %v5561_v34  ;;  %v5575_v21 = vrot.slane %v5574_v44, 4  ;;  %v14045_v41 = vadd.f32 %v3897_v22, %v3462_v48  ;;  %v3368_v16 = vpop.f32.mrf.mxu1 }
 0x4be   :  { %v5537_v55 = vrot.slane %v5536_v29, 1  ;;  %v5550_v50 = vmax.f32 %v5548_v26, %v5549_v10  ;;  %v5557_v1 = vmax.f32 %v5555_v30, %v5556_v8  ;;  %v5582_v11 = vrot.slane %v5581_v7, 4 }
 0x4bf   :  { %v5569_v45 = vmax.f32 %v5567_v23, %v5568_v31  ;;  %v4833_v15 = vpop.f32.mrf.mxu0  ;;  %v5563_v39 = vrot.slane %v5562_v5, 2  ;;  %v5576_v57 = vmax.f32 %v5574_v44, %v5575_v21  ;;  %v14051_v32 = vadd.f32 %v4425_v36, %v3995_v49 }
 0x4c0   :  { %v14055_v22 = vadd.f32 %v13821_v52, %v13158_v58  ;;  %v14057_v26 = vadd.f32 %v3900_v28, %v3463_v56  ;;  %v5544_v30 = vrot.slane %v5543_v53, 1  ;;  %v5583_v34 = vmax.f32 %v5581_v7, %v5582_v11 }
 0x4c1   :  { %16596 = vst [vmem:[#allocation28_spill] sm:$0xff] %v14051_v32  ;;  %v5570_v48 = vrot.slane %v5569_v45, 2  ;;  %v5564_v10 = vmax.f32 %v5562_v5, %v5563_v39  ;;  %v5577_v8 = vrot.slane %v5576_v57, 2  ;;  %v14064_v36 = vadd.f32 %v4428_v47, %v3996_v37 }
 0x4c2   :  { %11239 = vmatmul.msk.f32.gmra.mxu0 %vm97_vm1, %v4567_v27  ;;  %v14068_v58 = vadd.f32 %v13831_v2, %v13175_v63  ;;  %v5021_v49 = vadd.f32 %v4833_v15, %v13288_v35  ;;  %v14074_v23 = vadd.f32 %v3368_v16, %v13944_v17  ;;  %v5538_v44 = vmax.f32 %v5536_v29, %v5537_v55  ;;  %v4568_v15 = vld [vmem:[#allocation2 + $0x112] sm:$0xff] }
 0x4c3   :  { %16597 = vst [vmem:[#allocation29_spill] sm:$0xff] %v14064_v36  ;;  %v5571_v52 = vmax.f32 %v5569_v45, %v5570_v48  ;;  %v5551_v4 = vrot.slane %v5550_v50, 1  ;;  %v5558_v56 = vrot.slane %v5557_v1, 1  ;;  %v5578_v31 = vmax.f32 %v5576_v57, %v5577_v8  ;;  %v14106_v36 = vpop.f32.mrf.mxu2 }
 0x4c4   :  { %v5153_v28 = vrot.slane %v5021_v49, 2  ;;  %v5154_v37 = vrot.slane %v5021_v49, 4  ;;  %v5155_v5 = vrot.slane %v5021_v49, 6  ;;  %v5545_v21 = vmax.f32 %v5543_v53, %v5544_v30 }
 0x4c5   :  { %v5565_v7 = vrot.slane %v5564_v10, 1  ;;  %v5584_v63 = vrot.slane %v5583_v34, 2  ;;  %v5588_v2 = vsel %vm5531_vm3, %v5021_v49, -inf  ;;  %v5572_v27 = vrot.slane %v5571_v52, 1 }
 0x4c6   :  { %v5589_v59 = vrot.slane %v5588_v2, 4  ;;  %v5595_v45 = vsel %vm5531_vm3, %v5153_v28, -inf  ;;  %v5602_v35 = vsel %vm5531_vm3, %v5154_v37, -inf  ;;  %v5552_v29 = vmax.f32 %v5550_v50, %v5551_v4 }
 0x4c7   :  { %v4836_v17 = vpop.f32.mrf.mxu0  ;;  %v5559_v55 = vmax.f32 %v5557_v1, %v5558_v56  ;;  %v7325_v47 = vsel %vm7324_vm4, %v5538_v44, -inf  ;;  %v5596_v39 = vrot.slane %v5595_v45, 4  ;;  %v5579_v57 = vrot.slane %v5578_v31, 1 }
 0x4c8   :  { %v5590_v11 = vmax.f32 %v5588_v2, %v5589_v59  ;;  %v5603_v53 = vrot.slane %v5602_v35, 4  ;;  %v5609_v16 = vsel %vm5531_vm3, %v5155_v5, -inf  ;;  %v5566_v48 = vmax.f32 %v5564_v10, %v5565_v7 }
 0x4c9   :  { %v14081_v30 = vmax.f32 %v5583_v34, %v5584_v63  ;;  %v5597_v8 = vmax.f32 %v5595_v45, %v5596_v39  ;;  %v5610_v49 = vrot.slane %v5609_v16, 4  ;;  %v7328_v28 = vsel %vm7324_vm4, %v5545_v21, -inf }
 0x4ca   :  { %11240 = vmatmul.msk.f32.gmra.mxu0 %vm97_vm1, %v4568_v15  ;;  %v5573_v37 = vmax.f32 %v5571_v52, %v5572_v27  ;;  %v5591_v50 = vrot.slane %v5590_v11, 2  ;;  %v5604_v1 = vmax.f32 %v5602_v35, %v5603_v53  ;;  %v7331_v44 = vsel %vm7324_vm4, %v5552_v29, -inf  ;;  %v4569_v29 = vld [vmem:[#allocation2 + $0x122] sm:$0xff] }
 0x4cb   :  { %v7334_v4 = vsel %vm7324_vm4, %v5559_v55, -inf  ;;  %v5598_v56 = vrot.slane %v5597_v8, 2  ;;  %v5611_v2 = vmax.f32 %v5609_v16, %v5610_v49  ;;  %v14087_v59 = vmax.f32 %v5578_v31, %v5579_v57 }
 0x4cc   :  { %v5592_v10 = vmax.f32 %v5590_v11, %v5591_v50  ;;  %v5605_v34 = vrot.slane %v5604_v1, 2  ;;  %v5022_v5 = vadd.f32 %v4836_v17, %v13299_v25  ;;  %v5586_v7 = vrot.slane %v14081_v30, 1 }
 0x4cd   :  { %v14092_v63 = vsel %vm7324_vm4, %v5566_v48, -inf  ;;  %v5599_v52 = vmax.f32 %v5597_v8, %v5598_v56  ;;  %v5612_v21 = vrot.slane %v5611_v2, 2  ;;  %v14095_v27 = vsel %vm7324_vm4, %v5573_v37, -inf }
 0x4ce   :  { %v5593_v45 = vrot.slane %v5592_v10, 1  ;;  %v5606_v35 = vmax.f32 %v5604_v1, %v5605_v34  ;;  %v5156_v15 = vrot.slane %v5022_v5, 2  ;;  %v5157_v25 = vrot.slane %v5022_v5, 4 }
 0x4cf   :  { %v14097_v31 = vpop.f32.mrf.mxu0  ;;  %v5600_v55 = vrot.slane %v5599_v52, 1  ;;  %v5613_v39 = vmax.f32 %v5611_v2, %v5612_v21  ;;  %v5616_v11 = vsel %vm5531_vm3, %v5022_v5, -inf  ;;  %v5158_v1 = vrot.slane %v5022_v5, 6 }
 0x4d0   :  { %v5594_v17 = vmax.f32 %v5592_v10, %v5593_v45  ;;  %v5607_v57 = vrot.slane %v5606_v35, 1  ;;  %v5623_v53 = vsel %vm5531_vm3, %v5156_v15, -inf  ;;  %v5617_v8 = vrot.slane %v5616_v11, 4 }
 0x4d1   :  { %v5601_v16 = vmax.f32 %v5599_v52, %v5600_v55  ;;  %v5614_v48 = vrot.slane %v5613_v39, 1  ;;  %v5624_v49 = vrot.slane %v5623_v53, 4  ;;  %v5630_v56 = vsel %vm5531_vm3, %v5157_v25, -inf }
 0x4d2   :  { %11241 = vmatmul.msk.f32.gmra.mxu0 %vm97_vm1, %v4569_v29  ;;  %v5608_v37 = vmax.f32 %v5606_v35, %v5607_v57  ;;  %v7326_v50 = vsel %vm7324_vm4, %v5594_v17, -inf  ;;  %v5618_v21 = vmax.f32 %v5616_v11, %v5617_v8  ;;  %v5631_v55 = vrot.slane %v5630_v56, 4 }
 0x4d3   :  { %v5615_v2 = vmax.f32 %v5613_v39, %v5614_v48  ;;  %v7327_v34 = vmax.f32 %v7325_v47, %v7326_v50  ;;  %v7329_v10 = vsel %vm7324_vm4, %v5601_v16, -inf  ;;  %v5625_v52 = vmax.f32 %v5623_v53, %v5624_v49  ;;  %v4570_v47 = vld [vmem:[#allocation2 + $0x12a] sm:$0xff]  ;;  %v14109_v48 = vpop.f32.mrf.mxu1 }
 0x4d4   :  { %v7330_v45 = vmax.f32 %v7328_v28, %v7329_v10  ;;  %v7332_v15 = vsel %vm7324_vm4, %v5608_v37, -inf  ;;  %v5619_v17 = vrot.slane %v5618_v21, 2  ;;  %v5632_v39 = vmax.f32 %v5630_v56, %v5631_v55  ;;  %v8454_v10 = vld [vmem:[#allocation3 + $0x2] sm:$0xff] }
 0x4d5   :  { %v7333_v32 = vmax.f32 %v7331_v44, %v7332_v15  ;;  %v7335_v35 = vsel %vm7324_vm4, %v5615_v2, -inf  ;;  %v7709_v29 = vmax.f32 %v7327_v34, 0.0  ;;  %v5626_v25 = vrot.slane %v5625_v52, 2  ;;  %v8307_v34 = vld [vmem:[#allocation3 + $0x1] sm:$0xff]  ;;  %11319 = vmatmul.msk.f32.vlgmr.msrb.gmra.mxu3 %vm7324_vm4, %v8454_v10 }
 0x4d6   :  { %v7336_v5 = vmax.f32 %v7334_v4, %v7335_v35  ;;  %v7710_v57 = vmax.f32 %v7330_v45, 0.0  ;;  %v5620_v28 = vmax.f32 %v5618_v21, %v5619_v17  ;;  %v5637_v53 = vsel %vm5531_vm3, %v5158_v1, -inf  ;;  %11302 = vmatmul.msk.f32.vlgmr.msra.gmra.mxu2 %vm7324_vm4, %v8307_v34 }
 0x4d7   :  { %v7711_v11 = vmax.f32 %v7333_v32, 0.0  ;;  %v14112_v16 = vpop.f32.mrf.mxu0  ;;  %v5627_v49 = vmax.f32 %v5625_v52, %v5626_v25  ;;  %v5633_v37 = vrot.slane %v5632_v39, 2  ;;  %v5587_v4 = vmax.f32 %v14081_v30, %v5586_v7  ;;  %v8161_v32 = vld [vmem:[#allocation3] sm:$0xff] }
 0x4d8   :  { %v7712_v8 = vmax.f32 %v7336_v5, 0.0  ;;  %v8006_v44 = vsel %vm8005_vm5, %v7710_v57, %v7709_v29  ;;  %v5621_v56 = vrot.slane %v5620_v28, 1  ;;  %v5638_v2 = vrot.slane %v5637_v53, 4  ;;  %11285 = vmatmul.msk.f32.vlgmr.msrb.gmra.mxu1 %vm7324_vm4, %v8161_v32 }
 0x4d9   :  { %v8008_v50 = vsel %vm8007_vm6, %v7711_v11, %v8006_v44  ;;  %v7343_v1 = vsel %vm7324_vm4, %v14087_v59, -inf  ;;  %v5628_v45 = vrot.slane %v5627_v49, 1  ;;  %v5634_v15 = vmax.f32 %v5632_v39, %v5633_v37  ;;  %v4571_v11 = vld [vmem:[#allocation2 + $0x13a] sm:$0xff] }
 0x4da   :  { %11242 = vmatmul.msk.f32.gmra.mxu0 %vm97_vm1, %v4570_v47  ;;  %v8010_v21 = vsel %vm8009_vm7, %v7712_v8, %v8008_v50  ;;  %v5622_v30 = vmax.f32 %v5620_v28, %v5621_v56  ;;  %v5639_v7 = vmax.f32 %v5637_v53, %v5638_v2  ;;  %v5023_v52 = vadd.f32 %v14097_v31, %v13310_v43  ;;  %v4431_v28 = vpop.f32.mrf.mxu3  ;;  %v3906_v43 = vpop.f32.mrf.mxu2 }
 0x4db   :  { %v5629_v55 = vmax.f32 %v5627_v49, %v5628_v45  ;;  %v5635_v35 = vrot.slane %v5634_v15, 1  ;;  %v3374_v2 = vpop.f32.mrf.mxu1 }
 0x4dc   :  { %v5640_v59 = vrot.slane %v5639_v7, 2  ;;  %v7338_v29 = vsel %vm7324_vm4, %v5622_v30, -inf  ;;  %v5159_v17 = vrot.slane %v5023_v52, 2  ;;  %v5160_v5 = vrot.slane %v5023_v52, 4 }
 0x4dd   :  { %v5636_v57 = vmax.f32 %v5634_v15, %v5635_v35  ;;  %v7339_v25 = vmax.f32 %v14092_v63, %v7338_v29  ;;  %v7341_v39 = vsel %vm7324_vm4, %v5629_v55, -inf  ;;  %v5161_v47 = vrot.slane %v5023_v52, 6 }
 0x4de   :  { %v5641_v31 = vmax.f32 %v5639_v7, %v5640_v59  ;;  %v7342_v53 = vmax.f32 %v14095_v27, %v7341_v39  ;;  %v5644_v8 = vsel %vm5531_vm3, %v5023_v52, -inf  ;;  %v5651_v44 = vsel %vm5531_vm3, %v5159_v17, -inf }
 0x4df   :  { %v7344_v49 = vsel %vm7324_vm4, %v5636_v57, -inf  ;;  %v7713_v37 = vmax.f32 %v7339_v25, 0.0  ;;  %v5645_v50 = vrot.slane %v5644_v8, 4  ;;  %v5652_v56 = vrot.slane %v5651_v44, 4  ;;  %v4845_v45 = vpop.f32.mrf.mxu0 }
 0x4e0   :  { %v5642_v63 = vrot.slane %v5641_v31, 1  ;;  %v7345_v32 = vmax.f32 %v7343_v1, %v7344_v49  ;;  %v7714_v34 = vmax.f32 %v7342_v53, 0.0  ;;  %v5658_v10 = vsel %vm5531_vm3, %v5160_v5, -inf }
 0x4e1   :  { %v8012_v27 = vsel %vm8011_vm8, %v7713_v37, %v8010_v21  ;;  %v5646_v15 = vmax.f32 %v5644_v8, %v5645_v50  ;;  %v5653_v30 = vmax.f32 %v5651_v44, %v5652_v56  ;;  %v5659_v7 = vrot.slane %v5658_v10, 4 }
 0x4e2   :  { %11243 = vmatmul.msk.f32.gmra.mxu0 %vm97_vm1, %v4571_v11  ;;  %v5643_v52 = vmax.f32 %v5641_v31, %v5642_v63  ;;  %v7715_v55 = vmax.f32 %v7345_v32, 0.0  ;;  %v8014_v35 = vsel %vm8013_vm9, %v7714_v34, %v8012_v27  ;;  %v5665_v59 = vsel %vm5531_vm3, %v5161_v47, -inf }
 0x4e3   :  { %v3465_v1 = vadd.f32 %v14109_v48, %v13948_v6  ;;  %v5647_v29 = vrot.slane %v5646_v15, 2  ;;  %v5660_v17 = vmax.f32 %v5658_v10, %v5659_v7  ;;  %v5666_v5 = vrot.slane %v5665_v59, 4  ;;  %v4572_v48 = vld [vmem:[#allocation2 + $0x142] sm:$0xff] }
 0x4e4   :  { %v14142_v57 = vadd.f32 %v14106_v36, %v14074_v23  ;;  %v7346_v21 = vsel %vm7324_vm4, %v5587_v4, -inf  ;;  %v7347_v25 = vsel %vm7324_vm4, %v5643_v52, -inf  ;;  %v8016_v39 = vsel %vm8015_vm10, %v7715_v55, %v8014_v35 }
 0x4e5   :  { %v14149_v11 = vadd.f32 %v13840_v13, %v13190_v46  ;;  %v7348_v47 = vmax.f32 %v7346_v21, %v7347_v25  ;;  %v5648_v31 = vmax.f32 %v5646_v15, %v5647_v29  ;;  %v5654_v6 = vrot.slane %v5653_v30, 2  ;;  %v4434_v46 = vpop.f32.mrf.mxu3  ;;  %v3909_v13 = vpop.f32.mrf.mxu2 }
 0x4e6   :  { %v5661_v53 = vrot.slane %v5660_v17, 2  ;;  %v5667_v8 = vmax.f32 %v5665_v59, %v5666_v5  ;;  %v5024_v36 = vadd.f32 %v14112_v16, %v13324_v42  ;;  %v14154_v23 = vadd.f32 %v4431_v28, %v14045_v41  ;;  %v3377_v28 = vpop.f32.mrf.mxu1 }
 0x4e7   :  { %v14156_v4 = vadd.f32 %v3906_v43, %v3465_v1  ;;  %v3466_v44 = vadd.f32 %v3374_v2, %v13955_v60  ;;  %v7716_v49 = vmax.f32 %v7348_v47, 0.0  ;;  %v14162_v32 = vadd.f32 %v13850_v62, %v13204_v0  ;;  %v14169_v10 = vpop.f32.mrf.mxu0 }
 0x4e8   :  { %v5668_v37 = vrot.slane %v5667_v8, 2  ;;  %v5162_v50 = vrot.slane %v5024_v36, 2  ;;  %v5163_v56 = vrot.slane %v5024_v36, 4  ;;  %v5164_v63 = vrot.slane %v5024_v36, 6 }
 0x4e9   :  { %v8018_v42 = vsel %vm8017_vm11, %v7716_v49, %v8016_v39  ;;  %v5649_v41 = vrot.slane %v5648_v31, 1  ;;  %v5655_v16 = vmax.f32 %v5653_v30, %v5654_v6  ;;  %v5662_v60 = vmax.f32 %v5660_v17, %v5661_v53 }
 0x4ea   :  { %11244 = vmatmul.msk.f32.gmra.mxu0 %vm97_vm1, %v4572_v48  ;;  %8141 = vst.msk [vmem:[#allocation3 + $0x11] sm:$0xff] %vm7324_vm4, %v8018_v42  ;;  %v5672_v43 = vsel %vm5531_vm3, %v5024_v36, -inf  ;;  %v5679_v2 = vsel %vm5531_vm3, %v5162_v50, -inf  ;;  %v5686_v34 = vsel %vm5531_vm3, %v5163_v56, -inf  ;;  %v14172_v27 = vadd.f32 %v4434_v46, %v14057_v26 }
 0x4eb   :  { %v14174_v0 = vadd.f32 %v3909_v13, %v3466_v44  ;;  %v5673_v62 = vrot.slane %v5672_v43, 4  ;;  %v5025_v15 = vadd.f32 %v4845_v45, %v13338_v19  ;;  %v5669_v30 = vmax.f32 %v5667_v8, %v5668_v37  ;;  %v4573_v19 = vld [vmem:[#allocation2 + $0x152] sm:$0xff] }
 0x4ec   :  { %v5680_v7 = vrot.slane %v5679_v2, 4  ;;  %v5687_v52 = vrot.slane %v5686_v34, 4  ;;  %v5693_v55 = vsel %vm5531_vm3, %v5164_v63, -inf  ;;  %v14179_v35 = vadd.f32 %v3377_v28, %v13968_v20 }
 0x4ed   :  { %v5656_v59 = vrot.slane %v5655_v16, 1  ;;  %v5674_v1 = vmax.f32 %v5672_v43, %v5673_v62  ;;  %v5694_v29 = vrot.slane %v5693_v55, 4  ;;  %v5650_v17 = vmax.f32 %v5648_v31, %v5649_v41 }
 0x4ee   :  { %v5663_v5 = vrot.slane %v5662_v60, 1  ;;  %v5681_v26 = vmax.f32 %v5679_v2, %v5680_v7  ;;  %v5688_v21 = vmax.f32 %v5686_v34, %v5687_v52  ;;  %v5165_v47 = vrot.slane %v5025_v15, 2 }
 0x4ef   :  { %v5675_v25 = vrot.slane %v5674_v1, 2  ;;  %v5695_v39 = vmax.f32 %v5693_v55, %v5694_v29  ;;  %v5166_v6 = vrot.slane %v5025_v15, 4  ;;  %v5670_v45 = vrot.slane %v5669_v30, 1  ;;  %v14189_v7 = vpop.f32.mrf.mxu0 }
 0x4f0   :  { %v5682_v48 = vrot.slane %v5681_v26, 2  ;;  %v5689_v53 = vrot.slane %v5688_v21, 2  ;;  %v5167_v8 = vrot.slane %v5025_v15, 6  ;;  %v5700_v44 = vsel %vm5531_vm3, %v5025_v15, -inf }
 0x4f1   :  { %v5676_v20 = vmax.f32 %v5674_v1, %v5675_v25  ;;  %v5696_v36 = vrot.slane %v5695_v39, 2  ;;  %v5707_v31 = vsel %vm5531_vm3, %v5165_v47, -inf  ;;  %v8162_v49 = vld [vmem:[#allocation3 + $0x10] sm:$0xff]  ;;  %v5701_v56 = vrot.slane %v5700_v44, 4 }
 0x4f2   :  { %11245 = vmatmul.msk.f32.gmra.mxu0 %vm97_vm1, %v4573_v19  ;;  %v8308_v46 = vld [vmem:[#allocation3 + $0x11] sm:$0xff]  ;;  %v5683_v37 = vmax.f32 %v5681_v26, %v5682_v48  ;;  %v5690_v50 = vmax.f32 %v5688_v21, %v5689_v53  ;;  %v5708_v63 = vrot.slane %v5707_v31, 4  ;;  %11286 = vmatmul.msk.f32.gmra.mxu1 %vm7324_vm4, %v8162_v49  ;;  %v5714_v28 = vsel %vm5531_vm3, %v5166_v6, -inf  ;;  %v4574_v53 = vld [vmem:[#allocation2 + $0x15a] sm:$0xff] }
 0x4f3   :  { %v8455_v13 = vld [vmem:[#allocation3 + $0x12] sm:$0xff]  ;;  %11303 = vmatmul.msk.f32.gmra.mxu2 %vm7324_vm4, %v8308_v46  ;;  %v5677_v42 = vrot.slane %v5676_v20, 1  ;;  %v5697_v41 = vmax.f32 %v5695_v39, %v5696_v36  ;;  %v5721_v43 = vsel %vm5531_vm3, %v5167_v8, -inf  ;;  %v5657_v2 = vmax.f32 %v5655_v16, %v5656_v59 }
 0x4f4   :  { %11320 = vmatmul.msk.f32.gmra.mxu3 %vm7324_vm4, %v8455_v13  ;;  %v5664_v34 = vmax.f32 %v5662_v60, %v5663_v5  ;;  %v5702_v62 = vmax.f32 %v5700_v44, %v5701_v56  ;;  %v5709_v15 = vmax.f32 %v5707_v31, %v5708_v63  ;;  %v5671_v52 = vmax.f32 %v5669_v30, %v5670_v45 }
 0x4f5   :  { %v5684_v55 = vrot.slane %v5683_v37, 1  ;;  %v5715_v1 = vrot.slane %v5714_v28, 4  ;;  %v5722_v29 = vrot.slane %v5721_v43, 4  ;;  %v7349_v26 = vsel %vm7324_vm4, %v5650_v17, -inf }
 0x4f6   :  { %v5691_v21 = vrot.slane %v5690_v50, 1  ;;  %v5703_v25 = vrot.slane %v5702_v62, 2  ;;  %v5710_v39 = vrot.slane %v5709_v15, 2  ;;  %v5678_v47 = vmax.f32 %v5676_v20, %v5677_v42 }
 0x4f7   :  { %v5698_v6 = vrot.slane %v5697_v41, 1  ;;  %v5716_v19 = vmax.f32 %v5714_v28, %v5715_v1  ;;  %v5723_v48 = vmax.f32 %v5721_v43, %v5722_v29  ;;  %v7352_v16 = vsel %vm7324_vm4, %v5657_v2, -inf }
 0x4f8   :  { %v7355_v60 = vsel %vm7324_vm4, %v5664_v34, -inf  ;;  %v5704_v59 = vmax.f32 %v5702_v62, %v5703_v25  ;;  %v5711_v5 = vmax.f32 %v5709_v15, %v5710_v39  ;;  %v7358_v30 = vsel %vm7324_vm4, %v5671_v52, -inf }
 0x4f9   :  { %v5685_v45 = vmax.f32 %v5683_v37, %v5684_v55  ;;  %v5717_v8 = vrot.slane %v5716_v19, 2  ;;  %v5724_v36 = vrot.slane %v5723_v48, 2  ;;  %v5692_v17 = vmax.f32 %v5690_v50, %v5691_v21 }
 0x4fa   :  { %11246 = vmatmul.msk.f32.gmra.mxu0 %vm97_vm1, %v4574_v53  ;;  %v5705_v44 = vrot.slane %v5704_v59, 1  ;;  %v5712_v20 = vrot.slane %v5711_v5, 1  ;;  %v5026_v31 = vadd.f32 %v14169_v10, %v13352_v24  ;;  %v5699_v49 = vmax.f32 %v5697_v41, %v5698_v6  ;;  %v14205_v41 = vpop.f32.mrf.mxu0  ;;  %v4575_v6 = vld [vmem:[#allocation2 + $0x16a] sm:$0xff] }
 0x4fb   :  { %v14199_v46 = vsel %vm7324_vm4, %v5678_v47, -inf  ;;  %v5718_v13 = vmax.f32 %v5716_v19, %v5717_v8  ;;  %v5725_v56 = vmax.f32 %v5723_v48, %v5724_v36 }
 0x4fc   :  { %v5706_v63 = vmax.f32 %v5704_v59, %v5705_v44  ;;  %v5713_v42 = vmax.f32 %v5711_v5, %v5712_v20  ;;  %v5168_v28 = vrot.slane %v5026_v31, 2  ;;  %v5169_v37 = vrot.slane %v5026_v31, 4 }
 0x4fd   :  { %v5719_v43 = vrot.slane %v5718_v13, 1  ;;  %v5726_v2 = vrot.slane %v5725_v56, 1  ;;  %v5170_v34 = vrot.slane %v5026_v31, 6  ;;  %v5728_v50 = vsel %vm5531_vm3, %v5026_v31, -inf }
 0x4fe   :  { %v7350_v62 = vsel %vm7324_vm4, %v5706_v63, -inf  ;;  %v7353_v15 = vsel %vm7324_vm4, %v5713_v42, -inf  ;;  %v5729_v24 = vrot.slane %v5728_v50, 4  ;;  %v5735_v10 = vsel %vm5531_vm3, %v5168_v28, -inf }
 0x4ff   :  { %v5720_v52 = vmax.f32 %v5718_v13, %v5719_v43  ;;  %v5727_v55 = vmax.f32 %v5725_v56, %v5726_v2  ;;  %v7351_v1 = vmax.f32 %v7349_v26, %v7350_v62  ;;  %v7354_v29 = vmax.f32 %v7352_v16, %v7353_v15 }
 0x500   :  { %v5730_v21 = vmax.f32 %v5728_v50, %v5729_v24  ;;  %v5736_v25 = vrot.slane %v5735_v10, 4  ;;  %v5742_v39 = vsel %vm5531_vm3, %v5169_v37, -inf  ;;  %v5749_v47 = vsel %vm5531_vm3, %v5170_v34, -inf  ;;  %v4437_v50 = vpop.f32.mrf.mxu3 }
 0x501   :  { %v7356_v19 = vsel %vm7324_vm4, %v5720_v52, -inf  ;;  %v7359_v48 = vsel %vm7324_vm4, %v5727_v55, -inf  ;;  %v7717_v59 = vmax.f32 %v7351_v1, 0.0  ;;  %v7718_v5 = vmax.f32 %v7354_v29, 0.0 }
 0x502   :  { %11247 = vmatmul.msk.f32.gmra.mxu0 %vm97_vm1, %v4575_v6  ;;  %v7357_v53 = vmax.f32 %v7355_v60, %v7356_v19  ;;  %v7360_v8 = vmax.f32 %v7358_v30, %v7359_v48  ;;  %v5731_v36 = vrot.slane %v5730_v21, 2  ;;  %v5737_v26 = vmax.f32 %v5735_v10, %v5736_v25  ;;  %v14222_v29 = vpop.f32.mrf.mxu0 }
 0x503   :  { %v7364_v16 = vsel %vm7324_vm4, %v5685_v45, -inf  ;;  %v8019_v44 = vsel %vm8005_vm5, %v7718_v5, %v7717_v59  ;;  %v5743_v20 = vrot.slane %v5742_v39, 4  ;;  %v5750_v31 = vrot.slane %v5749_v47, 4 }
 0x504   :  { %v14215_v13 = vsel %vm7324_vm4, %v5692_v17, -inf  ;;  %v7719_v56 = vmax.f32 %v7357_v53, 0.0  ;;  %v5732_v63 = vmax.f32 %v5730_v21, %v5731_v36  ;;  %v5738_v42 = vrot.slane %v5737_v26, 2  ;;  %v4576_v53 = vld [vmem:[#allocation2 + $0x172] sm:$0xff] }
 0x505   :  { %v7720_v28 = vmax.f32 %v7360_v8, 0.0  ;;  %v5744_v37 = vmax.f32 %v5742_v39, %v5743_v20  ;;  %v5751_v43 = vmax.f32 %v5749_v47, %v5750_v31  ;;  %v5027_v60 = vadd.f32 %v14189_v7, %v13366_v61 }
 0x506   :  { %v7370_v30 = vsel %vm7324_vm4, %v5699_v49, -inf  ;;  %v8020_v45 = vsel %vm8007_vm6, %v7719_v56, %v8019_v44  ;;  %v5733_v2 = vrot.slane %v5732_v63, 1  ;;  %v5739_v34 = vmax.f32 %v5737_v26, %v5738_v42 }
 0x507   :  { %v8021_v62 = vsel %vm8009_vm7, %v7720_v28, %v8020_v45  ;;  %v5745_v17 = vrot.slane %v5744_v37, 2  ;;  %v5752_v15 = vrot.slane %v5751_v43, 2  ;;  %v5171_v24 = vrot.slane %v5027_v60, 2 }
 0x508   :  { %v5734_v10 = vmax.f32 %v5732_v63, %v5733_v2  ;;  %v5740_v52 = vrot.slane %v5739_v34, 1  ;;  %v5172_v55 = vrot.slane %v5027_v60, 4  ;;  %v5173_v1 = vrot.slane %v5027_v60, 6 }
 0x509   :  { %v5746_v21 = vmax.f32 %v5744_v37, %v5745_v17  ;;  %v5753_v61 = vmax.f32 %v5751_v43, %v5752_v15  ;;  %v5756_v7 = vsel %vm5531_vm3, %v5027_v60, -inf  ;;  %v5763_v49 = vsel %vm5531_vm3, %v5171_v24, -inf }
 0x50a   :  { %v5741_v25 = vmax.f32 %v5739_v34, %v5740_v52  ;;  %v7362_v39 = vsel %vm7324_vm4, %v5734_v10, -inf  ;;  %v5757_v47 = vrot.slane %v5756_v7, 4  ;;  %v5764_v6 = vrot.slane %v5763_v49, 4  ;;  %11248 = vmatmul.msk.f32.gmra.mxu0 %vm97_vm1, %v4576_v53  ;;  %v4440_v10 = vpop.f32.mrf.mxu3 }
 0x50b   :  { %v5747_v19 = vrot.slane %v5746_v21, 1  ;;  %v5754_v48 = vrot.slane %v5753_v61, 1  ;;  %v7363_v59 = vmax.f32 %v14199_v46, %v7362_v39  ;;  %v5770_v5 = vsel %vm5531_vm3, %v5172_v55, -inf  ;;  %v3912_v55 = vpop.f32.mrf.mxu2 }
 0x50c   :  { %v7365_v8 = vsel %vm7324_vm4, %v5741_v25, -inf  ;;  %v5758_v36 = vmax.f32 %v5756_v7, %v5757_v47  ;;  %v5765_v26 = vmax.f32 %v5763_v49, %v5764_v6  ;;  %v5771_v44 = vrot.slane %v5770_v5, 4  ;;  %v16599_v6 = vld [vmem:[#allocation47_spill] sm:$0xff] }
 0x50d   :  { %v5748_v20 = vmax.f32 %v5746_v21, %v5747_v19  ;;  %v5755_v31 = vmax.f32 %v5753_v61, %v5754_v48  ;;  %v7366_v56 = vmax.f32 %v7364_v16, %v7365_v8  ;;  %v7721_v63 = vmax.f32 %v7363_v59, 0.0  ;;  %v16598_v16 = vld [vmem:[#allocation57_spill] sm:$0xff] }
 0x50e   :  { %v5759_v42 = vrot.slane %v5758_v36, 2  ;;  %v5766_v28 = vrot.slane %v5765_v26, 2  ;;  %v5772_v37 = vmax.f32 %v5770_v5, %v5771_v44  ;;  %v5777_v43 = vsel %vm5531_vm3, %v5173_v1, -inf  ;;  %v16600_v59 = vld [vmem:[#allocation45_spill] sm:$0xff]  ;;  %v16601_v5 = vld [vmem:[#allocation58_spill] sm:$0xff]  ;;  %v3380_v44 = vpop.f32.mrf.mxu1 }
 0x50f   :  { %v7368_v46 = vsel %vm7324_vm4, %v5748_v20, -inf  ;;  %v7371_v60 = vsel %vm7324_vm4, %v5755_v31, -inf  ;;  %v7722_v45 = vmax.f32 %v7366_v56, 0.0  ;;  %v8022_v2 = vsel %vm8011_vm8, %v7721_v63, %v8021_v62 }
 0x510   :  { %v7369_v34 = vmax.f32 %v14215_v13, %v7368_v46  ;;  %v7372_v17 = vmax.f32 %v7370_v30, %v7371_v60  ;;  %v5760_v15 = vmax.f32 %v5758_v36, %v5759_v42  ;;  %v5767_v24 = vmax.f32 %v5765_v26, %v5766_v28  ;;  %v4860_v13 = vpop.f32.mrf.mxu0  ;;  %v4577_v28 = vld [vmem:[#allocation2 + $0x182] sm:$0xff] }
 0x511   :  { %v14238_v52 = vadd.f32 %v16598_v16, %v13218_v33  ;;  %v8023_v1 = vsel %vm8013_vm9, %v7722_v45, %v8022_v2  ;;  %v5773_v21 = vrot.slane %v5772_v37, 2  ;;  %v5778_v61 = vrot.slane %v5777_v43, 4 }
 0x512   :  { %v14242_v7 = vadd.f32 %v4437_v50, %v14142_v57  ;;  %v7723_v49 = vmax.f32 %v7369_v34, 0.0  ;;  %v5761_v62 = vrot.slane %v5760_v15, 1  ;;  %v5768_v25 = vrot.slane %v5767_v24, 1  ;;  %11249 = vmatmul.msk.f32.gmra.mxu0 %vm97_vm1, %v4577_v28 }
 0x513   :  { %v7724_v30 = vmax.f32 %v7372_v17, 0.0  ;;  %v5774_v39 = vmax.f32 %v5772_v37, %v5773_v21  ;;  %v5779_v47 = vmax.f32 %v5777_v43, %v5778_v61  ;;  %v5028_v19 = vadd.f32 %v14205_v41, %v16599_v6  ;;  %v16602_v61 = vld [vmem:[#allocation48_spill] sm:$0xff] }
 0x514   :  { %v14247_v33 = vadd.f32 %v4440_v10, %v14156_v4  ;;  %v14250_v48 = vadd.f32 %v3912_v55, %v14179_v35  ;;  %v14254_v57 = vadd.f32 %v16601_v5, %v16600_v59  ;;  %v8024_v50 = vsel %vm8015_vm10, %v7723_v49, %v8023_v1 }
 0x515   :  { %v8025_v53 = vsel %vm8017_vm11, %v7724_v30, %v8024_v50  ;;  %v5775_v8 = vrot.slane %v5774_v39, 1  ;;  %v5780_v36 = vrot.slane %v5779_v47, 2  ;;  %v5174_v26 = vrot.slane %v5028_v19, 2  ;;  %v16603_v30 = vld [vmem:[#allocation49_spill] sm:$0xff] }
 0x516   :  { %8142 = vst.msk [vmem:[#allocation3 + $0x21] sm:$0xff] %vm7324_vm4, %v8025_v53  ;;  %v5762_v41 = vmax.f32 %v5760_v15, %v5761_v62  ;;  %v5769_v4 = vmax.f32 %v5767_v24, %v5768_v25  ;;  %v5175_v20 = vrot.slane %v5028_v19, 4  ;;  %v5176_v31 = vrot.slane %v5028_v19, 6 }
 0x517   :  { %v5776_v35 = vmax.f32 %v5774_v39, %v5775_v8  ;;  %v5781_v56 = vmax.f32 %v5779_v47, %v5780_v36  ;;  %v5784_v63 = vsel %vm5531_vm3, %v5028_v19, -inf  ;;  %v5791_v42 = vsel %vm5531_vm3, %v5174_v26, -inf }
 0x518   :  { %v5785_v37 = vrot.slane %v5784_v63, 4  ;;  %v5792_v43 = vrot.slane %v5791_v42, 4  ;;  %v5798_v46 = vsel %vm5531_vm3, %v5175_v20, -inf  ;;  %v5805_v60 = vsel %vm5531_vm3, %v5176_v31, -inf  ;;  %v14281_v47 = vpop.f32.mrf.mxu0 }
 0x519   :  { %v14265_v45 = vadd.f32 %v3380_v44, %v13973_v3  ;;  %v5782_v2 = vrot.slane %v5781_v56, 1  ;;  %v5799_v34 = vrot.slane %v5798_v46, 4  ;;  %v5806_v17 = vrot.slane %v5805_v60, 4 }
 0x51a   :  { %v14268_v15 = vsel %vm7324_vm4, %v5762_v41, -inf  ;;  %v14271_v24 = vsel %vm7324_vm4, %v5769_v4, -inf  ;;  %v5786_v10 = vmax.f32 %v5784_v63, %v5785_v37  ;;  %v5793_v16 = vmax.f32 %v5791_v42, %v5792_v43 }
 0x51b   :  { %v5783_v55 = vmax.f32 %v5781_v56, %v5782_v2  ;;  %v5800_v1 = vmax.f32 %v5798_v46, %v5799_v34  ;;  %v5807_v21 = vmax.f32 %v5805_v60, %v5806_v17  ;;  %v5029_v49 = vadd.f32 %v14222_v29, %v16602_v61  ;;  %v4578_v46 = vld [vmem:[#allocation2 + $0x18a] sm:$0xff] }
 0x51c   :  { %v14276_v3 = vsel %vm7324_vm4, %v5776_v35, -inf  ;;  %v5787_v62 = vrot.slane %v5786_v10, 2  ;;  %v5794_v25 = vrot.slane %v5793_v16, 2  ;;  %v14279_v39 = vadd.f32 %v4860_v13, %v16603_v30  ;;  %11250 = vmatmul.msk.f32.gmra.mxu0 %vm97_vm1, %v4578_v46 }
 0x51d   :  { %v14284_v6 = vsel %vm7324_vm4, %v5783_v55, -inf  ;;  %v5801_v19 = vrot.slane %v5800_v1, 2  ;;  %v5808_v59 = vrot.slane %v5807_v21, 2  ;;  %v5177_v5 = vrot.slane %v5029_v49, 2  ;;  %v8163_v50 = vld [vmem:[#allocation3 + $0x20] sm:$0xff] }
 0x51e   :  { %v8309_v53 = vld [vmem:[#allocation3 + $0x21] sm:$0xff]  ;;  %v5788_v8 = vmax.f32 %v5786_v10, %v5787_v62  ;;  %v5795_v29 = vmax.f32 %v5793_v16, %v5794_v25  ;;  %v5178_v36 = vrot.slane %v5029_v49, 4  ;;  %v5179_v26 = vrot.slane %v5029_v49, 6  ;;  %11287 = vmatmul.msk.f32.gmra.mxu1 %vm7324_vm4, %v8163_v50 }
 0x51f   :  { %11304 = vmatmul.msk.f32.gmra.mxu2 %vm7324_vm4, %v8309_v53  ;;  %v8456_v13 = vld [vmem:[#allocation3 + $0x22] sm:$0xff]  ;;  %v5802_v44 = vmax.f32 %v5800_v1, %v5801_v19  ;;  %v5809_v41 = vmax.f32 %v5807_v21, %v5808_v59  ;;  %v5812_v4 = vsel %vm5531_vm3, %v5029_v49, -inf  ;;  %v5819_v20 = vsel %vm5531_vm3, %v5177_v5, -inf }
 0x520   :  { %11321 = vmatmul.msk.f32.gmra.mxu3 %vm7324_vm4, %v8456_v13  ;;  %v5789_v31 = vrot.slane %v5788_v8, 1  ;;  %v5796_v35 = vrot.slane %v5795_v29, 1  ;;  %v5813_v56 = vrot.slane %v5812_v4, 4  ;;  %v5820_v63 = vrot.slane %v5819_v20, 4 }
 0x521   :  { %v5803_v42 = vrot.slane %v5802_v44, 1  ;;  %v5810_v28 = vrot.slane %v5809_v41, 1  ;;  %v5826_v37 = vsel %vm5531_vm3, %v5178_v36, -inf  ;;  %v5833_v43 = vsel %vm5531_vm3, %v5179_v26, -inf }
 0x522   :  { %v5790_v60 = vmax.f32 %v5788_v8, %v5789_v31  ;;  %v5797_v2 = vmax.f32 %v5795_v29, %v5796_v35  ;;  %v5814_v34 = vmax.f32 %v5812_v4, %v5813_v56  ;;  %v5821_v17 = vmax.f32 %v5819_v20, %v5820_v63  ;;  %v14308_v29 = vpop.f32.mrf.mxu0 }
 0x523   :  { %v5804_v10 = vmax.f32 %v5802_v44, %v5803_v42  ;;  %v5811_v16 = vmax.f32 %v5809_v41, %v5810_v28  ;;  %v5827_v55 = vrot.slane %v5826_v37, 4  ;;  %v5834_v1 = vrot.slane %v5833_v43, 4 }
 0x524   :  { %v14295_v21 = vsel %vm7324_vm4, %v5790_v60, -inf  ;;  %v14298_v61 = vsel %vm7324_vm4, %v5797_v2, -inf  ;;  %v5815_v49 = vrot.slane %v5814_v34, 2  ;;  %v5822_v62 = vrot.slane %v5821_v17, 2  ;;  %v4579_v60 = vld [vmem:[#allocation2 + $0x19a] sm:$0xff] }
 0x525   :  { %v14301_v25 = vsel %vm7324_vm4, %v5804_v10, -inf  ;;  %v14304_v30 = vsel %vm7324_vm4, %v5811_v16, -inf  ;;  %v5828_v19 = vmax.f32 %v5826_v37, %v5827_v55  ;;  %v5835_v59 = vmax.f32 %v5833_v43, %v5834_v1  ;;  %11251 = vmatmul.msk.f32.gmra.mxu0 %vm97_vm1, %v4579_v60 }
 0x526   :  { %v5816_v5 = vmax.f32 %v5814_v34, %v5815_v49  ;;  %v5823_v50 = vmax.f32 %v5821_v17, %v5822_v62  ;;  %v5180_v53 = vrot.slane %v14279_v39, 2  ;;  %v5181_v8 = vrot.slane %v14279_v39, 4 }
 0x527   :  { %v5829_v36 = vrot.slane %v5828_v19, 2  ;;  %v5836_v26 = vrot.slane %v5835_v59, 2  ;;  %v5182_v13 = vrot.slane %v14279_v39, 6  ;;  %v5840_v44 = vsel %vm5531_vm3, %v14279_v39, -inf }
 0x528   :  { %v5817_v41 = vrot.slane %v5816_v5, 1  ;;  %v5824_v4 = vrot.slane %v5823_v50, 1  ;;  %v5841_v20 = vrot.slane %v5840_v44, 4  ;;  %v5847_v31 = vsel %vm5531_vm3, %v5180_v53, -inf }
 0x529   :  { %v5830_v35 = vmax.f32 %v5828_v19, %v5829_v36  ;;  %v5837_v56 = vmax.f32 %v5835_v59, %v5836_v26  ;;  %v5848_v63 = vrot.slane %v5847_v31, 4  ;;  %v5854_v42 = vsel %vm5531_vm3, %v5181_v8, -inf }
 0x52a   :  { %v5818_v28 = vmax.f32 %v5816_v5, %v5817_v41  ;;  %v5825_v37 = vmax.f32 %v5823_v50, %v5824_v4  ;;  %v5842_v43 = vmax.f32 %v5840_v44, %v5841_v20  ;;  %v5855_v46 = vrot.slane %v5854_v42, 4 }
 0x52b   :  { %v5831_v2 = vrot.slane %v5830_v35, 1  ;;  %v5838_v34 = vrot.slane %v5837_v56, 1  ;;  %v5849_v17 = vmax.f32 %v5847_v31, %v5848_v63  ;;  %v5861_v39 = vsel %vm5531_vm3, %v5182_v13, -inf  ;;  %v16604_v63 = vld [vmem:[#allocation50_spill] sm:$0xff] }
 0x52c   :  { %v7374_v10 = vsel %vm7324_vm4, %v5818_v28, -inf  ;;  %v7377_v16 = vsel %vm7324_vm4, %v5825_v37, -inf  ;;  %v5843_v55 = vrot.slane %v5842_v43, 2  ;;  %v5856_v1 = vmax.f32 %v5854_v42, %v5855_v46 }
 0x52d   :  { %v5832_v49 = vmax.f32 %v5830_v35, %v5831_v2  ;;  %v5839_v62 = vmax.f32 %v5837_v56, %v5838_v34  ;;  %v7375_v19 = vmax.f32 %v14268_v15, %v7374_v10  ;;  %v7378_v59 = vmax.f32 %v14271_v24, %v7377_v16  ;;  %v14325_v35 = vpop.f32.mrf.mxu0 }
 0x52e   :  { %v5844_v5 = vmax.f32 %v5842_v43, %v5843_v55  ;;  %v5850_v50 = vrot.slane %v5849_v17, 2  ;;  %v5857_v53 = vrot.slane %v5856_v1, 2  ;;  %v5862_v8 = vrot.slane %v5861_v39, 4  ;;  %v4580_v55 = vld [vmem:[#allocation2 + $0x1a2] sm:$0xff] }
 0x52f   :  { %v7380_v36 = vsel %vm7324_vm4, %v5832_v49, -inf  ;;  %v7383_v26 = vsel %vm7324_vm4, %v5839_v62, -inf  ;;  %v7725_v13 = vmax.f32 %v7375_v19, 0.0  ;;  %v7726_v44 = vmax.f32 %v7378_v59, 0.0  ;;  %11252 = vmatmul.msk.f32.gmra.mxu0 %vm97_vm1, %v4580_v55 }
 0x530   :  { %v7381_v41 = vmax.f32 %v14276_v3, %v7380_v36  ;;  %v7384_v4 = vmax.f32 %v14284_v6, %v7383_v26  ;;  %v5845_v20 = vrot.slane %v5844_v5, 1  ;;  %v5851_v31 = vmax.f32 %v5849_v17, %v5850_v50 }
 0x531   :  { %v8026_v15 = vsel %vm8005_vm5, %v7726_v44, %v7725_v13  ;;  %v5858_v24 = vmax.f32 %v5856_v1, %v5857_v53  ;;  %v5863_v56 = vmax.f32 %v5861_v39, %v5862_v8  ;;  %v5031_v42 = vadd.f32 %v14281_v47, %v16604_v63 }
 0x532   :  { %v7727_v28 = vmax.f32 %v7381_v41, 0.0  ;;  %v7728_v37 = vmax.f32 %v7384_v4, 0.0  ;;  %v5846_v43 = vmax.f32 %v5844_v5, %v5845_v20  ;;  %v5852_v46 = vrot.slane %v5851_v31, 1 }
 0x533   :  { %v5859_v60 = vrot.slane %v5858_v24, 1  ;;  %v5864_v2 = vrot.slane %v5863_v56, 2  ;;  %v5183_v3 = vrot.slane %v5031_v42, 2  ;;  %v5184_v34 = vrot.slane %v5031_v42, 4 }
 0x534   :  { %v8027_v6 = vsel %vm8007_vm6, %v7727_v28, %v8026_v15  ;;  %v5853_v17 = vmax.f32 %v5851_v31, %v5852_v46  ;;  %v7386_v10 = vsel %vm7324_vm4, %v5846_v43, -inf  ;;  %v5185_v16 = vrot.slane %v5031_v42, 6 }
 0x535   :  { %v8028_v39 = vsel %vm8009_vm7, %v7728_v37, %v8027_v6  ;;  %v5860_v1 = vmax.f32 %v5858_v24, %v5859_v60  ;;  %v5865_v49 = vmax.f32 %v5863_v56, %v5864_v2  ;;  %v7387_v47 = vmax.f32 %v14295_v21, %v7386_v10 }
 0x536   :  { %v7389_v62 = vsel %vm7324_vm4, %v5853_v17, -inf  ;;  %v5868_v19 = vsel %vm5531_vm3, %v5031_v42, -inf  ;;  %v5875_v59 = vsel %vm5531_vm3, %v5183_v3, -inf  ;;  %v5882_v5 = vsel %vm5531_vm3, %v5184_v34, -inf  ;;  %v4872_v42 = vpop.f32.mrf.mxu0 }
 0x537   :  { %v5866_v50 = vrot.slane %v5865_v49, 1  ;;  %v7390_v53 = vmax.f32 %v14298_v61, %v7389_v62  ;;  %v7392_v8 = vsel %vm7324_vm4, %v5860_v1, -inf  ;;  %v7729_v36 = vmax.f32 %v7387_v47, 0.0 }
 0x538   :  { %v7393_v26 = vmax.f32 %v14301_v25, %v7392_v8  ;;  %v5869_v13 = vrot.slane %v5868_v19, 4  ;;  %v5876_v21 = vrot.slane %v5875_v59, 4  ;;  %v5883_v44 = vrot.slane %v5882_v5, 4  ;;  %v16605_v25 = vld [vmem:[#allocation51_spill] sm:$0xff] }
 0x539   :  { %v5867_v41 = vmax.f32 %v5865_v49, %v5866_v50  ;;  %v7730_v4 = vmax.f32 %v7390_v53, 0.0  ;;  %v8029_v20 = vsel %vm8011_vm8, %v7729_v36, %v8028_v39  ;;  %v5889_v31 = vsel %vm5531_vm3, %v5185_v16, -inf }
 0x53a   :  { %v7731_v15 = vmax.f32 %v7393_v26, 0.0  ;;  %v5870_v24 = vmax.f32 %v5868_v19, %v5869_v13  ;;  %v5877_v56 = vmax.f32 %v5875_v59, %v5876_v21  ;;  %v5884_v63 = vmax.f32 %v5882_v5, %v5883_v44 }
 0x53b   :  { %v7395_v61 = vsel %vm7324_vm4, %v5867_v41, -inf  ;;  %v8030_v28 = vsel %vm8013_vm9, %v7730_v4, %v8029_v20  ;;  %v5890_v37 = vrot.slane %v5889_v31, 4  ;;  %v5032_v43 = vadd.f32 %v14308_v29, %v16605_v25  ;;  %v4581_v41 = vld [vmem:[#allocation2 + $0x1e2] sm:$0xff] }
 0x53c   :  { %v7396_v46 = vmax.f32 %v14304_v30, %v7395_v61  ;;  %v8031_v60 = vsel %vm8015_vm10, %v7731_v15, %v8030_v28  ;;  %v5871_v2 = vrot.slane %v5870_v24, 2  ;;  %v5878_v3 = vrot.slane %v5877_v56, 2  ;;  %11253 = vmatmul.msk.f32.gmra.mxu0 %vm97_vm1, %v4581_v41 }
 0x53d   :  { %v5885_v34 = vrot.slane %v5884_v63, 2  ;;  %v5891_v6 = vmax.f32 %v5889_v31, %v5890_v37  ;;  %v5186_v17 = vrot.slane %v5032_v43, 2  ;;  %v5187_v10 = vrot.slane %v5032_v43, 4 }
 0x53e   :  { %v7732_v16 = vmax.f32 %v7396_v46, 0.0  ;;  %v5872_v55 = vmax.f32 %v5870_v24, %v5871_v2  ;;  %v5879_v39 = vmax.f32 %v5877_v56, %v5878_v3  ;;  %v5188_v1 = vrot.slane %v5032_v43, 6  ;;  %v4875_v28 = vpop.f32.mrf.mxu0  ;;  %v16606_v3 = vld [vmem:[#allocation52_spill] sm:$0xff] }
 0x53f   :  { %v5886_v49 = vmax.f32 %v5884_v63, %v5885_v34  ;;  %v5892_v47 = vrot.slane %v5891_v6, 2  ;;  %v5896_v62 = vsel %vm5531_vm3, %v5032_v43, -inf  ;;  %v5903_v29 = vsel %vm5531_vm3, %v5186_v17, -inf }
 0x540   :  { %v8032_v30 = vsel %vm8017_vm11, %v7732_v16, %v8031_v60  ;;  %v5873_v19 = vrot.slane %v5872_v55, 1  ;;  %v5880_v59 = vrot.slane %v5879_v39, 1  ;;  %v5897_v5 = vrot.slane %v5896_v62, 4 }
 0x541   :  { %8143 = vst.msk [vmem:[#allocation3 + $0x31] sm:$0xff] %vm7324_vm4, %v8032_v30  ;;  %v5887_v50 = vrot.slane %v5886_v49, 1  ;;  %v5893_v53 = vmax.f32 %v5891_v6, %v5892_v47  ;;  %v5904_v8 = vrot.slane %v5903_v29, 4  ;;  %v5910_v36 = vsel %vm5531_vm3, %v5187_v10, -inf  ;;  %v16607_v6 = vld [vmem:[#allocation53_spill] sm:$0xff] }
 0x542   :  { %v5874_v26 = vmax.f32 %v5872_v55, %v5873_v19  ;;  %v5881_v13 = vmax.f32 %v5879_v39, %v5880_v59  ;;  %v5898_v21 = vmax.f32 %v5896_v62, %v5897_v5  ;;  %v5911_v44 = vrot.slane %v5910_v36, 4  ;;  %v16608_v39 = vld [vmem:[#allocation54_spill] sm:$0xff] }
 0x543   :  { %v5888_v4 = vmax.f32 %v5886_v49, %v5887_v50  ;;  %v5894_v20 = vrot.slane %v5893_v53, 1  ;;  %v5905_v31 = vmax.f32 %v5903_v29, %v5904_v8  ;;  %v5917_v15 = vsel %vm5531_vm3, %v5188_v1, -inf }
 0x544   :  { %v14358_v24 = vsel %vm7324_vm4, %v5874_v26, -inf  ;;  %v14361_v56 = vsel %vm7324_vm4, %v5881_v13, -inf  ;;  %v5899_v63 = vrot.slane %v5898_v21, 2  ;;  %v5912_v61 = vmax.f32 %v5910_v36, %v5911_v44  ;;  %v4582_v13 = vld [vmem:[#allocation2 + $0x1ea] sm:$0xff] }
 0x545   :  { %v5895_v37 = vmax.f32 %v5893_v53, %v5894_v20  ;;  %v14364_v25 = vsel %vm7324_vm4, %v5888_v4, -inf  ;;  %v5906_v43 = vrot.slane %v5905_v31, 2  ;;  %v5918_v46 = vrot.slane %v5917_v15, 4  ;;  %11254 = vmatmul.msk.f32.gmra.mxu0 %vm97_vm1, %v4582_v13 }
 0x546   :  { %v5900_v60 = vmax.f32 %v5898_v21, %v5899_v63  ;;  %v5913_v2 = vrot.slane %v5912_v61, 2  ;;  %v5033_v34 = vadd.f32 %v14325_v35, %v16606_v3  ;;  %v5034_v17 = vadd.f32 %v4872_v42, %v16607_v6 }
 0x547   :  { %v14370_v10 = vsel %vm7324_vm4, %v5895_v37, -inf  ;;  %v5907_v16 = vmax.f32 %v5905_v31, %v5906_v43  ;;  %v5919_v55 = vmax.f32 %v5917_v15, %v5918_v46  ;;  %v14373_v1 = vadd.f32 %v4875_v28, %v16608_v39  ;;  %v14392_v39 = vpop.f32.mrf.mxu0 }
 0x548   :  { %v5901_v49 = vrot.slane %v5900_v60, 1  ;;  %v5914_v47 = vmax.f32 %v5912_v61, %v5913_v2  ;;  %v5189_v62 = vrot.slane %v5033_v34, 2  ;;  %v5190_v29 = vrot.slane %v5033_v34, 4  ;;  %v8164_v30 = vld [vmem:[#allocation3 + $0x30] sm:$0xff] }
 0x549   :  { %v8310_v19 = vld [vmem:[#allocation3 + $0x31] sm:$0xff]  ;;  %v5908_v5 = vrot.slane %v5907_v16, 1  ;;  %v5920_v50 = vrot.slane %v5919_v55, 2  ;;  %v5191_v35 = vrot.slane %v5033_v34, 6  ;;  %v5924_v42 = vsel %vm5531_vm3, %v5033_v34, -inf  ;;  %11288 = vmatmul.msk.f32.gmra.mxu1 %vm7324_vm4, %v8164_v30 }
 0x54a   :  { %v8457_v59 = vld [vmem:[#allocation3 + $0x32] sm:$0xff]  ;;  %11305 = vmatmul.msk.f32.gmra.mxu2 %vm7324_vm4, %v8310_v19  ;;  %v5902_v53 = vmax.f32 %v5900_v60, %v5901_v49  ;;  %v5915_v8 = vrot.slane %v5914_v47, 1  ;;  %v5925_v36 = vrot.slane %v5924_v42, 4  ;;  %v5931_v26 = vsel %vm5531_vm3, %v5189_v62, -inf }
 0x54b   :  { %11322 = vmatmul.msk.f32.gmra.mxu3 %vm7324_vm4, %v8457_v59  ;;  %v5909_v21 = vmax.f32 %v5907_v16, %v5908_v5  ;;  %v5921_v44 = vmax.f32 %v5919_v55, %v5920_v50  ;;  %v5932_v41 = vrot.slane %v5931_v26, 4  ;;  %v5938_v4 = vsel %vm5531_vm3, %v5190_v29, -inf }
 0x54c   :  { %v5916_v20 = vmax.f32 %v5914_v47, %v5915_v8  ;;  %v14383_v31 = vsel %vm7324_vm4, %v5902_v53, -inf  ;;  %v5926_v15 = vmax.f32 %v5924_v42, %v5925_v36  ;;  %v5939_v63 = vrot.slane %v5938_v4, 4 }
 0x54d   :  { %v5922_v61 = vrot.slane %v5921_v44, 1  ;;  %v14386_v28 = vsel %vm7324_vm4, %v5909_v21, -inf  ;;  %v5933_v37 = vmax.f32 %v5931_v26, %v5932_v41  ;;  %v5945_v43 = vsel %vm5531_vm3, %v5191_v35, -inf  ;;  %v4583_v21 = vld [vmem:[#allocation2 + $0x1fa] sm:$0xff] }
 0x54e   :  { %v14390_v46 = vsel %vm7324_vm4, %v5916_v20, -inf  ;;  %v5927_v60 = vrot.slane %v5926_v15, 2  ;;  %v5940_v2 = vmax.f32 %v5938_v4, %v5939_v63  ;;  %v5946_v3 = vrot.slane %v5945_v43, 4  ;;  %11255 = vmatmul.msk.f32.gmra.mxu0 %vm97_vm1, %v4583_v21 }
 0x54f   :  { %v5923_v34 = vmax.f32 %v5921_v44, %v5922_v61  ;;  %v5934_v6 = vrot.slane %v5933_v37, 2  ;;  %v5192_v16 = vrot.slane %v5034_v17, 2  ;;  %v5193_v55 = vrot.slane %v5034_v17, 4 }
 0x550   :  { %v5928_v49 = vmax.f32 %v5926_v15, %v5927_v60  ;;  %v5941_v47 = vrot.slane %v5940_v2, 2  ;;  %v5947_v62 = vmax.f32 %v5945_v43, %v5946_v3  ;;  %v5194_v29 = vrot.slane %v5034_v17, 6 }
 0x551   :  { %v14395_v30 = vsel %vm7324_vm4, %v5923_v34, -inf  ;;  %v5935_v19 = vmax.f32 %v5933_v37, %v5934_v6  ;;  %v5952_v59 = vsel %vm5531_vm3, %v5034_v17, -inf  ;;  %v5959_v5 = vsel %vm5531_vm3, %v5192_v16, -inf }
 0x552   :  { %v5929_v50 = vrot.slane %v5928_v49, 1  ;;  %v5942_v35 = vmax.f32 %v5940_v2, %v5941_v47  ;;  %v5948_v42 = vrot.slane %v5947_v62, 2  ;;  %v5953_v53 = vrot.slane %v5952_v59, 4 }
 0x553   :  { %v5936_v8 = vrot.slane %v5935_v19, 1  ;;  %v5960_v36 = vrot.slane %v5959_v5, 4  ;;  %v5966_v26 = vsel %vm5531_vm3, %v5193_v55, -inf  ;;  %v5973_v13 = vsel %vm5531_vm3, %v5194_v29, -inf }
 0x554   :  { %v5930_v44 = vmax.f32 %v5928_v49, %v5929_v50  ;;  %v5943_v41 = vrot.slane %v5942_v35, 1  ;;  %v5949_v4 = vmax.f32 %v5947_v62, %v5948_v42  ;;  %v5954_v20 = vmax.f32 %v5952_v59, %v5953_v53  ;;  %v4881_v50 = vpop.f32.mrf.mxu0 }
 0x555   :  { %v5937_v17 = vmax.f32 %v5935_v19, %v5936_v8  ;;  %v5961_v15 = vmax.f32 %v5959_v5, %v5960_v36  ;;  %v5967_v63 = vrot.slane %v5966_v26, 4  ;;  %v5974_v61 = vrot.slane %v5973_v13, 4 }
 0x556   :  { %v5944_v37 = vmax.f32 %v5942_v35, %v5943_v41  ;;  %v5950_v43 = vrot.slane %v5949_v4, 1  ;;  %v7398_v60 = vsel %vm7324_vm4, %v5930_v44, -inf  ;;  %v5955_v2 = vrot.slane %v5954_v20, 2 }
 0x557   :  { %v7399_v3 = vmax.f32 %v14358_v24, %v7398_v60  ;;  %v7401_v34 = vsel %vm7324_vm4, %v5937_v17, -inf  ;;  %v5962_v6 = vrot.slane %v5961_v15, 2  ;;  %v5968_v16 = vmax.f32 %v5966_v26, %v5967_v63 }
 0x558   :  { %v5951_v55 = vmax.f32 %v5949_v4, %v5950_v43  ;;  %v7402_v49 = vmax.f32 %v14361_v56, %v7401_v34  ;;  %v7404_v47 = vsel %vm7324_vm4, %v5944_v37, -inf  ;;  %v5956_v62 = vmax.f32 %v5954_v20, %v5955_v2 }
 0x559   :  { %v7405_v29 = vmax.f32 %v14364_v25, %v7404_v47  ;;  %v7733_v19 = vmax.f32 %v7399_v3, 0.0  ;;  %v5963_v59 = vmax.f32 %v5961_v15, %v5962_v6  ;;  %v5969_v5 = vrot.slane %v5968_v16, 2 }
 0x55a   :  { %v7407_v35 = vsel %vm7324_vm4, %v5951_v55, -inf  ;;  %v7734_v42 = vmax.f32 %v7402_v49, 0.0  ;;  %v5957_v24 = vrot.slane %v5956_v62, 1  ;;  %v5975_v53 = vmax.f32 %v5973_v13, %v5974_v61  ;;  %v4584_v61 = vld [vmem:[#allocation2 + $0x202] sm:$0xff] }
 0x55b   :  { %v7408_v8 = vmax.f32 %v14370_v10, %v7407_v35  ;;  %v7735_v36 = vmax.f32 %v7405_v29, 0.0  ;;  %v5964_v26 = vrot.slane %v5963_v59, 1  ;;  %v5970_v21 = vmax.f32 %v5968_v16, %v5969_v5  ;;  %11256 = vmatmul.msk.f32.gmra.mxu0 %vm97_vm1, %v4584_v61 }
 0x55c   :  { %v8033_v56 = vsel %vm8005_vm5, %v7734_v42, %v7733_v19  ;;  %v5958_v44 = vmax.f32 %v5956_v62, %v5957_v24  ;;  %v5976_v41 = vrot.slane %v5975_v53, 2  ;;  %v5195_v25 = vrot.slane %v14373_v1, 2 }
 0x55d   :  { %v7736_v4 = vmax.f32 %v7408_v8, 0.0  ;;  %v8034_v20 = vsel %vm8007_vm6, %v7735_v36, %v8033_v56  ;;  %v5965_v17 = vmax.f32 %v5963_v59, %v5964_v26  ;;  %v5971_v15 = vrot.slane %v5970_v21, 1 }
 0x55e   :  { %v5977_v63 = vmax.f32 %v5975_v53, %v5976_v41  ;;  %v7410_v37 = vsel %vm7324_vm4, %v5958_v44, -inf  ;;  %v5196_v13 = vrot.slane %v14373_v1, 4  ;;  %v5197_v10 = vrot.slane %v14373_v1, 6  ;;  %v14428_v53 = vpop.f32.mrf.mxu0 }
 0x55f   :  { %v8035_v43 = vsel %vm8009_vm7, %v7736_v4, %v8034_v20  ;;  %v5972_v60 = vmax.f32 %v5970_v21, %v5971_v15  ;;  %v7411_v2 = vmax.f32 %v14383_v31, %v7410_v37  ;;  %v7413_v3 = vsel %vm7324_vm4, %v5965_v17, -inf  ;;  %v16609_v4 = vld [vmem:[#allocation7_spill] sm:$0xff]  ;;  %v16610_v17 = vld [vmem:[#allocation8_spill] sm:$0xff] }
 0x560   :  { %v5978_v34 = vrot.slane %v5977_v63, 1  ;;  %v7414_v6 = vmax.f32 %v14386_v28, %v7413_v3  ;;  %v5980_v16 = vsel %vm5531_vm3, %v14373_v1, -inf  ;;  %v5987_v55 = vsel %vm5531_vm3, %v5195_v25, -inf }
 0x561   :  { %v7416_v49 = vsel %vm7324_vm4, %v5972_v60, -inf  ;;  %v7737_v47 = vmax.f32 %v7411_v2, 0.0  ;;  %v5981_v62 = vrot.slane %v5980_v16, 4  ;;  %v5988_v29 = vrot.slane %v5987_v55, 4 }
 0x562   :  { %v5979_v19 = vmax.f32 %v5977_v63, %v5978_v34  ;;  %v7417_v31 = vmax.f32 %v14390_v46, %v7416_v49  ;;  %v7738_v59 = vmax.f32 %v7414_v6, 0.0  ;;  %v5994_v5 = vsel %vm5531_vm3, %v5196_v13, -inf }
 0x563   :  { %v8036_v35 = vsel %vm8011_vm8, %v7737_v47, %v8035_v43  ;;  %v5982_v42 = vmax.f32 %v5980_v16, %v5981_v62  ;;  %v5989_v28 = vmax.f32 %v5987_v55, %v5988_v29  ;;  %v5995_v24 = vrot.slane %v5994_v5, 4 }
 0x564   :  { %v7419_v1 = vsel %vm7324_vm4, %v5979_v19, -inf  ;;  %v7739_v8 = vmax.f32 %v7417_v31, 0.0  ;;  %v8037_v36 = vsel %vm8013_vm9, %v7738_v59, %v8036_v35  ;;  %v6001_v26 = vsel %vm5531_vm3, %v5197_v10, -inf  ;;  %v4585_v35 = vld [vmem:[#allocation2 + $0x212] sm:$0xff] }
 0x565   :  { %v7420_v21 = vmax.f32 %v14395_v30, %v7419_v1  ;;  %v5983_v46 = vrot.slane %v5982_v42, 2  ;;  %v5990_v56 = vrot.slane %v5989_v28, 2  ;;  %v5996_v44 = vmax.f32 %v5994_v5, %v5995_v24  ;;  %11257 = vmatmul.msk.f32.gmra.mxu0 %vm97_vm1, %v4585_v35 }
 0x566   :  { %v8038_v41 = vsel %vm8015_vm10, %v7739_v8, %v8037_v36  ;;  %v6002_v25 = vrot.slane %v6001_v26, 4  ;;  %v5036_v20 = vadd.f32 %v14392_v39, %v16609_v4  ;;  %v14438_v15 = vadd.f32 %v4881_v50, %v16610_v17  ;;  %v4887_v8 = vpop.f32.mrf.mxu0 }
 0x567   :  { %v7740_v63 = vmax.f32 %v7420_v21, 0.0  ;;  %v5984_v37 = vmax.f32 %v5982_v42, %v5983_v46  ;;  %v5991_v13 = vmax.f32 %v5989_v28, %v5990_v56  ;;  %v5997_v61 = vrot.slane %v5996_v44, 2 }
 0x568   :  { %v6003_v43 = vmax.f32 %v6001_v26, %v6002_v25  ;;  %v5198_v10 = vrot.slane %v5036_v20, 2  ;;  %v5199_v60 = vrot.slane %v5036_v20, 4  ;;  %v5200_v30 = vrot.slane %v5036_v20, 6 }
 0x569   :  { %v8039_v2 = vsel %vm8017_vm11, %v7740_v63, %v8038_v41  ;;  %v5985_v3 = vrot.slane %v5984_v37, 1  ;;  %v5992_v34 = vrot.slane %v5991_v13, 1  ;;  %v5998_v6 = vmax.f32 %v5996_v44, %v5997_v61 }
 0x56a   :  { %8144 = vst.msk [vmem:[#allocation3 + $0x41] sm:$0xff] %vm7324_vm4, %v8039_v2  ;;  %v6004_v16 = vrot.slane %v6003_v43, 2  ;;  %v6008_v39 = vsel %vm5531_vm3, %v5036_v20, -inf  ;;  %v6015_v50 = vsel %vm5531_vm3, %v5198_v10, -inf  ;;  %v6022_v55 = vsel %vm5531_vm3, %v5199_v60, -inf }
 0x56b   :  { %v5986_v49 = vmax.f32 %v5984_v37, %v5985_v3  ;;  %v5993_v47 = vmax.f32 %v5991_v13, %v5992_v34  ;;  %v5999_v62 = vrot.slane %v5998_v6, 1  ;;  %v6009_v29 = vrot.slane %v6008_v39, 4 }
 0x56c   :  { %v6005_v19 = vmax.f32 %v6003_v43, %v6004_v16  ;;  %v6016_v31 = vrot.slane %v6015_v50, 4  ;;  %v6023_v59 = vrot.slane %v6022_v55, 4  ;;  %v6029_v5 = vsel %vm5531_vm3, %v5200_v30, -inf }
 0x56d   :  { %v6000_v42 = vmax.f32 %v5998_v6, %v5999_v62  ;;  %v14447_v28 = vsel %vm7324_vm4, %v5986_v49, -inf  ;;  %v14450_v24 = vsel %vm7324_vm4, %v5993_v47, -inf  ;;  %v6010_v1 = vmax.f32 %v6008_v39, %v6009_v29  ;;  %v4586_v29 = vld [vmem:[#allocation2 + $0x21a] sm:$0xff] }
 0x56e   :  { %v6006_v36 = vrot.slane %v6005_v19, 1  ;;  %v6017_v26 = vmax.f32 %v6015_v50, %v6016_v31  ;;  %v6024_v21 = vmax.f32 %v6022_v55, %v6023_v59  ;;  %v6030_v46 = vrot.slane %v6029_v5, 4  ;;  %11258 = vmatmul.msk.f32.gmra.mxu0 %vm97_vm1, %v4586_v29 }
 0x56f   :  { %v14454_v56 = vsel %vm7324_vm4, %v6000_v42, -inf  ;;  %v6011_v44 = vrot.slane %v6010_v1, 2  ;;  %v5201_v41 = vrot.slane %v14438_v15, 2  ;;  %v5202_v25 = vrot.slane %v14438_v15, 4 }
 0x570   :  { %v6007_v4 = vmax.f32 %v6005_v19, %v6006_v36  ;;  %v6018_v20 = vrot.slane %v6017_v26, 2  ;;  %v6025_v17 = vrot.slane %v6024_v21, 2  ;;  %v6031_v63 = vmax.f32 %v6029_v5, %v6030_v46 }
 0x571   :  { %v6012_v37 = vmax.f32 %v6010_v1, %v6011_v44  ;;  %v5203_v13 = vrot.slane %v14438_v15, 6  ;;  %v6036_v61 = vsel %vm5531_vm3, %v14438_v15, -inf  ;;  %v6043_v43 = vsel %vm5531_vm3, %v5201_v41, -inf  ;;  %v8165_v10 = vld [vmem:[#allocation3 + $0x40] sm:$0xff]  ;;  %v4890_v41 = vpop.f32.mrf.mxu0 }
 0x572   :  { %v8311_v60 = vld [vmem:[#allocation3 + $0x41] sm:$0xff]  ;;  %v14463_v2 = vsel %vm7324_vm4, %v6007_v4, -inf  ;;  %v6019_v3 = vmax.f32 %v6017_v26, %v6018_v20  ;;  %v6026_v34 = vmax.f32 %v6024_v21, %v6025_v17  ;;  %v6032_v6 = vrot.slane %v6031_v63, 2  ;;  %11289 = vmatmul.msk.f32.gmra.mxu1 %vm7324_vm4, %v8165_v10 }
 0x573   :  { %v8458_v30 = vld [vmem:[#allocation3 + $0x42] sm:$0xff]  ;;  %11306 = vmatmul.msk.f32.gmra.mxu2 %vm7324_vm4, %v8311_v60  ;;  %v6013_v16 = vrot.slane %v6012_v37, 1  ;;  %v6037_v39 = vrot.slane %v6036_v61, 4  ;;  %v6044_v50 = vrot.slane %v6043_v43, 4  ;;  %v6050_v15 = vsel %vm5531_vm3, %v5202_v25, -inf }
 0x574   :  { %11323 = vmatmul.msk.f32.gmra.mxu3 %vm7324_vm4, %v8458_v30  ;;  %v6020_v55 = vrot.slane %v6019_v3, 1  ;;  %v6027_v49 = vrot.slane %v6026_v34, 1  ;;  %v6033_v47 = vmax.f32 %v6031_v63, %v6032_v6  ;;  %v6051_v62 = vrot.slane %v6050_v15, 4  ;;  %v16612_v30 = vld [vmem:[#allocation10_spill] sm:$0xff] }
 0x575   :  { %v6014_v19 = vmax.f32 %v6012_v37, %v6013_v16  ;;  %v6038_v31 = vmax.f32 %v6036_v61, %v6037_v39  ;;  %v6045_v59 = vmax.f32 %v6043_v43, %v6044_v50  ;;  %v6057_v5 = vsel %vm5531_vm3, %v5203_v13, -inf  ;;  %v16611_v61 = vld [vmem:[#allocation9_spill] sm:$0xff] }
 0x576   :  { %v6021_v35 = vmax.f32 %v6019_v3, %v6020_v55  ;;  %v6028_v42 = vmax.f32 %v6026_v34, %v6027_v49  ;;  %v6034_v1 = vrot.slane %v6033_v47, 1  ;;  %v6052_v36 = vmax.f32 %v6050_v15, %v6051_v62  ;;  %v16613_v34 = vld [vmem:[#allocation11_spill] sm:$0xff] }
 0x577   :  { %v14472_v26 = vsel %vm7324_vm4, %v6014_v19, -inf  ;;  %v6039_v21 = vrot.slane %v6038_v31, 2  ;;  %v6046_v46 = vrot.slane %v6045_v59, 2  ;;  %v6058_v44 = vrot.slane %v6057_v5, 4 }
 0x578   :  { %v6035_v25 = vmax.f32 %v6033_v47, %v6034_v1  ;;  %v14475_v4 = vsel %vm7324_vm4, %v6021_v35, -inf  ;;  %v14478_v20 = vsel %vm7324_vm4, %v6028_v42, -inf  ;;  %v6053_v17 = vrot.slane %v6052_v36, 2  ;;  %v4587_v42 = vld [vmem:[#allocation2 + $0x22a] sm:$0xff] }
 0x579   :  { %v6040_v63 = vmax.f32 %v6038_v31, %v6039_v21  ;;  %v6047_v37 = vmax.f32 %v6045_v59, %v6046_v46  ;;  %v6059_v13 = vmax.f32 %v6057_v5, %v6058_v44  ;;  %v5038_v43 = vadd.f32 %v14428_v53, %v16611_v61  ;;  %11259 = vmatmul.msk.f32.gmra.mxu0 %vm97_vm1, %v4587_v42 }
 0x57a   :  { %v14483_v10 = vsel %vm7324_vm4, %v6035_v25, -inf  ;;  %v6054_v60 = vmax.f32 %v6052_v36, %v6053_v17  ;;  %v14486_v3 = vadd.f32 %v4887_v8, %v16612_v30  ;;  %v14489_v6 = vadd.f32 %v4890_v41, %v16613_v34 }
 0x57b   :  { %v6041_v16 = vrot.slane %v6040_v63, 1  ;;  %v6048_v39 = vrot.slane %v6047_v37, 1  ;;  %v6060_v50 = vrot.slane %v6059_v13, 2  ;;  %v5204_v15 = vrot.slane %v5038_v43, 2 }
 0x57c   :  { %v6055_v55 = vrot.slane %v6054_v60, 1  ;;  %v5205_v49 = vrot.slane %v5038_v43, 4  ;;  %v5206_v47 = vrot.slane %v5038_v43, 6  ;;  %v6064_v62 = vsel %vm5531_vm3, %v5038_v43, -inf }
 0x57d   :  { %v6042_v53 = vmax.f32 %v6040_v63, %v6041_v16  ;;  %v6049_v29 = vmax.f32 %v6047_v37, %v6048_v39  ;;  %v6061_v19 = vmax.f32 %v6059_v13, %v6060_v50  ;;  %v6065_v31 = vrot.slane %v6064_v62, 4 }
 0x57e   :  { %v6056_v59 = vmax.f32 %v6054_v60, %v6055_v55  ;;  %v6071_v8 = vsel %vm5531_vm3, %v5204_v15, -inf  ;;  %v6078_v5 = vsel %vm5531_vm3, %v5205_v49, -inf  ;;  %v6085_v35 = vsel %vm5531_vm3, %v5206_v47, -inf }
 0x57f   :  { %v6062_v1 = vrot.slane %v6061_v19, 1  ;;  %v7422_v36 = vsel %vm7324_vm4, %v6042_v53, -inf  ;;  %v7425_v21 = vsel %vm7324_vm4, %v6049_v29, -inf  ;;  %v6066_v46 = vmax.f32 %v6064_v62, %v6065_v31 }
 0x580   :  { %v7423_v44 = vmax.f32 %v14447_v28, %v7422_v36  ;;  %v7426_v41 = vmax.f32 %v14450_v24, %v7425_v21  ;;  %v7428_v25 = vsel %vm7324_vm4, %v6056_v59, -inf  ;;  %v6072_v17 = vrot.slane %v6071_v8, 4 }
 0x581   :  { %v6063_v63 = vmax.f32 %v6061_v19, %v6062_v1  ;;  %v7429_v37 = vmax.f32 %v14454_v56, %v7428_v25  ;;  %v6067_v13 = vrot.slane %v6066_v46, 2  ;;  %v6079_v61 = vrot.slane %v6078_v5, 4 }
 0x582   :  { %v7741_v43 = vmax.f32 %v7423_v44, 0.0  ;;  %v7742_v60 = vmax.f32 %v7426_v41, 0.0  ;;  %v6073_v30 = vmax.f32 %v6071_v8, %v6072_v17  ;;  %v6086_v34 = vrot.slane %v6085_v35, 4  ;;  %v3915_v17 = vpop.f32.mrf.mxu2 }
 0x583   :  { %v7431_v16 = vsel %vm7324_vm4, %v6063_v63, -inf  ;;  %v7743_v39 = vmax.f32 %v7429_v37, 0.0  ;;  %v6068_v50 = vmax.f32 %v6066_v46, %v6067_v13  ;;  %v6080_v15 = vmax.f32 %v6078_v5, %v6079_v61  ;;  %v3383_v63 = vpop.f32.mrf.mxu1 }
 0x584   :  { %v7432_v28 = vmax.f32 %v14463_v2, %v7431_v16  ;;  %v8040_v24 = vsel %vm8005_vm5, %v7742_v60, %v7741_v43  ;;  %v6074_v55 = vrot.slane %v6073_v30, 2  ;;  %v6087_v49 = vmax.f32 %v6085_v35, %v6086_v34 }
 0x585   :  { %v8041_v47 = vsel %vm8007_vm6, %v7743_v39, %v8040_v24  ;;  %v6069_v56 = vrot.slane %v6068_v50, 1  ;;  %v6081_v62 = vrot.slane %v6080_v15, 2  ;;  %v5207_v53 = vrot.slane %v14486_v3, 2 }
 0x586   :  { %v7744_v29 = vmax.f32 %v7432_v28, 0.0  ;;  %v6075_v19 = vmax.f32 %v6073_v30, %v6074_v55  ;;  %v6088_v31 = vrot.slane %v6087_v49, 2  ;;  %v5208_v59 = vrot.slane %v14486_v3, 4 }
 0x587   :  { %v6070_v8 = vmax.f32 %v6068_v50, %v6069_v56  ;;  %v6082_v42 = vmax.f32 %v6080_v15, %v6081_v62  ;;  %v5209_v5 = vrot.slane %v14486_v3, 6  ;;  %v6092_v2 = vsel %vm5531_vm3, %v14486_v3, -inf  ;;  %v4588_v3 = vld [vmem:[#allocation2 + $0x232] sm:$0xff] }
 0x588   :  { %v8042_v35 = vsel %vm8009_vm7, %v7744_v29, %v8041_v47  ;;  %v6076_v1 = vrot.slane %v6075_v19, 1  ;;  %v6089_v36 = vmax.f32 %v6087_v49, %v6088_v31  ;;  %v6093_v21 = vrot.slane %v6092_v2, 4  ;;  %11260 = vmatmul.msk.f32.gmra.mxu0 %vm97_vm1, %v4588_v3 }
 0x589   :  { %v6083_v46 = vrot.slane %v6082_v42, 1  ;;  %v7434_v44 = vsel %vm7324_vm4, %v6070_v8, -inf  ;;  %v6099_v41 = vsel %vm5531_vm3, %v5207_v53, -inf  ;;  %v6106_v25 = vsel %vm5531_vm3, %v5208_v59, -inf }
 0x58a   :  { %v6077_v37 = vmax.f32 %v6075_v19, %v6076_v1  ;;  %v6090_v13 = vrot.slane %v6089_v36, 1  ;;  %v7435_v61 = vmax.f32 %v14472_v26, %v7434_v44  ;;  %v6094_v43 = vmax.f32 %v6092_v2, %v6093_v21  ;;  %v4893_v2 = vpop.f32.mrf.mxu0  ;;  %v4443_v1 = vpop.f32.mrf.mxu3 }
 0x58b   :  { %v6084_v60 = vmax.f32 %v6082_v42, %v6083_v46  ;;  %v6100_v30 = vrot.slane %v6099_v41, 4  ;;  %v6107_v34 = vrot.slane %v6106_v25, 4  ;;  %v6113_v16 = vsel %vm5531_vm3, %v5209_v5, -inf  ;;  %v3918_v3 = vpop.f32.mrf.mxu2 }
 0x58c   :  { %v6091_v39 = vmax.f32 %v6089_v36, %v6090_v13  ;;  %v7437_v50 = vsel %vm7324_vm4, %v6077_v37, -inf  ;;  %v7745_v15 = vmax.f32 %v7435_v61, 0.0  ;;  %v6095_v28 = vrot.slane %v6094_v43, 2 }
 0x58d   :  { %v7438_v24 = vmax.f32 %v14475_v4, %v7437_v50  ;;  %v7440_v55 = vsel %vm7324_vm4, %v6084_v60, -inf  ;;  %v6101_v49 = vmax.f32 %v6099_v41, %v6100_v30  ;;  %v6108_v26 = vmax.f32 %v6106_v25, %v6107_v34  ;;  %v16614_v25 = vld [vmem:[#allocation46_spill] sm:$0xff]  ;;  %v3386_v60 = vpop.f32.mrf.mxu1 }
 0x58e   :  { %v7441_v47 = vmax.f32 %v14478_v20, %v7440_v55  ;;  %v7443_v56 = vsel %vm7324_vm4, %v6091_v39, -inf  ;;  %v8043_v62 = vsel %vm8011_vm8, %v7745_v15, %v8042_v35  ;;  %v6096_v53 = vmax.f32 %v6094_v43, %v6095_v28  ;;  %v4589_v15 = vld [vmem:[#allocation2 + $0x242] sm:$0xff] }
 0x58f   :  { %v7444_v29 = vmax.f32 %v14483_v10, %v7443_v56  ;;  %v7746_v19 = vmax.f32 %v7438_v24, 0.0  ;;  %v6102_v31 = vrot.slane %v6101_v49, 2  ;;  %v6109_v59 = vrot.slane %v6108_v26, 2 }
 0x590   :  { %v14526_v8 = vadd.f32 %v3915_v17, %v14265_v45  ;;  %v7747_v4 = vmax.f32 %v7441_v47, 0.0  ;;  %v6114_v42 = vrot.slane %v6113_v16, 4  ;;  %v5210_v5 = vrot.slane %v14489_v6, 2  ;;  %v16615_v45 = vld [vmem:[#allocation59_spill] sm:$0xff]  ;;  %11261 = vmatmul.msk.f32.gmra.mxu0 %vm97_vm1, %v4589_v15 }
 0x591   :  { %v7748_v20 = vmax.f32 %v7444_v29, 0.0  ;;  %v8044_v36 = vsel %vm8013_vm9, %v7746_v19, %v8043_v62  ;;  %v6097_v21 = vrot.slane %v6096_v53, 1  ;;  %v6103_v35 = vmax.f32 %v6101_v49, %v6102_v31  ;;  %v16616_v29 = vld [vmem:[#allocation12_spill] sm:$0xff] }
 0x592   :  { %v8045_v46 = vsel %vm8015_vm10, %v7747_v4, %v8044_v36  ;;  %v6110_v10 = vmax.f32 %v6108_v26, %v6109_v59  ;;  %v6115_v44 = vmax.f32 %v6113_v16, %v6114_v42  ;;  %v5211_v41 = vrot.slane %v14489_v6, 4 }
 0x593   :  { %v14534_v17 = vadd.f32 %v16615_v45, %v16614_v25  ;;  %v3469_v37 = vadd.f32 %v3383_v63, %v13991_v40  ;;  %v8046_v13 = vsel %vm8017_vm11, %v7748_v20, %v8045_v46  ;;  %v5212_v61 = vrot.slane %v14489_v6, 6 }
 0x594   :  { %v14540_v43 = vadd.f32 %v4443_v1, %v14174_v0  ;;  %8145 = vst.msk [vmem:[#allocation3 + $0x51] sm:$0xff] %vm7324_vm4, %v8046_v13  ;;  %v6116_v30 = vrot.slane %v6115_v44, 2  ;;  %v6120_v34 = vsel %vm5531_vm3, %v14489_v6, -inf  ;;  %v6127_v16 = vsel %vm5531_vm3, %v5210_v5, -inf }
 0x595   :  { %v6098_v39 = vmax.f32 %v6096_v53, %v6097_v21  ;;  %v6104_v50 = vrot.slane %v6103_v35, 1  ;;  %v6121_v40 = vrot.slane %v6120_v34, 4  ;;  %v6128_v63 = vrot.slane %v6127_v16, 4  ;;  %v4896_v21 = vpop.f32.mrf.mxu0 }
 0x596   :  { %v6111_v28 = vrot.slane %v6110_v10, 1  ;;  %v6117_v24 = vmax.f32 %v6115_v44, %v6116_v30  ;;  %v6134_v0 = vsel %vm5531_vm3, %v5211_v41, -inf  ;;  %v6141_v55 = vsel %vm5531_vm3, %v5212_v61, -inf }
 0x597   :  { %v14549_v49 = vadd.f32 %v3918_v3, %v3469_v37  ;;  %v14552_v26 = vadd.f32 %v3386_v60, %v14004_v51  ;;  %v6122_v6 = vmax.f32 %v6120_v34, %v6121_v40  ;;  %v6129_v47 = vmax.f32 %v6127_v16, %v6128_v63 }
 0x598   :  { %v6118_v56 = vrot.slane %v6117_v24, 1  ;;  %v6135_v62 = vrot.slane %v6134_v0, 4  ;;  %v6142_v53 = vrot.slane %v6141_v55, 4  ;;  %v5041_v19 = vadd.f32 %v4893_v2, %v16616_v29 }
 0x599   :  { %v6105_v31 = vmax.f32 %v6103_v35, %v6104_v50  ;;  %v14556_v59 = vsel %vm7324_vm4, %v6098_v39, -inf  ;;  %v6123_v4 = vrot.slane %v6122_v6, 2  ;;  %v6130_v42 = vrot.slane %v6129_v47, 2 }
 0x59a   :  { %v6112_v5 = vmax.f32 %v6110_v10, %v6111_v28  ;;  %v6136_v1 = vmax.f32 %v6134_v0, %v6135_v62  ;;  %v6143_v20 = vmax.f32 %v6141_v55, %v6142_v53  ;;  %v5213_v36 = vrot.slane %v5041_v19, 2 }
 0x59b   :  { %v6119_v51 = vmax.f32 %v6117_v24, %v6118_v56  ;;  %v6124_v46 = vmax.f32 %v6122_v6, %v6123_v4  ;;  %v6131_v44 = vmax.f32 %v6129_v47, %v6130_v42  ;;  %v5214_v41 = vrot.slane %v5041_v19, 4  ;;  %v8166_v25 = vld [vmem:[#allocation3 + $0x50] sm:$0xff] }
 0x59c   :  { %v8312_v45 = vld [vmem:[#allocation3 + $0x51] sm:$0xff]  ;;  %v6137_v13 = vrot.slane %v6136_v1, 2  ;;  %v6144_v2 = vrot.slane %v6143_v20, 2  ;;  %v5215_v35 = vrot.slane %v5041_v19, 6  ;;  %v6148_v61 = vsel %vm5531_vm3, %v5041_v19, -inf  ;;  %11290 = vmatmul.msk.f32.gmra.mxu1 %vm7324_vm4, %v8166_v25 }
 0x59d   :  { %v8459_v37 = vld [vmem:[#allocation3 + $0x52] sm:$0xff]  ;;  %11307 = vmatmul.msk.f32.gmra.mxu2 %vm7324_vm4, %v8312_v45  ;;  %v6125_v10 = vrot.slane %v6124_v46, 1  ;;  %v6132_v3 = vrot.slane %v6131_v44, 1  ;;  %v6149_v60 = vrot.slane %v6148_v61, 4  ;;  %v6155_v30 = vsel %vm5531_vm3, %v5213_v36, -inf  ;;  %v4590_v24 = vld [vmem:[#allocation2 + $0x24a] sm:$0xff] }
 0x59e   :  { %11324 = vmatmul.msk.f32.gmra.mxu3 %vm7324_vm4, %v8459_v37  ;;  %v6138_v34 = vmax.f32 %v6136_v1, %v6137_v13  ;;  %v6145_v16 = vmax.f32 %v6143_v20, %v6144_v2  ;;  %v6156_v39 = vrot.slane %v6155_v30, 4  ;;  %v6162_v50 = vsel %vm5531_vm3, %v5214_v41, -inf  ;;  %11262 = vmatmul.msk.f32.gmra.mxu0 %vm97_vm1, %v4590_v24  ;;  %v4899_v37 = vpop.f32.mrf.mxu0 }
 0x59f   :  { %v6126_v40 = vmax.f32 %v6124_v46, %v6125_v10  ;;  %v6133_v63 = vmax.f32 %v6131_v44, %v6132_v3  ;;  %v6150_v15 = vmax.f32 %v6148_v61, %v6149_v60  ;;  %v6163_v28 = vrot.slane %v6162_v50, 4  ;;  %v16617_v44 = vld [vmem:[#allocation13_spill] sm:$0xff] }
 0x5a0   :  { %v6139_v0 = vrot.slane %v6138_v34, 1  ;;  %v6146_v55 = vrot.slane %v6145_v16, 1  ;;  %v6157_v6 = vmax.f32 %v6155_v30, %v6156_v39  ;;  %v6169_v47 = vsel %vm5531_vm3, %v5215_v35, -inf }
 0x5a1   :  { %v7448_v56 = vsel %vm7324_vm4, %v6105_v31, -inf  ;;  %v7451_v62 = vsel %vm7324_vm4, %v6112_v5, -inf  ;;  %v6151_v53 = vrot.slane %v6150_v15, 2  ;;  %v6164_v29 = vmax.f32 %v6162_v50, %v6163_v28 }
 0x5a2   :  { %v14569_v19 = vsel %vm7324_vm4, %v6119_v51, -inf  ;;  %v14572_v4 = vsel %vm7324_vm4, %v6126_v40, -inf  ;;  %v6158_v42 = vrot.slane %v6157_v6, 2  ;;  %v6170_v1 = vrot.slane %v6169_v47, 4 }
 0x5a3   :  { %v14575_v20 = vsel %vm7324_vm4, %v6133_v63, -inf  ;;  %v6152_v36 = vmax.f32 %v6150_v15, %v6151_v53  ;;  %v6165_v46 = vrot.slane %v6164_v29, 2  ;;  %v5042_v41 = vadd.f32 %v4896_v21, %v16617_v44  ;;  %v4591_v21 = vld [vmem:[#allocation2 + $0x25a] sm:$0xff] }
 0x5a4   :  { %v6140_v31 = vmax.f32 %v6138_v34, %v6139_v0  ;;  %v6147_v25 = vmax.f32 %v6145_v16, %v6146_v55  ;;  %v6159_v5 = vmax.f32 %v6157_v6, %v6158_v42  ;;  %v6171_v45 = vmax.f32 %v6169_v47, %v6170_v1 }
 0x5a5   :  { %v6153_v13 = vrot.slane %v6152_v36, 1  ;;  %v6166_v51 = vmax.f32 %v6164_v29, %v6165_v46  ;;  %v5216_v2 = vrot.slane %v5042_v41, 2  ;;  %v5217_v35 = vrot.slane %v5042_v41, 4 }
 0x5a6   :  { %v6160_v61 = vrot.slane %v6159_v5, 1  ;;  %v6172_v10 = vrot.slane %v6171_v45, 2  ;;  %v5218_v3 = vrot.slane %v5042_v41, 6  ;;  %v6176_v60 = vsel %vm5531_vm3, %v5042_v41, -inf  ;;  %11263 = vmatmul.msk.f32.gmra.mxu0 %vm97_vm1, %v4591_v21 }
 0x5a7   :  { %v6154_v30 = vmax.f32 %v6152_v36, %v6153_v13  ;;  %v6167_v39 = vrot.slane %v6166_v51, 1  ;;  %v6177_v50 = vrot.slane %v6176_v60, 4  ;;  %v6183_v40 = vsel %vm5531_vm3, %v5216_v2, -inf }
 0x5a8   :  { %v6161_v34 = vmax.f32 %v6159_v5, %v6160_v61  ;;  %v6173_v16 = vmax.f32 %v6171_v45, %v6172_v10  ;;  %v6184_v63 = vrot.slane %v6183_v40, 4  ;;  %v6190_v15 = vsel %vm5531_vm3, %v5217_v35, -inf }
 0x5a9   :  { %v6168_v28 = vmax.f32 %v6166_v51, %v6167_v39  ;;  %v7446_v24 = vsel %vm7324_vm4, %v6154_v30, -inf  ;;  %v6178_v0 = vmax.f32 %v6176_v60, %v6177_v50  ;;  %v6191_v55 = vrot.slane %v6190_v15, 4  ;;  %v4902_v30 = vpop.f32.mrf.mxu0 }
 0x5aa   :  { %v6174_v6 = vrot.slane %v6173_v16, 1  ;;  %v7447_v47 = vmax.f32 %v14556_v59, %v7446_v24  ;;  %v7449_v53 = vsel %vm7324_vm4, %v6161_v34, -inf  ;;  %v6185_v29 = vmax.f32 %v6183_v40, %v6184_v63 }
 0x5ab   :  { %v7450_v42 = vmax.f32 %v7448_v56, %v7449_v53  ;;  %v7452_v1 = vsel %vm7324_vm4, %v6168_v28, -inf  ;;  %v6179_v36 = vrot.slane %v6178_v0, 2  ;;  %v6192_v46 = vmax.f32 %v6190_v15, %v6191_v55  ;;  %v16618_v28 = vld [vmem:[#allocation14_spill] sm:$0xff] }
 0x5ac   :  { %v6175_v44 = vmax.f32 %v6173_v16, %v6174_v6  ;;  %v7453_v41 = vmax.f32 %v7451_v62, %v7452_v1  ;;  %v7749_v5 = vmax.f32 %v7447_v47, 0.0  ;;  %v6186_v45 = vrot.slane %v6185_v29, 2  ;;  %v4592_v1 = vld [vmem:[#allocation2 + $0x262] sm:$0xff] }
 0x5ad   :  { %v7750_v13 = vmax.f32 %v7450_v42, 0.0  ;;  %v6180_v51 = vmax.f32 %v6178_v0, %v6179_v36  ;;  %v6193_v2 = vrot.slane %v6192_v46, 2  ;;  %v6197_v35 = vsel %vm5531_vm3, %v5218_v3, -inf }
 0x5ae   :  { %v7455_v61 = vsel %vm7324_vm4, %v6175_v44, -inf  ;;  %v7751_v59 = vmax.f32 %v7453_v41, 0.0  ;;  %v6187_v10 = vmax.f32 %v6185_v29, %v6186_v45  ;;  %v6198_v60 = vrot.slane %v6197_v35, 4  ;;  %11264 = vmatmul.msk.f32.gmra.mxu0 %vm97_vm1, %v4592_v1 }
 0x5af   :  { %v7456_v56 = vmax.f32 %v14569_v19, %v7455_v61  ;;  %v8047_v39 = vsel %vm8005_vm5, %v7750_v13, %v7749_v5  ;;  %v6181_v50 = vrot.slane %v6180_v51, 1  ;;  %v6194_v40 = vmax.f32 %v6192_v46, %v6193_v2  ;;  %v16619_v19 = vld [vmem:[#allocation15_spill] sm:$0xff]  ;;  %v4446_v13 = vpop.f32.mrf.mxu3 }
 0x5b0   :  { %v7463_v62 = vsel %vm7324_vm4, %v6140_v31, -inf  ;;  %v8048_v21 = vsel %vm8007_vm6, %v7751_v59, %v8047_v39  ;;  %v6188_v34 = vrot.slane %v6187_v10, 1  ;;  %v6199_v16 = vmax.f32 %v6197_v35, %v6198_v60 }
 0x5b1   :  { %v7752_v63 = vmax.f32 %v7456_v56, 0.0  ;;  %v6182_v3 = vmax.f32 %v6180_v51, %v6181_v50  ;;  %v6195_v15 = vrot.slane %v6194_v40, 1  ;;  %v5043_v24 = vadd.f32 %v4899_v37, %v16618_v28  ;;  %v4905_v50 = vpop.f32.mrf.mxu0 }
 0x5b2   :  { %v7466_v0 = vsel %vm7324_vm4, %v6147_v25, -inf  ;;  %v6189_v55 = vmax.f32 %v6187_v10, %v6188_v34  ;;  %v6200_v6 = vrot.slane %v6199_v16, 2  ;;  %v14595_v47 = vadd.f32 %v4902_v30, %v16619_v19 }
 0x5b3   :  { %v8049_v53 = vsel %vm8009_vm7, %v7752_v63, %v8048_v21  ;;  %v6196_v29 = vmax.f32 %v6194_v40, %v6195_v15  ;;  %v7458_v31 = vsel %vm7324_vm4, %v6182_v3, -inf  ;;  %v5219_v42 = vrot.slane %v5043_v24, 2 }
 0x5b4   :  { %v6201_v36 = vmax.f32 %v6199_v16, %v6200_v6  ;;  %v7459_v46 = vmax.f32 %v14572_v4, %v7458_v31  ;;  %v7461_v44 = vsel %vm7324_vm4, %v6189_v55, -inf  ;;  %v5220_v37 = vrot.slane %v5043_v24, 4 }
 0x5b5   :  { %v7462_v25 = vmax.f32 %v14575_v20, %v7461_v44  ;;  %v7464_v41 = vsel %vm7324_vm4, %v6196_v29, -inf  ;;  %v5221_v5 = vrot.slane %v5043_v24, 6  ;;  %v6204_v45 = vsel %vm5531_vm3, %v5043_v24, -inf }
 0x5b6   :  { %v6202_v51 = vrot.slane %v6201_v36, 1  ;;  %v7465_v2 = vmax.f32 %v7463_v62, %v7464_v41  ;;  %v7753_v35 = vmax.f32 %v7459_v46, 0.0  ;;  %v6205_v61 = vrot.slane %v6204_v45, 4 }
 0x5b7   :  { %v7754_v59 = vmax.f32 %v7462_v25, 0.0  ;;  %v6211_v4 = vsel %vm5531_vm3, %v5219_v42, -inf  ;;  %v6218_v10 = vsel %vm5531_vm3, %v5220_v37, -inf  ;;  %v6225_v60 = vsel %vm5531_vm3, %v5221_v5, -inf }
 0x5b8   :  { %v6203_v30 = vmax.f32 %v6201_v36, %v6202_v51  ;;  %v7755_v56 = vmax.f32 %v7465_v2, 0.0  ;;  %v8050_v20 = vsel %vm8011_vm8, %v7753_v35, %v8049_v53  ;;  %v6206_v39 = vmax.f32 %v6204_v45, %v6205_v61  ;;  %v4593_v2 = vld [vmem:[#allocation2 + $0x272] sm:$0xff]  ;;  %v4449_v35 = vpop.f32.mrf.mxu3  ;;  %v3921_v61 = vpop.f32.mrf.mxu2 }
 0x5b9   :  { %v8051_v40 = vsel %vm8013_vm9, %v7754_v59, %v8050_v20  ;;  %v6212_v21 = vrot.slane %v6211_v4, 4  ;;  %v6219_v34 = vrot.slane %v6218_v10, 4  ;;  %v6226_v62 = vrot.slane %v6225_v60, 4  ;;  %11265 = vmatmul.msk.f32.gmra.mxu0 %vm97_vm1, %v4593_v2 }
 0x5ba   :  { %v7467_v16 = vsel %vm7324_vm4, %v6203_v30, -inf  ;;  %v8052_v63 = vsel %vm8015_vm10, %v7755_v56, %v8051_v40  ;;  %v6207_v3 = vrot.slane %v6206_v39, 2  ;;  %v5222_v15 = vrot.slane %v14595_v47, 2 }
 0x5bb   :  { %v7468_v28 = vmax.f32 %v7466_v0, %v7467_v16  ;;  %v6213_v24 = vmax.f32 %v6211_v4, %v6212_v21  ;;  %v6220_v55 = vmax.f32 %v6218_v10, %v6219_v34  ;;  %v6227_v6 = vmax.f32 %v6225_v60, %v6226_v62  ;;  %v4908_v62 = vpop.f32.mrf.mxu0 }
 0x5bc   :  { %v6208_v19 = vmax.f32 %v6206_v39, %v6207_v3  ;;  %v5223_v53 = vrot.slane %v14595_v47, 4  ;;  %v5224_v29 = vrot.slane %v14595_v47, 6  ;;  %v6232_v31 = vsel %vm5531_vm3, %v14595_v47, -inf }
 0x5bd   :  { %v7756_v42 = vmax.f32 %v7468_v28, 0.0  ;;  %v6214_v1 = vrot.slane %v6213_v24, 2  ;;  %v6221_v36 = vrot.slane %v6220_v55, 2  ;;  %v6228_v46 = vrot.slane %v6227_v6, 2 }
 0x5be   :  { %v6209_v44 = vrot.slane %v6208_v19, 1  ;;  %v6233_v37 = vrot.slane %v6232_v31, 4  ;;  %v6239_v25 = vsel %vm5531_vm3, %v5222_v15, -inf  ;;  %v6246_v0 = vsel %vm5531_vm3, %v5223_v53, -inf }
 0x5bf   :  { %v8053_v41 = vsel %vm8017_vm11, %v7756_v42, %v8052_v63  ;;  %v6215_v5 = vmax.f32 %v6213_v24, %v6214_v1  ;;  %v6222_v45 = vmax.f32 %v6220_v55, %v6221_v36  ;;  %v6229_v51 = vmax.f32 %v6227_v6, %v6228_v46  ;;  %v16620_v6 = vld [vmem:[#allocation16_spill] sm:$0xff] }
 0x5c0   :  { %8146 = vst.msk [vmem:[#allocation3 + $0x61] sm:$0xff] %vm7324_vm4, %v8053_v41  ;;  %v6210_v47 = vmax.f32 %v6208_v19, %v6209_v44  ;;  %v6234_v59 = vmax.f32 %v6232_v31, %v6233_v37  ;;  %v6240_v4 = vrot.slane %v6239_v25, 4  ;;  %v6247_v10 = vrot.slane %v6246_v0, 4 }
 0x5c1   :  { %v6216_v60 = vrot.slane %v6215_v5, 1  ;;  %v6223_v30 = vrot.slane %v6222_v45, 1  ;;  %v6230_v56 = vrot.slane %v6229_v51, 1  ;;  %v6253_v20 = vsel %vm5531_vm3, %v5224_v29, -inf }
 0x5c2   :  { %v14624_v39 = vadd.f32 %v4446_v13, %v14250_v48  ;;  %v6235_v40 = vrot.slane %v6234_v59, 2  ;;  %v6241_v21 = vmax.f32 %v6239_v25, %v6240_v4  ;;  %v6248_v34 = vmax.f32 %v6246_v0, %v6247_v10 }
 0x5c3   :  { %v14627_v16 = vadd.f32 %v4449_v35, %v14526_v8  ;;  %v14630_v63 = vadd.f32 %v3921_v61, %v14552_v26  ;;  %v14633_v3 = vsel %vm7324_vm4, %v6210_v47, -inf  ;;  %v6254_v15 = vrot.slane %v6253_v20, 4 }
 0x5c4   :  { %v6236_v28 = vmax.f32 %v6234_v59, %v6235_v40  ;;  %v6242_v24 = vrot.slane %v6241_v21, 2  ;;  %v6249_v55 = vrot.slane %v6248_v34, 2  ;;  %v5045_v48 = vadd.f32 %v4905_v50, %v16620_v6 }
 0x5c5   :  { %v6217_v13 = vmax.f32 %v6215_v5, %v6216_v60  ;;  %v6224_v19 = vmax.f32 %v6222_v45, %v6223_v30  ;;  %v6231_v53 = vmax.f32 %v6229_v51, %v6230_v56  ;;  %v6255_v29 = vmax.f32 %v6253_v20, %v6254_v15  ;;  %v4594_v60 = vld [vmem:[#allocation2 + $0x27a] sm:$0xff] }
 0x5c6   :  { %v6237_v31 = vrot.slane %v6236_v28, 1  ;;  %v6243_v42 = vmax.f32 %v6241_v21, %v6242_v24  ;;  %v6250_v8 = vmax.f32 %v6248_v34, %v6249_v55  ;;  %v5225_v1 = vrot.slane %v5045_v48, 2  ;;  %11266 = vmatmul.msk.f32.gmra.mxu0 %vm97_vm1, %v4594_v60  ;;  %v4911_v24 = vpop.f32.mrf.mxu0 }
 0x5c7   :  { %v6256_v36 = vrot.slane %v6255_v29, 2  ;;  %v5226_v26 = vrot.slane %v5045_v48, 4  ;;  %v5227_v46 = vrot.slane %v5045_v48, 6  ;;  %v6260_v44 = vsel %vm5531_vm3, %v5045_v48, -inf  ;;  %v8167_v37 = vld [vmem:[#allocation3 + $0x60] sm:$0xff] }
 0x5c8   :  { %v8313_v25 = vld [vmem:[#allocation3 + $0x61] sm:$0xff]  ;;  %v6238_v0 = vmax.f32 %v6236_v28, %v6237_v31  ;;  %v6244_v41 = vrot.slane %v6243_v42, 1  ;;  %v6251_v2 = vrot.slane %v6250_v8, 1  ;;  %v6261_v35 = vrot.slane %v6260_v44, 4  ;;  %11291 = vmatmul.msk.f32.gmra.mxu1 %vm7324_vm4, %v8167_v37 }
 0x5c9   :  { %11308 = vmatmul.msk.f32.gmra.mxu2 %vm7324_vm4, %v8313_v25  ;;  %v8460_v50 = vld [vmem:[#allocation3 + $0x62] sm:$0xff]  ;;  %v6257_v5 = vmax.f32 %v6255_v29, %v6256_v36  ;;  %v6267_v45 = vsel %vm5531_vm3, %v5225_v1, -inf  ;;  %v6274_v51 = vsel %vm5531_vm3, %v5226_v26, -inf  ;;  %v6281_v61 = vsel %vm5531_vm3, %v5227_v46, -inf  ;;  %v16622_v26 = vld [vmem:[#allocation18_spill] sm:$0xff] }
 0x5ca   :  { %11325 = vmatmul.msk.f32.gmra.mxu3 %vm7324_vm4, %v8460_v50  ;;  %v14644_v47 = vsel %vm7324_vm4, %v6217_v13, -inf  ;;  %v6245_v59 = vmax.f32 %v6243_v42, %v6244_v41  ;;  %v6252_v4 = vmax.f32 %v6250_v8, %v6251_v2  ;;  %v6262_v10 = vmax.f32 %v6260_v44, %v6261_v35  ;;  %v16621_v8 = vld [vmem:[#allocation17_spill] sm:$0xff] }
 0x5cb   :  { %v6258_v30 = vrot.slane %v6257_v5, 1  ;;  %v6268_v56 = vrot.slane %v6267_v45, 4  ;;  %v6275_v20 = vrot.slane %v6274_v51, 4  ;;  %v6282_v40 = vrot.slane %v6281_v61, 4 }
 0x5cc   :  { %v7475_v21 = vsel %vm7324_vm4, %v6224_v19, -inf  ;;  %v7478_v34 = vsel %vm7324_vm4, %v6231_v53, -inf  ;;  %v14650_v15 = vsel %vm7324_vm4, %v6238_v0, -inf  ;;  %v6263_v28 = vrot.slane %v6262_v10, 2 }
 0x5cd   :  { %v14653_v55 = vsel %vm7324_vm4, %v6245_v59, -inf  ;;  %v6269_v6 = vmax.f32 %v6267_v45, %v6268_v56  ;;  %v6276_v48 = vmax.f32 %v6274_v51, %v6275_v20  ;;  %v6283_v13 = vmax.f32 %v6281_v61, %v6282_v40  ;;  %v4595_v61 = vld [vmem:[#allocation2 + $0x28a] sm:$0xff] }
 0x5ce   :  { %v6259_v29 = vmax.f32 %v6257_v5, %v6258_v30  ;;  %v14656_v31 = vsel %vm7324_vm4, %v6252_v4, -inf  ;;  %v6264_v42 = vmax.f32 %v6262_v10, %v6263_v28  ;;  %v5046_v19 = vadd.f32 %v4908_v62, %v16621_v8  ;;  %11267 = vmatmul.msk.f32.gmra.mxu0 %vm97_vm1, %v4595_v61 }
 0x5cf   :  { %v6270_v1 = vrot.slane %v6269_v6, 2  ;;  %v6277_v53 = vrot.slane %v6276_v48, 2  ;;  %v6284_v36 = vrot.slane %v6283_v13, 2  ;;  %v14660_v46 = vadd.f32 %v4911_v24, %v16622_v26 }
 0x5d0   :  { %v6265_v44 = vrot.slane %v6264_v42, 1  ;;  %v5228_v37 = vrot.slane %v5046_v19, 2  ;;  %v5229_v25 = vrot.slane %v5046_v19, 4  ;;  %v5230_v0 = vrot.slane %v5046_v19, 6 }
 0x5d1   :  { %v6271_v41 = vmax.f32 %v6269_v6, %v6270_v1  ;;  %v6278_v2 = vmax.f32 %v6276_v48, %v6277_v53  ;;  %v6285_v35 = vmax.f32 %v6283_v13, %v6284_v36  ;;  %v6288_v50 = vsel %vm5531_vm3, %v5046_v19, -inf }
 0x5d2   :  { %v6266_v5 = vmax.f32 %v6264_v42, %v6265_v44  ;;  %v6289_v45 = vrot.slane %v6288_v50, 4  ;;  %v6295_v51 = vsel %vm5531_vm3, %v5228_v37, -inf  ;;  %v6302_v62 = vsel %vm5531_vm3, %v5229_v25, -inf }
 0x5d3   :  { %v6272_v59 = vrot.slane %v6271_v41, 1  ;;  %v6279_v4 = vrot.slane %v6278_v2, 1  ;;  %v6286_v10 = vrot.slane %v6285_v35, 1  ;;  %v6296_v60 = vrot.slane %v6295_v51, 4 }
 0x5d4   :  { %v7470_v30 = vsel %vm7324_vm4, %v6266_v5, -inf  ;;  %v6290_v56 = vmax.f32 %v6288_v50, %v6289_v45  ;;  %v6303_v20 = vrot.slane %v6302_v62, 4  ;;  %v6309_v40 = vsel %vm5531_vm3, %v5230_v0, -inf  ;;  %v4914_v50 = vpop.f32.mrf.mxu0 }
 0x5d5   :  { %v6273_v28 = vmax.f32 %v6271_v41, %v6272_v59  ;;  %v6280_v24 = vmax.f32 %v6278_v2, %v6279_v4  ;;  %v6287_v6 = vmax.f32 %v6285_v35, %v6286_v10  ;;  %v7471_v48 = vmax.f32 %v14633_v3, %v7470_v30 }
 0x5d6   :  { %v6291_v13 = vrot.slane %v6290_v56, 2  ;;  %v6297_v42 = vmax.f32 %v6295_v51, %v6296_v60  ;;  %v6304_v8 = vmax.f32 %v6302_v62, %v6303_v20  ;;  %v6310_v19 = vrot.slane %v6309_v40, 4 }
 0x5d7   :  { %v14670_v1 = vsel %vm7324_vm4, %v6259_v29, -inf  ;;  %v7473_v53 = vsel %vm7324_vm4, %v6273_v28, -inf  ;;  %v7476_v36 = vsel %vm7324_vm4, %v6280_v24, -inf  ;;  %v7479_v26 = vsel %vm7324_vm4, %v6287_v6, -inf }
 0x5d8   :  { %v7474_v44 = vmax.f32 %v14644_v47, %v7473_v53  ;;  %v7477_v37 = vmax.f32 %v7475_v21, %v7476_v36  ;;  %v7480_v25 = vmax.f32 %v7478_v34, %v7479_v26  ;;  %v6292_v0 = vmax.f32 %v6290_v56, %v6291_v13  ;;  %v3389_v53 = vpop.f32.mrf.mxu1 }
 0x5d9   :  { %v7757_v41 = vmax.f32 %v7471_v48, 0.0  ;;  %v6298_v3 = vrot.slane %v6297_v42, 2  ;;  %v6305_v2 = vrot.slane %v6304_v8, 2  ;;  %v6311_v35 = vmax.f32 %v6309_v40, %v6310_v19  ;;  %v4596_v19 = vld [vmem:[#allocation2 + $0x292] sm:$0xff] }
 0x5da   :  { %v7758_v5 = vmax.f32 %v7474_v44, 0.0  ;;  %v7759_v45 = vmax.f32 %v7477_v37, 0.0  ;;  %v7760_v29 = vmax.f32 %v7480_v25, 0.0  ;;  %v6293_v51 = vrot.slane %v6292_v0, 1  ;;  %11268 = vmatmul.msk.f32.gmra.mxu0 %vm97_vm1, %v4596_v19  ;;  %v4452_v19 = vpop.f32.mrf.mxu3 }
 0x5db   :  { %v6299_v62 = vmax.f32 %v6297_v42, %v6298_v3  ;;  %v6306_v61 = vmax.f32 %v6304_v8, %v6305_v2  ;;  %v6312_v59 = vrot.slane %v6311_v35, 2  ;;  %v5231_v4 = vrot.slane %v14660_v46, 2 }
 0x5dc   :  { %v8054_v10 = vsel %vm8005_vm5, %v7758_v5, %v7757_v41  ;;  %v6294_v47 = vmax.f32 %v6292_v0, %v6293_v51  ;;  %v5232_v21 = vrot.slane %v14660_v46, 4  ;;  %v5233_v34 = vrot.slane %v14660_v46, 6 }
 0x5dd   :  { %v8055_v60 = vsel %vm8007_vm6, %v7759_v45, %v8054_v10  ;;  %v6300_v30 = vrot.slane %v6299_v62, 1  ;;  %v6307_v56 = vrot.slane %v6306_v61, 1  ;;  %v6313_v20 = vmax.f32 %v6311_v35, %v6312_v59 }
 0x5de   :  { %v8056_v40 = vsel %vm8009_vm7, %v7760_v29, %v8055_v60  ;;  %v7482_v28 = vsel %vm7324_vm4, %v6294_v47, -inf  ;;  %v6316_v24 = vsel %vm5531_vm3, %v14660_v46, -inf  ;;  %v6323_v6 = vsel %vm5531_vm3, %v5231_v4, -inf }
 0x5df   :  { %v6301_v48 = vmax.f32 %v6299_v62, %v6300_v30  ;;  %v6308_v13 = vmax.f32 %v6306_v61, %v6307_v56  ;;  %v6314_v42 = vrot.slane %v6313_v20, 1  ;;  %v7483_v8 = vmax.f32 %v14650_v15, %v7482_v28  ;;  %v4917_v62 = vpop.f32.mrf.mxu0 }
 0x5e0   :  { %v6317_v36 = vrot.slane %v6316_v24, 4  ;;  %v6324_v26 = vrot.slane %v6323_v6, 4  ;;  %v6330_v44 = vsel %vm5531_vm3, %v5232_v21, -inf  ;;  %v6337_v37 = vsel %vm5531_vm3, %v5233_v34, -inf }
 0x5e1   :  { %v6315_v25 = vmax.f32 %v6313_v20, %v6314_v42  ;;  %v7485_v46 = vsel %vm7324_vm4, %v6301_v48, -inf  ;;  %v7488_v0 = vsel %vm7324_vm4, %v6308_v13, -inf  ;;  %v7761_v41 = vmax.f32 %v7483_v8, 0.0  ;;  %v16624_v20 = vld [vmem:[#allocation20_spill] sm:$0xff] }
 0x5e2   :  { %v7486_v3 = vmax.f32 %v14653_v55, %v7485_v46  ;;  %v7489_v15 = vmax.f32 %v14656_v31, %v7488_v0  ;;  %v6318_v2 = vmax.f32 %v6316_v24, %v6317_v36  ;;  %v6325_v35 = vmax.f32 %v6323_v6, %v6324_v26  ;;  %v16623_v55 = vld [vmem:[#allocation19_spill] sm:$0xff] }
 0x5e3   :  { %v7491_v5 = vsel %vm7324_vm4, %v6315_v25, -inf  ;;  %v8057_v45 = vsel %vm8011_vm8, %v7761_v41, %v8056_v40  ;;  %v6331_v29 = vrot.slane %v6330_v44, 4  ;;  %v6338_v51 = vrot.slane %v6337_v37, 4  ;;  %v3392_v25 = vpop.f32.mrf.mxu1 }
 0x5e4   :  { %v7492_v61 = vmax.f32 %v14670_v1, %v7491_v5  ;;  %v7762_v59 = vmax.f32 %v7486_v3, 0.0  ;;  %v7763_v4 = vmax.f32 %v7489_v15, 0.0  ;;  %v6319_v10 = vrot.slane %v6318_v2, 2 }
 0x5e5   :  { %v6326_v47 = vrot.slane %v6325_v35, 2  ;;  %v6332_v21 = vmax.f32 %v6330_v44, %v6331_v29  ;;  %v6339_v34 = vmax.f32 %v6337_v37, %v6338_v51  ;;  %v5048_v60 = vadd.f32 %v4914_v50, %v16623_v55  ;;  %v4597_v37 = vld [vmem:[#allocation2 + $0x2a2] sm:$0xff] }
 0x5e6   :  { %v7764_v31 = vmax.f32 %v7492_v61, 0.0  ;;  %v8058_v30 = vsel %vm8013_vm9, %v7762_v59, %v8057_v45  ;;  %v6320_v56 = vmax.f32 %v6318_v2, %v6319_v10  ;;  %v14700_v28 = vadd.f32 %v4917_v62, %v16624_v20  ;;  %11269 = vmatmul.msk.f32.gmra.mxu0 %vm97_vm1, %v4597_v37 }
 0x5e7   :  { %v8059_v40 = vsel %vm8015_vm10, %v7763_v4, %v8058_v30  ;;  %v6327_v24 = vmax.f32 %v6325_v35, %v6326_v47  ;;  %v6333_v6 = vrot.slane %v6332_v21, 2  ;;  %v6340_v1 = vrot.slane %v6339_v34, 2 }
 0x5e8   :  { %v8060_v48 = vsel %vm8017_vm11, %v7764_v31, %v8059_v40  ;;  %v6321_v13 = vrot.slane %v6320_v56, 1  ;;  %v5234_v42 = vrot.slane %v5048_v60, 2  ;;  %v5235_v8 = vrot.slane %v5048_v60, 4 }
 0x5e9   :  { %8147 = vst.msk [vmem:[#allocation3 + $0x71] sm:$0xff] %vm7324_vm4, %v8060_v48  ;;  %v6328_v50 = vrot.slane %v6327_v24, 1  ;;  %v6334_v36 = vmax.f32 %v6332_v21, %v6333_v6  ;;  %v6341_v26 = vmax.f32 %v6339_v34, %v6340_v1  ;;  %v5236_v44 = vrot.slane %v5048_v60, 6  ;;  %v4920_v34 = vpop.f32.mrf.mxu0 }
 0x5ea   :  { %v6322_v46 = vmax.f32 %v6320_v56, %v6321_v13  ;;  %v6344_v0 = vsel %vm5531_vm3, %v5048_v60, -inf  ;;  %v6351_v41 = vsel %vm5531_vm3, %v5234_v42, -inf  ;;  %v6358_v3 = vsel %vm5531_vm3, %v5235_v8, -inf }
 0x5eb   :  { %v14710_v15 = vadd.f32 %v3389_v53, %v14015_v18  ;;  %v6335_v2 = vrot.slane %v6334_v36, 1  ;;  %v6342_v35 = vrot.slane %v6341_v26, 1  ;;  %v6345_v5 = vrot.slane %v6344_v0, 4 }
 0x5ec   :  { %v14713_v45 = vadd.f32 %v4452_v19, %v14549_v49  ;;  %v6352_v29 = vrot.slane %v6351_v41, 4  ;;  %v6359_v51 = vrot.slane %v6358_v3, 4  ;;  %v6365_v62 = vsel %vm5531_vm3, %v5236_v44, -inf }
 0x5ed   :  { %v14717_v61 = vadd.f32 %v3392_v25, %v14037_v38  ;;  %v6329_v59 = vmax.f32 %v6327_v24, %v6328_v50  ;;  %v14720_v4 = vsel %vm7324_vm4, %v6322_v46, -inf  ;;  %v6346_v10 = vmax.f32 %v6344_v0, %v6345_v5 }
 0x5ee   :  { %v6353_v18 = vmax.f32 %v6351_v41, %v6352_v29  ;;  %v6360_v53 = vmax.f32 %v6358_v3, %v6359_v51  ;;  %v6366_v47 = vrot.slane %v6365_v62, 4  ;;  %v5237_v21 = vrot.slane %v14700_v28, 2  ;;  %v4598_v29 = vld [vmem:[#allocation2 + $0x2aa] sm:$0xff] }
 0x5ef   :  { %v6336_v49 = vmax.f32 %v6334_v36, %v6335_v2  ;;  %v6343_v55 = vmax.f32 %v6341_v26, %v6342_v35  ;;  %v6347_v60 = vrot.slane %v6346_v10, 2  ;;  %v5238_v31 = vrot.slane %v14700_v28, 4  ;;  %11270 = vmatmul.msk.f32.gmra.mxu0 %vm97_vm1, %v4598_v29 }
 0x5f0   :  { %v6354_v30 = vrot.slane %v6353_v18, 2  ;;  %v6361_v56 = vrot.slane %v6360_v53, 2  ;;  %v6367_v38 = vmax.f32 %v6365_v62, %v6366_v47  ;;  %v5239_v20 = vrot.slane %v14700_v28, 6  ;;  %v8168_v40 = vld [vmem:[#allocation3 + $0x70] sm:$0xff] }
 0x5f1   :  { %v8314_v24 = vld [vmem:[#allocation3 + $0x71] sm:$0xff]  ;;  %v6348_v1 = vmax.f32 %v6346_v10, %v6347_v60  ;;  %v6372_v48 = vsel %vm5531_vm3, %v14700_v28, -inf  ;;  %v6379_v13 = vsel %vm5531_vm3, %v5237_v21, -inf  ;;  %v6386_v42 = vsel %vm5531_vm3, %v5238_v31, -inf  ;;  %11292 = vmatmul.msk.f32.gmra.mxu1 %vm7324_vm4, %v8168_v40 }
 0x5f2   :  { %v8461_v6 = vld [vmem:[#allocation3 + $0x72] sm:$0xff]  ;;  %11309 = vmatmul.msk.f32.gmra.mxu2 %vm7324_vm4, %v8314_v24  ;;  %v6355_v8 = vmax.f32 %v6353_v18, %v6354_v30  ;;  %v6362_v19 = vmax.f32 %v6360_v53, %v6361_v56  ;;  %v6368_v50 = vrot.slane %v6367_v38, 2  ;;  %v6373_v36 = vrot.slane %v6372_v48, 4 }
 0x5f3   :  { %11326 = vmatmul.msk.f32.gmra.mxu3 %vm7324_vm4, %v8461_v6  ;;  %v6349_v26 = vrot.slane %v6348_v1, 1  ;;  %v6380_v44 = vrot.slane %v6379_v13, 4  ;;  %v6387_v37 = vrot.slane %v6386_v42, 4  ;;  %v6393_v25 = vsel %vm5531_vm3, %v5239_v20, -inf  ;;  %v4923_v20 = vpop.f32.mrf.mxu0 }
 0x5f4   :  { %v6356_v28 = vrot.slane %v6355_v8, 1  ;;  %v6363_v46 = vrot.slane %v6362_v19, 1  ;;  %v6369_v0 = vmax.f32 %v6367_v38, %v6368_v50  ;;  %v6374_v41 = vmax.f32 %v6372_v48, %v6373_v36  ;;  %v16626_v50 = vld [vmem:[#allocation22_spill] sm:$0xff] }
 0x5f5   :  { %v6350_v3 = vmax.f32 %v6348_v1, %v6349_v26  ;;  %v6381_v2 = vmax.f32 %v6379_v13, %v6380_v44  ;;  %v6388_v35 = vmax.f32 %v6386_v42, %v6387_v37  ;;  %v6394_v5 = vrot.slane %v6393_v25, 4  ;;  %v16625_v42 = vld [vmem:[#allocation21_spill] sm:$0xff] }
 0x5f6   :  { %v6357_v51 = vmax.f32 %v6355_v8, %v6356_v28  ;;  %v6364_v62 = vmax.f32 %v6362_v19, %v6363_v46  ;;  %v6370_v10 = vrot.slane %v6369_v0, 1  ;;  %v6375_v18 = vrot.slane %v6374_v41, 2 }
 0x5f7   :  { %v7496_v53 = vsel %vm7324_vm4, %v6329_v59, -inf  ;;  %v6382_v47 = vrot.slane %v6381_v2, 2  ;;  %v6389_v21 = vrot.slane %v6388_v35, 2  ;;  %v6395_v60 = vmax.f32 %v6393_v25, %v6394_v5 }
 0x5f8   :  { %v7499_v31 = vsel %vm7324_vm4, %v6336_v49, -inf  ;;  %v7502_v30 = vsel %vm7324_vm4, %v6343_v55, -inf  ;;  %v14738_v56 = vsel %vm7324_vm4, %v6350_v3, -inf  ;;  %v6376_v38 = vmax.f32 %v6374_v41, %v6375_v18  ;;  %v4599_v3 = vld [vmem:[#allocation2 + $0x2ba] sm:$0xff] }
 0x5f9   :  { %v6371_v40 = vmax.f32 %v6369_v0, %v6370_v10  ;;  %v6383_v24 = vmax.f32 %v6381_v2, %v6382_v47  ;;  %v6390_v6 = vmax.f32 %v6388_v35, %v6389_v21  ;;  %v6396_v1 = vrot.slane %v6395_v60, 2  ;;  %11271 = vmatmul.msk.f32.gmra.mxu0 %vm97_vm1, %v4599_v3 }
 0x5fa   :  { %v14741_v48 = vsel %vm7324_vm4, %v6357_v51, -inf  ;;  %v14744_v59 = vsel %vm7324_vm4, %v6364_v62, -inf  ;;  %v6377_v13 = vrot.slane %v6376_v38, 1  ;;  %v5050_v49 = vadd.f32 %v4920_v34, %v16625_v42 }
 0x5fb   :  { %v6384_v8 = vrot.slane %v6383_v24, 1  ;;  %v6391_v55 = vrot.slane %v6390_v6, 1  ;;  %v6397_v19 = vmax.f32 %v6395_v60, %v6396_v1  ;;  %v14748_v36 = vadd.f32 %v4923_v20, %v16626_v50 }
 0x5fc   :  { %v6378_v26 = vmax.f32 %v6376_v38, %v6377_v13  ;;  %v5240_v44 = vrot.slane %v5050_v49, 2  ;;  %v5241_v37 = vrot.slane %v5050_v49, 4  ;;  %v5242_v25 = vrot.slane %v5050_v49, 6 }
 0x5fd   :  { %v6385_v28 = vmax.f32 %v6383_v24, %v6384_v8  ;;  %v6392_v46 = vmax.f32 %v6390_v6, %v6391_v55  ;;  %v6398_v0 = vrot.slane %v6397_v19, 1  ;;  %v6400_v41 = vsel %vm5531_vm3, %v5050_v49, -inf  ;;  %v14760_v8 = vpop.f32.mrf.mxu0 }
 0x5fe   :  { %v7494_v2 = vsel %vm7324_vm4, %v6378_v26, -inf  ;;  %v6401_v35 = vrot.slane %v6400_v41, 4  ;;  %v6407_v34 = vsel %vm5531_vm3, %v5240_v44, -inf  ;;  %v6414_v5 = vsel %vm5531_vm3, %v5241_v37, -inf }
 0x5ff   :  { %v6399_v29 = vmax.f32 %v6397_v19, %v6398_v0  ;;  %v7495_v51 = vmax.f32 %v14720_v4, %v7494_v2  ;;  %v7497_v62 = vsel %vm7324_vm4, %v6385_v28, -inf  ;;  %v7500_v10 = vsel %vm7324_vm4, %v6392_v46, -inf }
 0x600   :  { %v7498_v18 = vmax.f32 %v7496_v53, %v7497_v62  ;;  %v7501_v47 = vmax.f32 %v7499_v31, %v7500_v10  ;;  %v6402_v21 = vmax.f32 %v6400_v41, %v6401_v35  ;;  %v6408_v60 = vrot.slane %v6407_v34, 4 }
 0x601   :  { %v7503_v38 = vsel %vm7324_vm4, %v6399_v29, -inf  ;;  %v7765_v20 = vmax.f32 %v7495_v51, 0.0  ;;  %v6415_v24 = vrot.slane %v6414_v5, 4  ;;  %v6421_v6 = vsel %vm5531_vm3, %v5242_v25, -inf }
 0x602   :  { %v7504_v1 = vmax.f32 %v7502_v30, %v7503_v38  ;;  %v7766_v13 = vmax.f32 %v7498_v18, 0.0  ;;  %v7767_v42 = vmax.f32 %v7501_v47, 0.0  ;;  %v6403_v49 = vrot.slane %v6402_v21, 2 }
 0x603   :  { %v14763_v4 = vsel %vm7324_vm4, %v6371_v40, -inf  ;;  %v6409_v55 = vmax.f32 %v6407_v34, %v6408_v60  ;;  %v6416_v53 = vmax.f32 %v6414_v5, %v6415_v24  ;;  %v6422_v31 = vrot.slane %v6421_v6, 4  ;;  %v3924_v5 = vpop.f32.mrf.mxu2 }
 0x604   :  { %v7768_v19 = vmax.f32 %v7504_v1, 0.0  ;;  %v8061_v50 = vsel %vm8005_vm5, %v7766_v13, %v7765_v20  ;;  %v6404_v26 = vmax.f32 %v6402_v21, %v6403_v49  ;;  %v5243_v44 = vrot.slane %v14748_v36, 2  ;;  %v4600_v1 = vld [vmem:[#allocation2 + $0x2c2] sm:$0xff] }
 0x605   :  { %v8062_v37 = vsel %vm8007_vm6, %v7767_v42, %v8061_v50  ;;  %v6410_v30 = vrot.slane %v6409_v55, 2  ;;  %v6417_v25 = vrot.slane %v6416_v53, 2  ;;  %v6423_v28 = vmax.f32 %v6421_v6, %v6422_v31  ;;  %11272 = vmatmul.msk.f32.gmra.mxu0 %vm97_vm1, %v4600_v1  ;;  %v4929_v50 = vpop.f32.mrf.mxu0 }
 0x606   :  { %v8063_v46 = vsel %vm8009_vm7, %v7768_v19, %v8062_v37  ;;  %v6405_v0 = vrot.slane %v6404_v26, 1  ;;  %v5244_v40 = vrot.slane %v14748_v36, 4  ;;  %v5245_v41 = vrot.slane %v14748_v36, 6 }
 0x607   :  { %v6411_v3 = vmax.f32 %v6409_v55, %v6410_v30  ;;  %v6418_v2 = vmax.f32 %v6416_v53, %v6417_v25  ;;  %v6424_v35 = vrot.slane %v6423_v28, 2  ;;  %v6428_v34 = vsel %vm5531_vm3, %v14748_v36, -inf }
 0x608   :  { %v6406_v29 = vmax.f32 %v6404_v26, %v6405_v0  ;;  %v6429_v51 = vrot.slane %v6428_v34, 4  ;;  %v6435_v62 = vsel %vm5531_vm3, %v5243_v44, -inf  ;;  %v6442_v10 = vsel %vm5531_vm3, %v5244_v40, -inf }
 0x609   :  { %v6412_v18 = vrot.slane %v6411_v3, 1  ;;  %v6419_v47 = vrot.slane %v6418_v2, 1  ;;  %v6425_v21 = vmax.f32 %v6423_v28, %v6424_v35  ;;  %v6436_v60 = vrot.slane %v6435_v62, 4 }
 0x60a   :  { %v7506_v38 = vsel %vm7324_vm4, %v6406_v29, -inf  ;;  %v6430_v20 = vmax.f32 %v6428_v34, %v6429_v51  ;;  %v6443_v24 = vrot.slane %v6442_v10, 4  ;;  %v6449_v6 = vsel %vm5531_vm3, %v5245_v41, -inf }
 0x60b   :  { %v6413_v13 = vmax.f32 %v6411_v3, %v6412_v18  ;;  %v6420_v36 = vmax.f32 %v6418_v2, %v6419_v47  ;;  %v6426_v42 = vrot.slane %v6425_v21, 1  ;;  %v7507_v49 = vmax.f32 %v14738_v56, %v7506_v38  ;;  %v16627_v47 = vld [vmem:[#allocation23_spill] sm:$0xff] }
 0x60c   :  { %v6431_v55 = vrot.slane %v6430_v20, 2  ;;  %v6437_v53 = vmax.f32 %v6435_v62, %v6436_v60  ;;  %v6444_v31 = vmax.f32 %v6442_v10, %v6443_v24  ;;  %v6450_v19 = vrot.slane %v6449_v6, 4 }
 0x60d   :  { %v6427_v26 = vmax.f32 %v6425_v21, %v6426_v42  ;;  %v7509_v44 = vsel %vm7324_vm4, %v6413_v13, -inf  ;;  %v7512_v37 = vsel %vm7324_vm4, %v6420_v36, -inf  ;;  %v7769_v30 = vmax.f32 %v7507_v49, 0.0  ;;  %v3927_v21 = vpop.f32.mrf.mxu2 }
 0x60e   :  { %v7510_v25 = vmax.f32 %v14741_v48, %v7509_v44  ;;  %v7513_v28 = vmax.f32 %v14744_v59, %v7512_v37  ;;  %v6432_v0 = vmax.f32 %v6430_v20, %v6431_v55  ;;  %v6438_v40 = vrot.slane %v6437_v53, 2  ;;  %v4455_v59 = vpop.f32.mrf.mxu3  ;;  %v4601_v55 = vld [vmem:[#allocation2 + $0x2d2] sm:$0xff]  ;;  %v14806_v37 = vpop.f32.mrf.mxu0 }
 0x60f   :  { %v7515_v56 = vsel %vm7324_vm4, %v6427_v26, -inf  ;;  %v8064_v41 = vsel %vm8011_vm8, %v7769_v30, %v8063_v46  ;;  %v6445_v3 = vrot.slane %v6444_v31, 2  ;;  %v6451_v2 = vmax.f32 %v6449_v6, %v6450_v19  ;;  %v16628_v46 = vld [vmem:[#allocation24_spill] sm:$0xff]  ;;  %11273 = vmatmul.msk.f32.gmra.mxu0 %vm97_vm1, %v4601_v55 }
 0x610   :  { %v7516_v35 = vmax.f32 %v14763_v4, %v7515_v56  ;;  %v7770_v34 = vmax.f32 %v7510_v25, 0.0  ;;  %v7771_v29 = vmax.f32 %v7513_v28, 0.0  ;;  %v6433_v51 = vrot.slane %v6432_v0, 1 }
 0x611   :  { %v6439_v62 = vmax.f32 %v6437_v53, %v6438_v40  ;;  %v6446_v10 = vmax.f32 %v6444_v31, %v6445_v3  ;;  %v6452_v18 = vrot.slane %v6451_v2, 2  ;;  %v5052_v48 = vadd.f32 %v14760_v8, %v16627_v47 }
 0x612   :  { %v7772_v60 = vmax.f32 %v7516_v35, 0.0  ;;  %v8065_v38 = vsel %vm8013_vm9, %v7770_v34, %v8064_v41  ;;  %v6434_v20 = vmax.f32 %v6432_v0, %v6433_v51  ;;  %v5053_v24 = vadd.f32 %v4929_v50, %v16628_v46 }
 0x613   :  { %v8066_v6 = vsel %vm8015_vm10, %v7771_v29, %v8065_v38  ;;  %v6440_v4 = vrot.slane %v6439_v62, 1  ;;  %v6447_v1 = vrot.slane %v6446_v10, 1  ;;  %v6453_v13 = vmax.f32 %v6451_v2, %v6452_v18 }
 0x614   :  { %v14792_v36 = vadd.f32 %v3924_v5, %v14710_v15  ;;  %v8067_v42 = vsel %vm8017_vm11, %v7772_v60, %v8066_v6  ;;  %v5246_v49 = vrot.slane %v5052_v48, 2  ;;  %v5247_v8 = vrot.slane %v5052_v48, 4 }
 0x615   :  { %v14796_v53 = vadd.f32 %v4455_v59, %v14630_v63  ;;  %v14799_v31 = vadd.f32 %v3927_v21, %v14717_v61  ;;  %8148 = vst.msk [vmem:[#allocation3 + $0x81] sm:$0xff] %vm7324_vm4, %v8067_v42  ;;  %v6454_v19 = vrot.slane %v6453_v13, 1  ;;  %v5248_v50 = vrot.slane %v5052_v48, 6 }
 0x616   :  { %v6456_v15 = vsel %vm5531_vm3, %v5052_v48, -inf  ;;  %v6463_v5 = vsel %vm5531_vm3, %v5246_v49, -inf  ;;  %v6470_v26 = vsel %vm5531_vm3, %v5247_v8, -inf  ;;  %v5249_v44 = vrot.slane %v5053_v24, 2 }
 0x617   :  { %v6441_v63 = vmax.f32 %v6439_v62, %v6440_v4  ;;  %v6448_v30 = vmax.f32 %v6446_v10, %v6447_v1  ;;  %v14809_v61 = vsel %vm7324_vm4, %v6434_v20, -inf  ;;  %v6457_v25 = vrot.slane %v6456_v15, 4 }
 0x618   :  { %v6464_v28 = vrot.slane %v6463_v5, 4  ;;  %v6471_v0 = vrot.slane %v6470_v26, 4  ;;  %v6477_v40 = vsel %vm5531_vm3, %v5248_v50, -inf  ;;  %v5250_v56 = vrot.slane %v5053_v24, 4  ;;  %v4602_v50 = vld [vmem:[#allocation2 + $0x2da] sm:$0xff] }
 0x619   :  { %v6455_v41 = vmax.f32 %v6453_v13, %v6454_v19  ;;  %v6458_v3 = vmax.f32 %v6456_v15, %v6457_v25  ;;  %v6478_v2 = vrot.slane %v6477_v40, 4  ;;  %v5251_v35 = vrot.slane %v5053_v24, 6  ;;  %v4935_v25 = vpop.f32.mrf.mxu0  ;;  %11274 = vmatmul.msk.f32.gmra.mxu0 %vm97_vm1, %v4602_v50 }
 0x61a   :  { %v6465_v34 = vmax.f32 %v6463_v5, %v6464_v28  ;;  %v6472_v29 = vmax.f32 %v6470_v26, %v6471_v0  ;;  %v6484_v51 = vsel %vm5531_vm3, %v5053_v24, -inf  ;;  %v6491_v62 = vsel %vm5531_vm3, %v5249_v44, -inf }
 0x61b   :  { %v6459_v10 = vrot.slane %v6458_v3, 2  ;;  %v6479_v18 = vmax.f32 %v6477_v40, %v6478_v2  ;;  %v6485_v47 = vrot.slane %v6484_v51, 4  ;;  %v6492_v48 = vrot.slane %v6491_v62, 4 }
 0x61c   :  { %v6466_v59 = vrot.slane %v6465_v34, 2  ;;  %v6473_v21 = vrot.slane %v6472_v29, 2  ;;  %v6498_v60 = vsel %vm5531_vm3, %v5250_v56, -inf  ;;  %v6505_v38 = vsel %vm5531_vm3, %v5251_v35, -inf }
 0x61d   :  { %v6460_v20 = vmax.f32 %v6458_v3, %v6459_v10  ;;  %v6480_v46 = vrot.slane %v6479_v18, 2  ;;  %v6486_v6 = vmax.f32 %v6484_v51, %v6485_v47  ;;  %v6493_v4 = vmax.f32 %v6491_v62, %v6492_v48 }
 0x61e   :  { %v6467_v1 = vmax.f32 %v6465_v34, %v6466_v59  ;;  %v6474_v13 = vmax.f32 %v6472_v29, %v6473_v21  ;;  %v6499_v42 = vrot.slane %v6498_v60, 4  ;;  %v6506_v24 = vrot.slane %v6505_v38, 4 }
 0x61f   :  { %v6461_v49 = vrot.slane %v6460_v20, 1  ;;  %v6481_v8 = vmax.f32 %v6479_v18, %v6480_v46  ;;  %v6487_v55 = vrot.slane %v6486_v6, 2  ;;  %v6494_v19 = vrot.slane %v6493_v4, 2 }
 0x620   :  { %v6468_v15 = vrot.slane %v6467_v1, 1  ;;  %v6475_v5 = vrot.slane %v6474_v13, 1  ;;  %v6500_v26 = vmax.f32 %v6498_v60, %v6499_v42  ;;  %v6507_v44 = vmax.f32 %v6505_v38, %v6506_v24 }
 0x621   :  { %v6462_v28 = vmax.f32 %v6460_v20, %v6461_v49  ;;  %v6482_v0 = vrot.slane %v6481_v8, 1  ;;  %v6488_v40 = vmax.f32 %v6486_v6, %v6487_v55  ;;  %v6495_v56 = vmax.f32 %v6493_v4, %v6494_v19  ;;  %v16629_v4 = vld [vmem:[#allocation25_spill] sm:$0xff]  ;;  %v4603_v19 = vld [vmem:[#allocation2 + $0x2ea] sm:$0xff] }
 0x622   :  { %v6469_v3 = vmax.f32 %v6467_v1, %v6468_v15  ;;  %v6476_v2 = vmax.f32 %v6474_v13, %v6475_v5  ;;  %v6501_v35 = vrot.slane %v6500_v26, 2  ;;  %v6508_v34 = vrot.slane %v6507_v44, 2  ;;  %v8169_v1 = vld [vmem:[#allocation3 + $0xa0] sm:$0xff]  ;;  %11275 = vmatmul.msk.f32.gmra.mxu0 %vm97_vm1, %v4603_v19 }
 0x623   :  { %v7520_v29 = vsel %vm7324_vm4, %v6441_v63, -inf  ;;  %v6483_v51 = vmax.f32 %v6481_v8, %v6482_v0  ;;  %v6489_v62 = vrot.slane %v6488_v40, 1  ;;  %v6496_v10 = vrot.slane %v6495_v56, 1  ;;  %v8462_v13 = vld [vmem:[#allocation3 + $0xa2] sm:$0xff]  ;;  %v16630_v8 = vld [vmem:[#allocation26_spill] sm:$0xff]  ;;  %11293 = vmatmul.msk.f32.gmra.mxu1 %vm7324_vm4, %v8169_v1 }
 0x624   :  { %v7523_v18 = vsel %vm7324_vm4, %v6448_v30, -inf  ;;  %v7526_v47 = vsel %vm7324_vm4, %v6455_v41, -inf  ;;  %v6502_v48 = vmax.f32 %v6500_v26, %v6501_v35  ;;  %v6509_v59 = vmax.f32 %v6507_v44, %v6508_v34  ;;  %v8315_v41 = vld [vmem:[#allocation3 + $0xa1] sm:$0xff]  ;;  %11327 = vmatmul.msk.f32.gmra.mxu3 %vm7324_vm4, %v8462_v13 }
 0x625   :  { %v14821_v21 = vsel %vm7324_vm4, %v6462_v28, -inf  ;;  %v14824_v60 = vsel %vm7324_vm4, %v6469_v3, -inf  ;;  %v6490_v38 = vmax.f32 %v6488_v40, %v6489_v62  ;;  %v6497_v20 = vmax.f32 %v6495_v56, %v6496_v10  ;;  %11310 = vmatmul.msk.f32.gmra.mxu2 %vm7324_vm4, %v8315_v41 }
 0x626   :  { %v14827_v46 = vsel %vm7324_vm4, %v6476_v2, -inf  ;;  %v6503_v63 = vrot.slane %v6502_v48, 1  ;;  %v6510_v6 = vrot.slane %v6509_v59, 1  ;;  %v5054_v30 = vadd.f32 %v14806_v37, %v16629_v4  ;;  %v4938_v2 = vpop.f32.mrf.mxu0 }
 0x627   :  { %v14832_v42 = vsel %vm7324_vm4, %v6483_v51, -inf  ;;  %v7518_v24 = vsel %vm7324_vm4, %v6490_v38, -inf  ;;  %v7521_v49 = vsel %vm7324_vm4, %v6497_v20, -inf  ;;  %v5055_v55 = vadd.f32 %v4935_v25, %v16630_v8 }
 0x628   :  { %v6504_v50 = vmax.f32 %v6502_v48, %v6503_v63  ;;  %v6511_v15 = vmax.f32 %v6509_v59, %v6510_v6  ;;  %v7519_v37 = vmax.f32 %v14809_v61, %v7518_v24  ;;  %v7522_v5 = vmax.f32 %v7520_v29, %v7521_v49  ;;  %v16631_v63 = vld [vmem:[#allocation27_spill] sm:$0xff] }
 0x629   :  { %v5252_v26 = vrot.slane %v5054_v30, 2  ;;  %v5253_v44 = vrot.slane %v5054_v30, 4  ;;  %v5254_v28 = vrot.slane %v5054_v30, 6  ;;  %v6512_v0 = vsel %vm5531_vm3, %v5054_v30, -inf }
 0x62a   :  { %v7524_v25 = vsel %vm7324_vm4, %v6504_v50, -inf  ;;  %v7527_v40 = vsel %vm7324_vm4, %v6511_v15, -inf  ;;  %v7773_v56 = vmax.f32 %v7519_v37, 0.0  ;;  %v7774_v3 = vmax.f32 %v7522_v5, 0.0 }
 0x62b   :  { %v7525_v35 = vmax.f32 %v7523_v18, %v7524_v25  ;;  %v7528_v34 = vmax.f32 %v7526_v47, %v7527_v40  ;;  %v6513_v61 = vrot.slane %v6512_v0, 4  ;;  %v6519_v29 = vsel %vm5531_vm3, %v5252_v26, -inf }
 0x62c   :  { %v8068_v51 = vsel %vm8005_vm5, %v7774_v3, %v7773_v56  ;;  %v6520_v62 = vrot.slane %v6519_v29, 4  ;;  %v6526_v10 = vsel %vm5531_vm3, %v5253_v44, -inf  ;;  %v6533_v48 = vsel %vm5531_vm3, %v5254_v28, -inf  ;;  %v4458_v44 = vpop.f32.mrf.mxu3 }
 0x62d   :  { %v7775_v59 = vmax.f32 %v7525_v35, 0.0  ;;  %v6514_v38 = vmax.f32 %v6512_v0, %v6513_v61  ;;  %v6527_v20 = vrot.slane %v6526_v10, 4  ;;  %v14850_v6 = vadd.f32 %v4938_v2, %v16631_v63 }
 0x62e   :  { %v7776_v4 = vmax.f32 %v7528_v34, 0.0  ;;  %v6521_v30 = vmax.f32 %v6519_v29, %v6520_v62  ;;  %v6534_v18 = vrot.slane %v6533_v48, 4  ;;  %v5255_v47 = vrot.slane %v5055_v55, 2  ;;  %v4604_v62 = vld [vmem:[#allocation2 + $0x2f2] sm:$0xff] }
 0x62f   :  { %v8069_v1 = vsel %vm8007_vm6, %v7775_v59, %v8068_v51  ;;  %v6515_v41 = vrot.slane %v6514_v38, 2  ;;  %v6528_v13 = vmax.f32 %v6526_v10, %v6527_v20  ;;  %v5256_v24 = vrot.slane %v5055_v55, 4  ;;  %11276 = vmatmul.msk.f32.gmra.mxu0 %vm97_vm1, %v4604_v62 }
 0x630   :  { %v8070_v49 = vsel %vm8009_vm7, %v7776_v4, %v8069_v1  ;;  %v6522_v8 = vrot.slane %v6521_v30, 2  ;;  %v6535_v19 = vmax.f32 %v6533_v48, %v6534_v18  ;;  %v5257_v50 = vrot.slane %v5055_v55, 6 }
 0x631   :  { %v6516_v15 = vmax.f32 %v6514_v38, %v6515_v41  ;;  %v6529_v37 = vrot.slane %v6528_v13, 2  ;;  %v6540_v5 = vsel %vm5531_vm3, %v5055_v55, -inf  ;;  %v6547_v26 = vsel %vm5531_vm3, %v5255_v47, -inf  ;;  %v4941_v41 = vpop.f32.mrf.mxu0 }
 0x632   :  { %v6523_v28 = vmax.f32 %v6521_v30, %v6522_v8  ;;  %v6536_v0 = vrot.slane %v6535_v19, 2  ;;  %v6541_v25 = vrot.slane %v6540_v5, 4  ;;  %v6548_v40 = vrot.slane %v6547_v26, 4 }
 0x633   :  { %v6517_v56 = vrot.slane %v6516_v15, 1  ;;  %v6530_v3 = vmax.f32 %v6528_v13, %v6529_v37  ;;  %v6554_v2 = vsel %vm5531_vm3, %v5256_v24, -inf  ;;  %v6561_v35 = vsel %vm5531_vm3, %v5257_v50, -inf }
 0x634   :  { %v6524_v34 = vrot.slane %v6523_v28, 1  ;;  %v6537_v61 = vmax.f32 %v6535_v19, %v6536_v0  ;;  %v6542_v29 = vmax.f32 %v6540_v5, %v6541_v25  ;;  %v6549_v51 = vmax.f32 %v6547_v26, %v6548_v40  ;;  %v3395_v26 = vpop.f32.mrf.mxu1 }
 0x635   :  { %v6518_v10 = vmax.f32 %v6516_v15, %v6517_v56  ;;  %v6531_v55 = vrot.slane %v6530_v3, 1  ;;  %v6555_v48 = vrot.slane %v6554_v2, 4  ;;  %v6562_v59 = vrot.slane %v6561_v35, 4 }
 0x636   :  { %v6525_v38 = vmax.f32 %v6523_v28, %v6524_v34  ;;  %v6538_v20 = vrot.slane %v6537_v61, 1  ;;  %v6543_v63 = vrot.slane %v6542_v29, 2  ;;  %v6550_v4 = vrot.slane %v6549_v51, 2 }
 0x637   :  { %v6532_v30 = vmax.f32 %v6530_v3, %v6531_v55  ;;  %v7530_v18 = vsel %vm7324_vm4, %v6518_v10, -inf  ;;  %v6556_v47 = vmax.f32 %v6554_v2, %v6555_v48  ;;  %v6563_v1 = vmax.f32 %v6561_v35, %v6562_v59 }
 0x638   :  { %v6539_v13 = vmax.f32 %v6537_v61, %v6538_v20  ;;  %v7531_v24 = vmax.f32 %v14821_v21, %v7530_v18  ;;  %v7533_v8 = vsel %vm7324_vm4, %v6525_v38, -inf  ;;  %v6544_v19 = vmax.f32 %v6542_v29, %v6543_v63 }
 0x639   :  { %v7534_v50 = vmax.f32 %v14824_v60, %v7533_v8  ;;  %v7536_v15 = vsel %vm7324_vm4, %v6532_v30, -inf  ;;  %v6551_v37 = vmax.f32 %v6549_v51, %v6550_v4  ;;  %v6557_v5 = vrot.slane %v6556_v47, 2  ;;  %v4461_v60 = vpop.f32.mrf.mxu3 }
 0x63a   :  { %v7537_v28 = vmax.f32 %v14827_v46, %v7536_v15  ;;  %v7539_v0 = vsel %vm7324_vm4, %v6539_v13, -inf  ;;  %v7777_v25 = vmax.f32 %v7531_v24, 0.0  ;;  %v6545_v40 = vrot.slane %v6544_v19, 1  ;;  %v14892_v13 = vpop.f32.mrf.mxu0 }
 0x63b   :  { %v7540_v56 = vmax.f32 %v14832_v42, %v7539_v0  ;;  %v7778_v3 = vmax.f32 %v7534_v50, 0.0  ;;  %v6552_v21 = vrot.slane %v6551_v37, 1  ;;  %v6558_v2 = vmax.f32 %v6556_v47, %v6557_v5  ;;  %v16632_v50 = vld [vmem:[#allocation55_spill] sm:$0xff] }
 0x63c   :  { %v14868_v35 = vadd.f32 %v4458_v44, %v14792_v36  ;;  %v7779_v34 = vmax.f32 %v7537_v28, 0.0  ;;  %v8071_v61 = vsel %vm8011_vm8, %v7777_v25, %v8070_v49  ;;  %v6564_v29 = vrot.slane %v6563_v1, 2  ;;  %v4605_v36 = vld [vmem:[#allocation2 + $0x302] sm:$0xff] }
 0x63d   :  { %v14872_v51 = vadd.f32 %v3395_v26, %v14055_v22  ;;  %v7780_v46 = vmax.f32 %v7540_v56, 0.0  ;;  %v8072_v62 = vsel %vm8013_vm9, %v7778_v3, %v8071_v61  ;;  %v6546_v10 = vmax.f32 %v6544_v19, %v6545_v40  ;;  %11277 = vmatmul.msk.f32.gmra.mxu0 %vm97_vm1, %v4605_v36 }
 0x63e   :  { %v8073_v42 = vsel %vm8015_vm10, %v7779_v34, %v8072_v62  ;;  %v6559_v55 = vrot.slane %v6558_v2, 1  ;;  %v6565_v48 = vmax.f32 %v6563_v1, %v6564_v29  ;;  %v5258_v59 = vrot.slane %v14850_v6, 2 }
 0x63f   :  { %v14878_v44 = vadd.f32 %v4461_v60, %v14799_v31  ;;  %v8074_v49 = vsel %vm8017_vm11, %v7780_v46, %v8073_v42  ;;  %v6553_v38 = vmax.f32 %v6551_v37, %v6552_v21  ;;  %v5259_v22 = vrot.slane %v14850_v6, 4 }
 0x640   :  { %8149 = vst.msk [vmem:[#allocation3 + $0xb1] sm:$0xff] %vm7324_vm4, %v8074_v49  ;;  %v6566_v20 = vrot.slane %v6565_v48, 1  ;;  %v5260_v63 = vrot.slane %v14850_v6, 6  ;;  %v6568_v4 = vsel %vm5531_vm3, %v14850_v6, -inf  ;;  %v6575_v30 = vsel %vm5531_vm3, %v5258_v59, -inf }
 0x641   :  { %v14889_v31 = vsel %vm7324_vm4, %v6546_v10, -inf  ;;  %v6569_v18 = vrot.slane %v6568_v4, 4  ;;  %v6576_v47 = vrot.slane %v6575_v30, 4  ;;  %v6582_v1 = vsel %vm5531_vm3, %v5259_v22, -inf }
 0x642   :  { %v6560_v24 = vmax.f32 %v6558_v2, %v6559_v55  ;;  %v6583_v8 = vrot.slane %v6582_v1, 4  ;;  %v6589_v19 = vsel %vm5531_vm3, %v5260_v63, -inf  ;;  %v5057_v15 = vadd.f32 %v4941_v41, %v16632_v50 }
 0x643   :  { %v14897_v37 = vsel %vm7324_vm4, %v6553_v38, -inf  ;;  %v6570_v6 = vmax.f32 %v6568_v4, %v6569_v18  ;;  %v6577_v5 = vmax.f32 %v6575_v30, %v6576_v47  ;;  %v6590_v26 = vrot.slane %v6589_v19, 4 }
 0x644   :  { %v6567_v28 = vmax.f32 %v6565_v48, %v6566_v20  ;;  %v6584_v0 = vmax.f32 %v6582_v1, %v6583_v8  ;;  %v5261_v25 = vrot.slane %v5057_v15, 2  ;;  %v5262_v40 = vrot.slane %v5057_v15, 4  ;;  %v4606_v8 = vld [vmem:[#allocation2 + $0x30a] sm:$0xff] }
 0x645   :  { %v6571_v56 = vrot.slane %v6570_v6, 2  ;;  %v6578_v3 = vrot.slane %v6577_v5, 2  ;;  %v6591_v21 = vmax.f32 %v6589_v19, %v6590_v26  ;;  %v5263_v60 = vrot.slane %v5057_v15, 6  ;;  %11278 = vmatmul.msk.f32.gmra.mxu0 %vm97_vm1, %v4606_v8 }
 0x646   :  { %v6585_v2 = vrot.slane %v6584_v0, 2  ;;  %v6596_v34 = vsel %vm5531_vm3, %v5057_v15, -inf  ;;  %v6603_v61 = vsel %vm5531_vm3, %v5261_v25, -inf  ;;  %v6610_v41 = vsel %vm5531_vm3, %v5262_v40, -inf }
 0x647   :  { %v6572_v29 = vmax.f32 %v6570_v6, %v6571_v56  ;;  %v6579_v46 = vmax.f32 %v6577_v5, %v6578_v3  ;;  %v6592_v62 = vrot.slane %v6591_v21, 2  ;;  %v6597_v10 = vrot.slane %v6596_v34, 4  ;;  %v8170_v42 = vld [vmem:[#allocation3 + $0xb0] sm:$0xff]  ;;  %v4947_v5 = vpop.f32.mrf.mxu0 }
 0x648   :  { %v8316_v55 = vld [vmem:[#allocation3 + $0xb1] sm:$0xff]  ;;  %v6586_v59 = vmax.f32 %v6584_v0, %v6585_v2  ;;  %v6604_v36 = vrot.slane %v6603_v61, 4  ;;  %v6611_v49 = vrot.slane %v6610_v41, 4  ;;  %v6617_v38 = vsel %vm5531_vm3, %v5263_v60, -inf  ;;  %11294 = vmatmul.msk.f32.gmra.mxu1 %vm7324_vm4, %v8170_v42 }
 0x649   :  { %v8463_v48 = vld [vmem:[#allocation3 + $0xb2] sm:$0xff]  ;;  %11311 = vmatmul.msk.f32.gmra.mxu2 %vm7324_vm4, %v8316_v55  ;;  %v6573_v22 = vrot.slane %v6572_v29, 1  ;;  %v6580_v20 = vrot.slane %v6579_v46, 1  ;;  %v6593_v63 = vmax.f32 %v6591_v21, %v6592_v62  ;;  %v6598_v4 = vmax.f32 %v6596_v34, %v6597_v10  ;;  %v16633_v10 = vld [vmem:[#allocation56_spill] sm:$0xff] }
 0x64a   :  { %11328 = vmatmul.msk.f32.gmra.mxu3 %vm7324_vm4, %v8463_v48  ;;  %v6587_v30 = vrot.slane %v6586_v59, 1  ;;  %v6605_v18 = vmax.f32 %v6603_v61, %v6604_v36  ;;  %v6612_v47 = vmax.f32 %v6610_v41, %v6611_v49  ;;  %v6618_v1 = vrot.slane %v6617_v38, 4 }
 0x64b   :  { %v6574_v19 = vmax.f32 %v6572_v29, %v6573_v22  ;;  %v6581_v50 = vmax.f32 %v6579_v46, %v6580_v20  ;;  %v6594_v15 = vrot.slane %v6593_v63, 1  ;;  %v6599_v6 = vrot.slane %v6598_v4, 2 }
 0x64c   :  { %v6588_v26 = vmax.f32 %v6586_v59, %v6587_v30  ;;  %v6606_v0 = vrot.slane %v6605_v18, 2  ;;  %v6613_v25 = vrot.slane %v6612_v47, 2  ;;  %v6619_v40 = vmax.f32 %v6617_v38, %v6618_v1  ;;  %v4607_v30 = vld [vmem:[#allocation2 + $0x31a] sm:$0xff] }
 0x64d   :  { %v7547_v56 = vsel %vm7324_vm4, %v6560_v24, -inf  ;;  %v7550_v3 = vsel %vm7324_vm4, %v6567_v28, -inf  ;;  %v6595_v21 = vmax.f32 %v6593_v63, %v6594_v15  ;;  %v6600_v60 = vmax.f32 %v6598_v4, %v6599_v6  ;;  %11279 = vmatmul.msk.f32.gmra.mxu0 %vm97_vm1, %v4607_v30 }
 0x64e   :  { %v14910_v2 = vsel %vm7324_vm4, %v6574_v19, -inf  ;;  %v6607_v34 = vmax.f32 %v6605_v18, %v6606_v0  ;;  %v6614_v61 = vmax.f32 %v6612_v47, %v6613_v25  ;;  %v6620_v41 = vrot.slane %v6619_v40, 2 }
 0x64f   :  { %v14913_v29 = vsel %vm7324_vm4, %v6581_v50, -inf  ;;  %v14916_v46 = vsel %vm7324_vm4, %v6588_v26, -inf  ;;  %v6601_v62 = vrot.slane %v6600_v60, 1  ;;  %v5058_v24 = vadd.f32 %v14892_v13, %v16633_v10  ;;  %v14932_v0 = vpop.f32.mrf.mxu0 }
 0x650   :  { %v6608_v42 = vrot.slane %v6607_v34, 1  ;;  %v6615_v28 = vrot.slane %v6614_v61, 1  ;;  %v6621_v55 = vmax.f32 %v6619_v40, %v6620_v41  ;;  %v14921_v48 = vadd.f32 %v4947_v5, %v13986_v12 }
 0x651   :  { %v6602_v59 = vmax.f32 %v6600_v60, %v6601_v62  ;;  %v5264_v36 = vrot.slane %v5058_v24, 2  ;;  %v5265_v49 = vrot.slane %v5058_v24, 4  ;;  %v5266_v38 = vrot.slane %v5058_v24, 6 }
 0x652   :  { %v6609_v22 = vmax.f32 %v6607_v34, %v6608_v42  ;;  %v6616_v20 = vmax.f32 %v6614_v61, %v6615_v28  ;;  %v6622_v63 = vrot.slane %v6621_v55, 1  ;;  %v6624_v4 = vsel %vm5531_vm3, %v5058_v24, -inf }
 0x653   :  { %v7542_v18 = vsel %vm7324_vm4, %v6602_v59, -inf  ;;  %v6625_v47 = vrot.slane %v6624_v4, 4  ;;  %v6631_v13 = vsel %vm5531_vm3, %v5264_v36, -inf  ;;  %v6638_v1 = vsel %vm5531_vm3, %v5265_v49, -inf }
 0x654   :  { %v6623_v12 = vmax.f32 %v6621_v55, %v6622_v63  ;;  %v7543_v8 = vmax.f32 %v14889_v31, %v7542_v18  ;;  %v7545_v19 = vsel %vm7324_vm4, %v6609_v22, -inf  ;;  %v7548_v50 = vsel %vm7324_vm4, %v6616_v20, -inf }
 0x655   :  { %v7546_v15 = vmax.f32 %v14897_v37, %v7545_v19  ;;  %v7549_v6 = vmax.f32 %v7547_v56, %v7548_v50  ;;  %v6626_v5 = vmax.f32 %v6624_v4, %v6625_v47  ;;  %v6632_v26 = vrot.slane %v6631_v13, 4 }
 0x656   :  { %v7551_v25 = vsel %vm7324_vm4, %v6623_v12, -inf  ;;  %v7781_v40 = vmax.f32 %v7543_v8, 0.0  ;;  %v6639_v60 = vrot.slane %v6638_v1, 4  ;;  %v6645_v34 = vsel %vm5531_vm3, %v5266_v38, -inf }
 0x657   :  { %v7552_v61 = vmax.f32 %v7550_v3, %v7551_v25  ;;  %v7782_v41 = vmax.f32 %v7546_v15, 0.0  ;;  %v7783_v31 = vmax.f32 %v7549_v6, 0.0  ;;  %v6627_v62 = vrot.slane %v6626_v5, 2 }
 0x658   :  { %v14937_v10 = vsel %vm7324_vm4, %v6595_v21, -inf  ;;  %v6633_v24 = vmax.f32 %v6631_v13, %v6632_v26  ;;  %v6640_v37 = vmax.f32 %v6638_v1, %v6639_v60  ;;  %v6646_v56 = vrot.slane %v6645_v34, 4  ;;  %v3398_v13 = vpop.f32.mrf.mxu1 }
 0x659   :  { %v7784_v42 = vmax.f32 %v7552_v61, 0.0  ;;  %v8075_v28 = vsel %vm8005_vm5, %v7782_v41, %v7781_v40  ;;  %v6628_v55 = vmax.f32 %v6626_v5, %v6627_v62  ;;  %v5267_v59 = vrot.slane %v14921_v48, 2  ;;  %v4608_v61 = vld [vmem:[#allocation2 + $0x322] sm:$0xff] }
 0x65a   :  { %v8076_v36 = vsel %vm8007_vm6, %v7783_v31, %v8075_v28  ;;  %v6634_v49 = vrot.slane %v6633_v24, 2  ;;  %v6641_v38 = vrot.slane %v6640_v37, 2  ;;  %v6647_v3 = vmax.f32 %v6645_v34, %v6646_v56  ;;  %v4953_v34 = vpop.f32.mrf.mxu0  ;;  %11280 = vmatmul.msk.f32.gmra.mxu0 %vm97_vm1, %v4608_v61 }
 0x65b   :  { %v8077_v22 = vsel %vm8009_vm7, %v7784_v42, %v8076_v36  ;;  %v6629_v20 = vrot.slane %v6628_v55, 1  ;;  %v5268_v21 = vrot.slane %v14921_v48, 4  ;;  %v5269_v63 = vrot.slane %v14921_v48, 6 }
 0x65c   :  { %v6635_v4 = vmax.f32 %v6633_v24, %v6634_v49  ;;  %v6642_v30 = vmax.f32 %v6640_v37, %v6641_v38  ;;  %v6648_v18 = vrot.slane %v6647_v3, 2  ;;  %v6652_v47 = vsel %vm5531_vm3, %v14921_v48, -inf }
 0x65d   :  { %v6630_v1 = vmax.f32 %v6628_v55, %v6629_v20  ;;  %v6653_v12 = vrot.slane %v6652_v47, 4  ;;  %v6659_v8 = vsel %vm5531_vm3, %v5267_v59, -inf  ;;  %v6666_v19 = vsel %vm5531_vm3, %v5268_v21, -inf }
 0x65e   :  { %v6636_v50 = vrot.slane %v6635_v4, 1  ;;  %v6643_v15 = vrot.slane %v6642_v30, 1  ;;  %v6649_v6 = vmax.f32 %v6647_v3, %v6648_v18  ;;  %v6660_v5 = vrot.slane %v6659_v8, 4 }
 0x65f   :  { %v7554_v26 = vsel %vm7324_vm4, %v6630_v1, -inf  ;;  %v6654_v25 = vmax.f32 %v6652_v47, %v6653_v12  ;;  %v6667_v40 = vrot.slane %v6666_v19, 4  ;;  %v6673_v60 = vsel %vm5531_vm3, %v5269_v63, -inf  ;;  %v3930_v12 = vpop.f32.mrf.mxu2 }
 0x660   :  { %v6637_v48 = vmax.f32 %v6635_v4, %v6636_v50  ;;  %v6644_v41 = vmax.f32 %v6642_v30, %v6643_v15  ;;  %v6650_v31 = vrot.slane %v6649_v6, 1  ;;  %v7555_v62 = vmax.f32 %v14910_v2, %v7554_v26 }
 0x661   :  { %v6655_v24 = vrot.slane %v6654_v25, 2  ;;  %v6661_v37 = vmax.f32 %v6659_v8, %v6660_v5  ;;  %v6668_v56 = vmax.f32 %v6666_v19, %v6667_v40  ;;  %v6674_v42 = vrot.slane %v6673_v60, 4 }
 0x662   :  { %v6651_v28 = vmax.f32 %v6649_v6, %v6650_v31  ;;  %v7557_v55 = vsel %vm7324_vm4, %v6637_v48, -inf  ;;  %v7560_v59 = vsel %vm7324_vm4, %v6644_v41, -inf  ;;  %v7785_v36 = vmax.f32 %v7555_v62, 0.0 }
 0x663   :  { %v7558_v49 = vmax.f32 %v14913_v29, %v7557_v55  ;;  %v7561_v38 = vmax.f32 %v14916_v46, %v7560_v59  ;;  %v6656_v3 = vmax.f32 %v6654_v25, %v6655_v24  ;;  %v6662_v20 = vrot.slane %v6661_v37, 2  ;;  %v3401_v46 = vpop.f32.mrf.mxu1 }
 0x664   :  { %v7563_v2 = vsel %vm7324_vm4, %v6651_v28, -inf  ;;  %v8078_v21 = vsel %vm8011_vm8, %v7785_v36, %v8077_v22  ;;  %v6669_v63 = vrot.slane %v6668_v56, 2  ;;  %v6675_v4 = vmax.f32 %v6673_v60, %v6674_v42 }
 0x665   :  { %v7564_v30 = vmax.f32 %v14937_v10, %v7563_v2  ;;  %v7786_v18 = vmax.f32 %v7558_v49, 0.0  ;;  %v7787_v47 = vmax.f32 %v7561_v38, 0.0  ;;  %v6657_v1 = vrot.slane %v6656_v3, 1 }
 0x666   :  { %v6663_v8 = vmax.f32 %v6661_v37, %v6662_v20  ;;  %v6670_v19 = vmax.f32 %v6668_v56, %v6669_v63  ;;  %v6676_v50 = vrot.slane %v6675_v4, 2  ;;  %v5060_v29 = vadd.f32 %v14932_v0, %v14000_v9  ;;  %v14969_v9 = vpop.f32.mrf.mxu0  ;;  %v4609_v0 = vld [vmem:[#allocation2 + $0x332] sm:$0xff] }
 0x667   :  { %v7788_v15 = vmax.f32 %v7564_v30, 0.0  ;;  %v8079_v6 = vsel %vm8013_vm9, %v7786_v18, %v8078_v21  ;;  %v6658_v5 = vmax.f32 %v6656_v3, %v6657_v1  ;;  %v5061_v22 = vadd.f32 %v4953_v34, %v14010_v14  ;;  %11281 = vmatmul.msk.f32.gmra.mxu0 %vm97_vm1, %v4609_v0 }
 0x668   :  { %v8080_v26 = vsel %vm8015_vm10, %v7787_v47, %v8079_v6  ;;  %v6664_v10 = vrot.slane %v6663_v8, 1  ;;  %v6671_v25 = vrot.slane %v6670_v19, 1  ;;  %v6677_v40 = vmax.f32 %v6675_v4, %v6676_v50 }
 0x669   :  { %v14966_v60 = vadd.f32 %v3930_v12, %v14872_v51  ;;  %v8081_v61 = vsel %vm8017_vm11, %v7788_v15, %v8080_v26  ;;  %v5270_v48 = vrot.slane %v5060_v29, 2  ;;  %v5271_v41 = vrot.slane %v5060_v29, 4 }
 0x66a   :  { %v14972_v31 = vadd.f32 %v3398_v13, %v14068_v58  ;;  %v14975_v14 = vadd.f32 %v3401_v46, %v14149_v11  ;;  %8150 = vst.msk [vmem:[#allocation3 + $0xc1] sm:$0xff] %vm7324_vm4, %v8081_v61  ;;  %v6678_v34 = vrot.slane %v6677_v40, 1  ;;  %v5272_v62 = vrot.slane %v5060_v29, 6 }
 0x66b   :  { %v6680_v51 = vsel %vm5531_vm3, %v5060_v29, -inf  ;;  %v6687_v24 = vsel %vm5531_vm3, %v5270_v48, -inf  ;;  %v6694_v37 = vsel %vm5531_vm3, %v5271_v41, -inf  ;;  %v5273_v56 = vrot.slane %v5061_v22, 2 }
 0x66c   :  { %v6665_v42 = vmax.f32 %v6663_v8, %v6664_v10  ;;  %v6672_v28 = vmax.f32 %v6670_v19, %v6671_v25  ;;  %v14983_v58 = vsel %vm7324_vm4, %v6658_v5, -inf  ;;  %v6681_v11 = vrot.slane %v6680_v51, 4 }
 0x66d   :  { %v6688_v13 = vrot.slane %v6687_v24, 4  ;;  %v6695_v55 = vrot.slane %v6694_v37, 4  ;;  %v6701_v59 = vsel %vm5531_vm3, %v5272_v62, -inf  ;;  %v5274_v36 = vrot.slane %v5061_v22, 4 }
 0x66e   :  { %v6679_v49 = vmax.f32 %v6677_v40, %v6678_v34  ;;  %v6682_v38 = vmax.f32 %v6680_v51, %v6681_v11  ;;  %v6702_v3 = vrot.slane %v6701_v59, 4  ;;  %v5275_v20 = vrot.slane %v5061_v22, 6  ;;  %v4959_v48 = vpop.f32.mrf.mxu0  ;;  %v4610_v51 = vld [vmem:[#allocation2 + $0x33a] sm:$0xff] }
 0x66f   :  { %v6689_v2 = vmax.f32 %v6687_v24, %v6688_v13  ;;  %v6696_v21 = vmax.f32 %v6694_v37, %v6695_v55  ;;  %v6708_v63 = vsel %vm5531_vm3, %v5061_v22, -inf  ;;  %v6715_v4 = vsel %vm5531_vm3, %v5273_v56, -inf  ;;  %11282 = vmatmul.msk.f32.gmra.mxu0 %vm97_vm1, %v4610_v51 }
 0x670   :  { %v6683_v30 = vrot.slane %v6682_v38, 2  ;;  %v6703_v18 = vmax.f32 %v6701_v59, %v6702_v3  ;;  %v6709_v47 = vrot.slane %v6708_v63, 4  ;;  %v6716_v1 = vrot.slane %v6715_v4, 4 }
 0x671   :  { %v6690_v12 = vrot.slane %v6689_v2, 2  ;;  %v6697_v8 = vrot.slane %v6696_v21, 2  ;;  %v6722_v19 = vsel %vm5531_vm3, %v5274_v36, -inf  ;;  %v6729_v50 = vsel %vm5531_vm3, %v5275_v20, -inf  ;;  %v8171_v29 = vld [vmem:[#allocation3 + $0xc0] sm:$0xff] }
 0x672   :  { %v8317_v46 = vld [vmem:[#allocation3 + $0xc1] sm:$0xff]  ;;  %v6684_v15 = vmax.f32 %v6682_v38, %v6683_v30  ;;  %v6704_v6 = vrot.slane %v6703_v18, 2  ;;  %v6710_v5 = vmax.f32 %v6708_v63, %v6709_v47  ;;  %v6717_v26 = vmax.f32 %v6715_v4, %v6716_v1  ;;  %11295 = vmatmul.msk.f32.gmra.mxu1 %vm7324_vm4, %v8171_v29 }
 0x673   :  { %11312 = vmatmul.msk.f32.gmra.mxu2 %vm7324_vm4, %v8317_v46  ;;  %v8464_v22 = vld [vmem:[#allocation3 + $0xc2] sm:$0xff]  ;;  %v6691_v10 = vmax.f32 %v6689_v2, %v6690_v12  ;;  %v6698_v25 = vmax.f32 %v6696_v21, %v6697_v8  ;;  %v6723_v40 = vrot.slane %v6722_v19, 4  ;;  %v6730_v61 = vrot.slane %v6729_v50, 4 }
 0x674   :  { %11329 = vmatmul.msk.f32.gmra.mxu3 %vm7324_vm4, %v8464_v22  ;;  %v6685_v41 = vrot.slane %v6684_v15, 1  ;;  %v6705_v0 = vmax.f32 %v6703_v18, %v6704_v6  ;;  %v6711_v34 = vrot.slane %v6710_v5, 2  ;;  %v6718_v62 = vrot.slane %v6717_v26, 2 }
 0x675   :  { %v6692_v24 = vrot.slane %v6691_v10, 1  ;;  %v6699_v37 = vrot.slane %v6698_v25, 1  ;;  %v6724_v56 = vmax.f32 %v6722_v19, %v6723_v40  ;;  %v6731_v11 = vmax.f32 %v6729_v50, %v6730_v61 }
 0x676   :  { %v6686_v13 = vmax.f32 %v6684_v15, %v6685_v41  ;;  %v6706_v55 = vrot.slane %v6705_v0, 1  ;;  %v6712_v59 = vmax.f32 %v6710_v5, %v6711_v34  ;;  %v6719_v36 = vmax.f32 %v6717_v26, %v6718_v62  ;;  %v16634_v26 = vld [vmem:[#allocation28_spill] sm:$0xff] }
 0x677   :  { %v6693_v38 = vmax.f32 %v6691_v10, %v6692_v24  ;;  %v6700_v3 = vmax.f32 %v6698_v25, %v6699_v37  ;;  %v6725_v20 = vrot.slane %v6724_v56, 2  ;;  %v6732_v2 = vrot.slane %v6731_v11, 2  ;;  %v4611_v10 = vld [vmem:[#allocation2 + $0x34a] sm:$0xff] }
 0x678   :  { %v7568_v21 = vsel %vm7324_vm4, %v6665_v42, -inf  ;;  %v6707_v63 = vmax.f32 %v6705_v0, %v6706_v55  ;;  %v6713_v4 = vrot.slane %v6712_v59, 1  ;;  %v6720_v30 = vrot.slane %v6719_v36, 1  ;;  %v4962_v0 = vpop.f32.mrf.mxu0  ;;  %11283 = vmatmul.msk.f32.gmra.mxu0 %vm97_vm1, %v4611_v10 }
 0x679   :  { %v7571_v18 = vsel %vm7324_vm4, %v6672_v28, -inf  ;;  %v7574_v47 = vsel %vm7324_vm4, %v6679_v49, -inf  ;;  %v6726_v1 = vmax.f32 %v6724_v56, %v6725_v20  ;;  %v6733_v12 = vmax.f32 %v6731_v11, %v6732_v2 }
 0x67a   :  { %v14998_v8 = vsel %vm7324_vm4, %v6686_v13, -inf  ;;  %v15001_v19 = vsel %vm7324_vm4, %v6693_v38, -inf  ;;  %v6714_v50 = vmax.f32 %v6712_v59, %v6713_v4  ;;  %v6721_v29 = vmax.f32 %v6719_v36, %v6720_v30 }
 0x67b   :  { %v15004_v46 = vsel %vm7324_vm4, %v6700_v3, -inf  ;;  %v6727_v42 = vrot.slane %v6726_v1, 1  ;;  %v6734_v15 = vrot.slane %v6733_v12, 1  ;;  %v5062_v28 = vadd.f32 %v14969_v9, %v14033_v54 }
 0x67c   :  { %v15009_v49 = vsel %vm7324_vm4, %v6707_v63, -inf  ;;  %v7566_v6 = vsel %vm7324_vm4, %v6714_v50, -inf  ;;  %v7569_v5 = vsel %vm7324_vm4, %v6721_v29, -inf  ;;  %v5063_v22 = vadd.f32 %v4959_v48, %v16634_v26 }
 0x67d   :  { %v6728_v25 = vmax.f32 %v6726_v1, %v6727_v42  ;;  %v6735_v40 = vmax.f32 %v6733_v12, %v6734_v15  ;;  %v7567_v61 = vmax.f32 %v14983_v58, %v7566_v6  ;;  %v7570_v41 = vmax.f32 %v7568_v21, %v7569_v5  ;;  %v16635_v21 = vld [vmem:[#allocation29_spill] sm:$0xff] }
 0x67e   :  { %v5276_v34 = vrot.slane %v5062_v28, 2  ;;  %v5277_v54 = vrot.slane %v5062_v28, 4  ;;  %v5278_v9 = vrot.slane %v5062_v28, 6  ;;  %v6736_v62 = vsel %vm5531_vm3, %v5062_v28, -inf }
 0x67f   :  { %v7572_v51 = vsel %vm7324_vm4, %v6728_v25, -inf  ;;  %v7575_v24 = vsel %vm7324_vm4, %v6735_v40, -inf  ;;  %v7789_v37 = vmax.f32 %v7567_v61, 0.0  ;;  %v7790_v48 = vmax.f32 %v7570_v41, 0.0  ;;  %v3933_v40 = vpop.f32.mrf.mxu2 }
 0x680   :  { %v7573_v56 = vmax.f32 %v7571_v18, %v7572_v51  ;;  %v7576_v11 = vmax.f32 %v7574_v47, %v7575_v24  ;;  %v6737_v13 = vrot.slane %v6736_v62, 4  ;;  %v6743_v58 = vsel %vm5531_vm3, %v5276_v34, -inf }
 0x681   :  { %v8082_v55 = vsel %vm8005_vm5, %v7790_v48, %v7789_v37  ;;  %v6744_v59 = vrot.slane %v6743_v58, 4  ;;  %v6750_v36 = vsel %vm5531_vm3, %v5277_v54, -inf  ;;  %v6757_v38 = vsel %vm5531_vm3, %v5278_v9, -inf  ;;  %v15030_v54 = vpop.f32.mrf.mxu0 }
 0x682   :  { %v7791_v3 = vmax.f32 %v7573_v56, 0.0  ;;  %v6738_v20 = vmax.f32 %v6736_v62, %v6737_v13  ;;  %v6751_v2 = vrot.slane %v6750_v36, 4  ;;  %v15024_v63 = vadd.f32 %v4962_v0, %v16635_v21 }
 0x683   :  { %v7792_v4 = vmax.f32 %v7576_v11, 0.0  ;;  %v6745_v30 = vmax.f32 %v6743_v58, %v6744_v59  ;;  %v6758_v18 = vrot.slane %v6757_v38, 4  ;;  %v5279_v47 = vrot.slane %v5063_v22, 2 }
 0x684   :  { %v8083_v1 = vsel %vm8007_vm6, %v7791_v3, %v8082_v55  ;;  %v6739_v12 = vrot.slane %v6738_v20, 2  ;;  %v6752_v50 = vmax.f32 %v6750_v36, %v6751_v2  ;;  %v5280_v29 = vrot.slane %v5063_v22, 4 }
 0x685   :  { %v8084_v42 = vsel %vm8009_vm7, %v7792_v4, %v8083_v1  ;;  %v6746_v15 = vrot.slane %v6745_v30, 2  ;;  %v6759_v28 = vmax.f32 %v6757_v38, %v6758_v18  ;;  %v5281_v6 = vrot.slane %v5063_v22, 6 }
 0x686   :  { %v6740_v5 = vmax.f32 %v6738_v20, %v6739_v12  ;;  %v6753_v26 = vrot.slane %v6752_v50, 2  ;;  %v6764_v10 = vsel %vm5531_vm3, %v5063_v22, -inf  ;;  %v6771_v25 = vsel %vm5531_vm3, %v5279_v47, -inf  ;;  %v4612_v22 = vld [vmem:[#allocation2 + $0x352] sm:$0xff] }
 0x687   :  { %v6747_v61 = vmax.f32 %v6745_v30, %v6746_v15  ;;  %v6760_v41 = vrot.slane %v6759_v28, 2  ;;  %v6765_v0 = vrot.slane %v6764_v10, 4  ;;  %v6772_v34 = vrot.slane %v6771_v25, 4  ;;  %11284 = vmatmul.msk.f32.gmra.mxu0 %vm97_vm1, %v4612_v22 }
 0x688   :  { %v6741_v9 = vrot.slane %v6740_v5, 1  ;;  %v6754_v62 = vmax.f32 %v6752_v50, %v6753_v26  ;;  %v6778_v51 = vsel %vm5531_vm3, %v5280_v29, -inf  ;;  %v6785_v24 = vsel %vm5531_vm3, %v5281_v6, -inf  ;;  %v4464_v6 = vpop.f32.mrf.mxu3 }
 0x689   :  { %v6748_v37 = vrot.slane %v6747_v61, 1  ;;  %v6761_v48 = vmax.f32 %v6759_v28, %v6760_v41  ;;  %v6766_v56 = vmax.f32 %v6764_v10, %v6765_v0  ;;  %v6773_v11 = vmax.f32 %v6771_v25, %v6772_v34 }
 0x68a   :  { %v6742_v13 = vmax.f32 %v6740_v5, %v6741_v9  ;;  %v6755_v58 = vrot.slane %v6754_v62, 1  ;;  %v6779_v55 = vrot.slane %v6778_v51, 4  ;;  %v6786_v59 = vrot.slane %v6785_v24, 4 }
 0x68b   :  { %v6749_v36 = vmax.f32 %v6747_v61, %v6748_v37  ;;  %v6762_v38 = vrot.slane %v6761_v48, 1  ;;  %v6767_v3 = vrot.slane %v6766_v56, 2  ;;  %v6774_v20 = vrot.slane %v6773_v11, 2 }
 0x68c   :  { %v6756_v2 = vmax.f32 %v6754_v62, %v6755_v58  ;;  %v7578_v21 = vsel %vm7324_vm4, %v6742_v13, -inf  ;;  %v6780_v4 = vmax.f32 %v6778_v51, %v6779_v55  ;;  %v6787_v30 = vmax.f32 %v6785_v24, %v6786_v59  ;;  %v15047_v24 = vpop.f32.mrf.mxu0 }
 0x68d   :  { %v6763_v18 = vmax.f32 %v6761_v48, %v6762_v38  ;;  %v7579_v47 = vmax.f32 %v14998_v8, %v7578_v21  ;;  %v7581_v1 = vsel %vm7324_vm4, %v6749_v36, -inf  ;;  %v6768_v12 = vmax.f32 %v6766_v56, %v6767_v3 }
 0x68e   :  { %v7582_v50 = vmax.f32 %v15001_v19, %v7581_v1  ;;  %v7584_v29 = vsel %vm7324_vm4, %v6756_v2, -inf  ;;  %v6775_v15 = vmax.f32 %v6773_v11, %v6774_v20  ;;  %v6781_v28 = vrot.slane %v6780_v4, 2  ;;  %v3936_v19 = vpop.f32.mrf.mxu2 }
 0x68f   :  { %v7585_v5 = vmax.f32 %v15004_v46, %v7584_v29  ;;  %v7587_v26 = vsel %vm7324_vm4, %v6763_v18, -inf  ;;  %v7793_v10 = vmax.f32 %v7579_v47, 0.0  ;;  %v6769_v25 = vrot.slane %v6768_v12, 1 }
 0x690   :  { %v7588_v61 = vmax.f32 %v15009_v49, %v7587_v26  ;;  %v7794_v41 = vmax.f32 %v7582_v50, 0.0  ;;  %v6776_v8 = vrot.slane %v6775_v15, 1  ;;  %v6782_v0 = vmax.f32 %v6780_v4, %v6781_v28 }
 0x691   :  { %v15044_v34 = vadd.f32 %v3933_v40, %v14972_v31  ;;  %v7795_v9 = vmax.f32 %v7585_v5, 0.0  ;;  %v8085_v62 = vsel %vm8011_vm8, %v7793_v10, %v8084_v42  ;;  %v6788_v51 = vrot.slane %v6787_v30, 2 }
 0x692   :  { %v15050_v46 = vadd.f32 %v4464_v6, %v14966_v60  ;;  %v7796_v37 = vmax.f32 %v7588_v61, 0.0  ;;  %v8086_v48 = vsel %vm8013_vm9, %v7794_v41, %v8085_v62  ;;  %v6770_v49 = vmax.f32 %v6768_v12, %v6769_v25 }
 0x693   :  { %v8087_v56 = vsel %vm8015_vm10, %v7795_v9, %v8086_v48  ;;  %v6783_v11 = vrot.slane %v6782_v0, 1  ;;  %v6789_v22 = vmax.f32 %v6787_v30, %v6788_v51  ;;  %v5282_v31 = vrot.slane %v15024_v63, 2 }
 0x694   :  { %v15056_v40 = vadd.f32 %v3936_v19, %v14975_v14  ;;  %v8088_v42 = vsel %vm8017_vm11, %v7796_v37, %v8087_v56  ;;  %v6777_v13 = vmax.f32 %v6775_v15, %v6776_v8  ;;  %v5283_v58 = vrot.slane %v15024_v63, 4 }
 0x695   :  { %8151 = vst.msk [vmem:[#allocation3 + $0xd1] sm:$0xff] %vm7324_vm4, %v8088_v42  ;;  %v6790_v60 = vrot.slane %v6789_v22, 1  ;;  %v5284_v55 = vrot.slane %v15024_v63, 6  ;;  %v6792_v59 = vsel %vm5531_vm3, %v15024_v63, -inf  ;;  %v6799_v36 = vsel %vm5531_vm3, %v5282_v31, -inf }
 0x696   :  { %v15066_v38 = vsel %vm7324_vm4, %v6770_v49, -inf  ;;  %v6793_v14 = vrot.slane %v6792_v59, 4  ;;  %v6800_v3 = vrot.slane %v6799_v36, 4  ;;  %v6806_v20 = vsel %vm5531_vm3, %v5283_v58, -inf }
 0x697   :  { %v6784_v2 = vmax.f32 %v6782_v0, %v6783_v11  ;;  %v6807_v21 = vrot.slane %v6806_v20, 4  ;;  %v6813_v4 = vsel %vm5531_vm3, %v5284_v55, -inf  ;;  %v5065_v30 = vadd.f32 %v15030_v54, %v14154_v23  ;;  %v4971_v54 = vpop.f32.mrf.mxu0 }
 0x698   :  { %v15073_v18 = vsel %vm7324_vm4, %v6777_v13, -inf  ;;  %v6794_v63 = vmax.f32 %v6792_v59, %v6793_v14  ;;  %v6801_v47 = vmax.f32 %v6799_v36, %v6800_v3  ;;  %v6814_v1 = vrot.slane %v6813_v4, 4 }
 0x699   :  { %v6791_v12 = vmax.f32 %v6789_v22, %v6790_v60  ;;  %v6808_v50 = vmax.f32 %v6806_v20, %v6807_v21  ;;  %v5285_v29 = vrot.slane %v5065_v30, 2  ;;  %v5286_v15 = vrot.slane %v5065_v30, 4 }
 0x69a   :  { %v6795_v28 = vrot.slane %v6794_v63, 2  ;;  %v6802_v6 = vrot.slane %v6801_v47, 2  ;;  %v6815_v5 = vmax.f32 %v6813_v4, %v6814_v1  ;;  %v5287_v26 = vrot.slane %v5065_v30, 6 }
 0x69b   :  { %v6809_v10 = vrot.slane %v6808_v50, 2  ;;  %v6820_v25 = vsel %vm5531_vm3, %v5065_v30, -inf  ;;  %v6827_v61 = vsel %vm5531_vm3, %v5285_v29, -inf  ;;  %v6834_v23 = vsel %vm5531_vm3, %v5286_v15, -inf }
 0x69c   :  { %v6796_v41 = vmax.f32 %v6794_v63, %v6795_v28  ;;  %v6803_v8 = vmax.f32 %v6801_v47, %v6802_v6  ;;  %v6816_v0 = vrot.slane %v6815_v5, 2  ;;  %v6821_v19 = vrot.slane %v6820_v25, 4  ;;  %v8172_v9 = vld [vmem:[#allocation3 + $0xd0] sm:$0xff] }
 0x69d   :  { %v8318_v62 = vld [vmem:[#allocation3 + $0xd1] sm:$0xff]  ;;  %v6810_v37 = vmax.f32 %v6808_v50, %v6809_v10  ;;  %v6828_v48 = vrot.slane %v6827_v61, 4  ;;  %v6835_v49 = vrot.slane %v6834_v23, 4  ;;  %v6841_v56 = vsel %vm5531_vm3, %v5287_v26, -inf  ;;  %11296 = vmatmul.msk.f32.gmra.mxu1 %vm7324_vm4, %v8172_v9  ;;  %v11369_v26 = vld [vmem:[%s16468_s3 + $0x28] sm:$0xff] }
 0x69e   :  { %v8465_v51 = vld [vmem:[#allocation3 + $0xd2] sm:$0xff]  ;;  %11313 = vmatmul.msk.f32.gmra.mxu2 %vm7324_vm4, %v8318_v62  ;;  %v6797_v11 = vrot.slane %v6796_v41, 1  ;;  %v6804_v22 = vrot.slane %v6803_v8, 1  ;;  %v6817_v31 = vmax.f32 %v6815_v5, %v6816_v0  ;;  %v6822_v42 = vmax.f32 %v6820_v25, %v6821_v19  ;;  %v11352_v5 = vld [vmem:[%s16468_s3 + $0x20] sm:$0xff]  ;;  %8976 = vmatpush.msra.mxu3 %v11369_v26 }
 0x69f   :  { %11330 = vmatmul.msk.f32.gmra.mxu3 %vm7324_vm4, %v8465_v51  ;;  %v6811_v13 = vrot.slane %v6810_v37, 1  ;;  %v6829_v58 = vmax.f32 %v6827_v61, %v6828_v48  ;;  %v6836_v60 = vmax.f32 %v6834_v23, %v6835_v49  ;;  %v6842_v55 = vrot.slane %v6841_v56, 4  ;;  %8829 = vmatpush.msrb.mxu2 %v11352_v5  ;;  %v15107_v19 = vpop.f32.mrf.mxu0 }
 0x6a0   :  { %v6798_v59 = vmax.f32 %v6796_v41, %v6797_v11  ;;  %v6805_v36 = vmax.f32 %v6803_v8, %v6804_v22  ;;  %v6818_v14 = vrot.slane %v6817_v31, 1  ;;  %v6823_v3 = vrot.slane %v6822_v42, 2 }
 0x6a1   :  { %v6812_v20 = vmax.f32 %v6810_v37, %v6811_v13  ;;  %v6830_v21 = vrot.slane %v6829_v58, 2  ;;  %v6837_v4 = vrot.slane %v6836_v60, 2  ;;  %v6843_v30 = vmax.f32 %v6841_v56, %v6842_v55 }
 0x6a2   :  { %v7595_v63 = vsel %vm7324_vm4, %v6784_v2, -inf  ;;  %v7598_v47 = vsel %vm7324_vm4, %v6791_v12, -inf  ;;  %v6819_v1 = vmax.f32 %v6817_v31, %v6818_v14  ;;  %v6824_v50 = vmax.f32 %v6822_v42, %v6823_v3  ;;  %v11335_v2 = vld [vmem:[%s16468_s3 + $0x18] sm:$0xff] }
 0x6a3   :  { %v15085_v29 = vsel %vm7324_vm4, %v6798_v59, -inf  ;;  %v6831_v15 = vmax.f32 %v6829_v58, %v6830_v21  ;;  %v6838_v28 = vmax.f32 %v6836_v60, %v6837_v4  ;;  %v6844_v6 = vrot.slane %v6843_v30, 2  ;;  %8682 = vmatpush.msra.mxu1 %v11335_v2 }
 0x6a4   :  { %v15097_v12 = vsel %vm7324_vm4, %v6805_v36, -inf  ;;  %v15100_v10 = vsel %vm7324_vm4, %v6812_v20, -inf  ;;  %v6825_v25 = vrot.slane %v6824_v50, 1  ;;  %v5066_v61 = vadd.f32 %v15047_v24, %v14172_v27 }
 0x6a5   :  { %v6832_v23 = vrot.slane %v6831_v15, 1  ;;  %v6839_v41 = vrot.slane %v6838_v28, 1  ;;  %v6845_v8 = vmax.f32 %v6843_v30, %v6844_v6  ;;  %v15105_v0 = vadd.f32 %v4971_v54, %v14242_v7 }
 0x6a6   :  { %v6826_v9 = vmax.f32 %v6824_v50, %v6825_v25  ;;  %v5288_v62 = vrot.slane %v5066_v61, 2  ;;  %v5289_v51 = vrot.slane %v5066_v61, 4  ;;  %v5290_v37 = vrot.slane %v5066_v61, 6 }
 0x6a7   :  { %v6833_v48 = vmax.f32 %v6831_v15, %v6832_v23  ;;  %v6840_v49 = vmax.f32 %v6838_v28, %v6839_v41  ;;  %v6846_v56 = vrot.slane %v6845_v8, 1  ;;  %v6848_v27 = vsel %vm5531_vm3, %v5066_v61, -inf }
 0x6a8   :  { %v7590_v24 = vsel %vm7324_vm4, %v6826_v9, -inf  ;;  %v6849_v11 = vrot.slane %v6848_v27, 4  ;;  %v6855_v22 = vsel %vm5531_vm3, %v5288_v62, -inf  ;;  %v6862_v7 = vsel %vm5531_vm3, %v5289_v51, -inf }
 0x6a9   :  { %v6847_v54 = vmax.f32 %v6845_v8, %v6846_v56  ;;  %v7591_v31 = vmax.f32 %v15066_v38, %v7590_v24  ;;  %v7593_v42 = vsel %vm7324_vm4, %v6833_v48, -inf  ;;  %v7596_v13 = vsel %vm7324_vm4, %v6840_v49, -inf }
 0x6aa   :  { %v7594_v58 = vmax.f32 %v15073_v18, %v7593_v42  ;;  %v7597_v60 = vmax.f32 %v7595_v63, %v7596_v13  ;;  %v6850_v55 = vmax.f32 %v6848_v27, %v6849_v11  ;;  %v6856_v59 = vrot.slane %v6855_v22, 4 }
 0x6ab   :  { %v7599_v36 = vsel %vm7324_vm4, %v6847_v54, -inf  ;;  %v7797_v14 = vmax.f32 %v7591_v31, 0.0  ;;  %v6863_v3 = vrot.slane %v6862_v7, 4  ;;  %v6869_v20 = vsel %vm5531_vm3, %v5290_v37, -inf }
 0x6ac   :  { %v7600_v21 = vmax.f32 %v7598_v47, %v7599_v36  ;;  %v7798_v4 = vmax.f32 %v7594_v58, 0.0  ;;  %v7799_v30 = vmax.f32 %v7597_v60, 0.0  ;;  %v6851_v50 = vrot.slane %v6850_v55, 2  ;;  %v4977_v47 = vpop.f32.mrf.mxu0 }
 0x6ad   :  { %v7610_v38 = vsel %vm7324_vm4, %v6819_v1, -inf  ;;  %v6857_v15 = vmax.f32 %v6855_v22, %v6856_v59  ;;  %v6864_v28 = vmax.f32 %v6862_v7, %v6863_v3  ;;  %v6870_v6 = vrot.slane %v6869_v20, 4 }
 0x6ae   :  { %v7800_v5 = vmax.f32 %v7600_v21, 0.0  ;;  %v8089_v18 = vsel %vm8005_vm5, %v7798_v4, %v7797_v14  ;;  %v6852_v63 = vmax.f32 %v6850_v55, %v6851_v50  ;;  %v5291_v26 = vrot.slane %v15105_v0, 2 }
 0x6af   :  { %v8090_v2 = vsel %vm8007_vm6, %v7799_v30, %v8089_v18  ;;  %v6858_v25 = vrot.slane %v6857_v15, 2  ;;  %v6865_v61 = vrot.slane %v6864_v28, 2  ;;  %v6871_v23 = vmax.f32 %v6869_v20, %v6870_v6 }
 0x6b0   :  { %v8091_v41 = vsel %vm8009_vm7, %v7800_v5, %v8090_v2  ;;  %v6853_v8 = vrot.slane %v6852_v63, 1  ;;  %v5292_v1 = vrot.slane %v15105_v0, 4  ;;  %v5293_v9 = vrot.slane %v15105_v0, 6 }
 0x6b1   :  { %v6859_v62 = vmax.f32 %v6857_v15, %v6858_v25  ;;  %v6866_v51 = vmax.f32 %v6864_v28, %v6865_v61  ;;  %v6872_v37 = vrot.slane %v6871_v23, 2  ;;  %v6876_v48 = vsel %vm5531_vm3, %v15105_v0, -inf }
 0x6b2   :  { %v6854_v49 = vmax.f32 %v6852_v63, %v6853_v8  ;;  %v6877_v56 = vrot.slane %v6876_v48, 4  ;;  %v6883_v27 = vsel %vm5531_vm3, %v5291_v26, -inf  ;;  %v6890_v24 = vsel %vm5531_vm3, %v5292_v1, -inf }
 0x6b3   :  { %v6860_v11 = vrot.slane %v6859_v62, 1  ;;  %v6867_v22 = vrot.slane %v6866_v51, 1  ;;  %v6873_v7 = vmax.f32 %v6871_v23, %v6872_v37  ;;  %v6884_v54 = vrot.slane %v6883_v27, 4 }
 0x6b4   :  { %v7602_v31 = vsel %vm7324_vm4, %v6854_v49, -inf  ;;  %v6878_v42 = vmax.f32 %v6876_v48, %v6877_v56  ;;  %v6891_v13 = vrot.slane %v6890_v24, 4  ;;  %v6897_v58 = vsel %vm5531_vm3, %v5293_v9, -inf  ;;  %v15139_v2 = vpop.f32.mrf.mxu0 }
 0x6b5   :  { %v6861_v60 = vmax.f32 %v6859_v62, %v6860_v11  ;;  %v6868_v55 = vmax.f32 %v6866_v51, %v6867_v22  ;;  %v6874_v59 = vrot.slane %v6873_v7, 1  ;;  %v7603_v0 = vmax.f32 %v15085_v29, %v7602_v31 }
 0x6b6   :  { %v6879_v36 = vrot.slane %v6878_v42, 2  ;;  %v6885_v14 = vmax.f32 %v6883_v27, %v6884_v54  ;;  %v6892_v3 = vmax.f32 %v6890_v24, %v6891_v13  ;;  %v6898_v20 = vrot.slane %v6897_v58, 4 }
 0x6b7   :  { %v6875_v21 = vmax.f32 %v6873_v7, %v6874_v59  ;;  %v7605_v4 = vsel %vm7324_vm4, %v6861_v60, -inf  ;;  %v7608_v30 = vsel %vm7324_vm4, %v6868_v55, -inf  ;;  %v7801_v50 = vmax.f32 %v7603_v0, 0.0 }
 0x6b8   :  { %v7606_v15 = vmax.f32 %v15097_v12, %v7605_v4  ;;  %v7609_v28 = vmax.f32 %v15100_v10, %v7608_v30  ;;  %v6880_v6 = vmax.f32 %v6878_v42, %v6879_v36  ;;  %v6886_v5 = vrot.slane %v6885_v14, 2 }
 0x6b9   :  { %v7611_v18 = vsel %vm7324_vm4, %v6875_v21, -inf  ;;  %v8092_v29 = vsel %vm8011_vm8, %v7801_v50, %v8091_v41  ;;  %v6893_v63 = vrot.slane %v6892_v3, 2  ;;  %v6899_v26 = vmax.f32 %v6897_v58, %v6898_v20 }
 0x6ba   :  { %v7612_v25 = vmax.f32 %v7610_v38, %v7611_v18  ;;  %v7802_v61 = vmax.f32 %v7606_v15, 0.0  ;;  %v7803_v23 = vmax.f32 %v7609_v28, 0.0  ;;  %v6881_v8 = vrot.slane %v6880_v6, 1 }
 0x6bb   :  { %v6887_v1 = vmax.f32 %v6885_v14, %v6886_v5  ;;  %v6894_v9 = vmax.f32 %v6892_v3, %v6893_v63  ;;  %v6900_v62 = vrot.slane %v6899_v26, 2  ;;  %v5068_v12 = vadd.f32 %v15107_v19, %v14247_v33 }
 0x6bc   :  { %v7804_v10 = vmax.f32 %v7612_v25, 0.0  ;;  %v8093_v51 = vsel %vm8013_vm9, %v7802_v61, %v8092_v29  ;;  %v6882_v37 = vmax.f32 %v6880_v6, %v6881_v8  ;;  %v5069_v41 = vadd.f32 %v4977_v47, %v14540_v43  ;;  %v4983_v30 = vpop.f32.mrf.mxu0 }
 0x6bd   :  { %v8094_v48 = vsel %vm8015_vm10, %v7803_v23, %v8093_v51  ;;  %v6888_v49 = vrot.slane %v6887_v1, 1  ;;  %v6895_v56 = vrot.slane %v6894_v9, 1  ;;  %v6901_v38 = vmax.f32 %v6899_v26, %v6900_v62 }
 0x6be   :  { %v8095_v27 = vsel %vm8017_vm11, %v7804_v10, %v8094_v48  ;;  %v15148_v24 = vsel %vm7324_vm4, %v6882_v37, -inf  ;;  %v5294_v11 = vrot.slane %v5068_v12, 2  ;;  %v5295_v22 = vrot.slane %v5068_v12, 4 }
 0x6bf   :  { %8152 = vst.msk [vmem:[#allocation3 + $0xe1] sm:$0xff] %vm7324_vm4, %v8095_v27  ;;  %v6889_v33 = vmax.f32 %v6887_v1, %v6888_v49  ;;  %v6896_v19 = vmax.f32 %v6894_v9, %v6895_v56  ;;  %v6902_v7 = vrot.slane %v6901_v38, 1  ;;  %v5296_v54 = vrot.slane %v5068_v12, 6 }
 0x6c0   :  { %v6904_v43 = vsel %vm5531_vm3, %v5068_v12, -inf  ;;  %v6911_v47 = vsel %vm5531_vm3, %v5294_v11, -inf  ;;  %v6918_v31 = vsel %vm5531_vm3, %v5295_v22, -inf  ;;  %v5297_v42 = vrot.slane %v5069_v41, 2 }
 0x6c1   :  { %v6903_v13 = vmax.f32 %v6901_v38, %v6902_v7  ;;  %v15155_v58 = vsel %vm7324_vm4, %v6889_v33, -inf  ;;  %v15158_v60 = vsel %vm7324_vm4, %v6896_v19, -inf  ;;  %v6905_v55 = vrot.slane %v6904_v43, 4 }
 0x6c2   :  { %v6912_v59 = vrot.slane %v6911_v47, 4  ;;  %v6919_v0 = vrot.slane %v6918_v31, 4  ;;  %v6925_v36 = vsel %vm5531_vm3, %v5296_v54, -inf  ;;  %v5298_v14 = vrot.slane %v5069_v41, 4 }
 0x6c3   :  { %v15162_v3 = vsel %vm7324_vm4, %v6903_v13, -inf  ;;  %v6906_v20 = vmax.f32 %v6904_v43, %v6905_v55  ;;  %v6926_v21 = vrot.slane %v6925_v36, 4  ;;  %v5299_v4 = vrot.slane %v5069_v41, 6 }
 0x6c4   :  { %v6913_v50 = vmax.f32 %v6911_v47, %v6912_v59  ;;  %v6920_v15 = vmax.f32 %v6918_v31, %v6919_v0  ;;  %v6932_v28 = vsel %vm5531_vm3, %v5069_v41, -inf  ;;  %v6939_v6 = vsel %vm5531_vm3, %v5297_v42, -inf }
 0x6c5   :  { %v6907_v5 = vrot.slane %v6906_v20, 2  ;;  %v6927_v18 = vmax.f32 %v6925_v36, %v6926_v21  ;;  %v6933_v29 = vrot.slane %v6932_v28, 4  ;;  %v6940_v63 = vrot.slane %v6939_v6, 4  ;;  %v4986_v21 = vpop.f32.mrf.mxu0 }
 0x6c6   :  { %v6914_v26 = vrot.slane %v6913_v50, 2  ;;  %v6921_v25 = vrot.slane %v6920_v15, 2  ;;  %v6946_v61 = vsel %vm5531_vm3, %v5298_v14, -inf  ;;  %v6953_v23 = vsel %vm5531_vm3, %v5299_v4, -inf  ;;  %v8173_v8 = vld [vmem:[#allocation3 + $0xe0] sm:$0xff] }
 0x6c7   :  { %v8319_v1 = vld [vmem:[#allocation3 + $0xe1] sm:$0xff]  ;;  %v6908_v9 = vmax.f32 %v6906_v20, %v6907_v5  ;;  %v6928_v62 = vrot.slane %v6927_v18, 2  ;;  %v6934_v12 = vmax.f32 %v6932_v28, %v6933_v29  ;;  %v6941_v10 = vmax.f32 %v6939_v6, %v6940_v63  ;;  %11297 = vmatmul.msk.f32.gmra.mxu1 %vm7324_vm4, %v8173_v8 }
 0x6c8   :  { %11314 = vmatmul.msk.f32.gmra.mxu2 %vm7324_vm4, %v8319_v1  ;;  %v8466_v51 = vld [vmem:[#allocation3 + $0xe2] sm:$0xff]  ;;  %v6915_v37 = vmax.f32 %v6913_v50, %v6914_v26  ;;  %v6922_v41 = vmax.f32 %v6920_v15, %v6921_v25  ;;  %v6947_v48 = vrot.slane %v6946_v61, 4  ;;  %v6954_v49 = vrot.slane %v6953_v23, 4 }
 0x6c9   :  { %11331 = vmatmul.msk.f32.gmra.mxu3 %vm7324_vm4, %v8466_v51  ;;  %v6909_v56 = vrot.slane %v6908_v9, 1  ;;  %v6929_v38 = vmax.f32 %v6927_v18, %v6928_v62  ;;  %v6935_v27 = vrot.slane %v6934_v12, 2  ;;  %v6942_v11 = vrot.slane %v6941_v10, 2 }
 0x6ca   :  { %v6916_v22 = vrot.slane %v6915_v37, 1  ;;  %v6923_v33 = vrot.slane %v6922_v41, 1  ;;  %v6948_v19 = vmax.f32 %v6946_v61, %v6947_v48  ;;  %v6955_v7 = vmax.f32 %v6953_v23, %v6954_v49 }
 0x6cb   :  { %v6910_v54 = vmax.f32 %v6908_v9, %v6909_v56  ;;  %v6930_v43 = vrot.slane %v6929_v38, 1  ;;  %v6936_v47 = vmax.f32 %v6934_v12, %v6935_v27  ;;  %v6943_v31 = vmax.f32 %v6941_v10, %v6942_v11 }
 0x6cc   :  { %v6917_v42 = vmax.f32 %v6915_v37, %v6916_v22  ;;  %v6924_v13 = vmax.f32 %v6922_v41, %v6923_v33  ;;  %v6949_v55 = vrot.slane %v6948_v19, 2  ;;  %v6956_v59 = vrot.slane %v6955_v7, 2 }
 0x6cd   :  { %v6931_v0 = vmax.f32 %v6929_v38, %v6930_v43  ;;  %v15172_v36 = vsel %vm7324_vm4, %v6910_v54, -inf  ;;  %v6937_v14 = vrot.slane %v6936_v47, 1  ;;  %v6944_v20 = vrot.slane %v6943_v31, 1 }
 0x6ce   :  { %v15175_v4 = vsel %vm7324_vm4, %v6917_v42, -inf  ;;  %v15178_v50 = vsel %vm7324_vm4, %v6924_v13, -inf  ;;  %v6950_v15 = vmax.f32 %v6948_v19, %v6949_v55  ;;  %v6957_v28 = vmax.f32 %v6955_v7, %v6956_v59  ;;  %v3404_v13 = vpop.f32.mrf.mxu1 }
 0x6cf   :  { %v15181_v6 = vsel %vm7324_vm4, %v6931_v0, -inf  ;;  %v6938_v5 = vmax.f32 %v6936_v47, %v6937_v14  ;;  %v6945_v18 = vmax.f32 %v6943_v31, %v6944_v20  ;;  %v5070_v29 = vadd.f32 %v15139_v2, %v14624_v39  ;;  %v4467_v0 = vpop.f32.mrf.mxu3 }
 0x6d0   :  { %v6951_v63 = vrot.slane %v6950_v15, 1  ;;  %v6958_v26 = vrot.slane %v6957_v28, 1  ;;  %v5071_v25 = vadd.f32 %v4983_v30, %v14627_v16  ;;  %v15187_v61 = vadd.f32 %v4986_v21, %v14713_v45 }
 0x6d1   :  { %v7614_v23 = vsel %vm7324_vm4, %v6938_v5, -inf  ;;  %v7617_v8 = vsel %vm7324_vm4, %v6945_v18, -inf  ;;  %v5300_v1 = vrot.slane %v5070_v29, 2  ;;  %v5301_v9 = vrot.slane %v5070_v29, 4 }
 0x6d2   :  { %v6952_v62 = vmax.f32 %v6950_v15, %v6951_v63  ;;  %v6959_v12 = vmax.f32 %v6957_v28, %v6958_v26  ;;  %v7615_v10 = vmax.f32 %v15148_v24, %v7614_v23  ;;  %v7618_v51 = vmax.f32 %v15155_v58, %v7617_v8 }
 0x6d3   :  { %v5302_v39 = vrot.slane %v5070_v29, 6  ;;  %v6960_v2 = vsel %vm5531_vm3, %v5070_v29, -inf  ;;  %v6967_v16 = vsel %vm5531_vm3, %v5300_v1, -inf  ;;  %v6974_v45 = vsel %vm5531_vm3, %v5301_v9, -inf  ;;  %v3939_v1 = vpop.f32.mrf.mxu2 }
 0x6d4   :  { %v7620_v30 = vsel %vm7324_vm4, %v6952_v62, -inf  ;;  %v7623_v37 = vsel %vm7324_vm4, %v6959_v12, -inf  ;;  %v7805_v41 = vmax.f32 %v7615_v10, 0.0  ;;  %v7806_v48 = vmax.f32 %v7618_v51, 0.0 }
 0x6d5   :  { %v7621_v49 = vmax.f32 %v15158_v60, %v7620_v30  ;;  %v7624_v56 = vmax.f32 %v15162_v3, %v7623_v37  ;;  %v6961_v24 = vrot.slane %v6960_v2, 4  ;;  %v6968_v38 = vrot.slane %v6967_v16, 4 }
 0x6d6   :  { %v8096_v58 = vsel %vm8005_vm5, %v7806_v48, %v7805_v41  ;;  %v6975_v27 = vrot.slane %v6974_v45, 4  ;;  %v6981_v11 = vsel %vm5531_vm3, %v5302_v39, -inf  ;;  %v5303_v22 = vrot.slane %v5071_v25, 2 }
 0x6d7   :  { %v7807_v33 = vmax.f32 %v7621_v49, 0.0  ;;  %v7808_v19 = vmax.f32 %v7624_v56, 0.0  ;;  %v6962_v7 = vmax.f32 %v6960_v2, %v6961_v24  ;;  %v6969_v54 = vmax.f32 %v6967_v16, %v6968_v38 }
 0x6d8   :  { %v6976_v43 = vmax.f32 %v6974_v45, %v6975_v27  ;;  %v6982_v47 = vrot.slane %v6981_v11, 4  ;;  %v5304_v31 = vrot.slane %v5071_v25, 4  ;;  %v5305_v42 = vrot.slane %v5071_v25, 6 }
 0x6d9   :  { %v8097_v60 = vsel %vm8007_vm6, %v7807_v33, %v8096_v58  ;;  %v6963_v3 = vrot.slane %v6962_v7, 2  ;;  %v6970_v55 = vrot.slane %v6969_v54, 2  ;;  %v6988_v59 = vsel %vm5531_vm3, %v5071_v25, -inf }
 0x6da   :  { %v8098_v14 = vsel %vm8009_vm7, %v7808_v19, %v8097_v60  ;;  %v6977_v20 = vrot.slane %v6976_v43, 2  ;;  %v6983_v21 = vmax.f32 %v6981_v11, %v6982_v47  ;;  %v6989_v15 = vrot.slane %v6988_v59, 4  ;;  %v4989_v11 = vpop.f32.mrf.mxu0  ;;  %v4470_v60 = vpop.f32.mrf.mxu3 }
 0x6db   :  { %v6964_v28 = vmax.f32 %v6962_v7, %v6963_v3  ;;  %v6971_v5 = vmax.f32 %v6969_v54, %v6970_v55  ;;  %v6995_v18 = vsel %vm5531_vm3, %v5303_v22, -inf  ;;  %v7002_v29 = vsel %vm5531_vm3, %v5304_v31, -inf  ;;  %v3407_v54 = vpop.f32.mrf.mxu1 }
 0x6dc   :  { %v6978_v63 = vmax.f32 %v6976_v43, %v6977_v20  ;;  %v6984_v26 = vrot.slane %v6983_v21, 2  ;;  %v6990_v23 = vmax.f32 %v6988_v59, %v6989_v15  ;;  %v6996_v8 = vrot.slane %v6995_v18, 4 }
 0x6dd   :  { %v6965_v9 = vrot.slane %v6964_v28, 1  ;;  %v6972_v62 = vrot.slane %v6971_v5, 1  ;;  %v7003_v25 = vrot.slane %v7002_v29, 4  ;;  %v7009_v12 = vsel %vm5531_vm3, %v5305_v42, -inf }
 0x6de   :  { %v6979_v10 = vrot.slane %v6978_v63, 1  ;;  %v6985_v51 = vmax.f32 %v6983_v21, %v6984_v26  ;;  %v6991_v39 = vrot.slane %v6990_v23, 2  ;;  %v6997_v2 = vmax.f32 %v6995_v18, %v6996_v8 }
 0x6df   :  { %v6966_v16 = vmax.f32 %v6964_v28, %v6965_v9  ;;  %v6973_v45 = vmax.f32 %v6971_v5, %v6972_v62  ;;  %v7004_v30 = vmax.f32 %v7002_v29, %v7003_v25  ;;  %v7010_v37 = vrot.slane %v7009_v12, 4 }
 0x6e0   :  { %v6980_v41 = vmax.f32 %v6978_v63, %v6979_v10  ;;  %v6986_v48 = vrot.slane %v6985_v51, 1  ;;  %v6992_v49 = vmax.f32 %v6990_v23, %v6991_v39  ;;  %v6998_v56 = vrot.slane %v6997_v2, 2  ;;  %v3942_v63 = vpop.f32.mrf.mxu2 }
 0x6e1   :  { %v7626_v24 = vsel %vm7324_vm4, %v6966_v16, -inf  ;;  %v7629_v38 = vsel %vm7324_vm4, %v6973_v45, -inf  ;;  %v7005_v58 = vrot.slane %v7004_v30, 2  ;;  %v7011_v27 = vmax.f32 %v7009_v12, %v7010_v37 }
 0x6e2   :  { %v6987_v22 = vmax.f32 %v6985_v51, %v6986_v48  ;;  %v7627_v33 = vmax.f32 %v15172_v36, %v7626_v24  ;;  %v7630_v19 = vmax.f32 %v15175_v4, %v7629_v38  ;;  %v7632_v7 = vsel %vm7324_vm4, %v6980_v41, -inf  ;;  %v4992_v16 = vpop.f32.mrf.mxu0 }
 0x6e3   :  { %v7633_v43 = vmax.f32 %v15178_v50, %v7632_v7  ;;  %v6993_v47 = vrot.slane %v6992_v49, 1  ;;  %v6999_v31 = vmax.f32 %v6997_v2, %v6998_v56  ;;  %v7006_v42 = vmax.f32 %v7004_v30, %v7005_v58 }
 0x6e4   :  { %v7635_v3 = vsel %vm7324_vm4, %v6987_v22, -inf  ;;  %v7809_v55 = vmax.f32 %v7627_v33, 0.0  ;;  %v7810_v59 = vmax.f32 %v7630_v19, 0.0  ;;  %v7012_v20 = vrot.slane %v7011_v27, 2 }
 0x6e5   :  { %v15216_v21 = vadd.f32 %v4467_v0, %v15044_v34  ;;  %v3476_v36 = vadd.f32 %v3404_v13, %v14162_v32  ;;  %v7636_v4 = vmax.f32 %v15181_v6, %v7635_v3  ;;  %v7811_v15 = vmax.f32 %v7633_v43, 0.0 }
 0x6e6   :  { %v3477_v28 = vadd.f32 %v3407_v54, %v14238_v52  ;;  %v8099_v50 = vsel %vm8011_vm8, %v7809_v55, %v8098_v14  ;;  %v7013_v5 = vmax.f32 %v7011_v27, %v7012_v20  ;;  %v5306_v18 = vrot.slane %v15187_v61, 2 }
 0x6e7   :  { %v15224_v29 = vadd.f32 %v4470_v60, %v15056_v40  ;;  %v7812_v26 = vmax.f32 %v7636_v4, 0.0  ;;  %v8100_v34 = vsel %vm8013_vm9, %v7810_v59, %v8099_v50  ;;  %v7000_v0 = vrot.slane %v6999_v31, 1 }
 0x6e8   :  { %v8101_v32 = vsel %vm8015_vm10, %v7811_v15, %v8100_v34  ;;  %v6994_v13 = vmax.f32 %v6992_v49, %v6993_v47  ;;  %v7007_v6 = vrot.slane %v7006_v42, 1  ;;  %v5307_v23 = vrot.slane %v15187_v61, 4 }
 0x6e9   :  { %v8102_v52 = vsel %vm8017_vm11, %v7812_v26, %v8101_v32  ;;  %v7014_v14 = vrot.slane %v7013_v5, 1  ;;  %v5308_v8 = vrot.slane %v15187_v61, 6  ;;  %v7016_v40 = vsel %vm5531_vm3, %v15187_v61, -inf }
 0x6ea   :  { %v15233_v9 = vadd.f32 %v3939_v1, %v3476_v36  ;;  %v15235_v62 = vadd.f32 %v3942_v63, %v3477_v28  ;;  %8153 = vst.msk [vmem:[#allocation3 + $0xf1] sm:$0xff] %vm7324_vm4, %v8102_v52  ;;  %v7017_v25 = vrot.slane %v7016_v40, 4  ;;  %v7023_v12 = vsel %vm5531_vm3, %v5306_v18, -inf }
 0x6eb   :  { %v7001_v10 = vmax.f32 %v6999_v31, %v7000_v0  ;;  %v7024_v51 = vrot.slane %v7023_v12, 4  ;;  %v7030_v39 = vsel %vm5531_vm3, %v5307_v23, -inf  ;;  %v7037_v2 = vsel %vm5531_vm3, %v5308_v8, -inf }
 0x6ec   :  { %v15242_v45 = vsel %vm7324_vm4, %v6994_v13, -inf  ;;  %v7018_v61 = vmax.f32 %v7016_v40, %v7017_v25  ;;  %v7031_v1 = vrot.slane %v7030_v39, 4  ;;  %v7038_v30 = vrot.slane %v7037_v2, 4 }
 0x6ed   :  { %v7008_v37 = vmax.f32 %v7006_v42, %v7007_v6  ;;  %v7015_v41 = vmax.f32 %v7013_v5, %v7014_v14  ;;  %v7025_v48 = vmax.f32 %v7023_v12, %v7024_v51  ;;  %v5073_v49 = vadd.f32 %v4989_v11, %v14796_v53 }
 0x6ee   :  { %v7019_v56 = vrot.slane %v7018_v61, 2  ;;  %v7032_v24 = vmax.f32 %v7030_v39, %v7031_v1  ;;  %v7039_v38 = vmax.f32 %v7037_v2, %v7038_v30  ;;  %v15246_v58 = vadd.f32 %v4992_v16, %v14868_v35 }
 0x6ef   :  { %v7026_v27 = vrot.slane %v7025_v48, 2  ;;  %v5309_v22 = vrot.slane %v5073_v49, 2  ;;  %v5310_v33 = vrot.slane %v5073_v49, 4  ;;  %v5311_v19 = vrot.slane %v5073_v49, 6 }
 0x6f0   :  { %v7020_v7 = vmax.f32 %v7018_v61, %v7019_v56  ;;  %v7033_v54 = vrot.slane %v7032_v24, 2  ;;  %v7040_v43 = vrot.slane %v7039_v38, 2  ;;  %v7044_v47 = vsel %vm5531_vm3, %v5073_v49, -inf }
 0x6f1   :  { %v7027_v31 = vmax.f32 %v7025_v48, %v7026_v27  ;;  %v7045_v42 = vrot.slane %v7044_v47, 4  ;;  %v7051_v60 = vsel %vm5531_vm3, %v5309_v22, -inf  ;;  %v7058_v53 = vsel %vm5531_vm3, %v5310_v33, -inf  ;;  %v8174_v11 = vld [vmem:[#allocation3 + $0xf0] sm:$0xff] }
 0x6f2   :  { %v8320_v3 = vld [vmem:[#allocation3 + $0xf1] sm:$0xff]  ;;  %v7021_v35 = vrot.slane %v7020_v7, 1  ;;  %v7034_v59 = vmax.f32 %v7032_v24, %v7033_v54  ;;  %v7041_v20 = vmax.f32 %v7039_v38, %v7040_v43  ;;  %v7052_v36 = vrot.slane %v7051_v60, 4  ;;  %11298 = vmatmul.msk.f32.gmra.mxu1 %vm7324_vm4, %v8174_v11 }
 0x6f3   :  { %v8467_v55 = vld [vmem:[#allocation3 + $0xf2] sm:$0xff]  ;;  %11315 = vmatmul.msk.f32.gmra.mxu2 %vm7324_vm4, %v8320_v3  ;;  %v7028_v4 = vrot.slane %v7027_v31, 1  ;;  %v7046_v15 = vmax.f32 %v7044_v47, %v7045_v42  ;;  %v7059_v28 = vrot.slane %v7058_v53, 4  ;;  %v7065_v50 = vsel %vm5531_vm3, %v5311_v19, -inf }
 0x6f4   :  { %11332 = vmatmul.msk.f32.gmra.mxu3 %vm7324_vm4, %v8467_v55  ;;  %v7022_v5 = vmax.f32 %v7020_v7, %v7021_v35  ;;  %v7035_v18 = vrot.slane %v7034_v59, 1  ;;  %v7042_v63 = vrot.slane %v7041_v20, 1  ;;  %v7053_v26 = vmax.f32 %v7051_v60, %v7052_v36 }
 0x6f5   :  { %v7029_v34 = vmax.f32 %v7027_v31, %v7028_v4  ;;  %v7047_v0 = vrot.slane %v7046_v15, 2  ;;  %v7060_v32 = vmax.f32 %v7058_v53, %v7059_v28  ;;  %v7066_v13 = vrot.slane %v7065_v50, 4 }
 0x6f6   :  { %v7640_v6 = vsel %vm7324_vm4, %v7001_v10, -inf  ;;  %v7643_v23 = vsel %vm7324_vm4, %v7008_v37, -inf  ;;  %v7646_v52 = vsel %vm7324_vm4, %v7015_v41, -inf  ;;  %v7054_v14 = vrot.slane %v7053_v26, 2  ;;  %v4995_v37 = vpop.f32.mrf.mxu0 }
 0x6f7   :  { %v7036_v8 = vmax.f32 %v7034_v59, %v7035_v18  ;;  %v7048_v40 = vmax.f32 %v7046_v15, %v7047_v0  ;;  %v7061_v25 = vrot.slane %v7060_v32, 2  ;;  %v7067_v12 = vmax.f32 %v7065_v50, %v7066_v13 }
 0x6f8   :  { %v7043_v51 = vmax.f32 %v7041_v20, %v7042_v63  ;;  %v15259_v39 = vsel %vm7324_vm4, %v7022_v5, -inf  ;;  %v15262_v2 = vsel %vm7324_vm4, %v7029_v34, -inf  ;;  %v7055_v16 = vmax.f32 %v7053_v26, %v7054_v14 }
 0x6f9   :  { %v7049_v61 = vrot.slane %v7048_v40, 1  ;;  %v7062_v1 = vmax.f32 %v7060_v32, %v7061_v25  ;;  %v7068_v10 = vrot.slane %v7067_v12, 2  ;;  %v5312_v30 = vrot.slane %v15246_v58, 2 }
 0x6fa   :  { %v7056_v41 = vrot.slane %v7055_v16, 1  ;;  %v5313_v48 = vrot.slane %v15246_v58, 4  ;;  %v5314_v49 = vrot.slane %v15246_v58, 6  ;;  %v7072_v56 = vsel %vm5531_vm3, %v15246_v58, -inf }
 0x6fb   :  { %v7050_v24 = vmax.f32 %v7048_v40, %v7049_v61  ;;  %v7063_v38 = vrot.slane %v7062_v1, 1  ;;  %v7069_v27 = vmax.f32 %v7067_v12, %v7068_v10  ;;  %v7073_v22 = vrot.slane %v7072_v56, 4 }
 0x6fc   :  { %v7057_v33 = vmax.f32 %v7055_v16, %v7056_v41  ;;  %v7079_v19 = vsel %vm5531_vm3, %v5312_v30, -inf  ;;  %v7086_v7 = vsel %vm5531_vm3, %v5313_v48, -inf  ;;  %v7093_v54 = vsel %vm5531_vm3, %v5314_v49, -inf }
 0x6fd   :  { %v7064_v43 = vmax.f32 %v7062_v1, %v7063_v38  ;;  %v7070_v47 = vrot.slane %v7069_v27, 1  ;;  %v7638_v31 = vsel %vm7324_vm4, %v7050_v24, -inf  ;;  %v7074_v42 = vmax.f32 %v7072_v56, %v7073_v22 }
 0x6fe   :  { %v7639_v60 = vmax.f32 %v15242_v45, %v7638_v31  ;;  %v7641_v58 = vsel %vm7324_vm4, %v7057_v33, -inf  ;;  %v7080_v53 = vrot.slane %v7079_v19, 4  ;;  %v7087_v11 = vrot.slane %v7086_v7, 4  ;;  %v4998_v14 = vpop.f32.mrf.mxu0 }
 0x6ff   :  { %v7071_v3 = vmax.f32 %v7069_v27, %v7070_v47  ;;  %v7642_v55 = vmax.f32 %v7640_v6, %v7641_v58  ;;  %v7644_v35 = vsel %vm7324_vm4, %v7064_v43, -inf  ;;  %v7075_v59 = vrot.slane %v7074_v42, 2 }
 0x700   :  { %v7645_v20 = vmax.f32 %v7643_v23, %v7644_v35  ;;  %v7813_v36 = vmax.f32 %v7639_v60, 0.0  ;;  %v7081_v4 = vmax.f32 %v7079_v19, %v7080_v53  ;;  %v7088_v15 = vmax.f32 %v7086_v7, %v7087_v11  ;;  %v4473_v7 = vpop.f32.mrf.mxu3 }
 0x701   :  { %v7647_v28 = vsel %vm7324_vm4, %v7071_v3, -inf  ;;  %v7814_v50 = vmax.f32 %v7642_v55, 0.0  ;;  %v7076_v5 = vmax.f32 %v7074_v42, %v7075_v59  ;;  %v7094_v18 = vrot.slane %v7093_v54, 4 }
 0x702   :  { %v7648_v63 = vmax.f32 %v7646_v52, %v7647_v28  ;;  %v7815_v45 = vmax.f32 %v7645_v20, 0.0  ;;  %v7082_v26 = vrot.slane %v7081_v4, 2  ;;  %v7089_v34 = vrot.slane %v7088_v15, 2 }
 0x703   :  { %v7655_v0 = vsel %vm7324_vm4, %v7036_v8, -inf  ;;  %v8103_v32 = vsel %vm8005_vm5, %v7814_v50, %v7813_v36  ;;  %v7077_v13 = vrot.slane %v7076_v5, 1  ;;  %v7095_v6 = vmax.f32 %v7093_v54, %v7094_v18 }
 0x704   :  { %v7816_v23 = vmax.f32 %v7648_v63, 0.0  ;;  %v8104_v40 = vsel %vm8007_vm6, %v7815_v45, %v8103_v32  ;;  %v7083_v25 = vmax.f32 %v7081_v4, %v7082_v26  ;;  %v7090_v12 = vmax.f32 %v7088_v15, %v7089_v34 }
 0x705   :  { %v7658_v16 = vsel %vm7324_vm4, %v7043_v51, -inf  ;;  %v7078_v61 = vmax.f32 %v7076_v5, %v7077_v13  ;;  %v7096_v1 = vrot.slane %v7095_v6, 2  ;;  %v5075_v52 = vadd.f32 %v4995_v37, %v14878_v44 }
 0x706   :  { %v8105_v10 = vsel %vm8009_vm7, %v7816_v23, %v8104_v40  ;;  %v7084_v30 = vrot.slane %v7083_v25, 1  ;;  %v7091_v8 = vrot.slane %v7090_v12, 1  ;;  %v15284_v41 = vadd.f32 %v4998_v14, %v15050_v46 }
 0x707   :  { %v7097_v48 = vmax.f32 %v7095_v6, %v7096_v1  ;;  %v7650_v49 = vsel %vm7324_vm4, %v7078_v61, -inf  ;;  %v5315_v56 = vrot.slane %v5075_v52, 2  ;;  %v5316_v24 = vrot.slane %v5075_v52, 4 }
 0x708   :  { %v7085_v38 = vmax.f32 %v7083_v25, %v7084_v30  ;;  %v7092_v27 = vmax.f32 %v7090_v12, %v7091_v8  ;;  %v7651_v51 = vmax.f32 %v15259_v39, %v7650_v49  ;;  %v5317_v22 = vrot.slane %v5075_v52, 6  ;;  %v4476_v30 = vpop.f32.mrf.mxu3 }
 0x709   :  { %v7098_v33 = vrot.slane %v7097_v48, 1  ;;  %v7100_v44 = vsel %vm5531_vm3, %v5075_v52, -inf  ;;  %v7107_v37 = vsel %vm5531_vm3, %v5315_v56, -inf  ;;  %v7114_v19 = vsel %vm5531_vm3, %v5316_v24, -inf }
 0x70a   :  { %v7653_v46 = vsel %vm7324_vm4, %v7085_v38, -inf  ;;  %v7656_v54 = vsel %vm7324_vm4, %v7092_v27, -inf  ;;  %v7817_v43 = vmax.f32 %v7651_v51, 0.0  ;;  %v7101_v47 = vrot.slane %v7100_v44, 4 }
 0x70b   :  { %v7099_v31 = vmax.f32 %v7097_v48, %v7098_v33  ;;  %v7654_v42 = vmax.f32 %v15262_v2, %v7653_v46  ;;  %v7657_v60 = vmax.f32 %v7655_v0, %v7656_v54  ;;  %v7108_v39 = vrot.slane %v7107_v37, 4  ;;  %v5001_v0 = vpop.f32.mrf.mxu0 }
 0x70c   :  { %v8106_v58 = vsel %vm8011_vm8, %v7817_v43, %v8105_v10  ;;  %v7102_v53 = vmax.f32 %v7100_v44, %v7101_v47  ;;  %v7115_v11 = vrot.slane %v7114_v19, 4  ;;  %v7121_v3 = vsel %vm5531_vm3, %v5317_v22, -inf }
 0x70d   :  { %v7659_v55 = vsel %vm7324_vm4, %v7099_v31, -inf  ;;  %v7818_v35 = vmax.f32 %v7654_v42, 0.0  ;;  %v7819_v59 = vmax.f32 %v7657_v60, 0.0  ;;  %v7109_v20 = vmax.f32 %v7107_v37, %v7108_v39 }
 0x70e   :  { %v7660_v36 = vmax.f32 %v7658_v16, %v7659_v55  ;;  %v7103_v4 = vrot.slane %v7102_v53, 2  ;;  %v7116_v15 = vmax.f32 %v7114_v19, %v7115_v11  ;;  %v7122_v28 = vrot.slane %v7121_v3, 4  ;;  %v3410_v16 = vpop.f32.mrf.mxu1 }
 0x70f   :  { %v8107_v50 = vsel %vm8013_vm9, %v7818_v35, %v8106_v58  ;;  %v7110_v2 = vrot.slane %v7109_v20, 2  ;;  %v5318_v5 = vrot.slane %v15284_v41, 2  ;;  %v5319_v18 = vrot.slane %v15284_v41, 4 }
 0x710   :  { %v7820_v63 = vmax.f32 %v7660_v36, 0.0  ;;  %v8108_v45 = vsel %vm8015_vm10, %v7819_v59, %v8107_v50  ;;  %v7104_v26 = vmax.f32 %v7102_v53, %v7103_v4  ;;  %v7117_v34 = vrot.slane %v7116_v15, 2 }
 0x711   :  { %v7111_v32 = vmax.f32 %v7109_v20, %v7110_v2  ;;  %v7123_v13 = vmax.f32 %v7121_v3, %v7122_v28  ;;  %v5320_v6 = vrot.slane %v15284_v41, 6  ;;  %v7128_v14 = vsel %vm5531_vm3, %v15284_v41, -inf }
 0x712   :  { %v8109_v23 = vsel %vm8017_vm11, %v7820_v63, %v8108_v45  ;;  %v7105_v40 = vrot.slane %v7104_v26, 1  ;;  %v7118_v25 = vmax.f32 %v7116_v15, %v7117_v34  ;;  %v7129_v12 = vrot.slane %v7128_v14, 4 }
 0x713   :  { %8154 = vst.msk [vmem:[#allocation3 + $0x101] sm:$0xff] %vm7324_vm4, %v8109_v23  ;;  %v7112_v61 = vrot.slane %v7111_v32, 1  ;;  %v7124_v1 = vrot.slane %v7123_v13, 2  ;;  %v7135_v52 = vsel %vm5531_vm3, %v5318_v5, -inf  ;;  %v7142_v10 = vsel %vm5531_vm3, %v5319_v18, -inf  ;;  %v5004_v11 = vpop.f32.mrf.mxu0 }
 0x714   :  { %v7106_v8 = vmax.f32 %v7104_v26, %v7105_v40  ;;  %v7119_v48 = vrot.slane %v7118_v25, 1  ;;  %v7130_v49 = vmax.f32 %v7128_v14, %v7129_v12  ;;  %v7136_v56 = vrot.slane %v7135_v52, 4 }
 0x715   :  { %v7113_v41 = vmax.f32 %v7111_v32, %v7112_v61  ;;  %v7125_v24 = vmax.f32 %v7123_v13, %v7124_v1  ;;  %v7143_v38 = vrot.slane %v7142_v10, 4  ;;  %v7149_v27 = vsel %vm5531_vm3, %v5320_v6, -inf }
 0x716   :  { %v15310_v51 = vadd.f32 %v4473_v7, %v15233_v9  ;;  %v15313_v22 = vadd.f32 %v3410_v16, %v14254_v57  ;;  %v7131_v33 = vrot.slane %v7130_v49, 2  ;;  %v7137_v44 = vmax.f32 %v7135_v52, %v7136_v56 }
 0x717   :  { %v15316_v37 = vadd.f32 %v4476_v30, %v15235_v62  ;;  %v7126_v19 = vrot.slane %v7125_v24, 1  ;;  %v7144_v46 = vmax.f32 %v7142_v10, %v7143_v38  ;;  %v7150_v54 = vrot.slane %v7149_v27, 4 }
 0x718   :  { %v7120_v43 = vmax.f32 %v7118_v25, %v7119_v48  ;;  %v7132_v47 = vmax.f32 %v7130_v49, %v7131_v33  ;;  %v7138_v31 = vrot.slane %v7137_v44, 2  ;;  %v5077_v42 = vadd.f32 %v5001_v0, %v15216_v21 }
 0x719   :  { %v15320_v60 = vsel %vm7324_vm4, %v7106_v8, -inf  ;;  %v15323_v9 = vsel %vm7324_vm4, %v7113_v41, -inf  ;;  %v7145_v57 = vrot.slane %v7144_v46, 2  ;;  %v7151_v7 = vmax.f32 %v7149_v27, %v7150_v54 }
 0x71a   :  { %v7133_v39 = vrot.slane %v7132_v47, 1  ;;  %v7139_v58 = vmax.f32 %v7137_v44, %v7138_v31  ;;  %v5321_v62 = vrot.slane %v5077_v42, 2  ;;  %v5322_v53 = vrot.slane %v5077_v42, 4  ;;  %v15325_v3 = vld [vmem:[#allocation3 + $0x100] sm:$0xff] }
 0x71b   :  { %v15327_v55 = vld [vmem:[#allocation3 + $0x101] sm:$0xff]  ;;  %v7127_v21 = vmax.f32 %v7125_v24, %v7126_v19  ;;  %v7146_v59 = vmax.f32 %v7144_v46, %v7145_v57  ;;  %v7152_v20 = vrot.slane %v7151_v7, 2  ;;  %v5323_v36 = vrot.slane %v5077_v42, 6  ;;  %11299 = vmatmul.msk.f32.gmra.mxu1 %vm7324_vm4, %v15325_v3  ;;  %v5007_v44 = vpop.f32.mrf.mxu0 }
 0x71c   :  { %v15329_v35 = vld [vmem:[#allocation3 + $0x102] sm:$0xff]  ;;  %11316 = vmatmul.msk.f32.gmra.mxu2 %vm7324_vm4, %v15327_v55  ;;  %v7134_v4 = vmax.f32 %v7132_v47, %v7133_v39  ;;  %v7140_v15 = vrot.slane %v7139_v58, 1  ;;  %v7156_v28 = vsel %vm5531_vm3, %v5077_v42, -inf  ;;  %v7163_v50 = vsel %vm5531_vm3, %v5321_v62, -inf }
 0x71d   :  { %11333 = vmatmul.msk.f32.gmra.mxu3 %vm7324_vm4, %v15329_v35  ;;  %v7147_v2 = vrot.slane %v7146_v59, 1  ;;  %v7153_v5 = vmax.f32 %v7151_v7, %v7152_v20  ;;  %v7157_v18 = vrot.slane %v7156_v28, 4  ;;  %v7164_v63 = vrot.slane %v7163_v50, 4 }
 0x71e   :  { %v15340_v45 = vsel %vm7324_vm4, %v7120_v43, -inf  ;;  %v7141_v26 = vmax.f32 %v7139_v58, %v7140_v15  ;;  %v7170_v34 = vsel %vm5531_vm3, %v5322_v53, -inf  ;;  %v7177_v0 = vsel %vm5531_vm3, %v5323_v36, -inf }
 0x71f   :  { %v15345_v32 = vsel %vm7324_vm4, %v7127_v21, -inf  ;;  %v7154_v13 = vrot.slane %v7153_v5, 1  ;;  %v7158_v6 = vmax.f32 %v7156_v28, %v7157_v18  ;;  %v7165_v14 = vmax.f32 %v7163_v50, %v7164_v63 }
 0x720   :  { %v15348_v23 = vsel %vm7324_vm4, %v7134_v4, -inf  ;;  %v7171_v40 = vrot.slane %v7170_v34, 4  ;;  %v7178_v25 = vrot.slane %v7177_v0, 4  ;;  %v5078_v12 = vadd.f32 %v5004_v11, %v15224_v29 }
 0x721   :  { %v7148_v16 = vmax.f32 %v7146_v59, %v7147_v2  ;;  %v15352_v61 = vsel %vm7324_vm4, %v7141_v26, -inf  ;;  %v7159_v1 = vrot.slane %v7158_v6, 2  ;;  %v7166_v52 = vrot.slane %v7165_v14, 2 }
 0x722   :  { %v7172_v10 = vmax.f32 %v7170_v34, %v7171_v40  ;;  %v7179_v30 = vmax.f32 %v7177_v0, %v7178_v25  ;;  %v5324_v8 = vrot.slane %v5078_v12, 2  ;;  %v5325_v48 = vrot.slane %v5078_v12, 4 }
 0x723   :  { %v7155_v49 = vmax.f32 %v7153_v5, %v7154_v13  ;;  %v7160_v56 = vmax.f32 %v7158_v6, %v7159_v1  ;;  %v7167_v41 = vmax.f32 %v7165_v14, %v7166_v52  ;;  %v5326_v24 = vrot.slane %v5078_v12, 6 }
 0x724   :  { %v7173_v38 = vrot.slane %v7172_v10, 2  ;;  %v7180_v27 = vrot.slane %v7179_v30, 2  ;;  %v7184_v33 = vsel %vm5531_vm3, %v5078_v12, -inf  ;;  %v7191_v29 = vsel %vm5531_vm3, %v5324_v8, -inf }
 0x725   :  { %v7161_v19 = vrot.slane %v7160_v56, 1  ;;  %v7168_v46 = vrot.slane %v7167_v41, 1  ;;  %v7185_v54 = vrot.slane %v7184_v33, 4  ;;  %v7192_v43 = vrot.slane %v7191_v29, 4 }
 0x726   :  { %v7174_v47 = vmax.f32 %v7172_v10, %v7173_v38  ;;  %v7181_v31 = vmax.f32 %v7179_v30, %v7180_v27  ;;  %v7198_v42 = vsel %vm5531_vm3, %v5325_v48, -inf  ;;  %v7205_v57 = vsel %vm5531_vm3, %v5326_v24, -inf  ;;  %v5010_v30 = vpop.f32.mrf.mxu0 }
 0x727   :  { %v7162_v7 = vmax.f32 %v7160_v56, %v7161_v19  ;;  %v7169_v39 = vmax.f32 %v7167_v41, %v7168_v46  ;;  %v7186_v58 = vmax.f32 %v7184_v33, %v7185_v54  ;;  %v7193_v62 = vmax.f32 %v7191_v29, %v7192_v43 }
 0x728   :  { %v7175_v53 = vrot.slane %v7174_v47, 1  ;;  %v7182_v11 = vrot.slane %v7181_v31, 1  ;;  %v7199_v21 = vrot.slane %v7198_v42, 4  ;;  %v7206_v59 = vrot.slane %v7205_v57, 4 }
 0x729   :  { %v7662_v20 = vsel %vm7324_vm4, %v7162_v7, -inf  ;;  %v7665_v36 = vsel %vm7324_vm4, %v7169_v39, -inf  ;;  %v7187_v4 = vrot.slane %v7186_v58, 2  ;;  %v7194_v15 = vrot.slane %v7193_v62, 2  ;;  %v3945_v39 = vpop.f32.mrf.mxu2 }
 0x72a   :  { %v7176_v28 = vmax.f32 %v7174_v47, %v7175_v53  ;;  %v7183_v50 = vmax.f32 %v7181_v31, %v7182_v11  ;;  %v7663_v2 = vmax.f32 %v15320_v60, %v7662_v20  ;;  %v7666_v5 = vmax.f32 %v15323_v9, %v7665_v36 }
 0x72b   :  { %v7188_v18 = vmax.f32 %v7186_v58, %v7187_v4  ;;  %v7195_v63 = vmax.f32 %v7193_v62, %v7194_v15  ;;  %v7200_v26 = vmax.f32 %v7198_v42, %v7199_v21  ;;  %v7207_v34 = vmax.f32 %v7205_v57, %v7206_v59  ;;  %v4479_v15 = vpop.f32.mrf.mxu3 }
 0x72c   :  { %v7668_v0 = vsel %vm7324_vm4, %v7176_v28, -inf  ;;  %v7671_v13 = vsel %vm7324_vm4, %v7183_v50, -inf  ;;  %v7821_v6 = vmax.f32 %v7663_v2, 0.0  ;;  %v7822_v14 = vmax.f32 %v7666_v5, 0.0 }
 0x72d   :  { %v7669_v40 = vmax.f32 %v15340_v45, %v7668_v0  ;;  %v7672_v25 = vmax.f32 %v15345_v32, %v7671_v13  ;;  %v7189_v12 = vrot.slane %v7188_v18, 1  ;;  %v7196_v1 = vrot.slane %v7195_v63, 1  ;;  %v3413_v0 = vpop.f32.mrf.mxu1 }
 0x72e   :  { %v7679_v60 = vsel %vm7324_vm4, %v7148_v16, -inf  ;;  %v8110_v9 = vsel %vm8005_vm5, %v7822_v14, %v7821_v6  ;;  %v7201_v52 = vrot.slane %v7200_v26, 2  ;;  %v7208_v10 = vrot.slane %v7207_v34, 2 }
 0x72f   :  { %v7682_v8 = vsel %vm7324_vm4, %v7155_v49, -inf  ;;  %v7823_v48 = vmax.f32 %v7669_v40, 0.0  ;;  %v7190_v56 = vmax.f32 %v7188_v18, %v7189_v12  ;;  %v7197_v41 = vmax.f32 %v7195_v63, %v7196_v1 }
 0x730   :  { %v7824_v24 = vmax.f32 %v7672_v25, 0.0  ;;  %v7202_v38 = vmax.f32 %v7200_v26, %v7201_v52  ;;  %v7209_v27 = vmax.f32 %v7207_v34, %v7208_v10  ;;  %v5079_v45 = vadd.f32 %v5007_v44, %v15310_v51 }
 0x731   :  { %v8111_v32 = vsel %vm8007_vm6, %v7823_v48, %v8110_v9  ;;  %v7674_v33 = vsel %vm7324_vm4, %v7190_v56, -inf  ;;  %v7677_v16 = vsel %vm7324_vm4, %v7197_v41, -inf  ;;  %v15374_v29 = vadd.f32 %v5010_v30, %v15316_v37 }
 0x732   :  { %v8112_v19 = vsel %vm8009_vm7, %v7824_v24, %v8111_v32  ;;  %v7203_v49 = vrot.slane %v7202_v38, 1  ;;  %v7210_v46 = vrot.slane %v7209_v27, 1  ;;  %v7675_v54 = vmax.f32 %v15348_v23, %v7674_v33  ;;  %v5013_v32 = vpop.f32.mrf.mxu0 }
 0x733   :  { %v7678_v43 = vmax.f32 %v15352_v61, %v7677_v16  ;;  %v5327_v47 = vrot.slane %v5079_v45, 2  ;;  %v5328_v31 = vrot.slane %v5079_v45, 4  ;;  %v5329_v51 = vrot.slane %v5079_v45, 6  ;;  %v3948_v16 = vpop.f32.mrf.mxu2 }
 0x734   :  { %v7204_v44 = vmax.f32 %v7202_v38, %v7203_v49  ;;  %v7211_v42 = vmax.f32 %v7209_v27, %v7210_v46  ;;  %v7825_v57 = vmax.f32 %v7675_v54, 0.0  ;;  %v7212_v7 = vsel %vm5531_vm3, %v5079_v45, -inf }
 0x735   :  { %v7826_v58 = vmax.f32 %v7678_v43, 0.0  ;;  %v7213_v37 = vrot.slane %v7212_v7, 4  ;;  %v7219_v62 = vsel %vm5531_vm3, %v5327_v47, -inf  ;;  %v7226_v53 = vsel %vm5531_vm3, %v5328_v31, -inf }
 0x736   :  { %v7680_v11 = vsel %vm7324_vm4, %v7204_v44, -inf  ;;  %v7683_v23 = vsel %vm7324_vm4, %v7211_v42, -inf  ;;  %v8113_v61 = vsel %vm8011_vm8, %v7825_v57, %v8112_v19  ;;  %v7220_v21 = vrot.slane %v7219_v62, 4  ;;  %v4482_v42 = vpop.f32.mrf.mxu3 }
 0x737   :  { %v7681_v59 = vmax.f32 %v7679_v60, %v7680_v11  ;;  %v7684_v20 = vmax.f32 %v7682_v8, %v7683_v23  ;;  %v8114_v36 = vsel %vm8013_vm9, %v7826_v58, %v8113_v61  ;;  %v7214_v4 = vmax.f32 %v7212_v7, %v7213_v37 }
 0x738   :  { %v7221_v28 = vmax.f32 %v7219_v62, %v7220_v21  ;;  %v7227_v50 = vrot.slane %v7226_v53, 4  ;;  %v7233_v2 = vsel %vm5531_vm3, %v5329_v51, -inf  ;;  %v5330_v5 = vrot.slane %v15374_v29, 2 }
 0x739   :  { %v7827_v18 = vmax.f32 %v7681_v59, 0.0  ;;  %v7828_v63 = vmax.f32 %v7684_v20, 0.0  ;;  %v7215_v26 = vrot.slane %v7214_v4, 2  ;;  %v7234_v34 = vrot.slane %v7233_v2, 4 }
 0x73a   :  { %v7222_v13 = vrot.slane %v7221_v28, 2  ;;  %v7228_v6 = vmax.f32 %v7226_v53, %v7227_v50  ;;  %v5331_v14 = vrot.slane %v15374_v29, 4  ;;  %v5332_v40 = vrot.slane %v15374_v29, 6 }
 0x73b   :  { %v8115_v25 = vsel %vm8015_vm10, %v7827_v18, %v8114_v36  ;;  %v7216_v12 = vmax.f32 %v7214_v4, %v7215_v26  ;;  %v7235_v1 = vmax.f32 %v7233_v2, %v7234_v34  ;;  %v7240_v60 = vsel %vm5531_vm3, %v15374_v29, -inf }
 0x73c   :  { %v8116_v9 = vsel %vm8017_vm11, %v7828_v63, %v8115_v25  ;;  %v7223_v52 = vmax.f32 %v7221_v28, %v7222_v13  ;;  %v7229_v10 = vrot.slane %v7228_v6, 2  ;;  %v7241_v30 = vrot.slane %v7240_v60, 4  ;;  %v11420_v13 = vld [vmem:[%s16468_s3 + $0x40] sm:$0xff] }
 0x73d   :  { %v3479_v8 = vadd.f32 %v3413_v0, %v14534_v17  ;;  %8155 = vst.msk [vmem:[#allocation3 + $0x111] sm:$0xff] %vm7324_vm4, %v8116_v9  ;;  %v7236_v48 = vrot.slane %v7235_v1, 2  ;;  %v7247_v56 = vsel %vm5531_vm3, %v5330_v5, -inf  ;;  %v7254_v41 = vsel %vm5531_vm3, %v5331_v14, -inf  ;;  %v11403_v0 = vld [vmem:[%s16468_s3 + $0x38] sm:$0xff]  ;;  %9418 = vmatpush.msrb.mxu3 %v11420_v13 }
 0x73e   :  { %v7217_v24 = vrot.slane %v7216_v12, 1  ;;  %v7230_v38 = vmax.f32 %v7228_v6, %v7229_v10  ;;  %v7242_v27 = vmax.f32 %v7240_v60, %v7241_v30  ;;  %v7248_v45 = vrot.slane %v7247_v56, 4  ;;  %v11386_v6 = vld [vmem:[%s16468_s3 + $0x30] sm:$0xff]  ;;  %9271 = vmatpush.msra.mxu2 %v11403_v0 }
 0x73f   :  { %v4013_v33 = vadd.f32 %v3945_v39, %v15313_v22  ;;  %v7237_v29 = vmax.f32 %v7235_v1, %v7236_v48  ;;  %v7255_v19 = vrot.slane %v7254_v41, 4  ;;  %v7261_v49 = vsel %vm5531_vm3, %v5332_v40, -inf  ;;  %v5016_v1 = vpop.f32.mrf.mxu0  ;;  %9124 = vmatpush.msrb.mxu1 %v11386_v6 }
 0x740   :  { %v7224_v17 = vrot.slane %v7223_v52, 1  ;;  %v7243_v46 = vrot.slane %v7242_v27, 2  ;;  %v7249_v54 = vmax.f32 %v7247_v56, %v7248_v45  ;;  %v7231_v47 = vrot.slane %v7230_v38, 1  ;;  %v15446_v45 = vpop.f32.mrf.mxu2 }
 0x741   :  { %v4547_v43 = vadd.f32 %v4479_v15, %v4013_v33  ;;  %v7256_v31 = vmax.f32 %v7254_v41, %v7255_v19  ;;  %v7262_v51 = vrot.slane %v7261_v49, 4  ;;  %v4014_v44 = vadd.f32 %v3948_v16, %v3479_v8  ;;  %v15410_v15 = vpop.f32.mrf.mxu1  ;;  %v8601_v19 = vld [vmem:[#allocation3 + $0x10] sm:$0xff] }
 0x742   :  { %v7218_v57 = vmax.f32 %v7216_v12, %v7217_v24  ;;  %v7238_v7 = vrot.slane %v7237_v29, 1  ;;  %v7250_v58 = vrot.slane %v7249_v54, 2  ;;  %v7244_v37 = vmax.f32 %v7242_v27, %v7243_v46 }
 0x743   :  { %v7257_v62 = vrot.slane %v7256_v31, 2  ;;  %v7263_v22 = vmax.f32 %v7261_v49, %v7262_v51  ;;  %v5081_v39 = vadd.f32 %v5013_v32, %v4547_v43  ;;  %v7225_v53 = vmax.f32 %v7223_v52, %v7224_v17  ;;  %v8748_v49 = vld [vmem:[#allocation3 + $0x11] sm:$0xff]  ;;  %v15450_v17 = vpop.f32.mrf.mxu3 }
 0x744   :  { %v7251_v11 = vmax.f32 %v7249_v54, %v7250_v58  ;;  %v15400_v23 = vld [vmem:[#allocation3 + $0x110] sm:$0xff]  ;;  %v4548_v59 = vadd.f32 %v4482_v42, %v4014_v44  ;;  %v7232_v20 = vmax.f32 %v7230_v38, %v7231_v47  ;;  %v7239_v28 = vmax.f32 %v7237_v29, %v7238_v7 }
 0x745   :  { %v15402_v61 = vld [vmem:[#allocation3 + $0x111] sm:$0xff]  ;;  %v7264_v36 = vrot.slane %v7263_v22, 2  ;;  %v5333_v4 = vrot.slane %v5081_v39, 2  ;;  %11300 = vmatmul.msk.f32.gmra.mxu1 %vm7324_vm4, %v15400_v23  ;;  %v15413_v50 = vsel %vm7324_vm4, %v7218_v57, -inf  ;;  %v5334_v2 = vrot.slane %v5081_v39, 4 }
 0x746   :  { %v15404_v21 = vld [vmem:[#allocation3 + $0x112] sm:$0xff]  ;;  %11317 = vmatmul.msk.f32.gmra.mxu2 %vm7324_vm4, %v15402_v61  ;;  %v5335_v5 = vrot.slane %v5081_v39, 6  ;;  %v7245_v18 = vrot.slane %v7244_v37, 1  ;;  %v15417_v63 = vmax.f32 %v7256_v31, %v7257_v62  ;;  %v7268_v26 = vsel %vm5531_vm3, %v5081_v39, -inf }
 0x747   :  { %11334 = vmatmul.msk.f32.gmra.mxu3 %vm7324_vm4, %v15404_v21  ;;  %v7275_v34 = vsel %vm5531_vm3, %v5333_v4, -inf  ;;  %v15431_v14 = vsel %vm7324_vm4, %v7225_v53, -inf  ;;  %v7252_v40 = vrot.slane %v7251_v11, 1  ;;  %v7269_v25 = vrot.slane %v7268_v26, 4  ;;  %v8895_v31 = vld [vmem:[#allocation3 + $0x12] sm:$0xff] }
 0x748   :  { %v7276_v12 = vrot.slane %v7275_v34, 4  ;;  %v15434_v60 = vsel %vm7324_vm4, %v7232_v20, -inf  ;;  %v15436_v9 = vmax.f32 %v7263_v22, %v7264_v36  ;;  %v7282_v52 = vsel %vm5531_vm3, %v5334_v2, -inf }
 0x749   :  { %v7289_v10 = vsel %vm5531_vm3, %v5335_v5, -inf  ;;  %v15441_v30 = vsel %vm7324_vm4, %v7239_v28, -inf  ;;  %v7270_v8 = vmax.f32 %v7268_v26, %v7269_v25  ;;  %v7283_v56 = vrot.slane %v7282_v52, 4  ;;  %v15459_v22 = vpop.f32.mrf.mxu1 }
 0x74a   :  { %v7277_v48 = vmax.f32 %v7275_v34, %v7276_v12  ;;  %v15443_v41 = vmax.f32 %v7244_v37, %v7245_v18  ;;  %v7259_v24 = vrot.slane %v15417_v63, 1  ;;  %v7290_v38 = vrot.slane %v7289_v10, 4 }
 0x74b   :  { %v5082_v27 = vadd.f32 %v5016_v1, %v4548_v59  ;;  %v15448_v32 = vmax.f32 %v7251_v11, %v7252_v40  ;;  %v7271_v33 = vrot.slane %v7270_v8, 2  ;;  %v7284_v29 = vmax.f32 %v7282_v52, %v7283_v56  ;;  %v15464_v52 = vld [vmem:[#allocation3 + $0x20] sm:$0xff] }
 0x74c   :  { %v7278_v16 = vrot.slane %v7277_v48, 2  ;;  %v7266_v46 = vrot.slane %v15436_v9, 1  ;;  %v7291_v54 = vmax.f32 %v7289_v10, %v7290_v38  ;;  %v15466_v10 = vld [vmem:[#allocation3 + $0x21] sm:$0xff] }
 0x74d   :  { %v5336_v43 = vrot.slane %v5082_v27, 2  ;;  %v5337_v47 = vrot.slane %v5082_v27, 4  ;;  %11336 = vmatmul.msk.f32.vlgmr.msra.gmra.mxu1 %vm7324_vm4, %v8601_v19  ;;  %v7272_v51 = vmax.f32 %v7270_v8, %v7271_v33  ;;  %v7285_v42 = vrot.slane %v7284_v29, 2  ;;  %v15476_v33 = vpop.f32.mrf.mxu2 }
 0x74e   :  { %11353 = vmatmul.msk.f32.vlgmr.msrb.gmra.mxu2 %vm7324_vm4, %v8748_v49  ;;  %v7279_v44 = vmax.f32 %v7277_v48, %v7278_v16  ;;  %v5338_v57 = vrot.slane %v5082_v27, 6  ;;  %v7292_v7 = vrot.slane %v7291_v54, 2  ;;  %v7296_v58 = vsel %vm5531_vm3, %v5082_v27, -inf  ;;  %v15474_v27 = vld [vmem:[#allocation3 + $0x22] sm:$0xff] }
 0x74f   :  { %11370 = vmatmul.msk.f32.vlgmr.msra.gmra.mxu3 %vm7324_vm4, %v8895_v31  ;;  %v7303_v37 = vsel %vm5531_vm3, %v5336_v43, -inf  ;;  %v7310_v62 = vsel %vm5531_vm3, %v5337_v47, -inf  ;;  %v7273_v39 = vrot.slane %v7272_v51, 1  ;;  %v7286_v11 = vmax.f32 %v7284_v29, %v7285_v42 }
 0x750   :  { %v7280_v53 = vrot.slane %v7279_v44, 1  ;;  %v7297_v59 = vrot.slane %v7296_v58, 4  ;;  %v7293_v20 = vmax.f32 %v7291_v54, %v7292_v7  ;;  %v7304_v36 = vrot.slane %v7303_v37, 4 }
 0x751   :  { %v7311_v4 = vrot.slane %v7310_v62, 4  ;;  %v7317_v28 = vsel %vm5531_vm3, %v5338_v57, -inf  ;;  %v7274_v2 = vmax.f32 %v7272_v51, %v7273_v39  ;;  %v7287_v18 = vrot.slane %v7286_v11, 1  ;;  %v15485_v31 = vpop.f32.mrf.mxu1 }
 0x752   :  { %v7281_v5 = vmax.f32 %v7279_v44, %v7280_v53  ;;  %v7298_v26 = vmax.f32 %v7296_v58, %v7297_v59  ;;  %v7294_v34 = vrot.slane %v7293_v20, 1  ;;  %v7305_v0 = vmax.f32 %v7303_v37, %v7304_v36 }
 0x753   :  { %v7312_v13 = vmax.f32 %v7310_v62, %v7311_v4  ;;  %v7318_v6 = vrot.slane %v7317_v28, 4  ;;  %v7288_v40 = vmax.f32 %v7286_v11, %v7287_v18  ;;  %v7686_v25 = vsel %vm7324_vm4, %v7274_v2, -inf  ;;  %v15500_v2 = vld [vmem:[#allocation3 + $0x30] sm:$0xff] }
 0x754   :  { %v7689_v12 = vsel %vm7324_vm4, %v7281_v5, -inf  ;;  %v7299_v1 = vrot.slane %v7298_v26, 2  ;;  %v7295_v8 = vmax.f32 %v7293_v20, %v7294_v34  ;;  %v7687_v48 = vmax.f32 %v15413_v50, %v7686_v25  ;;  %v15481_v50 = vpop.f32.mrf.mxu3  ;;  %v15502_v5 = vld [vmem:[#allocation3 + $0x31] sm:$0xff] }
 0x755   :  { %v7690_v56 = vmax.f32 %v15431_v14, %v7689_v12  ;;  %v7306_v38 = vrot.slane %v7305_v0, 2  ;;  %11337 = vmatmul.msk.f32.gmra.mxu1 %vm7324_vm4, %v15464_v52  ;;  %v7692_v16 = vsel %vm7324_vm4, %v7288_v40, -inf  ;;  %v7313_v19 = vrot.slane %v7312_v13, 2 }
 0x756   :  { %11354 = vmatmul.msk.f32.gmra.mxu2 %vm7324_vm4, %v15466_v10  ;;  %v7300_v29 = vmax.f32 %v7298_v26, %v7299_v1  ;;  %v7319_v49 = vmax.f32 %v7317_v28, %v7318_v6  ;;  %v7693_v14 = vmax.f32 %v15434_v60, %v7692_v16  ;;  %v7695_v54 = vsel %vm7324_vm4, %v7295_v8, -inf }
 0x757   :  { %11371 = vmatmul.msk.f32.gmra.mxu3 %vm7324_vm4, %v15474_v27  ;;  %v7829_v43 = vmax.f32 %v7687_v48, 0.0  ;;  %v7830_v47 = vmax.f32 %v7690_v56, 0.0  ;;  %v7696_v51 = vmax.f32 %v15441_v30, %v7695_v54  ;;  %v7307_v42 = vmax.f32 %v7305_v0, %v7306_v38  ;;  %v15528_v54 = vld [vmem:[#allocation3 + $0x40] sm:$0xff] }
 0x758   :  { %v7301_v44 = vrot.slane %v7300_v29, 1  ;;  %v7314_v57 = vmax.f32 %v7312_v13, %v7313_v19  ;;  %v7260_v7 = vmax.f32 %v15417_v63, %v7259_v24  ;;  %v7831_v58 = vmax.f32 %v7693_v14, 0.0 }
 0x759   :  { %v8117_v37 = vsel %vm8005_vm5, %v7830_v47, %v7829_v43  ;;  %v7320_v62 = vrot.slane %v7319_v49, 2  ;;  %v7832_v60 = vmax.f32 %v7696_v51, 0.0  ;;  %v7308_v53 = vrot.slane %v7307_v42, 1  ;;  %v15521_v8 = vpop.f32.mrf.mxu1  ;;  %v15530_v43 = vld [vmem:[#allocation3 + $0x41] sm:$0xff] }
 0x75a   :  { %v7302_v39 = vmax.f32 %v7300_v29, %v7301_v44  ;;  %v7315_v11 = vrot.slane %v7314_v57, 1  ;;  %v7267_v59 = vmax.f32 %v15436_v9, %v7266_v46  ;;  %v7697_v30 = vsel %vm7324_vm4, %v15443_v41, -inf  ;;  %v15508_v9 = vld [vmem:[#allocation3 + $0x32] sm:$0xff]  ;;  %v15510_v41 = vpop.f32.mrf.mxu2  ;;  %v15536_v47 = vld [vmem:[#allocation3 + $0x42] sm:$0xff] }
 0x75b   :  { %v8118_v20 = vsel %vm8007_vm6, %v7831_v58, %v8117_v37  ;;  %v7321_v36 = vmax.f32 %v7319_v49, %v7320_v62  ;;  %v7309_v24 = vmax.f32 %v7307_v42, %v7308_v53  ;;  %v7700_v46 = vsel %vm7324_vm4, %v15448_v32, -inf  ;;  %v15550_v58 = vld [vmem:[#allocation3 + $0x51] sm:$0xff]  ;;  %v15566_v53 = vld [vmem:[#allocation3 + $0x60] sm:$0xff] }
 0x75c   :  { %v8119_v63 = vsel %vm8009_vm7, %v7832_v60, %v8118_v20  ;;  %v7316_v4 = vmax.f32 %v7314_v57, %v7315_v11  ;;  %v7698_v28 = vsel %vm7324_vm4, %v7302_v39, -inf  ;;  %v7703_v34 = vsel %vm7324_vm4, %v7260_v7, -inf  ;;  %v15519_v6 = vpop.f32.mrf.mxu3  ;;  %v15548_v7 = vld [vmem:[#allocation3 + $0x50] sm:$0xff]  ;;  %v15568_v11 = vld [vmem:[#allocation3 + $0x61] sm:$0xff] }
 0x75d   :  { %v7322_v18 = vrot.slane %v7321_v36, 1  ;;  %v7699_v26 = vmax.f32 %v7697_v30, %v7698_v28  ;;  %11338 = vmatmul.msk.f32.gmra.mxu1 %vm7324_vm4, %v15500_v2  ;;  %v7701_v0 = vsel %vm7324_vm4, %v7309_v24, -inf  ;;  %v7706_v48 = vsel %vm7324_vm4, %v7267_v59, -inf  ;;  %v15556_v37 = vld [vmem:[#allocation3 + $0x52] sm:$0xff]  ;;  %v15574_v59 = vld [vmem:[#allocation3 + $0x62] sm:$0xff] }
 0x75e   :  { %11355 = vmatmul.msk.f32.gmra.mxu2 %vm7324_vm4, %v15502_v5  ;;  %v7704_v13 = vsel %vm7324_vm4, %v7316_v4, -inf  ;;  %v7702_v25 = vmax.f32 %v7700_v46, %v7701_v0  ;;  %v15586_v24 = vld [vmem:[#allocation3 + $0x71] sm:$0xff]  ;;  %v15602_v46 = vld [vmem:[#allocation3 + $0x80] sm:$0xff] }
 0x75f   :  { %11372 = vmatmul.msk.f32.gmra.mxu3 %vm7324_vm4, %v15508_v9  ;;  %v7323_v40 = vmax.f32 %v7321_v36, %v7322_v18  ;;  %v7705_v12 = vmax.f32 %v7703_v34, %v7704_v13  ;;  %v7833_v1 = vmax.f32 %v7699_v26, 0.0  ;;  %v15592_v4 = vld [vmem:[#allocation3 + $0x72] sm:$0xff]  ;;  %v15604_v34 = vld [vmem:[#allocation3 + $0x81] sm:$0xff] }
 0x760   :  { %v7834_v56 = vmax.f32 %v7702_v25, 0.0  ;;  %v15610_v0 = vld [vmem:[#allocation3 + $0x82] sm:$0xff] }
 0x761   :  { %v7707_v32 = vsel %vm7324_vm4, %v7323_v40, -inf  ;;  %v7835_v38 = vmax.f32 %v7705_v12, 0.0  ;;  %v8120_v16 = vsel %vm8011_vm8, %v7833_v1, %v8119_v63  ;;  %v15546_v57 = vpop.f32.mrf.mxu1  ;;  %v15584_v63 = vld [vmem:[#allocation3 + $0x70] sm:$0xff] }
 0x762   :  { %v7708_v29 = vmax.f32 %v7706_v48, %v7707_v32  ;;  %v8121_v19 = vsel %vm8013_vm9, %v7834_v56, %v8120_v16  ;;  %v15538_v51 = vpop.f32.mrf.mxu2  ;;  %v8609_v12 = vld [vmem:[#allocation3 + $0xb0] sm:$0xff]  ;;  %v15629_v16 = vld [vmem:[#allocation3 + $0xc0] sm:$0xff] }
 0x763   :  { %v8122_v14 = vsel %vm8015_vm10, %v7835_v38, %v8121_v19  ;;  %v8756_v1 = vld [vmem:[#allocation3 + $0xb1] sm:$0xff]  ;;  %v15637_v19 = vld [vmem:[#allocation3 + $0xc2] sm:$0xff] }
 0x764   :  { %v7836_v49 = vmax.f32 %v7708_v29, 0.0  ;;  %v15543_v42 = vpop.f32.mrf.mxu3  ;;  %v8903_v48 = vld [vmem:[#allocation3 + $0xb2] sm:$0xff]  ;;  %v15631_v29 = vld [vmem:[#allocation3 + $0xc1] sm:$0xff] }
 0x765   :  { %11339 = vmatmul.msk.f32.gmra.mxu1 %vm7324_vm4, %v15528_v54 }
 0x766   :  { %11356 = vmatmul.msk.f32.gmra.mxu2 %vm7324_vm4, %v15530_v43  ;;  %v8123_v44 = vsel %vm8017_vm11, %v7836_v49, %v8122_v14 }
 0x767   :  { %11373 = vmatmul.msk.f32.gmra.mxu3 %vm7324_vm4, %v15536_v47  ;;  %8156 = vst.msk [vmem:[#allocation3 + $0x121] sm:$0xff] %vm7324_vm4, %v8123_v44 }
 0x769   :  { %v15564_v39 = vpop.f32.mrf.mxu1 }
 0x76a   :  { %v15558_v62 = vpop.f32.mrf.mxu2 }
 0x76c   :  { %v15562_v60 = vpop.f32.mrf.mxu3 }
 0x76d   :  { %11340 = vmatmul.msk.f32.gmra.mxu1 %vm7324_vm4, %v15548_v7 }
 0x76e   :  { %11357 = vmatmul.msk.f32.gmra.mxu2 %vm7324_vm4, %v15550_v58 }
 0x76f   :  { %11374 = vmatmul.msk.f32.gmra.mxu3 %vm7324_vm4, %v15556_v37 }
 0x771   :  { %v15582_v36 = vpop.f32.mrf.mxu1 }
 0x772   :  { %v15576_v30 = vpop.f32.mrf.mxu2 }
 0x774   :  { %v15580_v20 = vpop.f32.mrf.mxu3 }
 0x775   :  { %11341 = vmatmul.msk.f32.gmra.mxu1 %vm7324_vm4, %v15566_v53 }
 0x776   :  { %11358 = vmatmul.msk.f32.gmra.mxu2 %vm7324_vm4, %v15568_v11 }
 0x777   :  { %11375 = vmatmul.msk.f32.gmra.mxu3 %vm7324_vm4, %v15574_v59 }
 0x779   :  { %v15600_v26 = vpop.f32.mrf.mxu1 }
 0x77a   :  { %v15594_v28 = vpop.f32.mrf.mxu2 }
 0x77c   :  { %v15598_v18 = vpop.f32.mrf.mxu3 }
 0x77d   :  { %11342 = vmatmul.msk.f32.gmra.mxu1 %vm7324_vm4, %v15584_v63 }
 0x77e   :  { %11359 = vmatmul.msk.f32.gmra.mxu2 %vm7324_vm4, %v15586_v24 }
 0x77f   :  { %11376 = vmatmul.msk.f32.gmra.mxu3 %vm7324_vm4, %v15592_v4 }
 0x781   :  { %v15618_v25 = vpop.f32.mrf.mxu1 }
 0x782   :  { %v15612_v13 = vpop.f32.mrf.mxu2  ;;  %16636 = vst [vmem:[#allocation30_spill] sm:$0xff] %v15618_v25  ;;  %v11493_v25 = vld [vmem:[#allocation3 + $0xf0] sm:$0xff] }
 0x784   :  { %v15616_v40 = vpop.f32.mrf.mxu3 }
 0x785   :  { %11343 = vmatmul.msk.f32.gmra.mxu1 %vm7324_vm4, %v15602_v46 }
 0x786   :  { %11360 = vmatmul.msk.f32.gmra.mxu2 %vm7324_vm4, %v15604_v34 }
 0x787   :  { %11377 = vmatmul.msk.f32.gmra.mxu3 %vm7324_vm4, %v15610_v0 }
 0x789   :  { %v15627_v38 = vpop.f32.mrf.mxu1 }
 0x78a   :  { %v15622_v32 = vpop.f32.mrf.mxu2  ;;  %16639 = vst [vmem:[#allocation33_spill] sm:$0xff] %v15627_v38  ;;  %v15673_v38 = vld [vmem:[#allocation3 + $0xe2] sm:$0xff] }
 0x78b   :  { %16637 = vst [vmem:[#allocation31_spill] sm:$0xff] %v15622_v32  ;;  %v15667_v32 = vld [vmem:[#allocation3 + $0xe1] sm:$0xff] }
 0x78c   :  { %v15625_v56 = vpop.f32.mrf.mxu3  ;;  %16649 = vst [vmem:[#allocation43_spill] sm:$0xff] %v15667_v32 }
 0x78d   :  { %11344 = vmatmul.msk.f32.gmra.mxu1 %vm7324_vm4, %v8609_v12  ;;  %16638 = vst [vmem:[#allocation32_spill] sm:$0xff] %v15625_v56  ;;  %v15647_v12 = vld [vmem:[#allocation3 + $0xd0] sm:$0xff] }
 0x78e   :  { %11361 = vmatmul.msk.f32.gmra.mxu2 %vm7324_vm4, %v8756_v1  ;;  %v15649_v1 = vld [vmem:[#allocation3 + $0xd1] sm:$0xff]  ;;  %16650 = vst [vmem:[#allocation44_spill] sm:$0xff] %v15673_v38 }
 0x78f   :  { %11378 = vmatmul.msk.f32.gmra.mxu3 %vm7324_vm4, %v8903_v48  ;;  %16643 = vst [vmem:[#allocation37_spill] sm:$0xff] %v15649_v1  ;;  %v15655_v48 = vld [vmem:[#allocation3 + $0xd2] sm:$0xff] }
 0x790   :  { %16644 = vst [vmem:[#allocation38_spill] sm:$0xff] %v15655_v48 }
 0x791   :  { %v15645_v44 = vpop.f32.mrf.mxu1 }
 0x792   :  { %v15641_v49 = vpop.f32.mrf.mxu2  ;;  %16642 = vst [vmem:[#allocation36_spill] sm:$0xff] %v15645_v44 }
 0x793   :  { %16640 = vst [vmem:[#allocation34_spill] sm:$0xff] %v15641_v49  ;;  %v15665_v49 = vld [vmem:[#allocation3 + $0xe0] sm:$0xff] }
 0x794   :  { %v15643_v14 = vpop.f32.mrf.mxu3  ;;  %16648 = vst [vmem:[#allocation42_spill] sm:$0xff] %v15665_v49 }
 0x795   :  { %11345 = vmatmul.msk.f32.gmra.mxu1 %vm7324_vm4, %v15629_v16  ;;  %16641 = vst [vmem:[#allocation35_spill] sm:$0xff] %v15643_v14 }
 0x796   :  { %11362 = vmatmul.msk.f32.gmra.mxu2 %vm7324_vm4, %v15631_v29 }
 0x797   :  { %11379 = vmatmul.msk.f32.gmra.mxu3 %vm7324_vm4, %v15637_v19 }
 0x799   :  { %v15663_v44 = vpop.f32.mrf.mxu1 }
 0x79a   :  { %v15659_v56 = vpop.f32.mrf.mxu2  ;;  %16647 = vst [vmem:[#allocation41_spill] sm:$0xff] %v15663_v44 }
 0x79b   :  { %16645 = vst [vmem:[#allocation39_spill] sm:$0xff] %v15659_v56 }
 0x79c   :  { %v15661_v14 = vpop.f32.mrf.mxu3 }
 0x79d   :  { %11346 = vmatmul.msk.f32.gmra.mxu1 %vm7324_vm4, %v15647_v12  ;;  %16646 = vst [vmem:[#allocation40_spill] sm:$0xff] %v15661_v14 }
 0x79e   :  { %11363 = vmatmul.msk.f32.gmra.mxu2 %vm7324_vm4, %v15649_v1 }
 0x79f   :  { %11380 = vmatmul.msk.f32.gmra.mxu3 %vm7324_vm4, %v15655_v48  ;;  %v11494_v48 = vld [vmem:[#allocation3 + $0xf1] sm:$0xff] }
 0x7a1   :  { %v15681_v44 = vpop.f32.mrf.mxu1 }
 0x7a2   :  { %v15677_v56 = vpop.f32.mrf.mxu2  ;;  %16653 = vst [vmem:[#allocation45_spill] sm:$0xff] %v15681_v44 }
 0x7a3   :  { %16651 = vst [vmem:[#allocation57_spill] sm:$0xff] %v15677_v56 }
 0x7a4   :  { %v15679_v14 = vpop.f32.mrf.mxu3 }
 0x7a5   :  { %11347 = vmatmul.msk.f32.gmra.mxu1 %vm7324_vm4, %v15665_v49  ;;  %16652 = vst [vmem:[#allocation47_spill] sm:$0xff] %v15679_v14  ;;  %v11495_v49 = vld [vmem:[#allocation3 + $0xf2] sm:$0xff]  ;;  %v15721_v14 = vld [vmem:[#allocation3 + $0x121] sm:$0xff] }
 0x7a6   :  { %11364 = vmatmul.msk.f32.gmra.mxu2 %vm7324_vm4, %v15667_v32 }
 0x7a7   :  { %11381 = vmatmul.msk.f32.gmra.mxu3 %vm7324_vm4, %v15673_v38 }
 0x7a9   :  { %v15690_v38 = vpop.f32.mrf.mxu1 }
 0x7aa   :  { %v15686_v32 = vpop.f32.mrf.mxu2  ;;  %16656 = vst [vmem:[#allocation49_spill] sm:$0xff] %v15690_v38 }
 0x7ab   :  { %16654 = vst [vmem:[#allocation58_spill] sm:$0xff] %v15686_v32  ;;  %v15729_v32 = vld [vmem:[#allocation3 + $0x122] sm:$0xff] }
 0x7ac   :  { %v15688_v1 = vpop.f32.mrf.mxu3 }
 0x7ad   :  { %11348 = vmatmul.msk.f32.gmra.mxu1 %vm7324_vm4, %v11493_v25  ;;  %16655 = vst [vmem:[#allocation48_spill] sm:$0xff] %v15688_v1  ;;  %v15719_v1 = vld [vmem:[#allocation3 + $0x120] sm:$0xff] }
 0x7ae   :  { %11365 = vmatmul.msk.f32.gmra.mxu2 %vm7324_vm4, %v11494_v48  ;;  %16662 = vst [vmem:[#allocation7_spill] sm:$0xff] %v15719_v1 }
 0x7af   :  { %11382 = vmatmul.msk.f32.gmra.mxu3 %vm7324_vm4, %v11495_v49 }
 0x7b1   :  { %v15702_v49 = vpop.f32.mrf.mxu1 }
 0x7b2   :  { %v15698_v25 = vpop.f32.mrf.mxu2  ;;  %16659 = vst [vmem:[#allocation52_spill] sm:$0xff] %v15702_v49 }
 0x7b3   :  { %16657 = vst [vmem:[#allocation50_spill] sm:$0xff] %v15698_v25 }
 0x7b4   :  { %v15700_v48 = vpop.f32.mrf.mxu3 }
 0x7b5   :  { %11349 = vmatmul.msk.f32.gmra.mxu1 %vm7324_vm4, %v15325_v3  ;;  %16658 = vst [vmem:[#allocation51_spill] sm:$0xff] %v15700_v48  ;;  %v15717_v48 = vld [vmem:[%s16469_s4] ss:$0 sm:$0xff] }
 0x7b6   :  { %11366 = vmatmul.msk.f32.gmra.mxu2 %vm7324_vm4, %v15327_v55  ;;  %v8291_v25 = vadd.f32 %v15717_v48, %v15410_v15 }
 0x7b7   :  { %11383 = vmatmul.msk.f32.gmra.mxu3 %vm7324_vm4, %v15329_v35 }
 0x7b8   :  { %v8438_v44 = vadd.f32 %v15446_v45, %v8291_v25 }
 0x7ba   :  { %v15710_v3 = vpop.f32.mrf.mxu2 }
 0x7bb   :  { %16660 = vst [vmem:[#allocation53_spill] sm:$0xff] %v15710_v3 }
 0x7bc   :  { %v15712_v55 = vpop.f32.mrf.mxu3 }
 0x7bd   :  { %11350 = vmatmul.msk.f32.gmra.mxu1 %vm7324_vm4, %v15400_v23  ;;  %16661 = vst [vmem:[#allocation54_spill] sm:$0xff] %v15712_v55 }
 0x7be   :  { %11367 = vmatmul.msk.f32.gmra.mxu2 %vm7324_vm4, %v15402_v61 }
 0x7bf   :  { %11384 = vmatmul.msk.f32.gmra.mxu3 %vm7324_vm4, %v15404_v21 }
 0x7c2   :  { %v8288_v35 = vpop.f32.mrf.mxu1 }
 0x7c3   :  { %v8306_v56 = vadd.f32 %v15717_v48, %v8288_v35  ;;  %v8292_v35 = vadd.f32 %v15717_v48, %v15459_v22  ;;  %v8293_v22 = vadd.f32 %v15717_v48, %v15485_v31  ;;  %v8294_v31 = vadd.f32 %v15717_v48, %v15521_v8 }
 0x7c4   :  { %v8295_v8 = vadd.f32 %v15717_v48, %v15546_v57  ;;  %v8296_v57 = vadd.f32 %v15717_v48, %v15564_v39  ;;  %v8297_v39 = vadd.f32 %v15717_v48, %v15582_v36  ;;  %v8298_v36 = vadd.f32 %v15717_v48, %v15600_v26 }
 0x7c5   :  { %11351 = vmatmul.msk.f32.gmra.mxu1 %vm7324_vm4, %v15719_v1  ;;  %v8585_v1 = vadd.f32 %v15450_v17, %v8438_v44 }
 0x7c6   :  { %11368 = vmatmul.msk.f32.gmra.mxu2 %vm7324_vm4, %v15721_v14 }
 0x7c7   :  { %11385 = vmatmul.msk.f32.gmra.mxu3 %vm7324_vm4, %v15729_v32 }
 0x7c9   :  { %v8435_v38 = vpop.f32.mrf.mxu2 }
 0x7ca   :  { %v8453_v55 = vadd.f32 %v8435_v38, %v8306_v56  ;;  %v8582_v3 = vpop.f32.mrf.mxu3  ;;  %v8684_v49 = vpop.f32.mrf.mxu1  ;;  %v8439_v38 = vadd.f32 %v15476_v33, %v8292_v35  ;;  %v8440_v33 = vadd.f32 %v15510_v41, %v8293_v22  ;;  %v8441_v41 = vadd.f32 %v15538_v51, %v8294_v31 }
 0x7cb   :  { %v8732_v45 = vadd.f32 %v8684_v49, %v8585_v1  ;;  %v8442_v51 = vadd.f32 %v15558_v62, %v8295_v8  ;;  %v8443_v62 = vadd.f32 %v15576_v30, %v8296_v57  ;;  %v8444_v30 = vadd.f32 %v15594_v28, %v8297_v39  ;;  %v16665_v8 = vld [vmem:[#allocation42_spill] sm:$0xff]  ;;  %v9201_v57 = vld [vmem:[#allocation3 + $0xf1] sm:$0xff]  ;;  %v11498_v39 = vld [vmem:[#allocation3 + $0x102] sm:$0xff] }
 0x7cc   :  { %v15735_v15 = vadd.f32 %v8582_v3, %v8453_v55  ;;  %v8445_v28 = vadd.f32 %v15612_v13, %v8298_v36 }
 0x7cd   :  { %11387 = vmatmul.msk.f32.vlgmr.msrb.gmra.mxu1 %vm7324_vm4, %v15464_v52  ;;  %v8586_v52 = vadd.f32 %v15481_v50, %v8439_v38 }
 0x7ce   :  { %11404 = vmatmul.msk.f32.vlgmr.msra.gmra.mxu2 %vm7324_vm4, %v15466_v10 }
 0x7cf   :  { %11421 = vmatmul.msk.f32.vlgmr.msrb.gmra.mxu3 %vm7324_vm4, %v15474_v27 }
 0x7d1   :  { %v8831_v56 = vpop.f32.mrf.mxu2 }
 0x7d2   :  { %v8879_v25 = vadd.f32 %v8831_v56, %v8732_v45  ;;  %v8978_v3 = vpop.f32.mrf.mxu3  ;;  %v8687_v55 = vpop.f32.mrf.mxu1 }
 0x7d3   :  { %v8733_v10 = vadd.f32 %v8687_v55, %v8586_v52 }
 0x7d4   :  { %v15747_v17 = vadd.f32 %v8978_v3, %v8879_v25 }
 0x7d5   :  { %11388 = vmatmul.msk.f32.gmra.mxu1 %vm7324_vm4, %v15500_v2  ;;  %v8587_v2 = vadd.f32 %v15519_v6, %v8440_v33 }
 0x7d6   :  { %11405 = vmatmul.msk.f32.gmra.mxu2 %vm7324_vm4, %v15502_v5 }
 0x7d7   :  { %11422 = vmatmul.msk.f32.gmra.mxu3 %vm7324_vm4, %v15508_v9 }
 0x7d9   :  { %v8834_v27 = vpop.f32.mrf.mxu2 }
 0x7da   :  { %v8880_v44 = vadd.f32 %v8834_v27, %v8733_v10  ;;  %v8981_v1 = vpop.f32.mrf.mxu3  ;;  %v8690_v49 = vpop.f32.mrf.mxu1 }
 0x7db   :  { %v8734_v5 = vadd.f32 %v8690_v49, %v8587_v2  ;;  %v9197_v2 = vld [vmem:[#allocation3 + $0x91] sm:$0xff] }
 0x7dc   :  { %v15759_v50 = vadd.f32 %v8981_v1, %v8880_v44 }
 0x7dd   :  { %11389 = vmatmul.msk.f32.gmra.mxu1 %vm7324_vm4, %v15528_v54  ;;  %v8588_v54 = vadd.f32 %v15543_v42, %v8441_v41 }
 0x7de   :  { %11406 = vmatmul.msk.f32.gmra.mxu2 %vm7324_vm4, %v15530_v43 }
 0x7df   :  { %11423 = vmatmul.msk.f32.gmra.mxu3 %vm7324_vm4, %v15536_v47 }
 0x7e1   :  { %v8837_v9 = vpop.f32.mrf.mxu2 }
 0x7e2   :  { %v8881_v35 = vadd.f32 %v8837_v9, %v8734_v5  ;;  %v8984_v45 = vpop.f32.mrf.mxu3  ;;  %v8693_v56 = vpop.f32.mrf.mxu1 }
 0x7e3   :  { %v8735_v43 = vadd.f32 %v8693_v56, %v8588_v54  ;;  %v16663_v56 = vld [vmem:[#allocation37_spill] sm:$0xff]  ;;  %v16664_v54 = vld [vmem:[#allocation38_spill] sm:$0xff] }
 0x7e4   :  { %v15771_v6 = vadd.f32 %v8984_v45, %v8881_v35 }
 0x7e5   :  { %11390 = vmatmul.msk.f32.gmra.mxu1 %vm7324_vm4, %v15548_v7  ;;  %v8589_v7 = vadd.f32 %v15562_v60, %v8442_v51 }
 0x7e6   :  { %11407 = vmatmul.msk.f32.gmra.mxu2 %vm7324_vm4, %v15550_v58 }
 0x7e7   :  { %11424 = vmatmul.msk.f32.gmra.mxu3 %vm7324_vm4, %v15556_v37 }
 0x7e9   :  { %v8840_v47 = vpop.f32.mrf.mxu2 }
 0x7ea   :  { %v8882_v38 = vadd.f32 %v8840_v47, %v8735_v43  ;;  %v8987_v25 = vpop.f32.mrf.mxu3  ;;  %v8696_v3 = vpop.f32.mrf.mxu1  ;;  %v16666_v43 = vld [vmem:[#allocation43_spill] sm:$0xff]  ;;  %v16667_v47 = vld [vmem:[#allocation44_spill] sm:$0xff] }
 0x7eb   :  { %v8736_v58 = vadd.f32 %v8696_v3, %v8589_v7  ;;  %v10179_v3 = vld [vmem:[%s16470_s5 + $0x8] sm:$0xff]  ;;  %v9054_v7 = vld [vmem:[#allocation3 + $0xf0] sm:$0xff] }
 0x7ec   :  { %v15783_v42 = vadd.f32 %v8987_v25, %v8882_v38  ;;  %v11439_v25 = vld [vmem:[%s16470_s5 + $0x18] sm:$0xff]  ;;  %10199 = vmatpush.msra.mxu1 %v10179_v3  ;;  %v16676_v3 = vld [vmem:[#allocation36_spill] sm:$0xff] }
 0x7ed   :  { %11391 = vmatmul.msk.f32.gmra.mxu1 %vm7324_vm4, %v15566_v53  ;;  %v8590_v53 = vadd.f32 %v15580_v20, %v8443_v62  ;;  %10228 = vmatpush.msrb.mxu2 %v11439_v25 }
 0x7ee   :  { %11408 = vmatmul.msk.f32.gmra.mxu2 %vm7324_vm4, %v15568_v11 }
 0x7ef   :  { %11425 = vmatmul.msk.f32.gmra.mxu3 %vm7324_vm4, %v15574_v59 }
 0x7f1   :  { %v8843_v37 = vpop.f32.mrf.mxu2 }
 0x7f2   :  { %v8883_v55 = vadd.f32 %v8843_v37, %v8736_v58  ;;  %v8990_v52 = vpop.f32.mrf.mxu3  ;;  %v8699_v22 = vpop.f32.mrf.mxu1  ;;  %v11442_v58 = vld [vmem:[%s16470_s5 + $0x28] sm:$0xff]  ;;  %v9348_v37 = vld [vmem:[#allocation3 + $0xf2] sm:$0xff] }
 0x7f3   :  { %v8737_v11 = vadd.f32 %v8699_v22, %v8590_v53  ;;  %10257 = vmatpush.msra.mxu3 %v11442_v58  ;;  %v11496_v22 = vld [vmem:[#allocation3 + $0x100] sm:$0xff] }
 0x7f4   :  { %v15795_v60 = vadd.f32 %v8990_v52, %v8883_v55  ;;  %v11497_v53 = vld [vmem:[#allocation3 + $0x101] sm:$0xff] }
 0x7f5   :  { %11392 = vmatmul.msk.f32.gmra.mxu1 %vm7324_vm4, %v15584_v63  ;;  %v8591_v63 = vadd.f32 %v15598_v18, %v8444_v30  ;;  %v9050_v18 = vld [vmem:[#allocation3 + $0x90] sm:$0xff] }
 0x7f6   :  { %11409 = vmatmul.msk.f32.gmra.mxu2 %vm7324_vm4, %v15586_v24 }
 0x7f7   :  { %11426 = vmatmul.msk.f32.gmra.mxu3 %vm7324_vm4, %v15592_v4 }
 0x7f9   :  { %v8846_v59 = vpop.f32.mrf.mxu2 }
 0x7fa   :  { %v8884_v10 = vadd.f32 %v8846_v59, %v8737_v11  ;;  %v8993_v27 = vpop.f32.mrf.mxu3  ;;  %v8702_v33 = vpop.f32.mrf.mxu1 }
 0x7fb   :  { %v8738_v24 = vadd.f32 %v8702_v33, %v8591_v63  ;;  %v16669_v63 = vld [vmem:[#allocation53_spill] sm:$0xff] }
 0x7fc   :  { %v15807_v20 = vadd.f32 %v8993_v27, %v8884_v10  ;;  %v16668_v10 = vld [vmem:[#allocation52_spill] sm:$0xff] }
 0x7fd   :  { %11393 = vmatmul.msk.f32.gmra.mxu1 %vm7324_vm4, %v15602_v46  ;;  %v9344_v46 = vld [vmem:[#allocation3 + $0x92] sm:$0xff]  ;;  %v8305_v27 = vadd.f32 %v15717_v48, %v16668_v10 }
 0x7fe   :  { %11410 = vmatmul.msk.f32.gmra.mxu2 %vm7324_vm4, %v15604_v34  ;;  %v8592_v34 = vadd.f32 %v15616_v40, %v8445_v28  ;;  %v16670_v28 = vld [vmem:[#allocation54_spill] sm:$0xff] }
 0x7ff   :  { %11427 = vmatmul.msk.f32.gmra.mxu3 %vm7324_vm4, %v15610_v0  ;;  %v8452_v36 = vadd.f32 %v16669_v63, %v8305_v27 }
 0x801   :  { %v8849_v4 = vpop.f32.mrf.mxu2 }
 0x802   :  { %v8885_v44 = vadd.f32 %v8849_v4, %v8738_v24  ;;  %v8996_v1 = vpop.f32.mrf.mxu3  ;;  %v8705_v49 = vpop.f32.mrf.mxu1 }
 0x803   :  { %v8739_v26 = vadd.f32 %v8705_v49, %v8592_v34 }
 0x804   :  { %v15819_v31 = vadd.f32 %v8996_v1, %v8885_v44  ;;  %v8599_v44 = vadd.f32 %v16670_v28, %v8452_v36  ;;  %v16671_v1 = vld [vmem:[#allocation7_spill] sm:$0xff]  ;;  %v16681_v28 = vld [vmem:[#allocation57_spill] sm:$0xff] }
 0x805   :  { %11394 = vmatmul.msk.f32.gmra.mxu1 %vm7324_vm4, %v9050_v18  ;;  %v16680_v36 = vld [vmem:[#allocation39_spill] sm:$0xff] }
 0x806   :  { %11411 = vmatmul.msk.f32.gmra.mxu2 %vm7324_vm4, %v9197_v2  ;;  %v9058_v2 = vld [vmem:[#allocation3 + $0x130] sm:$0xff] }
 0x807   :  { %11428 = vmatmul.msk.f32.gmra.mxu3 %vm7324_vm4, %v9344_v46  ;;  %v9205_v46 = vld [vmem:[#allocation3 + $0x131] sm:$0xff] }
 0x809   :  { %v8852_v0 = vpop.f32.mrf.mxu2 }
 0x80a   :  { %v8886_v5 = vadd.f32 %v8852_v0, %v8739_v26  ;;  %v8999_v13 = vpop.f32.mrf.mxu3  ;;  %v15825_v9 = vpop.f32.mrf.mxu1  ;;  %v9352_v0 = vld [vmem:[#allocation3 + $0x132] sm:$0xff] }
 0x80c   :  { %v15827_v41 = vadd.f32 %v8999_v13, %v8886_v5  ;;  %v16672_v5 = vld [vmem:[#allocation30_spill] sm:$0xff] }
 0x80d   :  { %11395 = vmatmul.msk.f32.gmra.mxu1 %vm7324_vm4, %v15629_v16  ;;  %v8299_v13 = vadd.f32 %v15717_v48, %v16672_v5 }
 0x80e   :  { %11412 = vmatmul.msk.f32.gmra.mxu2 %vm7324_vm4, %v15631_v29 }
 0x80f   :  { %11429 = vmatmul.msk.f32.gmra.mxu3 %vm7324_vm4, %v15637_v19 }
 0x811   :  { %v15835_v40 = vpop.f32.mrf.mxu2 }
 0x812   :  { %v15837_v35 = vpop.f32.mrf.mxu3  ;;  %v15839_v45 = vpop.f32.mrf.mxu1 }
 0x815   :  { %11396 = vmatmul.msk.f32.gmra.mxu1 %vm7324_vm4, %v15647_v12 }
 0x816   :  { %11413 = vmatmul.msk.f32.gmra.mxu2 %vm7324_vm4, %v16663_v56 }
 0x817   :  { %11430 = vmatmul.msk.f32.gmra.mxu3 %vm7324_vm4, %v16664_v54  ;;  %v16674_v54 = vld [vmem:[#allocation31_spill] sm:$0xff] }
 0x819   :  { %v15847_v16 = vpop.f32.mrf.mxu2 }
 0x81a   :  { %v15849_v29 = vpop.f32.mrf.mxu3  ;;  %v15851_v19 = vpop.f32.mrf.mxu1 }
 0x81d   :  { %11397 = vmatmul.msk.f32.gmra.mxu1 %vm7324_vm4, %v16665_v8  ;;  %v8446_v8 = vadd.f32 %v16674_v54, %v8299_v13  ;;  %v16687_v13 = vld [vmem:[#allocation47_spill] sm:$0xff] }
 0x81e   :  { %11414 = vmatmul.msk.f32.gmra.mxu2 %vm7324_vm4, %v16666_v43  ;;  %v16675_v43 = vld [vmem:[#allocation34_spill] sm:$0xff]  ;;  %v16689_v54 = vld [vmem:[#allocation51_spill] sm:$0xff] }
 0x81f   :  { %11431 = vmatmul.msk.f32.gmra.mxu3 %vm7324_vm4, %v16667_v47 }
 0x821   :  { %v15859_v12 = vpop.f32.mrf.mxu2 }
 0x822   :  { %v15861_v51 = vpop.f32.mrf.mxu3  ;;  %v15863_v38 = vpop.f32.mrf.mxu1 }
 0x825   :  { %11398 = vmatmul.msk.f32.gmra.mxu1 %vm7324_vm4, %v9054_v7  ;;  %v8301_v7 = vadd.f32 %v15717_v48, %v16676_v3 }
 0x826   :  { %11415 = vmatmul.msk.f32.gmra.mxu2 %vm7324_vm4, %v9201_v57  ;;  %v16677_v57 = vld [vmem:[#allocation41_spill] sm:$0xff] }
 0x827   :  { %11432 = vmatmul.msk.f32.gmra.mxu3 %vm7324_vm4, %v9348_v37  ;;  %v8302_v58 = vadd.f32 %v15717_v48, %v16677_v57  ;;  %v16678_v37 = vld [vmem:[#allocation45_spill] sm:$0xff] }
 0x829   :  { %v15877_v62 = vpop.f32.mrf.mxu2 }
 0x82a   :  { %v15879_v55 = vpop.f32.mrf.mxu3  ;;  %v15881_v52 = vpop.f32.mrf.mxu1 }
 0x82d   :  { %11399 = vmatmul.msk.f32.gmra.mxu1 %vm7324_vm4, %v11496_v22  ;;  %v8303_v22 = vadd.f32 %v15717_v48, %v16678_v37 }
 0x82e   :  { %11416 = vmatmul.msk.f32.gmra.mxu2 %vm7324_vm4, %v11497_v53 }
 0x82f   :  { %11433 = vmatmul.msk.f32.gmra.mxu3 %vm7324_vm4, %v11498_v39  ;;  %v16679_v39 = vld [vmem:[#allocation49_spill] sm:$0xff] }
 0x830   :  { %v8304_v10 = vadd.f32 %v15717_v48, %v16679_v39 }
 0x831   :  { %v15886_v11 = vpop.f32.mrf.mxu2 }
 0x832   :  { %v15888_v59 = vpop.f32.mrf.mxu3  ;;  %v15890_v30 = vpop.f32.mrf.mxu1 }
 0x835   :  { %11400 = vmatmul.msk.f32.gmra.mxu1 %vm7324_vm4, %v15400_v23 }
 0x836   :  { %11417 = vmatmul.msk.f32.gmra.mxu2 %vm7324_vm4, %v15402_v61 }
 0x837   :  { %11434 = vmatmul.msk.f32.gmra.mxu3 %vm7324_vm4, %v15404_v21 }
 0x839   :  { %v15900_v33 = vpop.f32.mrf.mxu2 }
 0x83a   :  { %v15903_v24 = vpop.f32.mrf.mxu3  ;;  %v8726_v4 = vpop.f32.mrf.mxu1 }
 0x83b   :  { %v8746_v23 = vadd.f32 %v8726_v4, %v8599_v44  ;;  %v8448_v4 = vadd.f32 %v16680_v36, %v8301_v7  ;;  %v8449_v44 = vadd.f32 %v16681_v28, %v8302_v58 }
 0x83d   :  { %11401 = vmatmul.msk.f32.gmra.mxu1 %vm7324_vm4, %v16671_v1  ;;  %v16682_v1 = vld [vmem:[#allocation58_spill] sm:$0xff] }
 0x83e   :  { %11418 = vmatmul.msk.f32.gmra.mxu2 %vm7324_vm4, %v15721_v14 }
 0x83f   :  { %11435 = vmatmul.msk.f32.gmra.mxu3 %vm7324_vm4, %v15729_v32  ;;  %v16673_v32 = vld [vmem:[#allocation33_spill] sm:$0xff] }
 0x840   :  { %v8300_v14 = vadd.f32 %v15717_v48, %v16673_v32  ;;  %v16688_v32 = vld [vmem:[#allocation48_spill] sm:$0xff] }
 0x841   :  { %v8873_v61 = vpop.f32.mrf.mxu2 }
 0x842   :  { %v8893_v21 = vadd.f32 %v8873_v61, %v8746_v23  ;;  %v9020_v49 = vpop.f32.mrf.mxu3  ;;  %v8729_v18 = vpop.f32.mrf.mxu1  ;;  %v8447_v47 = vadd.f32 %v16675_v43, %v8300_v14  ;;  %v8450_v23 = vadd.f32 %v16682_v1, %v8303_v22  ;;  %v16683_v61 = vld [vmem:[#allocation32_spill] sm:$0xff] }
 0x843   :  { %v8747_v26 = vadd.f32 %v8729_v18, %v15735_v15 }
 0x844   :  { %v15912_v34 = vadd.f32 %v9020_v49, %v8893_v21  ;;  %v8593_v21 = vadd.f32 %v16683_v61, %v8446_v8  ;;  %v16684_v49 = vld [vmem:[#allocation35_spill] sm:$0xff]  ;;  %v8597_v14 = vadd.f32 %v16688_v32, %v8450_v23 }
 0x845   :  { %11402 = vmatmul.msk.f32.gmra.mxu1 %vm7324_vm4, %v9058_v2  ;;  %v8594_v18 = vadd.f32 %v16684_v49, %v8447_v47  ;;  %v16685_v2 = vld [vmem:[#allocation50_spill] sm:$0xff] }
 0x846   :  { %11419 = vmatmul.msk.f32.gmra.mxu2 %vm7324_vm4, %v9205_v46  ;;  %v8451_v46 = vadd.f32 %v16685_v2, %v8304_v10 }
 0x847   :  { %11436 = vmatmul.msk.f32.gmra.mxu3 %vm7324_vm4, %v9352_v0  ;;  %v8741_v48 = vadd.f32 %v15839_v45, %v8594_v18  ;;  %v16686_v0 = vld [vmem:[#allocation40_spill] sm:$0xff]  ;;  %v8744_v45 = vadd.f32 %v15881_v52, %v8597_v14 }
 0x848   :  { %v8595_v5 = vadd.f32 %v16686_v0, %v8448_v4  ;;  %v8598_v43 = vadd.f32 %v16689_v54, %v8451_v46 }
 0x849   :  { %v8876_v56 = vpop.f32.mrf.mxu2  ;;  %v8888_v8 = vadd.f32 %v15847_v16, %v8741_v48 }
 0x84a   :  { %v8894_v25 = vadd.f32 %v8876_v56, %v8747_v26  ;;  %v9023_v15 = vpop.f32.mrf.mxu3  ;;  %v9126_v53 = vpop.f32.mrf.mxu1  ;;  %v8740_v26 = vadd.f32 %v15825_v9, %v8593_v21  ;;  %v8742_v3 = vadd.f32 %v15851_v19, %v8595_v5  ;;  %v8745_v16 = vadd.f32 %v15890_v30, %v8598_v43 }
 0x84b   :  { %v9174_v63 = vadd.f32 %v9126_v53, %v15747_v17  ;;  %v8596_v17 = vadd.f32 %v16687_v13, %v8449_v44  ;;  %v15962_v10 = vadd.f32 %v15849_v29, %v8888_v8 }
 0x84c   :  { %v15932_v27 = vadd.f32 %v9023_v15, %v8894_v25  ;;  %v8887_v25 = vadd.f32 %v15835_v40, %v8740_v26  ;;  %v8889_v37 = vadd.f32 %v15859_v12, %v8742_v3  ;;  %v8891_v40 = vadd.f32 %v15886_v11, %v8744_v45 }
 0x84d   :  { %v8743_v9 = vadd.f32 %v15863_v38, %v8596_v17  ;;  %v8892_v12 = vadd.f32 %v15900_v33, %v8745_v16 }
 0x84e   :  { %v15959_v52 = vadd.f32 %v15837_v35, %v8887_v25  ;;  %v15969_v35 = vadd.f32 %v15861_v51, %v8889_v37  ;;  %v15975_v1 = vadd.f32 %v15888_v59, %v8891_v40 }
 0x84f   :  { %v8890_v22 = vadd.f32 %v15877_v62, %v8743_v9  ;;  %v15978_v46 = vadd.f32 %v15903_v24, %v8892_v12 }
 0x851   :  { %v9273_v56 = vpop.f32.mrf.mxu2  ;;  %v15972_v29 = vadd.f32 %v15879_v55, %v8890_v22 }
 0x852   :  { %v9321_v47 = vadd.f32 %v9273_v56, %v9174_v63  ;;  %v9420_v15 = vpop.f32.mrf.mxu3  ;;  %v9129_v7 = vpop.f32.mrf.mxu1 }
 0x853   :  { %v9175_v58 = vadd.f32 %v9129_v7, %v15759_v50 }
 0x854   :  { %v9468_v57 = vadd.f32 %v9420_v15, %v9321_v47 }
 0x856   :  { %v9500_v53 = vrot.slane %v9468_v57, 2  ;;  %v9501_v39 = vrot.slane %v9468_v57, 4  ;;  %v9502_v19 = vrot.slane %v9468_v57, 6  ;;  %v9597_v38 = vsel %vm9596_vm12, %v9468_v57, -inf }
 0x857   :  { %v9598_v50 = vrot.slane %v9597_v38, 4 }
 0x858   :  { %v9604_v62 = vsel %vm9596_vm12, %v9500_v53, -inf  ;;  %v9611_v11 = vsel %vm9596_vm12, %v9501_v39, -inf  ;;  %v9618_v30 = vsel %vm9596_vm12, %v9502_v19, -inf }
 0x859   :  { %v9599_v63 = vmax.f32 %v9597_v38, %v9598_v50  ;;  %v9605_v36 = vrot.slane %v9604_v62, 4  ;;  %v9612_v4 = vrot.slane %v9611_v11, 4  ;;  %v9619_v28 = vrot.slane %v9618_v30, 4  ;;  %v9276_v44 = vpop.f32.mrf.mxu2 }
 0x85a   :  { %v9322_v33 = vadd.f32 %v9276_v44, %v9175_v58  ;;  %v9423_v23 = vpop.f32.mrf.mxu3  ;;  %v9132_v2 = vpop.f32.mrf.mxu1 }
 0x85b   :  { %v9600_v61 = vrot.slane %v9599_v63, 2  ;;  %v9606_v21 = vmax.f32 %v9604_v62, %v9605_v36  ;;  %v9613_v49 = vmax.f32 %v9611_v11, %v9612_v4  ;;  %v9620_v18 = vmax.f32 %v9618_v30, %v9619_v28 }
 0x85c   :  { %v9469_v26 = vadd.f32 %v9423_v23, %v9322_v33  ;;  %v9176_v51 = vadd.f32 %v9132_v2, %v15771_v6 }
 0x85d   :  { %v9601_v48 = vmax.f32 %v9599_v63, %v9600_v61  ;;  %v9607_v55 = vrot.slane %v9606_v21, 2  ;;  %v9614_v0 = vrot.slane %v9613_v49, 2  ;;  %v9621_v5 = vrot.slane %v9620_v18, 2 }
 0x85e   :  { %v9503_v59 = vrot.slane %v9469_v26, 2  ;;  %v9504_v13 = vrot.slane %v9469_v26, 4  ;;  %v9505_v17 = vrot.slane %v9469_v26, 6  ;;  %v9625_v32 = vsel %vm9596_vm12, %v9469_v26, -inf }
 0x85f   :  { %v9602_v14 = vrot.slane %v9601_v48, 1  ;;  %v9608_v56 = vmax.f32 %v9606_v21, %v9607_v55  ;;  %v9615_v54 = vmax.f32 %v9613_v49, %v9614_v0  ;;  %v9622_v43 = vmax.f32 %v9620_v18, %v9621_v5 }
 0x860   :  { %v9626_v25 = vrot.slane %v9625_v32, 4  ;;  %v9632_v24 = vsel %vm9596_vm12, %v9503_v59, -inf  ;;  %v9639_v8 = vsel %vm9596_vm12, %v9504_v13, -inf  ;;  %v9646_v6 = vsel %vm9596_vm12, %v9505_v17, -inf }
 0x861   :  { %v9603_v47 = vmax.f32 %v9601_v48, %v9602_v14  ;;  %v9609_v15 = vrot.slane %v9608_v56, 1  ;;  %v9616_v3 = vrot.slane %v9615_v54, 1  ;;  %v9623_v9 = vrot.slane %v9622_v43, 1  ;;  %v9279_v45 = vpop.f32.mrf.mxu2 }
 0x862   :  { %v9627_v7 = vmax.f32 %v9625_v32, %v9626_v25  ;;  %v9633_v57 = vrot.slane %v9632_v24, 4  ;;  %v9640_v58 = vrot.slane %v9639_v8, 4  ;;  %v9647_v37 = vrot.slane %v9646_v6, 4  ;;  %v9426_v22 = vpop.f32.mrf.mxu3  ;;  %v9135_v19 = vpop.f32.mrf.mxu1 }
 0x863   :  { %v9610_v40 = vmax.f32 %v9608_v56, %v9609_v15  ;;  %v15985_v16 = vmax.f32 %v9615_v54, %v9616_v3  ;;  %v15987_v53 = vmax.f32 %v9622_v43, %v9623_v9  ;;  %v9323_v39 = vadd.f32 %v9279_v45, %v9176_v51 }
 0x864   :  { %v9628_v38 = vrot.slane %v9627_v7, 2  ;;  %v9634_v50 = vmax.f32 %v9632_v24, %v9633_v57  ;;  %v9641_v12 = vmax.f32 %v9639_v8, %v9640_v58  ;;  %v9648_v62 = vmax.f32 %v9646_v6, %v9647_v37 }
 0x865   :  { %v9470_v11 = vadd.f32 %v9426_v22, %v9323_v39  ;;  %v9177_v30 = vadd.f32 %v9135_v19, %v15783_v42  ;;  %v15991_v63 = vsel %vm10045_vm13, %v9603_v47, -inf  ;;  %v15994_v36 = vsel %vm10045_vm13, %v9610_v40, -inf }
 0x866   :  { %v9629_v4 = vmax.f32 %v9627_v7, %v9628_v38  ;;  %v9635_v28 = vrot.slane %v9634_v50, 2  ;;  %v9642_v44 = vrot.slane %v9641_v12, 2  ;;  %v9649_v33 = vrot.slane %v9648_v62, 2 }
 0x867   :  { %v9506_v23 = vrot.slane %v9470_v11, 2  ;;  %v9507_v61 = vrot.slane %v9470_v11, 4  ;;  %v9508_v21 = vrot.slane %v9470_v11, 6  ;;  %v9653_v49 = vsel %vm9596_vm12, %v9470_v11, -inf }
 0x868   :  { %v9630_v18 = vrot.slane %v9629_v4, 1  ;;  %v9636_v2 = vmax.f32 %v9634_v50, %v9635_v28  ;;  %v9643_v26 = vmax.f32 %v9641_v12, %v9642_v44  ;;  %v9650_v51 = vmax.f32 %v9648_v62, %v9649_v33 }
 0x869   :  { %v9654_v42 = vrot.slane %v9653_v49, 4  ;;  %v9660_v48 = vsel %vm9596_vm12, %v9506_v23, -inf  ;;  %v9667_v55 = vsel %vm9596_vm12, %v9507_v61, -inf  ;;  %v9674_v0 = vsel %vm9596_vm12, %v9508_v21, -inf  ;;  %v9282_v5 = vpop.f32.mrf.mxu2 }
 0x86a   :  { %v9631_v59 = vmax.f32 %v9629_v4, %v9630_v18  ;;  %v9637_v13 = vrot.slane %v9636_v2, 1  ;;  %v9644_v17 = vrot.slane %v9643_v26, 1  ;;  %v9651_v32 = vrot.slane %v9650_v51, 1  ;;  %v9429_v14 = vpop.f32.mrf.mxu3  ;;  %v9138_v24 = vpop.f32.mrf.mxu1 }
 0x86b   :  { %v9655_v56 = vmax.f32 %v9653_v49, %v9654_v42  ;;  %v9661_v54 = vrot.slane %v9660_v48, 4  ;;  %v9668_v43 = vrot.slane %v9667_v55, 4  ;;  %v9675_v25 = vrot.slane %v9674_v0, 4 }
 0x86c   :  { %v9638_v8 = vmax.f32 %v9636_v2, %v9637_v13  ;;  %v16000_v6 = vmax.f32 %v9643_v26, %v9644_v17  ;;  %v16002_v47 = vmax.f32 %v9650_v51, %v9651_v32  ;;  %v9324_v15 = vadd.f32 %v9282_v5, %v9177_v30 }
 0x86d   :  { %v9656_v3 = vrot.slane %v9655_v56, 2  ;;  %v9662_v9 = vmax.f32 %v9660_v48, %v9661_v54  ;;  %v9669_v45 = vmax.f32 %v9667_v55, %v9668_v43  ;;  %v9676_v7 = vmax.f32 %v9674_v0, %v9675_v25 }
 0x86e   :  { %v9471_v57 = vadd.f32 %v9429_v14, %v9324_v15  ;;  %v9178_v58 = vadd.f32 %v9138_v24, %v15795_v60  ;;  %v16006_v37 = vsel %vm10045_vm13, %v9631_v59, -inf  ;;  %v16009_v22 = vsel %vm10045_vm13, %v9638_v8, -inf }
 0x86f   :  { %v9657_v40 = vmax.f32 %v9655_v56, %v9656_v3  ;;  %v9663_v39 = vrot.slane %v9662_v9, 2  ;;  %v9670_v19 = vrot.slane %v9669_v45, 2  ;;  %v9677_v38 = vrot.slane %v9676_v7, 2 }
 0x870   :  { %v9509_v50 = vrot.slane %v9471_v57, 2  ;;  %v9510_v12 = vrot.slane %v9471_v57, 4  ;;  %v9511_v62 = vrot.slane %v9471_v57, 6  ;;  %v9681_v11 = vsel %vm9596_vm12, %v9471_v57, -inf }
 0x871   :  { %v9658_v30 = vrot.slane %v9657_v40, 1  ;;  %v9664_v4 = vmax.f32 %v9662_v9, %v9663_v39  ;;  %v9671_v28 = vmax.f32 %v9669_v45, %v9670_v19  ;;  %v9678_v44 = vmax.f32 %v9676_v7, %v9677_v38  ;;  %v9285_v60 = vpop.f32.mrf.mxu2 }
 0x872   :  { %v9682_v33 = vrot.slane %v9681_v11, 4  ;;  %v9688_v23 = vsel %vm9596_vm12, %v9509_v50, -inf  ;;  %v9695_v61 = vsel %vm9596_vm12, %v9510_v12, -inf  ;;  %v9702_v21 = vsel %vm9596_vm12, %v9511_v62, -inf  ;;  %v9432_v49 = vpop.f32.mrf.mxu3  ;;  %v9141_v42 = vpop.f32.mrf.mxu1  ;;  %v11441_v12 = vld [vmem:[%s16470_s5 + $0x20] sm:$0xff] }
 0x873   :  { %v16015_v18 = vmax.f32 %v9657_v40, %v9658_v30  ;;  %v9665_v2 = vrot.slane %v9664_v4, 1  ;;  %v9672_v26 = vrot.slane %v9671_v28, 1  ;;  %v9679_v51 = vrot.slane %v9678_v44, 1  ;;  %10258 = vmatpush.msra.mxu3 %v11441_v12 }
 0x874   :  { %v9683_v48 = vmax.f32 %v9681_v11, %v9682_v33  ;;  %v9689_v55 = vrot.slane %v9688_v23, 4  ;;  %v9696_v0 = vrot.slane %v9695_v61, 4  ;;  %v9703_v5 = vrot.slane %v9702_v21, 4 }
 0x875   :  { %v16017_v59 = vmax.f32 %v9664_v4, %v9665_v2  ;;  %v16019_v13 = vmax.f32 %v9671_v28, %v9672_v26  ;;  %v16021_v17 = vmax.f32 %v9678_v44, %v9679_v51  ;;  %v9325_v32 = vadd.f32 %v9285_v60, %v9178_v58 }
 0x876   :  { %v9684_v14 = vrot.slane %v9683_v48, 2  ;;  %v9690_v56 = vmax.f32 %v9688_v23, %v9689_v55  ;;  %v9697_v54 = vmax.f32 %v9695_v61, %v9696_v0  ;;  %v9704_v43 = vmax.f32 %v9702_v21, %v9703_v5 }
 0x877   :  { %v9472_v25 = vadd.f32 %v9432_v49, %v9325_v32  ;;  %v9179_v24 = vadd.f32 %v9141_v42, %v15807_v20  ;;  %v10048_v8 = vmax.f32 %v15991_v63, %v16006_v37  ;;  %v10051_v15 = vmax.f32 %v15994_v36, %v16009_v22  ;;  %v11438_v20 = vld [vmem:[%s16470_s5 + $0x10] sm:$0xff]  ;;  %v10178_v63 = vld [vmem:[%s16470_s5] sm:$0xff] }
 0x878   :  { %v9685_v3 = vmax.f32 %v9683_v48, %v9684_v14  ;;  %v9691_v9 = vrot.slane %v9690_v56, 2  ;;  %v9698_v45 = vrot.slane %v9697_v54, 2  ;;  %v9705_v7 = vrot.slane %v9704_v43, 2  ;;  %10229 = vmatpush.msrb.mxu2 %v11438_v20  ;;  %10200 = vmatpush.msra.mxu1 %v10178_v63 }
 0x879   :  { %v9512_v57 = vrot.slane %v9472_v25, 2  ;;  %v9513_v40 = vrot.slane %v9472_v25, 4  ;;  %v9514_v58 = vrot.slane %v9472_v25, 6  ;;  %v9709_v39 = vsel %vm9596_vm12, %v9472_v25, -inf  ;;  %v9288_v19 = vpop.f32.mrf.mxu2 }
 0x87a   :  { %v9686_v37 = vrot.slane %v9685_v3, 1  ;;  %v9692_v36 = vmax.f32 %v9690_v56, %v9691_v9  ;;  %v9699_v22 = vmax.f32 %v9697_v54, %v9698_v45  ;;  %v9706_v38 = vmax.f32 %v9704_v43, %v9705_v7  ;;  %v9435_v50 = vpop.f32.mrf.mxu3  ;;  %v9144_v28 = vpop.f32.mrf.mxu1 }
 0x87b   :  { %v9710_v62 = vrot.slane %v9709_v39, 4  ;;  %v9716_v11 = vsel %vm9596_vm12, %v9512_v57, -inf  ;;  %v9723_v30 = vsel %vm9596_vm12, %v9513_v40, -inf  ;;  %v9730_v4 = vsel %vm9596_vm12, %v9514_v58, -inf }
 0x87c   :  { %v16041_v44 = vmax.f32 %v9685_v3, %v9686_v37  ;;  %v9693_v60 = vrot.slane %v9692_v36, 1  ;;  %v9700_v33 = vrot.slane %v9699_v22, 1  ;;  %v9707_v23 = vrot.slane %v9706_v38, 1 }
 0x87d   :  { %v9711_v61 = vmax.f32 %v9709_v39, %v9710_v62  ;;  %v9717_v21 = vrot.slane %v9716_v11, 4  ;;  %v9724_v49 = vrot.slane %v9723_v30, 4  ;;  %v9731_v2 = vrot.slane %v9730_v4, 4 }
 0x87e   :  { %v16043_v26 = vmax.f32 %v9692_v36, %v9693_v60  ;;  %v16045_v51 = vmax.f32 %v9699_v22, %v9700_v33  ;;  %v16047_v42 = vmax.f32 %v9706_v38, %v9707_v23  ;;  %v9326_v48 = vadd.f32 %v9288_v19, %v9179_v24 }
 0x87f   :  { %v9712_v55 = vrot.slane %v9711_v61, 2  ;;  %v9718_v0 = vmax.f32 %v9716_v11, %v9717_v21  ;;  %v9725_v5 = vmax.f32 %v9723_v30, %v9724_v49  ;;  %v9732_v32 = vmax.f32 %v9730_v4, %v9731_v2 }
 0x880   :  { %v9473_v14 = vadd.f32 %v9435_v50, %v9326_v48  ;;  %v9180_v56 = vadd.f32 %v9144_v28, %v15819_v31  ;;  %v16050_v54 = vmax.f32 %v10048_v8, 0.0  ;;  %v16052_v43 = vmax.f32 %v10051_v15, 0.0 }
 0x881   :  { %v9713_v25 = vmax.f32 %v9711_v61, %v9712_v55  ;;  %v9719_v3 = vrot.slane %v9718_v0, 2  ;;  %v9726_v9 = vrot.slane %v9725_v5, 2  ;;  %v9733_v45 = vrot.slane %v9732_v32, 2  ;;  %v9291_v7 = vpop.f32.mrf.mxu2 }
 0x882   :  { %v9515_v57 = vrot.slane %v9473_v14, 2  ;;  %v9516_v40 = vrot.slane %v9473_v14, 4  ;;  %v9517_v58 = vrot.slane %v9473_v14, 6  ;;  %v9737_v24 = vsel %vm9596_vm12, %v9473_v14, -inf  ;;  %v9438_v39 = vpop.f32.mrf.mxu3  ;;  %v9147_v31 = vpop.f32.mrf.mxu1 }
 0x883   :  { %v9714_v19 = vrot.slane %v9713_v25, 1  ;;  %v9720_v20 = vmax.f32 %v9718_v0, %v9719_v3  ;;  %v9727_v63 = vmax.f32 %v9725_v5, %v9726_v9  ;;  %v9734_v37 = vmax.f32 %v9732_v32, %v9733_v45 }
 0x884   :  { %v9738_v8 = vrot.slane %v9737_v24, 4  ;;  %v9744_v15 = vsel %vm9596_vm12, %v9515_v57, -inf  ;;  %v9751_v36 = vsel %vm9596_vm12, %v9516_v40, -inf  ;;  %v9758_v22 = vsel %vm9596_vm12, %v9517_v58, -inf }
 0x885   :  { %v16058_v38 = vmax.f32 %v9713_v25, %v9714_v19  ;;  %v9721_v50 = vrot.slane %v9720_v20, 1  ;;  %v9728_v12 = vrot.slane %v9727_v63, 1  ;;  %v9735_v62 = vrot.slane %v9734_v37, 1 }
 0x886   :  { %v9739_v11 = vmax.f32 %v9737_v24, %v9738_v8  ;;  %v9745_v30 = vrot.slane %v9744_v15, 4  ;;  %v9752_v4 = vrot.slane %v9751_v36, 4  ;;  %v9759_v28 = vrot.slane %v9758_v22, 4 }
 0x887   :  { %v16060_v60 = vmax.f32 %v9720_v20, %v9721_v50  ;;  %v16062_v33 = vmax.f32 %v9727_v63, %v9728_v12  ;;  %v16064_v23 = vmax.f32 %v9734_v37, %v9735_v62  ;;  %v9327_v61 = vadd.f32 %v9291_v7, %v9180_v56 }
 0x888   :  { %v9740_v21 = vrot.slane %v9739_v11, 2  ;;  %v9746_v49 = vmax.f32 %v9744_v15, %v9745_v30  ;;  %v9753_v2 = vmax.f32 %v9751_v36, %v9752_v4  ;;  %v9760_v48 = vmax.f32 %v9758_v22, %v9759_v28 }
 0x889   :  { %v9474_v55 = vadd.f32 %v9438_v39, %v9327_v61  ;;  %v9181_v0 = vadd.f32 %v9147_v31, %v15827_v41  ;;  %v9294_v5 = vpop.f32.mrf.mxu2  ;;  %v16069_v32 = vsel %vm10045_vm13, %v15985_v16, -inf  ;;  %v16073_v14 = vsel %vm10045_vm13, %v16000_v6, -inf }
 0x88a   :  { %v9741_v25 = vmax.f32 %v9739_v11, %v9740_v21  ;;  %v9747_v3 = vrot.slane %v9746_v49, 2  ;;  %v9754_v9 = vrot.slane %v9753_v2, 2  ;;  %v9761_v56 = vrot.slane %v9760_v48, 2  ;;  %v9441_v58 = vpop.f32.mrf.mxu3  ;;  %v9150_v41 = vpop.f32.mrf.mxu1 }
 0x88b   :  { %v9518_v45 = vrot.slane %v9474_v55, 2  ;;  %v9519_v7 = vrot.slane %v9474_v55, 4  ;;  %v9520_v57 = vrot.slane %v9474_v55, 6  ;;  %v9765_v40 = vsel %vm9596_vm12, %v9474_v55, -inf }
 0x88c   :  { %v9742_v24 = vrot.slane %v9741_v25, 1  ;;  %v9748_v39 = vmax.f32 %v9746_v49, %v9747_v3  ;;  %v9755_v19 = vmax.f32 %v9753_v2, %v9754_v9  ;;  %v9762_v16 = vmax.f32 %v9760_v48, %v9761_v56 }
 0x88d   :  { %v9766_v20 = vrot.slane %v9765_v40, 4  ;;  %v9772_v63 = vsel %vm9596_vm12, %v9518_v45, -inf  ;;  %v9779_v6 = vsel %vm9596_vm12, %v9519_v7, -inf  ;;  %v9786_v37 = vsel %vm9596_vm12, %v9520_v57, -inf }
 0x88e   :  { %v16079_v31 = vmax.f32 %v9741_v25, %v9742_v24  ;;  %v9749_v8 = vrot.slane %v9748_v39, 1  ;;  %v9756_v15 = vrot.slane %v9755_v19, 1  ;;  %v9763_v36 = vrot.slane %v9762_v16, 1 }
 0x88f   :  { %v9767_v22 = vmax.f32 %v9765_v40, %v9766_v20  ;;  %v9773_v50 = vrot.slane %v9772_v63, 4  ;;  %v9780_v12 = vrot.slane %v9779_v6, 4  ;;  %v9787_v62 = vrot.slane %v9786_v37, 4 }
 0x890   :  { %v16081_v11 = vmax.f32 %v9748_v39, %v9749_v8  ;;  %v16083_v30 = vmax.f32 %v9755_v19, %v9756_v15  ;;  %v16085_v4 = vmax.f32 %v9762_v16, %v9763_v36  ;;  %v9328_v28 = vadd.f32 %v9294_v5, %v9181_v0 }
 0x891   :  { %v9768_v61 = vrot.slane %v9767_v22, 2  ;;  %v9774_v21 = vmax.f32 %v9772_v63, %v9773_v50  ;;  %v9781_v49 = vmax.f32 %v9779_v6, %v9780_v12  ;;  %v9788_v2 = vmax.f32 %v9786_v37, %v9787_v62  ;;  %v9297_v48 = vpop.f32.mrf.mxu2 }
 0x892   :  { %16690 = vst [vmem:[#allocation8_spill] sm:$0xff] %v16085_v4  ;;  %v9475_v55 = vadd.f32 %v9441_v58, %v9328_v28  ;;  %v9182_v25 = vadd.f32 %v9150_v41, %v15959_v52  ;;  %v10054_v3 = vmax.f32 %v16069_v32, %v16073_v14  ;;  %v16092_v9 = vsel %vm10045_vm13, %v15987_v53, -inf  ;;  %v9153_v0 = vpop.f32.mrf.mxu1  ;;  %v9444_v16 = vpop.f32.mrf.mxu3 }
 0x893   :  { %v9769_v56 = vmax.f32 %v9767_v22, %v9768_v61  ;;  %v9775_v45 = vrot.slane %v9774_v21, 2  ;;  %v9782_v7 = vrot.slane %v9781_v49, 2  ;;  %v9789_v57 = vrot.slane %v9788_v2, 2 }
 0x894   :  { %v9521_v5 = vrot.slane %v9475_v55, 2  ;;  %v9522_v40 = vrot.slane %v9475_v55, 4  ;;  %v9523_v24 = vrot.slane %v9475_v55, 6  ;;  %v9793_v39 = vsel %vm9596_vm12, %v9475_v55, -inf }
 0x895   :  { %v9770_v58 = vrot.slane %v9769_v56, 1  ;;  %v9776_v19 = vmax.f32 %v9774_v21, %v9775_v45  ;;  %v9783_v52 = vmax.f32 %v9781_v49, %v9782_v7  ;;  %v9790_v41 = vmax.f32 %v9788_v2, %v9789_v57 }
 0x896   :  { %v9794_v32 = vrot.slane %v9793_v39, 4  ;;  %v9800_v14 = vsel %vm9596_vm12, %v9521_v5, -inf  ;;  %v9807_v53 = vsel %vm9596_vm12, %v9522_v40, -inf  ;;  %v9814_v20 = vsel %vm9596_vm12, %v9523_v24, -inf }
 0x897   :  { %v16098_v63 = vmax.f32 %v9769_v56, %v9770_v58  ;;  %v9777_v6 = vrot.slane %v9776_v19, 1  ;;  %v9784_v37 = vrot.slane %v9783_v52, 1  ;;  %v9791_v8 = vrot.slane %v9790_v41, 1 }
 0x898   :  { %v9795_v15 = vmax.f32 %v9793_v39, %v9794_v32  ;;  %v9801_v36 = vrot.slane %v9800_v14, 4  ;;  %v9808_v22 = vrot.slane %v9807_v53, 4  ;;  %v9815_v50 = vrot.slane %v9814_v20, 4 }
 0x899   :  { %16691 = vst [vmem:[#allocation9_spill] sm:$0xff] %v16098_v63  ;;  %v16100_v12 = vmax.f32 %v9776_v19, %v9777_v6  ;;  %v16102_v62 = vmax.f32 %v9783_v52, %v9784_v37  ;;  %v16104_v28 = vmax.f32 %v9790_v41, %v9791_v8  ;;  %v9329_v61 = vadd.f32 %v9297_v48, %v9182_v25  ;;  %v9300_v21 = vpop.f32.mrf.mxu2 }
 0x89a   :  { %v9796_v49 = vrot.slane %v9795_v15, 2  ;;  %v9802_v2 = vmax.f32 %v9800_v14, %v9801_v36  ;;  %v9809_v55 = vmax.f32 %v9807_v53, %v9808_v22  ;;  %v9816_v56 = vmax.f32 %v9814_v20, %v9815_v50  ;;  %v9156_v57 = vpop.f32.mrf.mxu1  ;;  %v9447_v20 = vpop.f32.mrf.mxu3 }
 0x89b   :  { %16692 = vst [vmem:[#allocation10_spill] sm:$0xff] %v16100_v12  ;;  %v9476_v45 = vadd.f32 %v9444_v16, %v9329_v61  ;;  %v9183_v7 = vadd.f32 %v9153_v0, %v15962_v10  ;;  %v16107_v5 = vmax.f32 %v10054_v3, 0.0  ;;  %v16111_v40 = vsel %vm10045_vm13, %v16002_v47, -inf }
 0x89c   :  { %16693 = vst [vmem:[#allocation11_spill] sm:$0xff] %v16102_v62  ;;  %v9797_v24 = vmax.f32 %v9795_v15, %v9796_v49  ;;  %v9803_v39 = vrot.slane %v9802_v2, 2  ;;  %v9810_v58 = vrot.slane %v9809_v55, 2  ;;  %v9817_v19 = vrot.slane %v9816_v56, 2 }
 0x89d   :  { %16694 = vst [vmem:[#allocation46_spill] sm:$0xff] %v16104_v28  ;;  %v9524_v48 = vrot.slane %v9476_v45, 2  ;;  %v9525_v25 = vrot.slane %v9476_v45, 4  ;;  %v9526_v52 = vrot.slane %v9476_v45, 6  ;;  %v9821_v41 = vsel %vm9596_vm12, %v9476_v45, -inf }
 0x89e   :  { %v9798_v32 = vrot.slane %v9797_v24, 1  ;;  %v9804_v16 = vmax.f32 %v9802_v2, %v9803_v39  ;;  %v9811_v14 = vmax.f32 %v9809_v55, %v9810_v58  ;;  %v9818_v10 = vmax.f32 %v9816_v56, %v9817_v19 }
 0x89f   :  { %v9822_v0 = vrot.slane %v9821_v41, 4  ;;  %v9828_v3 = vsel %vm9596_vm12, %v9524_v48, -inf  ;;  %v9835_v53 = vsel %vm9596_vm12, %v9525_v25, -inf  ;;  %v9842_v47 = vsel %vm9596_vm12, %v9526_v52, -inf }
 0x8a0   :  { %v16117_v6 = vmax.f32 %v9797_v24, %v9798_v32  ;;  %v9805_v37 = vrot.slane %v9804_v16, 1  ;;  %v9812_v8 = vrot.slane %v9811_v14, 1  ;;  %v9819_v15 = vrot.slane %v9818_v10, 1 }
 0x8a1   :  { %v9823_v36 = vmax.f32 %v9821_v41, %v9822_v0  ;;  %v9829_v22 = vrot.slane %v9828_v3, 4  ;;  %v9836_v50 = vrot.slane %v9835_v53, 4  ;;  %v9843_v61 = vrot.slane %v9842_v47, 4  ;;  %v9303_v49 = vpop.f32.mrf.mxu2 }
 0x8a2   :  { %16695 = vst [vmem:[#allocation59_spill] sm:$0xff] %v16117_v6  ;;  %v16119_v2 = vmax.f32 %v9804_v16, %v9805_v37  ;;  %v16121_v55 = vmax.f32 %v9811_v14, %v9812_v8  ;;  %v16123_v56 = vmax.f32 %v9818_v10, %v9819_v15  ;;  %v9330_v45 = vadd.f32 %v9300_v21, %v9183_v7  ;;  %v9159_v48 = vpop.f32.mrf.mxu1 }
 0x8a3   :  { %v9824_v39 = vrot.slane %v9823_v36, 2  ;;  %v9830_v58 = vmax.f32 %v9828_v3, %v9829_v22  ;;  %v9837_v19 = vmax.f32 %v9835_v53, %v9836_v50  ;;  %v9844_v24 = vmax.f32 %v9842_v47, %v9843_v61 }
 0x8a4   :  { %16696 = vst [vmem:[#allocation12_spill] sm:$0xff] %v16119_v2  ;;  %v9477_v25 = vadd.f32 %v9447_v20, %v9330_v45  ;;  %v9184_v52 = vadd.f32 %v9156_v57, %v15969_v35  ;;  %v9185_v41 = vadd.f32 %v9159_v48, %v15972_v29  ;;  %v9450_v45 = vpop.f32.mrf.mxu3 }
 0x8a5   :  { %16697 = vst [vmem:[#allocation13_spill] sm:$0xff] %v16121_v55  ;;  %v9825_v16 = vmax.f32 %v9823_v36, %v9824_v39  ;;  %v9831_v0 = vrot.slane %v9830_v58, 2  ;;  %v9838_v14 = vrot.slane %v9837_v19, 2  ;;  %v9845_v37 = vrot.slane %v9844_v24, 2 }
 0x8a6   :  { %16698 = vst [vmem:[#allocation14_spill] sm:$0xff] %v16123_v56  ;;  %v9527_v10 = vrot.slane %v9477_v25, 2  ;;  %v9528_v8 = vrot.slane %v9477_v25, 4  ;;  %v9529_v21 = vrot.slane %v9477_v25, 6  ;;  %v9849_v7 = vsel %vm9596_vm12, %v9477_v25, -inf }
 0x8a7   :  { %v9826_v3 = vrot.slane %v9825_v16, 1  ;;  %v9832_v53 = vmax.f32 %v9830_v58, %v9831_v0  ;;  %v9839_v47 = vmax.f32 %v9837_v19, %v9838_v14  ;;  %v9846_v20 = vmax.f32 %v9844_v24, %v9845_v37 }
 0x8a8   :  { %v9850_v15 = vrot.slane %v9849_v7, 4  ;;  %v9856_v35 = vsel %vm9596_vm12, %v9527_v10, -inf  ;;  %v9863_v29 = vsel %vm9596_vm12, %v9528_v8, -inf  ;;  %v9870_v57 = vsel %vm9596_vm12, %v9529_v21, -inf }
 0x8a9   :  { %v9827_v36 = vmax.f32 %v9825_v16, %v9826_v3  ;;  %v9833_v22 = vrot.slane %v9832_v53, 1  ;;  %v9840_v50 = vrot.slane %v9839_v47, 1  ;;  %v9847_v61 = vrot.slane %v9846_v20, 1  ;;  %v9306_v56 = vpop.f32.mrf.mxu2 }
 0x8aa   :  { %v9851_v39 = vmax.f32 %v9849_v7, %v9850_v15  ;;  %v9857_v48 = vrot.slane %v9856_v35, 4  ;;  %v9864_v32 = vrot.slane %v9863_v29, 4  ;;  %v9871_v25 = vrot.slane %v9870_v57, 4  ;;  %v9162_v14 = vpop.f32.mrf.mxu1 }
 0x8ab   :  { %v16133_v58 = vmax.f32 %v9832_v53, %v9833_v22  ;;  %v16135_v19 = vmax.f32 %v9839_v47, %v9840_v50  ;;  %v16137_v24 = vmax.f32 %v9846_v20, %v9847_v61  ;;  %v9331_v0 = vadd.f32 %v9303_v49, %v9184_v52 }
 0x8ac   :  { %v9852_v37 = vrot.slane %v9851_v39, 2  ;;  %v9858_v10 = vmax.f32 %v9856_v35, %v9857_v48  ;;  %v9865_v16 = vmax.f32 %v9863_v29, %v9864_v32  ;;  %v9872_v8 = vmax.f32 %v9870_v57, %v9871_v25  ;;  %v11445_v32 = vld [vmem:[%s16470_s5 + $0x38] sm:$0xff] }
 0x8ad   :  { %v9478_v21 = vadd.f32 %v9450_v45, %v9331_v0  ;;  %v9332_v3 = vadd.f32 %v9306_v56, %v9185_v41  ;;  %v16140_v7 = vadd.f32 %v9162_v14, %v15975_v1  ;;  %v16143_v15 = vsel %vm10045_vm13, %v9827_v36, -inf  ;;  %v11444_v1 = vld [vmem:[%s16470_s5 + $0x30] sm:$0xff]  ;;  %10286 = vmatpush.msrb.mxu1 %v11445_v32 }
 0x8ae   :  { %v9853_v53 = vmax.f32 %v9851_v39, %v9852_v37  ;;  %v9859_v22 = vrot.slane %v9858_v10, 2  ;;  %v9866_v47 = vrot.slane %v9865_v16, 2  ;;  %v9873_v50 = vrot.slane %v9872_v8, 2 }
 0x8af   :  { %v9530_v20 = vrot.slane %v9478_v21, 2  ;;  %v9531_v61 = vrot.slane %v9478_v21, 4  ;;  %v9532_v49 = vrot.slane %v9478_v21, 6  ;;  %v9877_v52 = vsel %vm9596_vm12, %v9478_v21, -inf  ;;  %10287 = vmatpush.msrb.mxu1 %v11444_v1 }
 0x8b0   :  { %v9854_v56 = vrot.slane %v9853_v53, 1  ;;  %v9860_v41 = vmax.f32 %v9858_v10, %v9859_v22  ;;  %v9867_v35 = vmax.f32 %v9865_v16, %v9866_v47  ;;  %v9874_v29 = vmax.f32 %v9872_v8, %v9873_v50  ;;  %v9453_v16 = vpop.f32.mrf.mxu3 }
 0x8b1   :  { %v9878_v57 = vrot.slane %v9877_v52, 4  ;;  %v9884_v36 = vsel %vm9596_vm12, %v9530_v20, -inf  ;;  %v9891_v45 = vsel %vm9596_vm12, %v9531_v61, -inf  ;;  %v9898_v39 = vsel %vm9596_vm12, %v9532_v49, -inf }
 0x8b2   :  { %v16155_v48 = vmax.f32 %v9853_v53, %v9854_v56  ;;  %v9861_v25 = vrot.slane %v9860_v41, 1  ;;  %v9868_v0 = vrot.slane %v9867_v35, 1  ;;  %v9875_v14 = vrot.slane %v9874_v29, 1 }
 0x8b3   :  { %v9879_v37 = vmax.f32 %v9877_v52, %v9878_v57  ;;  %v9885_v21 = vrot.slane %v9884_v36, 4  ;;  %v9892_v28 = vrot.slane %v9891_v45, 4  ;;  %v9899_v10 = vrot.slane %v9898_v39, 4 }
 0x8b4   :  { %v16157_v8 = vmax.f32 %v9860_v41, %v9861_v25  ;;  %v16159_v22 = vmax.f32 %v9867_v35, %v9868_v0  ;;  %v16161_v47 = vmax.f32 %v9874_v29, %v9875_v14  ;;  %v9479_v50 = vadd.f32 %v9453_v16, %v9332_v3 }
 0x8b5   :  { %v9880_v20 = vrot.slane %v9879_v37, 2  ;;  %v9886_v61 = vmax.f32 %v9884_v36, %v9885_v21  ;;  %v9893_v53 = vmax.f32 %v9891_v45, %v9892_v28  ;;  %v9900_v49 = vmax.f32 %v9898_v39, %v9899_v10  ;;  %v9309_v10 = vpop.f32.mrf.mxu2 }
 0x8b6   :  { %v9533_v32 = vrot.slane %v9479_v50, 2  ;;  %v9534_v56 = vrot.slane %v9479_v50, 4  ;;  %v9535_v55 = vrot.slane %v9479_v50, 6  ;;  %v9905_v52 = vsel %vm9596_vm12, %v9479_v50, -inf }
 0x8b7   :  { %v9881_v1 = vmax.f32 %v9879_v37, %v9880_v20  ;;  %v9887_v57 = vrot.slane %v9886_v61, 2  ;;  %v9894_v62 = vrot.slane %v9893_v53, 2  ;;  %v9901_v2 = vrot.slane %v9900_v49, 2 }
 0x8b8   :  { %v9906_v41 = vrot.slane %v9905_v52, 4  ;;  %v9912_v35 = vsel %vm9596_vm12, %v9533_v32, -inf  ;;  %v9919_v29 = vsel %vm9596_vm12, %v9534_v56, -inf  ;;  %v9926_v3 = vsel %vm9596_vm12, %v9535_v55, -inf  ;;  %v11448_v32 = vld [vmem:[%s16470_s5 + $0x48] sm:$0xff]  ;;  %v11447_v55 = vld [vmem:[%s16470_s5 + $0x40] sm:$0xff]  ;;  %v9165_v56 = vpop.f32.mrf.mxu1  ;;  %v9456_v4 = vpop.f32.mrf.mxu3 }
 0x8b9   :  { %v9882_v25 = vrot.slane %v9881_v1, 1  ;;  %v9888_v36 = vmax.f32 %v9886_v61, %v9887_v57  ;;  %v9895_v28 = vmax.f32 %v9893_v53, %v9894_v62  ;;  %v9902_v45 = vmax.f32 %v9900_v49, %v9901_v2  ;;  %v11451_v62 = vld [vmem:[%s16470_s5 + $0x58] sm:$0xff]  ;;  %10315 = vmatpush.msra.mxu2 %v11448_v32 }
 0x8ba   :  { %v9907_v39 = vmax.f32 %v9905_v52, %v9906_v41  ;;  %v9913_v0 = vrot.slane %v9912_v35, 4  ;;  %v9920_v14 = vrot.slane %v9919_v29, 4  ;;  %v9927_v21 = vrot.slane %v9926_v3, 4  ;;  %10344 = vmatpush.msrb.mxu3 %v11451_v62 }
 0x8bb   :  { %v16167_v37 = vmax.f32 %v9881_v1, %v9882_v25  ;;  %v9889_v16 = vrot.slane %v9888_v36, 1  ;;  %v9896_v50 = vrot.slane %v9895_v28, 1  ;;  %v9903_v20 = vrot.slane %v9902_v45, 1  ;;  %10316 = vmatpush.msra.mxu2 %v11447_v55 }
 0x8bc   :  { %v9908_v2 = vrot.slane %v9907_v39, 2  ;;  %v9914_v61 = vmax.f32 %v9912_v35, %v9913_v0  ;;  %v9921_v53 = vmax.f32 %v9919_v29, %v9920_v14  ;;  %v9928_v49 = vmax.f32 %v9926_v3, %v9927_v21 }
 0x8bd   :  { %v16178_v52 = vmax.f32 %v9888_v36, %v9889_v16  ;;  %v16180_v1 = vmax.f32 %v9895_v28, %v9896_v50  ;;  %v16182_v57 = vmax.f32 %v9902_v45, %v9903_v20  ;;  %v9333_v41 = vadd.f32 %v9309_v10, %v16140_v7 }
 0x8be   :  { %v9909_v25 = vmax.f32 %v9907_v39, %v9908_v2  ;;  %v9915_v12 = vrot.slane %v9914_v61, 2  ;;  %v9922_v6 = vrot.slane %v9921_v53, 2  ;;  %v9929_v63 = vrot.slane %v9928_v49, 2 }
 0x8bf   :  { %v9480_v35 = vadd.f32 %v9456_v4, %v9333_v41  ;;  %v10095_v29 = vsel %vm10045_vm13, %v16155_v48, -inf  ;;  %v9187_v3 = vadd.f32 %v9165_v56, %v15978_v46  ;;  %v10097_v36 = vsel %vm10045_vm13, %v16133_v58, -inf }
 0x8c0   :  { %v9910_v28 = vrot.slane %v9909_v25, 1  ;;  %v9916_v45 = vmax.f32 %v9914_v61, %v9915_v12  ;;  %v9923_v0 = vmax.f32 %v9921_v53, %v9922_v6  ;;  %v9930_v14 = vmax.f32 %v9928_v49, %v9929_v63  ;;  %v9312_v49 = vpop.f32.mrf.mxu2 }
 0x8c1   :  { %v9536_v7 = vrot.slane %v9480_v35, 2  ;;  %v9537_v39 = vrot.slane %v9480_v35, 4  ;;  %v9538_v21 = vrot.slane %v9480_v35, 6  ;;  %v9933_v10 = vsel %vm9596_vm12, %v9480_v35, -inf }
 0x8c2   :  { %v16191_v16 = vmax.f32 %v9909_v25, %v9910_v28  ;;  %v9917_v4 = vrot.slane %v9916_v45, 1  ;;  %v9924_v50 = vrot.slane %v9923_v0, 1  ;;  %v9931_v20 = vrot.slane %v9930_v14, 1  ;;  %v11450_v28 = vld [vmem:[%s16470_s5 + $0x50] sm:$0xff] }
 0x8c3   :  { %v9934_v48 = vrot.slane %v9933_v10, 4  ;;  %v9940_v46 = vsel %vm9596_vm12, %v9536_v7, -inf  ;;  %v9947_v32 = vsel %vm9596_vm12, %v9537_v39, -inf  ;;  %v9954_v58 = vsel %vm9596_vm12, %v9538_v21, -inf  ;;  %10345 = vmatpush.msrb.mxu3 %v11450_v28 }
 0x8c4   :  { %v16196_v12 = vmax.f32 %v9916_v45, %v9917_v4  ;;  %v16198_v63 = vmax.f32 %v9923_v0, %v9924_v50  ;;  %v16200_v6 = vmax.f32 %v9930_v14, %v9931_v20  ;;  %v9941_v55 = vrot.slane %v9940_v46, 4  ;;  %v9459_v50 = vpop.f32.mrf.mxu3 }
 0x8c5   :  { %v9935_v62 = vmax.f32 %v9933_v10, %v9934_v48  ;;  %v9948_v2 = vrot.slane %v9947_v32, 4  ;;  %v9955_v61 = vrot.slane %v9954_v58, 4  ;;  %v10096_v53 = vmax.f32 %v16143_v15, %v10095_v29 }
 0x8c6   :  { %v9942_v56 = vmax.f32 %v9940_v46, %v9941_v55  ;;  %v10098_v41 = vsel %vm10045_vm13, %v16157_v8, -inf  ;;  %v10100_v25 = vsel %vm10045_vm13, %v16135_v19, -inf  ;;  %v10101_v35 = vsel %vm10045_vm13, %v16159_v22, -inf  ;;  %v11454_v19 = vld [vmem:[%s16470_s5 + $0x68] sm:$0xff] }
 0x8c7   :  { %v9936_v45 = vrot.slane %v9935_v62, 2  ;;  %v9949_v0 = vmax.f32 %v9947_v32, %v9948_v2  ;;  %v9956_v14 = vmax.f32 %v9954_v58, %v9955_v61  ;;  %v10158_v7 = vmax.f32 %v10096_v53, 0.0 }
 0x8c8   :  { %v9943_v15 = vrot.slane %v9942_v56, 2  ;;  %v10099_v29 = vmax.f32 %v10097_v36, %v10098_v41  ;;  %v10102_v39 = vmax.f32 %v10100_v25, %v10101_v35  ;;  %v9334_v21 = vadd.f32 %v9312_v49, %v9187_v3  ;;  %v11456_v35 = vld [vmem:[%s16470_s5 + $0x70] sm:$0xff] }
 0x8c9   :  { %v9937_v8 = vmax.f32 %v9935_v62, %v9936_v45  ;;  %v9950_v10 = vrot.slane %v9949_v0, 2  ;;  %v9957_v22 = vrot.slane %v9956_v14, 2  ;;  %v10182_v4 = vsel %vm8005_vm5, %v10158_v7, %v16050_v54  ;;  %v11453_v62 = vld [vmem:[%s16470_s5 + $0x60] sm:$0xff]  ;;  %v11457_v54 = vld [vmem:[%s16470_s5 + $0x78] sm:$0xff] }
 0x8ca   :  { %v9944_v20 = vmax.f32 %v9942_v56, %v9943_v15  ;;  %11437 = vmatmul.msk.f32.vlgmr.msra.gmra.mxu1 %vm10045_vm13, %v10182_v4  ;;  %v10159_v48 = vmax.f32 %v10099_v29, 0.0  ;;  %v10160_v46 = vmax.f32 %v10102_v39, 0.0  ;;  %v9481_v32 = vadd.f32 %v9459_v50, %v9334_v21  ;;  %v9168_v29 = vpop.f32.mrf.mxu1 }
 0x8cb   :  { %v9938_v36 = vrot.slane %v9937_v8, 1  ;;  %v9951_v58 = vmax.f32 %v9949_v0, %v9950_v10  ;;  %v9958_v3 = vmax.f32 %v9956_v14, %v9957_v22  ;;  %v10103_v55 = vsel %vm10045_vm13, %v16137_v24, -inf  ;;  %10373 = vmatpush.msra.mxu1 %v11454_v19 }
 0x8cc   :  { %v9945_v2 = vrot.slane %v9944_v20, 1  ;;  %v10211_v61 = vsel %vm8005_vm5, %v10159_v48, %v16052_v43  ;;  %v10240_v53 = vsel %vm8005_vm5, %v10160_v46, %v16107_v5  ;;  %v9539_v49 = vrot.slane %v9481_v32, 2  ;;  %v9315_v48 = vpop.f32.mrf.mxu2 }
 0x8cd   :  { %v16230_v56 = vmax.f32 %v9937_v8, %v9938_v36  ;;  %v9952_v24 = vrot.slane %v9951_v58, 1  ;;  %v9959_v41 = vrot.slane %v9958_v3, 1  ;;  %11440 = vmatmul.msk.f32.vlgmr.msrb.gmra.mxu2 %vm10045_vm13, %v10211_v61  ;;  %11443 = vmatmul.msk.f32.vlgmr.msra.gmra.mxu3 %vm10045_vm13, %v10240_v53  ;;  %v9540_v25 = vrot.slane %v9481_v32, 4 }
 0x8ce   :  { %v16237_v28 = vmax.f32 %v9944_v20, %v9945_v2  ;;  %v9541_v43 = vrot.slane %v9481_v32, 6  ;;  %v9961_v45 = vsel %vm9596_vm12, %v9481_v32, -inf  ;;  %v9968_v5 = vsel %vm9596_vm12, %v9539_v49, -inf  ;;  %10374 = vmatpush.msra.mxu1 %v11453_v62  ;;  %10402 = vmatpush.msrb.mxu2 %v11457_v54 }
 0x8cf   :  { %v16241_v0 = vmax.f32 %v9951_v58, %v9952_v24  ;;  %v16243_v14 = vmax.f32 %v9958_v3, %v9959_v41  ;;  %v9962_v7 = vrot.slane %v9961_v45, 4  ;;  %v9969_v15 = vrot.slane %v9968_v5, 4  ;;  %v9462_v24 = vpop.f32.mrf.mxu3 }
 0x8d0   :  { %v9975_v39 = vsel %vm9596_vm12, %v9540_v25, -inf  ;;  %v9982_v21 = vsel %vm9596_vm12, %v9541_v43, -inf  ;;  %v10104_v19 = vsel %vm10045_vm13, %v16161_v47, -inf  ;;  %v16699_v8 = vmax.f32 %v16092_v9, %v16111_v40  ;;  %10403 = vmatpush.msrb.mxu2 %v11456_v35 }
 0x8d1   :  { %v9963_v22 = vmax.f32 %v9961_v45, %v9962_v7  ;;  %v9970_v4 = vmax.f32 %v9968_v5, %v9969_v15  ;;  %v9976_v50 = vrot.slane %v9975_v39, 4  ;;  %v9983_v20 = vrot.slane %v9982_v21, 4 }
 0x8d2   :  { %v10145_v10 = vmax.f32 %v16699_v8, 0.0  ;;  %v10105_v46 = vmax.f32 %v10103_v55, %v10104_v19  ;;  %v9188_v32 = vadd.f32 %v9168_v29, %v15912_v34  ;;  %v10058_v36 = vsel %vm10045_vm13, %v16015_v18, -inf }
 0x8d3   :  { %v10059_v58 = vsel %vm10045_vm13, %v16041_v44, -inf  ;;  %v9964_v47 = vrot.slane %v9963_v22, 2  ;;  %v9971_v3 = vrot.slane %v9970_v4, 2  ;;  %v9977_v62 = vmax.f32 %v9975_v39, %v9976_v50  ;;  %v11460_v39 = vld [vmem:[%s16470_s5 + $0x88] sm:$0xff]  ;;  %v11462_v50 = vld [vmem:[%s16470_s5 + $0x90] sm:$0xff] }
 0x8d4   :  { %v9984_v9 = vmax.f32 %v9982_v21, %v9983_v20  ;;  %v10161_v40 = vmax.f32 %v10105_v46, 0.0  ;;  %v9335_v54 = vadd.f32 %v9315_v48, %v9188_v32  ;;  %v10060_v2 = vmax.f32 %v10058_v36, %v10059_v58  ;;  %10431 = vmatpush.msra.mxu3 %v11460_v39 }
 0x8d5   :  { %v10106_v61 = vsel %vm10045_vm13, %v16167_v37, -inf  ;;  %v9965_v53 = vmax.f32 %v9963_v22, %v9964_v47  ;;  %v9972_v55 = vmax.f32 %v9970_v4, %v9971_v3  ;;  %v9978_v49 = vrot.slane %v9977_v62, 2  ;;  %v9171_v22 = vpop.f32.mrf.mxu1  ;;  %v11463_v4 = vld [vmem:[%s16470_s5 + $0x98] sm:$0xff] }
 0x8d6   :  { %v9985_v34 = vrot.slane %v9984_v9, 2  ;;  %v10269_v18 = vsel %vm8005_vm5, %v10161_v40, %v10145_v10  ;;  %v9482_v41 = vadd.f32 %v9462_v24, %v9335_v54  ;;  %v10107_v44 = vsel %vm10045_vm13, %v16191_v16, -inf  ;;  %v11459_v16 = vld [vmem:[%s16470_s5 + $0x80] sm:$0xff] }
 0x8d7   :  { %v10146_v25 = vmax.f32 %v10060_v2, 0.0  ;;  %v9966_v35 = vrot.slane %v9965_v53, 1  ;;  %v9973_v43 = vrot.slane %v9972_v55, 1  ;;  %v9979_v45 = vmax.f32 %v9977_v62, %v9978_v49  ;;  %11446 = vmatmul.msk.f32.vlgmr.msrb.gmra.mxu1 %vm10045_vm13, %v10269_v18  ;;  %10432 = vmatpush.msra.mxu3 %v11459_v16 }
 0x8d8   :  { %v9986_v5 = vmax.f32 %v9984_v9, %v9985_v34  ;;  %v9542_v7 = vrot.slane %v9482_v41, 2  ;;  %v9543_v37 = vrot.slane %v9482_v41, 4  ;;  %v9544_v15 = vrot.slane %v9482_v41, 6  ;;  %10460 = vmatpush.msrb.mxu1 %v11463_v4 }
 0x8d9   :  { %v9989_v29 = vsel %vm9596_vm12, %v9482_v41, -inf  ;;  %v16270_v21 = vmax.f32 %v9965_v53, %v9966_v35  ;;  %v16272_v19 = vmax.f32 %v9972_v55, %v9973_v43  ;;  %v9980_v8 = vrot.slane %v9979_v45, 1 }
 0x8da   :  { %v9987_v10 = vrot.slane %v9986_v5, 1  ;;  %v9990_v20 = vrot.slane %v9989_v29, 4  ;;  %v9996_v48 = vsel %vm9596_vm12, %v9542_v7, -inf  ;;  %v10003_v46 = vsel %vm9596_vm12, %v9543_v37, -inf  ;;  %10461 = vmatpush.msrb.mxu1 %v11462_v50  ;;  %v9318_v50 = vpop.f32.mrf.mxu2 }
 0x8db   :  { %v10010_v32 = vsel %vm9596_vm12, %v9544_v15, -inf  ;;  %v16283_v36 = vmax.f32 %v9979_v45, %v9980_v8  ;;  %v9997_v47 = vrot.slane %v9996_v48, 4  ;;  %v10004_v3 = vrot.slane %v10003_v46, 4 }
 0x8dc   :  { %v16285_v58 = vmax.f32 %v9986_v5, %v9987_v10  ;;  %v9991_v62 = vmax.f32 %v9989_v29, %v9990_v20  ;;  %v10011_v9 = vrot.slane %v10010_v32, 4  ;;  %v10108_v40 = vmax.f32 %v10106_v61, %v10107_v44  ;;  %v11466_v44 = vld [vmem:[%s16470_s5 + $0xa8] sm:$0xff] }
 0x8dd   :  { %v9189_v54 = vadd.f32 %v9171_v22, %v15932_v27  ;;  %v9998_v2 = vmax.f32 %v9996_v48, %v9997_v47  ;;  %v10005_v53 = vmax.f32 %v10003_v46, %v10004_v3  ;;  %v10061_v55 = vsel %vm10045_vm13, %v16017_v59, -inf }
 0x8de   :  { %v10062_v49 = vsel %vm10045_vm13, %v16043_v26, -inf  ;;  %v9992_v34 = vrot.slane %v9991_v62, 2  ;;  %v10012_v24 = vmax.f32 %v10010_v32, %v10011_v9  ;;  %v10162_v18 = vmax.f32 %v10108_v40, 0.0  ;;  %v11468_v9 = vld [vmem:[%s16470_s5 + $0xb0] sm:$0xff] }
 0x8df   :  { %v10063_v41 = vmax.f32 %v10061_v55, %v10062_v49  ;;  %v9999_v35 = vrot.slane %v9998_v2, 2  ;;  %v10006_v43 = vrot.slane %v10005_v53, 2  ;;  %v10109_v61 = vsel %vm10045_vm13, %v16178_v52, -inf }
 0x8e0   :  { %v10110_v27 = vsel %vm10045_vm13, %v16196_v12, -inf  ;;  %v9993_v59 = vmax.f32 %v9991_v62, %v9992_v34  ;;  %v10013_v45 = vrot.slane %v10012_v24, 2  ;;  %v10298_v26 = vsel %vm8005_vm5, %v10162_v18, %v10146_v25  ;;  %v11465_v12 = vld [vmem:[%s16470_s5 + $0xa0] sm:$0xff]  ;;  %v9465_v62 = vpop.f32.mrf.mxu3 }
 0x8e1   :  { %v10111_v5 = vmax.f32 %v10109_v61, %v10110_v27  ;;  %v10000_v7 = vmax.f32 %v9998_v2, %v9999_v35  ;;  %v10007_v37 = vmax.f32 %v10005_v53, %v10006_v43  ;;  %11449 = vmatmul.msk.f32.vlgmr.msra.gmra.mxu2 %vm10045_vm13, %v10298_v26  ;;  %v10147_v15 = vmax.f32 %v10063_v41, 0.0 }
 0x8e2   :  { %v10064_v52 = vsel %vm10045_vm13, %v16019_v13, -inf  ;;  %v9994_v29 = vrot.slane %v9993_v59, 1  ;;  %v10014_v39 = vmax.f32 %v10012_v24, %v10013_v45  ;;  %v10065_v8 = vsel %vm10045_vm13, %v16045_v51, -inf  ;;  %10489 = vmatpush.msra.mxu2 %v11466_v44  ;;  %v11469_v13 = vld [vmem:[%s16470_s5 + $0xb8] sm:$0xff] }
 0x8e3   :  { %v10163_v16 = vmax.f32 %v10111_v5, 0.0  ;;  %v10001_v25 = vrot.slane %v10000_v7, 1  ;;  %v10008_v10 = vrot.slane %v10007_v37, 1  ;;  %v10066_v22 = vmax.f32 %v10064_v52, %v10065_v8 }
 0x8e4   :  { %v10112_v4 = vsel %vm10045_vm13, %v16180_v1, -inf  ;;  %v16313_v20 = vmax.f32 %v9993_v59, %v9994_v29  ;;  %v10015_v48 = vrot.slane %v10014_v39, 1  ;;  %v10113_v51 = vsel %vm10045_vm13, %v16198_v63, -inf  ;;  %10490 = vmatpush.msra.mxu2 %v11465_v12 }
 0x8e5   :  { %v10327_v46 = vsel %vm8005_vm5, %v10163_v16, %v10147_v15  ;;  %v16318_v32 = vmax.f32 %v10000_v7, %v10001_v25  ;;  %v16320_v47 = vmax.f32 %v10007_v37, %v10008_v10  ;;  %v10114_v1 = vmax.f32 %v10112_v4, %v10113_v51 }
 0x8e6   :  { %11452 = vmatmul.msk.f32.vlgmr.msrb.gmra.mxu3 %vm10045_vm13, %v10327_v46  ;;  %v10148_v3 = vmax.f32 %v10066_v22, 0.0  ;;  %v16326_v40 = vmax.f32 %v10014_v39, %v10015_v48  ;;  %v9336_v2 = vadd.f32 %v9318_v50, %v9189_v54  ;;  %v10067_v63 = vsel %vm10045_vm13, %v16021_v17, -inf }
 0x8e7   :  { %v10068_v53 = vsel %vm10045_vm13, %v16047_v42, -inf  ;;  %10518 = vmatpush.msrb.mxu3 %v11469_v13  ;;  %v10164_v55 = vmax.f32 %v10114_v1, 0.0  ;;  %v10115_v34 = vsel %vm10045_vm13, %v16182_v57, -inf  ;;  %v10116_v24 = vsel %vm10045_vm13, %v16200_v6, -inf  ;;  %v11472_v42 = vld [vmem:[%s16470_s5 + $0xc8] sm:$0xff] }
 0x8e8   :  { %v10069_v49 = vmax.f32 %v10067_v63, %v10068_v53  ;;  %v10117_v18 = vmax.f32 %v10115_v34, %v10116_v24  ;;  %v9483_v41 = vadd.f32 %v9465_v62, %v9336_v2  ;;  %v10070_v54 = vsel %vm10045_vm13, %v16058_v38, -inf }
 0x8e9   :  { %v10071_v17 = vsel %vm10045_vm13, %v16079_v31, -inf  ;;  %10519 = vmatpush.msrb.mxu3 %v11468_v9  ;;  %v10356_v35 = vsel %vm8005_vm5, %v10164_v55, %v10148_v3  ;;  %v10118_v6 = vsel %vm10045_vm13, %v16230_v56, -inf  ;;  %v11471_v31 = vld [vmem:[%s16470_s5 + $0xc0] sm:$0xff]  ;;  %v10119_v45 = vsel %vm10045_vm13, %v16270_v21, -inf  ;;  %v11475_v56 = vld [vmem:[%s16470_s5 + $0xd8] sm:$0xff] }
 0x8ea   :  { %v10149_v43 = vmax.f32 %v10069_v49, 0.0  ;;  %v10072_v57 = vmax.f32 %v10070_v54, %v10071_v17  ;;  %11455 = vmatmul.msk.f32.vlgmr.msra.gmra.mxu1 %vm10045_vm13, %v10356_v35  ;;  %v10165_v61 = vmax.f32 %v10117_v18, 0.0  ;;  %v9545_v27 = vrot.slane %v9483_v41, 2 }
 0x8eb   :  { %v9546_v38 = vrot.slane %v9483_v41, 4  ;;  %v9547_v44 = vrot.slane %v9483_v41, 6  ;;  %v10017_v59 = vsel %vm9596_vm12, %v9483_v41, -inf  ;;  %v10073_v5 = vsel %vm10045_vm13, %v16060_v60, -inf  ;;  %10547 = vmatpush.msra.mxu1 %v11472_v42  ;;  %v11474_v60 = vld [vmem:[%s16470_s5 + $0xd0] sm:$0xff] }
 0x8ec   :  { %v10150_v26 = vmax.f32 %v10072_v57, 0.0  ;;  %v10385_v7 = vsel %vm8005_vm5, %v10165_v61, %v10149_v43  ;;  %v10018_v37 = vrot.slane %v10017_v59, 4  ;;  %v10024_v15 = vsel %vm9596_vm12, %v9545_v27, -inf }
 0x8ed   :  { %v10031_v52 = vsel %vm9596_vm12, %v9546_v38, -inf  ;;  %11458 = vmatmul.msk.f32.vlgmr.msrb.gmra.mxu2 %vm10045_vm13, %v10385_v7  ;;  %v10025_v12 = vrot.slane %v10024_v15, 4  ;;  %v10038_v29 = vsel %vm9596_vm12, %v9547_v44, -inf  ;;  %v10120_v39 = vmax.f32 %v10118_v6, %v10119_v45  ;;  %10548 = vmatpush.msra.mxu1 %v11471_v31 }
 0x8ee   :  { %v10032_v21 = vrot.slane %v10031_v52, 4  ;;  %v10019_v16 = vmax.f32 %v10017_v59, %v10018_v37  ;;  %v10039_v8 = vrot.slane %v10038_v29, 4  ;;  %v10074_v25 = vsel %vm10045_vm13, %v16081_v11, -inf  ;;  %10576 = vmatpush.msrb.mxu2 %v11475_v56  ;;  %v11478_v11 = vld [vmem:[%s16470_s5 + $0xe8] sm:$0xff] }
 0x8ef   :  { %v10121_v10 = vsel %vm10045_vm13, %v16237_v28, -inf  ;;  %v10026_v22 = vmax.f32 %v10024_v15, %v10025_v12  ;;  %v10166_v50 = vmax.f32 %v10120_v39, 0.0  ;;  %v10075_v13 = vmax.f32 %v10073_v5, %v10074_v25  ;;  %v16700_v59 = vld [vmem:[#allocation8_spill] sm:$0xff]  ;;  %v16701_v15 = vld [vmem:[#allocation9_spill] sm:$0xff]  ;;  %v16702_v12 = vld [vmem:[#allocation59_spill] sm:$0xff] }
 0x8f0   :  { %v10033_v4 = vmax.f32 %v10031_v52, %v10032_v21  ;;  %v10020_v48 = vrot.slane %v10019_v16, 2  ;;  %v10040_v46 = vmax.f32 %v10038_v29, %v10039_v8  ;;  %v10122_v51 = vsel %vm10045_vm13, %v16272_v19, -inf  ;;  %10577 = vmatpush.msrb.mxu2 %v11474_v60  ;;  %v16703_v8 = vld [vmem:[#allocation10_spill] sm:$0xff] }
 0x8f1   :  { %v10076_v1 = vsel %vm10045_vm13, %v16062_v33, -inf  ;;  %v10027_v3 = vrot.slane %v10026_v22, 2  ;;  %v10414_v62 = vsel %vm8005_vm5, %v10166_v50, %v10150_v26  ;;  %v10123_v9 = vmax.f32 %v10121_v10, %v10122_v51  ;;  %v11477_v33 = vld [vmem:[%s16470_s5 + $0xe0] sm:$0xff]  ;;  %v16704_v10 = vld [vmem:[#allocation12_spill] sm:$0xff] }
 0x8f2   :  { %v10034_v28 = vrot.slane %v10033_v4, 2  ;;  %v10021_v2 = vmax.f32 %v10019_v16, %v10020_v48  ;;  %v10041_v63 = vrot.slane %v10040_v46, 2  ;;  %11461 = vmatmul.msk.f32.vlgmr.msra.gmra.mxu3 %vm10045_vm13, %v10414_v62  ;;  %v10151_v53 = vmax.f32 %v10075_v13, 0.0 }
 0x8f3   :  { %v10077_v19 = vsel %vm10045_vm13, %v16083_v30, -inf  ;;  %v10028_v55 = vmax.f32 %v10026_v22, %v10027_v3  ;;  %v10167_v34 = vmax.f32 %v10123_v9, 0.0  ;;  %10605 = vmatpush.msra.mxu3 %v11478_v11  ;;  %v10124_v54 = vsel %vm10045_vm13, %v16241_v0, -inf  ;;  %v11481_v30 = vld [vmem:[%s16470_s5 + $0xf8] sm:$0xff] }
 0x8f4   :  { %v10035_v49 = vmax.f32 %v10033_v4, %v10034_v28  ;;  %v10078_v24 = vmax.f32 %v10076_v1, %v10077_v19  ;;  %v10022_v18 = vrot.slane %v10021_v2, 1  ;;  %v10042_v41 = vmax.f32 %v10040_v46, %v10041_v63  ;;  %v16705_v1 = vld [vmem:[#allocation11_spill] sm:$0xff]  ;;  %v16706_v28 = vld [vmem:[#allocation13_spill] sm:$0xff] }
 0x8f5   :  { %v10125_v17 = vsel %vm10045_vm13, %v16283_v36, -inf  ;;  %v10029_v42 = vrot.slane %v10028_v55, 1  ;;  %v10443_v43 = vsel %vm8005_vm5, %v10167_v34, %v10151_v53  ;;  %10606 = vmatpush.msra.mxu3 %v11477_v33  ;;  %v10079_v0 = vsel %vm10045_vm13, %v16064_v23, -inf  ;;  %v11480_v36 = vld [vmem:[%s16470_s5 + $0xf0] sm:$0xff]  ;;  %v16707_v33 = vld [vmem:[#allocation46_spill] sm:$0xff] }
 0x8f6   :  { %v10036_v35 = vrot.slane %v10035_v49, 1  ;;  %v10126_v57 = vmax.f32 %v10124_v54, %v10125_v17  ;;  %v10023_v6 = vmax.f32 %v10021_v2, %v10022_v18  ;;  %v10043_v61 = vrot.slane %v10042_v41, 1  ;;  %11464 = vmatmul.msk.f32.vlgmr.msrb.gmra.mxu1 %vm10045_vm13, %v10443_v43 }
 0x8f7   :  { %v10152_v27 = vmax.f32 %v10078_v24, 0.0  ;;  %v10030_v38 = vmax.f32 %v10028_v55, %v10029_v42  ;;  %v10080_v45 = vsel %vm10045_vm13, %v16700_v59, -inf  ;;  %10634 = vmatpush.msrb.mxu1 %v11481_v30  ;;  %v10127_v56 = vsel %vm10045_vm13, %v16243_v14, -inf }
 0x8f8   :  { %v10037_v44 = vmax.f32 %v10035_v49, %v10036_v35  ;;  %v10168_v31 = vmax.f32 %v10126_v57, 0.0  ;;  %v10044_v26 = vmax.f32 %v10042_v41, %v10043_v61  ;;  %v10081_v5 = vmax.f32 %v10079_v0, %v10080_v45  ;;  %v16708_v49 = vld [vmem:[#allocation14_spill] sm:$0xff] }
 0x8f9   :  { %v10128_v7 = vsel %vm10045_vm13, %v16285_v58, -inf  ;;  %v10082_v52 = vsel %vm10045_vm13, %v16701_v15, -inf  ;;  %v10083_v21 = vsel %vm10045_vm13, %v16702_v12, -inf  ;;  %10635 = vmatpush.msrb.mxu1 %v11480_v36  ;;  %v10130_v14 = vsel %vm10045_vm13, %v16313_v20, -inf  ;;  %v10642_v15 = vld [vmem:[%s16472_s7] sm:$0xff] }
 0x8fa   :  { %v10472_v23 = vsel %vm8005_vm5, %v10168_v31, %v10152_v27  ;;  %v10129_v37 = vmax.f32 %v10127_v56, %v10128_v7  ;;  %v10153_v29 = vmax.f32 %v10081_v5, 0.0  ;;  %v10084_v39 = vmax.f32 %v10082_v52, %v10083_v21  ;;  %v10645_v5 = vld [vmem:[%s16472_s7 + $0x18] sm:$0xff]  ;;  %v10644_v56 = vld [vmem:[%s16472_s7 + $0x10] sm:$0xff] }
 0x8fb   :  { %11467 = vmatmul.msk.f32.vlgmr.msra.gmra.mxu2 %vm10045_vm13, %v10472_v23  ;;  %v10131_v60 = vsel %vm10045_vm13, %v10023_v6, -inf  ;;  %v10085_v25 = vsel %vm10045_vm13, %v16703_v8, -inf  ;;  %v10086_v22 = vsel %vm10045_vm13, %v16704_v10, -inf  ;;  %v10133_v13 = vsel %vm10045_vm13, %v16318_v32, -inf  ;;  %v10643_v23 = vld [vmem:[%s16472_s7 + $0x8] sm:$0xff] }
 0x8fc   :  { %v10169_v58 = vmax.f32 %v10129_v37, 0.0  ;;  %v10132_v16 = vmax.f32 %v10130_v14, %v10131_v60  ;;  %v10154_v4 = vmax.f32 %v10084_v39, 0.0  ;;  %v10087_v50 = vmax.f32 %v10085_v25, %v10086_v22  ;;  %10666 = vmatpush.msra.mxu2 %v10645_v5 }
 0x8fd   :  { %v10134_v48 = vsel %vm10045_vm13, %v10030_v38, -inf  ;;  %v10088_v11 = vsel %vm10045_vm13, %v16705_v1, -inf  ;;  %v10089_v62 = vsel %vm10045_vm13, %v16706_v28, -inf  ;;  %v10136_v9 = vsel %vm10045_vm13, %v16320_v47, -inf  ;;  %v11491_v1 = vld [vmem:[%s16473_s8] ss:$0 sm:$0xff] }
 0x8fe   :  { %v10501_v46 = vsel %vm8005_vm5, %v10169_v58, %v10153_v29  ;;  %v10170_v20 = vmax.f32 %v10132_v16, 0.0  ;;  %v10135_v51 = vmax.f32 %v10133_v13, %v10134_v48  ;;  %v10155_v3 = vmax.f32 %v10087_v50, 0.0  ;;  %10667 = vmatpush.msra.mxu2 %v10644_v56 }
 0x8ff   :  { %11470 = vmatmul.msk.f32.vlgmr.msrb.gmra.mxu3 %vm10045_vm13, %v10501_v46  ;;  %v10137_v32 = vsel %vm10045_vm13, %v10037_v44, -inf  ;;  %v10090_v53 = vmax.f32 %v10088_v11, %v10089_v62  ;;  %v10091_v55 = vsel %vm10045_vm13, %v16707_v33, -inf  ;;  %v10092_v34 = vsel %vm10045_vm13, %v16708_v49, -inf }
 0x900   :  { %v10530_v2 = vsel %vm8005_vm5, %v10170_v20, %v10154_v4  ;;  %v10171_v63 = vmax.f32 %v10135_v51, 0.0  ;;  %v10138_v19 = vmax.f32 %v10136_v9, %v10137_v32  ;;  %v10139_v24 = vsel %vm10045_vm13, %v16326_v40, -inf  ;;  %v11490_v40 = vld [vmem:[%s16471_s6] ss:$0 sm:$0xff]  ;;  %10668 = vmatpush.msra.mxu2 %v10643_v23 }
 0x901   :  { %11473 = vmatmul.msk.f32.vlgmr.msra.gmra.mxu1 %vm10045_vm13, %v10530_v2  ;;  %v10140_v47 = vsel %vm10045_vm13, %v10044_v26, -inf  ;;  %v10156_v41 = vmax.f32 %v10090_v53, 0.0  ;;  %v10093_v17 = vmax.f32 %v10091_v55, %v10092_v34 }
 0x902   :  { %v10559_v18 = vsel %vm8005_vm5, %v10171_v63, %v10155_v3  ;;  %v10172_v54 = vmax.f32 %v10138_v19, 0.0  ;;  %v10141_v30 = vmax.f32 %v10139_v24, %v10140_v47  ;;  %10669 = vmatpush.msra.mxu2 %v10642_v15 }
 0x903   :  { %11476 = vmatmul.msk.f32.vlgmr.msrb.gmra.mxu2 %vm10045_vm13, %v10559_v18  ;;  %v10157_v35 = vmax.f32 %v10093_v17, 0.0 }
 0x904   :  { %v10588_v42 = vsel %vm8005_vm5, %v10172_v54, %v10156_v41  ;;  %v10173_v43 = vmax.f32 %v10141_v30, 0.0 }
 0x906   :  { %v10617_v57 = vsel %vm8005_vm5, %v10173_v43, %v10157_v35 }
 0x907   :  { %11479 = vmatmul.msk.f32.vlgmr.msra.gmra.mxu3 %vm10045_vm13, %v10588_v42 }
 0x909   :  { %11482 = vmatmul.msk.f32.vlgmr.msrb.gmra.mxu1 %vm10045_vm13, %v10617_v57 }
 0x947   :  { %v10202_v6 = vpop.f32.mrf.mxu1 }
 0x948   :  { %v10205_v27 = vadd.f32 %v11490_v40, %v10202_v6 }
 0x950   :  { %v10231_v61 = vpop.f32.mrf.mxu2  ;;  %v10260_v36 = vpop.f32.mrf.mxu3 }
 0x951   :  { %v10234_v0 = vadd.f32 %v10231_v61, %v10205_v27 }
 0x953   :  { %v10263_v38 = vadd.f32 %v10260_v36, %v10234_v0 }
 0x954   :  { %v10289_v44 = vpop.f32.mrf.mxu1 }
 0x955   :  { %v10292_v59 = vadd.f32 %v10289_v44, %v10263_v38 }
 0x964   :  { %v10318_v31 = vpop.f32.mrf.mxu2 }
 0x965   :  { %v10321_v45 = vadd.f32 %v10318_v31, %v10292_v59 }
 0x967   :  { %v10376_v37 = vpop.f32.mrf.mxu1 }
 0x969   :  { %v10347_v26 = vpop.f32.mrf.mxu3 }
 0x96a   :  { %v10350_v7 = vadd.f32 %v10347_v26, %v10321_v45 }
 0x96c   :  { %v10379_v12 = vadd.f32 %v10376_v37, %v10350_v7 }
 0x970   :  { %v10405_v52 = vpop.f32.mrf.mxu2 }
 0x971   :  { %v10408_v29 = vadd.f32 %v10405_v52, %v10379_v12 }
 0x973   :  { %v10463_v14 = vpop.f32.mrf.mxu1 }
 0x975   :  { %v10434_v21 = vpop.f32.mrf.mxu3 }
 0x976   :  { %v10437_v39 = vadd.f32 %v10434_v21, %v10408_v29 }
 0x978   :  { %v10466_v60 = vadd.f32 %v10463_v14, %v10437_v39 }
 0x97e   :  { %v10492_v58 = vpop.f32.mrf.mxu2  ;;  %v10550_v25 = vpop.f32.mrf.mxu1 }
 0x97f   :  { %v10495_v16 = vadd.f32 %v10492_v58, %v10466_v60 }
 0x982   :  { %v10521_v8 = vpop.f32.mrf.mxu3 }
 0x983   :  { %v10524_v10 = vadd.f32 %v10521_v8, %v10495_v16 }
 0x985   :  { %v10553_v22 = vadd.f32 %v10550_v25, %v10524_v10 }
 0x986   :  { %v10579_v4 = vpop.f32.mrf.mxu2  ;;  %v10637_v46 = vpop.f32.mrf.mxu1 }
 0x987   :  { %v10582_v50 = vadd.f32 %v10579_v4, %v10553_v22 }
 0x98a   :  { %v10608_v13 = vpop.f32.mrf.mxu3 }
 0x98b   :  { %v10611_v48 = vadd.f32 %v10608_v13, %v10582_v50 }
 0x98d   :  { %v10640_v20 = vadd.f32 %v10637_v46, %v10611_v48 }
 0x98f   :  { %v10641_v51 = vmax.f32 %v10640_v20, 0.0 }
 0x991   :  { %11483 = vmatmul.msk.f32.vlgmr.msra.gmra.mxu2 %vm10650_vm14, %v10641_v51 }
 0xa14   :  { %v10671_v11 = vpop.f32.mrf.mxu2 }
 0xa15   :  { %v10672_v3 = vadd.f32 %v11491_v1, %v10671_v11 }
 0xa17   :  { %10675 = vst.msk [vmem:[#allocation4] sm:$0x3] %vm10674_vm15, %v10672_v3 }
 0xa18   :  { %10686 = dma.vmem_to_hbm [thread:$0]  %s10682_s24, 32, %s10684_s26, [#allocation5]  }
 0xa19   :  { %11523 = dma.done.wait [#allocation5], 32  }
 0xa1a   :  { %11524 = vsyncadd [#allocation5], 4294967264 }
 0xa1b   :  { %10691 = vsyncpa [#allocation5], 1 }

</bundles_post_ra>
